<compile_context>
chip_gen: v7x
topology: tpu7x:2x2x1
jax: 0.10.0
libtpu: 0.0.40
codegen_flags: <defaults>
</compile_context>

<pallas_src>
import functools

import jax
import jax.numpy as jnp
from jax.experimental import pallas as pl
from jax.experimental.pallas import tpu as pltpu

EPS = 1e-5
LANE = 128
PAD_L = 8     # sublane-aligned interior column offset inside the conv2 scratch


def _round_up(n, m):
    return ((n + m - 1) // m) * m


def _vmem_limit_bytes():
    # Generation-aware scoped-VMEM budget: <= 3/4 of physical, capped at 96 MiB
    # (~48 MiB on v7x's 64 MiB, 96 MiB on v5e/v6e's 128 MiB).
    try:
        cap = pltpu.get_tpu_info().vmem_capacity_bytes
        return int(min(cap * 3 // 4, 96 * 1024 * 1024))
    except Exception:
        return 48 * 1024 * 1024


VMEM_LIMIT = _vmem_limit_bytes()


def _pick_tm(n, hw, m, tm_max):
    """Row tile: a multiple of h*w that divides m exactly (no row padding or
    re-pad copies), sublane-aligned, and as large as possible <= tm_max."""
    best = None
    for d in range(1, n + 1):
        if n % d:
            continue
        t = hw * d
        if t <= tm_max and t % 8 == 0:
            best = t
    return best if best is not None else m     # fall back to one big tile


def _bn_coeffs(stats, gamma, beta, inv_m):
    """Per-channel (scale, shift) from summed (sum, sumsq); f32 math."""
    mean = stats[0:1, :] * inv_m
    var = jnp.maximum(stats[1:2, :] * inv_m - mean * mean, 0.0)
    scale = gamma * jax.lax.rsqrt(var + EPS)
    shift = beta - mean * scale
    return scale, shift


# ----------------------------- kernels -----------------------------

def _conv1_kernel(x_ref, w_ref, y_ref, s_ref):
    # x: (TM, Cin) bf16, w: (Cin, Cw) bf16 -> y: (TM, Cw) + per-tile stats.
    y = jnp.dot(x_ref[...], w_ref[...], preferred_element_type=jnp.float32)
    y_ref[...] = y.astype(y_ref.dtype)
    s_ref[...] = jnp.concatenate(
        [jnp.sum(y, axis=0, keepdims=True),
         jnp.sum(y * y, axis=0, keepdims=True)], axis=0)[None]


def _conv2_kernel(hh, ww, inv_m,
                  y1_ref, s1_ref, g1_ref, b1_ref, w2_ref,
                  y2_ref, s2_ref, pad_ref):
    c = w2_ref.shape[-1]

    # Grid is 'parallel' (megacore may split it across cores), so re-establish
    # the zero halo every step; the interior is rewritten right below.
    pad_ref[...] = jnp.zeros_like(pad_ref)

    # BN1 coefficients from the tiny partial-stats reduce, then BN1+ReLU,
    # stored ONCE as bf16 into the zero-padded VMEM image (aligned offset).
    s1 = jnp.sum(s1_ref[...], axis=0)
    scale, shift = _bn_coeffs(s1, g1_ref[...], b1_ref[...], inv_m)
    h = jnp.maximum(y1_ref[0].astype(jnp.float32) * scale + shift, 0.0)
    pad_ref[1:hh + 1, PAD_L:PAD_L + ww, :] = h.astype(pad_ref.dtype)

    # 3x3 conv as 9 accumulated MXU matmuls over shifted views of the padded
    # bf16 image -- no (H*W, 9C) im2col slab is ever materialized.
    # TODO(synk): dx=+-1 views start at unaligned sublane offsets (7/9); a
    # pltpu.roll of an aligned view would move those shifts onto the XLU slot.
    acc = None
    for t, (dy, dx) in enumerate((dy, dx) for dy in range(3) for dx in range(3)):
        tap = pad_ref[dy:dy + hh, PAD_L - 1 + dx:PAD_L - 1 + dx + ww, :]
        tap = tap.reshape(hh * ww, c)
        part = jnp.dot(tap, w2_ref[t * c:(t + 1) * c, :],
                       preferred_element_type=jnp.float32)
        acc = part if acc is None else acc + part

    y2_ref[...] = acc[None].astype(y2_ref.dtype)
    s2_ref[...] = jnp.concatenate(
        [jnp.sum(acc, axis=0, keepdims=True),
         jnp.sum(acc * acc, axis=0, keepdims=True)], axis=0)[None]


def _conv3_kernel(inv_m,
                  y2_ref, s2_ref, g2_ref, b2_ref, w3_ref,
                  y3_ref, s3_ref):
    s2 = jnp.sum(s2_ref[...], axis=0)
    scale, shift = _bn_coeffs(s2, g2_ref[...], b2_ref[...], inv_m)
    h = jnp.maximum(y2_ref[...].astype(jnp.float32) * scale + shift, 0.0)
    y3 = jnp.dot(h.astype(jnp.bfloat16), w3_ref[...],
                 preferred_element_type=jnp.float32)
    y3_ref[...] = y3.astype(y3_ref.dtype)
    s3_ref[...] = jnp.concatenate(
        [jnp.sum(y3, axis=0, keepdims=True),
         jnp.sum(y3 * y3, axis=0, keepdims=True)], axis=0)[None]


def _finalize_kernel(inv_m, y3_ref, s3_ref, g3_ref, b3_ref, id_ref, o_ref):
    s3 = jnp.sum(s3_ref[...], axis=0)
    scale, shift = _bn_coeffs(s3, g3_ref[...], b3_ref[...], inv_m)
    out = (y3_ref[...].astype(jnp.float32) * scale + shift
           + id_ref[...].astype(jnp.float32))
    o_ref[...] = jnp.maximum(out, 0.0).astype(o_ref.dtype)


# ----------------------------- wrapper -----------------------------

def bottleneck_forward(x_nchw, p, *, tm_max=2048):
    n, cin, h, w = x_nchw.shape
    width = p["w1"].shape[1]
    cout = p["w3"].shape[1]
    assert cin == cout, "stride=1 / downsample=None requires inplanes == 4*planes"

    hw = h * w
    m = n * hw
    cw_p = _round_up(width, LANE)
    inv_m = 1.0 / m
    tm = _pick_tm(n, hw, m, tm_max)
    grid_m = m // tm

    # NCHW -> NHWC -> (M, Cin) bf16.  True channel count in HBM (no 8x lane-pad
    # inflation of the memory-bound K1 read / K4 identity read); only the tiny
    # weights / BN vectors are padded to the 128-lane conv width.  The same
    # array doubles as the identity operand of K4.
    # TODO(synk): folding this transpose (and the final one) into kernel index
    # maps would save two full activation round-trips through HBM.
    x_rows = jnp.transpose(x_nchw, (0, 2, 3, 1)).reshape(m, cin).astype(jnp.bfloat16)

    w1 = jnp.pad(p["w1"], ((0, 0), (0, cw_p - width))).astype(jnp.bfloat16)
    w2 = jnp.pad(p["w2"], ((0, 0), (0, cw_p - width), (0, cw_p - width)))
    w2 = w2.astype(jnp.bfloat16).reshape(9 * cw_p, cw_p)          # tap-major (9C, C)
    w3 = jnp.pad(p["w3"], ((0, cw_p - width), (0, 0))).astype(jnp.bfloat16)

    def pad_cvec(v, cp):
        return jnp.pad(v.astype(jnp.float32), ((0, 0), (0, cp - v.shape[1])))

    g1, b1 = pad_cvec(p["g1"], cw_p), pad_cvec(p["b1"], cw_p)
    g2, b2 = pad_cvec(p["g2"], cw_p), pad_cvec(p["b2"], cw_p)
    g3, b3 = p["g3"].astype(jnp.float32), p["b3"].astype(jnp.float32)

    cvec = lambda c: pl.BlockSpec((1, c), lambda *_: (0, 0))
    full_stats = lambda g, c: pl.BlockSpec((g, 2, c), lambda *_: (0, 0, 0))
    tile_stats = lambda c: pl.BlockSpec((1, 2, c), lambda i: (i, 0, 0))

    # ---- K1: conv1 (1x1) + BN1 partial stats (parallel row tiles) ----------
    y1, s1 = pl.pallas_call(
        _conv1_kernel,
        grid=(grid_m,),
        in_specs=[pl.BlockSpec((tm, cin), lambda i: (i, 0)),
                  pl.BlockSpec((cin, cw_p), lambda i: (0, 0))],
        out_specs=(pl.BlockSpec((tm, cw_p), lambda i: (i, 0)),
                   tile_stats(cw_p)),
        out_shape=(jax.ShapeDtypeStruct((m, cw_p), jnp.bfloat16),
                   jax.ShapeDtypeStruct((grid_m, 2, cw_p), jnp.float32)),
        compiler_params=pltpu.CompilerParams(
            dimension_semantics=("parallel",),
            vmem_limit_bytes=VMEM_LIMIT),
        cost_estimate=pl.CostEstimate(
            flops=2 * m * cin * cw_p, transcendentals=0,
            bytes_accessed=2 * m * (cin + cw_p) + 2 * cin * cw_p),
    )(x_rows, w1)

    # ---- K2: BN1-apply + ReLU + 3x3 conv + BN2 partial stats ---------------
    y1_img = y1.reshape(n, h, w, cw_p)                      # free reshape
    y2, s2 = pl.pallas_call(
        functools.partial(_conv2_kernel, h, w, inv_m),
        grid=(n,),
        in_specs=[pl.BlockSpec((1, h, w, cw_p), lambda b: (b, 0, 0, 0)),
                  full_stats(grid_m, cw_p), cvec(cw_p), cvec(cw_p),
                  pl.BlockSpec((9 * cw_p, cw_p), lambda b: (0, 0))],
        out_specs=(pl.BlockSpec((1, hw, cw_p), lambda b: (b, 0, 0)),
                   tile_stats(cw_p)),
        out_shape=(jax.ShapeDtypeStruct((n, hw, cw_p), jnp.bfloat16),
                   jax.ShapeDtypeStruct((n, 2, cw_p), jnp.float32)),
        scratch_shapes=[pltpu.VMEM((h + 2, w + 2 * PAD_L, cw_p), jnp.bfloat16)],
        compiler_params=pltpu.CompilerParams(
            dimension_semantics=("parallel",),
            vmem_limit_bytes=VMEM_LIMIT),
        cost_estimate=pl.CostEstimate(
            flops=2 * m * 9 * cw_p * cw_p, transcendentals=n * cw_p,
            bytes_accessed=4 * m * cw_p + 2 * 9 * cw_p * cw_p),
    )(y1_img, s1, g1, b1, w2)

    # ---- K3: BN2-apply + ReLU + conv3 (1x1) + BN3 partial stats -------------
    y2_rows = y2.reshape(m, cw_p)                           # free reshape, no pad
    y3, s3 = pl.pallas_call(
        functools.partial(_conv3_kernel, inv_m),
        grid=(grid_m,),
        in_specs=[pl.BlockSpec((tm, cw_p), lambda i: (i, 0)),
                  full_stats(n, cw_p), cvec(cw_p), cvec(cw_p),
                  pl.BlockSpec((cw_p, cout), lambda i: (0, 0))],
        out_specs=(pl.BlockSpec((tm, cout), lambda i: (i, 0)),
                   tile_stats(cout)),
        out_shape=(jax.ShapeDtypeStruct((m, cout), jnp.bfloat16),
                   jax.ShapeDtypeStruct((grid_m, 2, cout), jnp.float32)),
        compiler_params=pltpu.CompilerParams(
            dimension_semantics=("parallel",),
            vmem_limit_bytes=VMEM_LIMIT),
        cost_estimate=pl.CostEstimate(
            flops=2 * m * cw_p * cout, transcendentals=grid_m * cw_p,
            bytes_accessed=2 * m * (cw_p + cout) + 2 * cw_p * cout),
    )(y2_rows, s2, g2, b2, w3)

    # ---- K4: BN3-apply + identity add + ReLU (pure streaming, all bf16) -----
    out = pl.pallas_call(
        functools.partial(_finalize_kernel, inv_m),
        grid=(grid_m,),
        in_specs=[pl.BlockSpec((tm, cout), lambda i: (i, 0)),
                  full_stats(grid_m, cout), cvec(cout), cvec(cout),
                  pl.BlockSpec((tm, cin), lambda i: (i, 0))],
        out_specs=pl.BlockSpec((tm, cout), lambda i: (i, 0)),
        out_shape=jax.ShapeDtypeStruct((m, cout), jnp.bfloat16),
        compiler_params=pltpu.CompilerParams(
            dimension_semantics=("parallel",),
            vmem_limit_bytes=VMEM_LIMIT),
        cost_estimate=pl.CostEstimate(
            flops=6 * m * cout, transcendentals=grid_m * cout,
            bytes_accessed=6 * m * cout),
    )(y3, s3, g3, b3, x_rows)

    out = out.reshape(n, h, w, cout).astype(jnp.float32)
    return jnp.transpose(out, (0, 3, 1, 2))        # back to NCHW


# ----------------------------- pure-JAX f32 reference -----------------------------

def bottleneck_reference(x_nchw, p):
    x = jnp.transpose(x_nchw, (0, 2, 3, 1)).astype(jnp.float32)
    width = p["w1"].shape[1]

    def bn(y, g, b):
        mean = jnp.mean(y, axis=(0, 1, 2))
        var = jnp.mean((y - mean) ** 2, axis=(0, 1, 2))
        return (y - mean) * jax.lax.rsqrt(var + EPS) * g[0] + b[0]

    h1 = jax.nn.relu(bn(jnp.einsum('nhwc,cd->nhwd', x, p["w1"]), p["g1"], p["b1"]))
    w_hwio = p["w2"].reshape(3, 3, width, width)
    y2 = jax.lax.conv_general_dilated(
        h1, w_hwio, window_strides=(1, 1), padding="SAME",
        dimension_numbers=("NHWC", "HWIO", "NHWC"))
    h2 = jax.nn.relu(bn(y2, p["g2"], p["b2"]))
    y3 = jnp.einsum('nhwc,cd->nhwd', h2, p["w3"])
    out = jax.nn.relu(bn(y3, p["g3"], p["b3"]) + x)
    return jnp.transpose(out, (0, 3, 1, 2))


# ----------------------------- deterministic setup & run -----------------------------

if __name__ == "__main__":
    # Bottleneck(inplanes=16, planes=4): width=4, out=16, identity add valid.
    N, H, W = 2, 16, 16
    planes, expansion, groups, base_width = 4, 4, 1, 64
    inplanes = planes * expansion                         # 16
    width = int(planes * (base_width / 64.0)) * groups    # 4
    cout = planes * expansion                             # 16

    key = jax.random.PRNGKey(0)
    kx, k1, k2, k3 = jax.random.split(key, 4)
    x = jax.random.normal(kx, (N, inplanes, H, W), dtype=jnp.float32)   # NCHW

    params = dict(
        # conv1: (Cin, width); conv2: 3x3 stored tap-major (dy*3+dx, Cin, Cout);
        # conv3: (width, 4*planes).  All bias-free, BN gamma=1 / beta=0.
        w1=jax.random.normal(k1, (inplanes, width), jnp.float32) * 0.1,
        w2=jax.random.normal(k2, (9, width, width), jnp.float32) * 0.1,
        w3=jax.random.normal(k3, (width, cout), jnp.float32) * 0.1,
        g1=jnp.ones((1, width), jnp.float32), b1=jnp.zeros((1, width), jnp.float32),
        g2=jnp.ones((1, width), jnp.float32), b2=jnp.zeros((1, width), jnp.float32),
        g3=jnp.ones((1, cout), jnp.float32), b3=jnp.zeros((1, cout), jnp.float32),
    )

    fwd = jax.jit(bottleneck_forward)
    out = fwd(x, params)
    jax.block_until_ready(out)

    assert out.shape == (N, cout, H, W)
    ref = bottleneck_reference(x, params)
    max_err = float(jnp.max(jnp.abs(out - ref)))
    assert bool(jnp.allclose(out, ref, atol=1e-1, rtol=1e-1)), f"max abs err {max_err}"
    print("KERNEL_OK")
</pallas_src>

<mosaic_0001>
module attributes {stable_mosaic.version = 11 : i64} {
  func.func @_conv1_kernel(%arg0: i32, %arg1: memref<512x16xbf16, #tpu.memory_space<vmem>>, %arg2: memref<16x128xbf16, #tpu.memory_space<vmem>>, %arg3: memref<512x128xbf16, #tpu.memory_space<vmem>>, %arg4: memref<1x2x128xf32, #tpu.memory_space<vmem>>) attributes {dimension_semantics = [#tpu.dimension_semantics<parallel>], iteration_bounds = array<i64: 1>, scalar_prefetch = 0 : i64, scratch_operands = 0 : i64, tpu.core_type = #tpu.core_type<tc>, window_params = [{transform_indices = @transform_0, window_bounds = array<i64: 512, 16>}, {pipeline_mode = #tpu.pipeline_mode<synchronous>, transform_indices = @transform_1, window_bounds = array<i64: 16, 128>}, {transform_indices = @transform_2, window_bounds = array<i64: 512, 128>}, {transform_indices = @transform_3, window_bounds = array<i64: 1, 2, 128>}]} {
    %c0 = arith.constant 0 : index
    %c0_0 = arith.constant 0 : index
    %0 = vector.load %arg1[%c0, %c0_0] : memref<512x16xbf16, #tpu.memory_space<vmem>>, vector<512x16xbf16>
    %c0_1 = arith.constant 0 : index
    %c0_2 = arith.constant 0 : index
    %1 = vector.load %arg2[%c0_1, %c0_2] : memref<16x128xbf16, #tpu.memory_space<vmem>>, vector<16x128xbf16>
    %cst = arith.constant dense<0.000000e+00> : vector<512x128xf32>
    %2 = tpu.matmul %0, %1, %cst {dimension_numbers = #tpu.dot_dimension_numbers<[1], [0], [0], [1], [0, 0, 1, 1], [], []>} : vector<512x16xbf16>, vector<16x128xbf16>, vector<512x128xf32> -> vector<512x128xf32>
    %3 = arith.truncf %2 : vector<512x128xf32> to vector<512x128xbf16>
    %c0_3 = arith.constant 0 : index
    %c0_4 = arith.constant 0 : index
    %4 = vector.load %arg3[%c0_3, %c0_4] : memref<512x128xbf16, #tpu.memory_space<vmem>>, vector<512x128xbf16>
    tpu.vector_store %arg3[%c0_3, %c0_4], %3 {strides = array<i32>} : memref<512x128xbf16, #tpu.memory_space<vmem>>, vector<512x128xbf16>,
    %cst_5 = arith.constant dense<0.000000e+00> : vector<128xf32>
    %5 = vector.multi_reduction <add>, %2, %cst_5 [0] : vector<512x128xf32> to vector<128xf32>
    %6 = vector.shape_cast %5 : vector<128xf32> to vector<1x128xf32>
    %7 = arith.mulf %2, %2 : vector<512x128xf32>
    %cst_6 = arith.constant dense<0.000000e+00> : vector<128xf32>
    %8 = vector.multi_reduction <add>, %7, %cst_6 [0] : vector<512x128xf32> to vector<128xf32>
    %9 = vector.shape_cast %8 : vector<128xf32> to vector<1x128xf32>
    %10 = tpu.concatenate %6, %9 in 0 : vector<1x128xf32>, vector<1x128xf32> -> vector<2x128xf32>
    %11 = vector.shape_cast %10 : vector<2x128xf32> to vector<1x2x128xf32>
    %c0_7 = arith.constant 0 : index
    %c0_8 = arith.constant 0 : index
    %c0_9 = arith.constant 0 : index
    %12 = vector.load %arg4[%c0_7, %c0_8, %c0_9] : memref<1x2x128xf32, #tpu.memory_space<vmem>>, vector<1x2x128xf32>
    tpu.vector_store %arg4[%c0_7, %c0_8, %c0_9], %11 {strides = array<i32>} : memref<1x2x128xf32, #tpu.memory_space<vmem>>, vector<1x2x128xf32>,
    return
  }
  func.func @transform_0(%arg0: i32) -> (i32, i32) {
    %c0_i32 = arith.constant 0 : i32
    %c0_i32_0 = arith.constant 0 : i32
    return %arg0, %c0_i32 : i32, i32
  }
  func.func @transform_1(%arg0: i32) -> (i32, i32) {
    %c0_i32 = arith.constant 0 : i32
    %c0_i32_0 = arith.constant 0 : i32
    %c0_i32_1 = arith.constant 0 : i32
    return %c0_i32, %c0_i32_0 : i32, i32
  }
  func.func @transform_2(%arg0: i32) -> (i32, i32) {
    %c0_i32 = arith.constant 0 : i32
    %c0_i32_0 = arith.constant 0 : i32
    return %arg0, %c0_i32 : i32, i32
  }
  func.func @transform_3(%arg0: i32) -> (i32, i32, i32) {
    %c0_i32 = arith.constant 0 : i32
    %c0_i32_0 = arith.constant 0 : i32
    %c0_i32_1 = arith.constant 0 : i32
    return %arg0, %c0_i32, %c0_i32_0 : i32, i32, i32
  }
}

module attributes {stable_mosaic.version = 11 : i64} {
  func.func @_conv2_kernel(%arg0: i32, %arg1: memref<1x16x16x128xbf16, #tpu.memory_space<vmem>>, %arg2: memref<1x2x128xf32, #tpu.memory_space<vmem>>, %arg3: memref<1x128xf32, #tpu.memory_space<vmem>>, %arg4: memref<1x128xf32, #tpu.memory_space<vmem>>, %arg5: memref<1152x128xbf16, #tpu.memory_space<vmem>>, %arg6: memref<1x256x128xbf16, #tpu.memory_space<vmem>>, %arg7: memref<1x2x128xf32, #tpu.memory_space<vmem>>, %arg8: memref<18x32x128xbf16, #tpu.memory_space<vmem>>) attributes {dimension_semantics = [#tpu.dimension_semantics<parallel>], iteration_bounds = array<i64: 2>, scalar_prefetch = 0 : i64, scratch_operands = 1 : i64, tpu.core_type = #tpu.core_type<tc>, window_params = [{transform_indices = @transform_0, window_bounds = array<i64: 1, 16, 16, 128>}, {pipeline_mode = #tpu.pipeline_mode<synchronous>, transform_indices = @transform_1, window_bounds = array<i64: 1, 2, 128>}, {pipeline_mode = #tpu.pipeline_mode<synchronous>, transform_indices = @transform_2, window_bounds = array<i64: 1, 128>}, {pipeline_mode = #tpu.pipeline_mode<synchronous>, transform_indices = @transform_3, window_bounds = array<i64: 1, 128>}, {pipeline_mode = #tpu.pipeline_mode<synchronous>, transform_indices = @transform_4, window_bounds = array<i64: 1152, 128>}, {transform_indices = @transform_5, window_bounds = array<i64: 1, 256, 128>}, {transform_indices = @transform_6, window_bounds = array<i64: 1, 2, 128>}]} {
    %cst = arith.constant 0.000000e+00 : bf16
    %0 = vector.broadcast %cst : bf16 to vector<18x32x128xbf16>
    %c0 = arith.constant 0 : index
    %c0_0 = arith.constant 0 : index
    %c0_1 = arith.constant 0 : index
    %1 = vector.load %arg8[%c0, %c0_0, %c0_1] : memref<18x32x128xbf16, #tpu.memory_space<vmem>>, vector<18x32x128xbf16>
    tpu.vector_store %arg8[%c0, %c0_0, %c0_1], %0 {strides = array<i32>} : memref<18x32x128xbf16, #tpu.memory_space<vmem>>, vector<18x32x128xbf16>,
    %c0_2 = arith.constant 0 : index
    %c0_3 = arith.constant 0 : index
    %c0_4 = arith.constant 0 : index
    %2 = vector.load %arg2[%c0_2, %c0_3, %c0_4] : memref<1x2x128xf32, #tpu.memory_space<vmem>>, vector<1x2x128xf32>
    %cst_5 = arith.constant dense<0.000000e+00> : vector<2x128xf32>
    %3 = vector.multi_reduction <add>, %2, %cst_5 [0] : vector<1x2x128xf32> to vector<2x128xf32>
    %c0_6 = arith.constant 0 : index
    %c0_7 = arith.constant 0 : index
    %4 = vector.load %arg3[%c0_6, %c0_7] : memref<1x128xf32, #tpu.memory_space<vmem>>, vector<1x128xf32>
    %c0_8 = arith.constant 0 : index
    %c0_9 = arith.constant 0 : index
    %5 = vector.load %arg4[%c0_8, %c0_9] : memref<1x128xf32, #tpu.memory_space<vmem>>, vector<1x128xf32>
    %6 = vector.extract_strided_slice %3 {offsets = [0, 0], sizes = [1, 128], strides = [1, 1]} : vector<2x128xf32> to vector<1x128xf32>
    %cst_10 = arith.constant 0.001953125 : f32
    %7 = vector.broadcast %cst_10 : f32 to vector<1x128xf32>
    %8 = arith.mulf %6, %7 : vector<1x128xf32>
    %9 = vector.extract_strided_slice %3 {offsets = [1, 0], sizes = [1, 128], strides = [1, 1]} : vector<2x128xf32> to vector<1x128xf32>
    %cst_11 = arith.constant 0.001953125 : f32
    %10 = vector.broadcast %cst_11 : f32 to vector<1x128xf32>
    %11 = arith.mulf %9, %10 : vector<1x128xf32>
    %12 = arith.mulf %8, %8 : vector<1x128xf32>
    %13 = arith.subf %11, %12 : vector<1x128xf32>
    %cst_12 = arith.constant 0.000000e+00 : f32
    %14 = vector.broadcast %cst_12 : f32 to vector<1x128xf32>
    %15 = arith.maximumf %13, %14 : vector<1x128xf32>
    %cst_13 = arith.constant 9.99999974E-6 : f32
    %16 = vector.broadcast %cst_13 : f32 to vector<1x128xf32>
    %17 = arith.addf %15, %16 : vector<1x128xf32>
    %18 = math.rsqrt %17 : vector<1x128xf32>
    %19 = arith.mulf %4, %18 : vector<1x128xf32>
    %20 = arith.mulf %8, %19 : vector<1x128xf32>
    %21 = arith.subf %5, %20 : vector<1x128xf32>
    %c0_14 = arith.constant 0 : index
    %c0_15 = arith.constant 0 : index
    %c0_16 = arith.constant 0 : index
    %c0_17 = arith.constant 0 : index
    %22 = vector.load %arg1[%c0_14, %c0_15, %c0_16, %c0_17] : memref<1x16x16x128xbf16, #tpu.memory_space<vmem>>, vector<1x16x16x128xbf16>
    %23 = vector.shape_cast %22 : vector<1x16x16x128xbf16> to vector<16x16x128xbf16>
    %24 = arith.extf %23 : vector<16x16x128xbf16> to vector<16x16x128xf32>
    %25 = vector.shape_cast %19 : vector<1x128xf32> to vector<1x1x128xf32>
    %26 = vector.broadcast %25 : vector<1x1x128xf32> to vector<16x16x128xf32>
    %27 = arith.mulf %24, %26 : vector<16x16x128xf32>
    %28 = vector.shape_cast %21 : vector<1x128xf32> to vector<1x1x128xf32>
    %29 = vector.broadcast %28 : vector<1x1x128xf32> to vector<16x16x128xf32>
    %30 = arith.addf %27, %29 : vector<16x16x128xf32>
    %cst_18 = arith.constant 0.000000e+00 : f32
    %31 = vector.broadcast %cst_18 : f32 to vector<16x16x128xf32>
    %32 = arith.maximumf %30, %31 : vector<16x16x128xf32>
    %33 = arith.truncf %32 : vector<16x16x128xf32> to vector<16x16x128xbf16>
    %c1 = arith.constant 1 : index
    %c8 = arith.constant 8 : index
    %c0_19 = arith.constant 0 : index
    %34 = vector.load %arg8[%c1, %c8, %c0_19] : memref<18x32x128xbf16, #tpu.memory_space<vmem>>, vector<16x16x128xbf16>
    tpu.vector_store %arg8[%c1, %c8, %c0_19], %33 {strides = array<i32>} : memref<18x32x128xbf16, #tpu.memory_space<vmem>>, vector<16x16x128xbf16>,
    %c0_20 = arith.constant 0 : index
    %c7 = arith.constant 7 : index
    %c0_21 = arith.constant 0 : index
    %35 = vector.load %arg8[%c0_20, %c7, %c0_21] : memref<18x32x128xbf16, #tpu.memory_space<vmem>>, vector<16x16x128xbf16>
    %36 = vector.shape_cast %35 : vector<16x16x128xbf16> to vector<256x128xbf16>
    %c0_22 = arith.constant 0 : index
    %c0_23 = arith.constant 0 : index
    %37 = vector.load %arg5[%c0_22, %c0_23] : memref<1152x128xbf16, #tpu.memory_space<vmem>>, vector<128x128xbf16>
    %cst_24 = arith.constant dense<0.000000e+00> : vector<256x128xf32>
    %38 = tpu.matmul %36, %37, %cst_24 {dimension_numbers = #tpu.dot_dimension_numbers<[1], [0], [0], [1], [0, 0, 1, 1], [], []>} : vector<256x128xbf16>, vector<128x128xbf16>, vector<256x128xf32> -> vector<256x128xf32>
    %c0_25 = arith.constant 0 : index
    %c8_26 = arith.constant 8 : index
    %c0_27 = arith.constant 0 : index
    %39 = vector.load %arg8[%c0_25, %c8_26, %c0_27] : memref<18x32x128xbf16, #tpu.memory_space<vmem>>, vector<16x16x128xbf16>
    %40 = vector.shape_cast %39 : vector<16x16x128xbf16> to vector<256x128xbf16>
    %c128 = arith.constant 128 : index
    %c0_28 = arith.constant 0 : index
    %41 = vector.load %arg5[%c128, %c0_28] : memref<1152x128xbf16, #tpu.memory_space<vmem>>, vector<128x128xbf16>
    %cst_29 = arith.constant dense<0.000000e+00> : vector<256x128xf32>
    %42 = tpu.matmul %40, %41, %cst_29 {dimension_numbers = #tpu.dot_dimension_numbers<[1], [0], [0], [1], [0, 0, 1, 1], [], []>} : vector<256x128xbf16>, vector<128x128xbf16>, vector<256x128xf32> -> vector<256x128xf32>
    %43 = arith.addf %38, %42 : vector<256x128xf32>
    %c0_30 = arith.constant 0 : index
    %c9 = arith.constant 9 : index
    %c0_31 = arith.constant 0 : index
    %44 = vector.load %arg8[%c0_30, %c9, %c0_31] : memref<18x32x128xbf16, #tpu.memory_space<vmem>>, vector<16x16x128xbf16>
    %45 = vector.shape_cast %44 : vector<16x16x128xbf16> to vector<256x128xbf16>
    %c256 = arith.constant 256 : index
    %c0_32 = arith.constant 0 : index
    %46 = vector.load %arg5[%c256, %c0_32] : memref<1152x128xbf16, #tpu.memory_space<vmem>>, vector<128x128xbf16>
    %cst_33 = arith.constant dense<0.000000e+00> : vector<256x128xf32>
    %47 = tpu.matmul %45, %46, %cst_33 {dimension_numbers = #tpu.dot_dimension_numbers<[1], [0], [0], [1], [0, 0, 1, 1], [], []>} : vector<256x128xbf16>, vector<128x128xbf16>, vector<256x128xf32> -> vector<256x128xf32>
    %48 = arith.addf %43, %47 : vector<256x128xf32>
    %c1_34 = arith.constant 1 : index
    %c7_35 = arith.constant 7 : index
    %c0_36 = arith.constant 0 : index
    %49 = vector.load %arg8[%c1_34, %c7_35, %c0_36] : memref<18x32x128xbf16, #tpu.memory_space<vmem>>, vector<16x16x128xbf16>
    %50 = vector.shape_cast %49 : vector<16x16x128xbf16> to vector<256x128xbf16>
    %c384 = arith.constant 384 : index
    %c0_37 = arith.constant 0 : index
    %51 = vector.load %arg5[%c384, %c0_37] : memref<1152x128xbf16, #tpu.memory_space<vmem>>, vector<128x128xbf16>
    %cst_38 = arith.constant dense<0.000000e+00> : vector<256x128xf32>
    %52 = tpu.matmul %50, %51, %cst_38 {dimension_numbers = #tpu.dot_dimension_numbers<[1], [0], [0], [1], [0, 0, 1, 1], [], []>} : vector<256x128xbf16>, vector<128x128xbf16>, vector<256x128xf32> -> vector<256x128xf32>
    %53 = arith.addf %48, %52 : vector<256x128xf32>
    %c1_39 = arith.constant 1 : index
    %c8_40 = arith.constant 8 : index
    %c0_41 = arith.constant 0 : index
    %54 = vector.load %arg8[%c1_39, %c8_40, %c0_41] : memref<18x32x128xbf16, #tpu.memory_space<vmem>>, vector<16x16x128xbf16>
    %55 = vector.shape_cast %54 : vector<16x16x128xbf16> to vector<256x128xbf16>
    %c512 = arith.constant 512 : index
    %c0_42 = arith.constant 0 : index
    %56 = vector.load %arg5[%c512, %c0_42] : memref<1152x128xbf16, #tpu.memory_space<vmem>>, vector<128x128xbf16>
    %cst_43 = arith.constant dense<0.000000e+00> : vector<256x128xf32>
    %57 = tpu.matmul %55, %56, %cst_43 {dimension_numbers = #tpu.dot_dimension_numbers<[1], [0], [0], [1], [0, 0, 1, 1], [], []>} : vector<256x128xbf16>, vector<128x128xbf16>, vector<256x128xf32> -> vector<256x128xf32>
    %58 = arith.addf %53, %57 : vector<256x128xf32>
    %c1_44 = arith.constant 1 : index
    %c9_45 = arith.constant 9 : index
    %c0_46 = arith.constant 0 : index
    %59 = vector.load %arg8[%c1_44, %c9_45, %c0_46] : memref<18x32x128xbf16, #tpu.memory_space<vmem>>, vector<16x16x128xbf16>
    %60 = vector.shape_cast %59 : vector<16x16x128xbf16> to vector<256x128xbf16>
    %c640 = arith.constant 640 : index
    %c0_47 = arith.constant 0 : index
    %61 = vector.load %arg5[%c640, %c0_47] : memref<1152x128xbf16, #tpu.memory_space<vmem>>, vector<128x128xbf16>
    %cst_48 = arith.constant dense<0.000000e+00> : vector<256x128xf32>
    %62 = tpu.matmul %60, %61, %cst_48 {dimension_numbers = #tpu.dot_dimension_numbers<[1], [0], [0], [1], [0, 0, 1, 1], [], []>} : vector<256x128xbf16>, vector<128x128xbf16>, vector<256x128xf32> -> vector<256x128xf32>
    %63 = arith.addf %58, %62 : vector<256x128xf32>
    %c2 = arith.constant 2 : index
    %c7_49 = arith.constant 7 : index
    %c0_50 = arith.constant 0 : index
    %64 = vector.load %arg8[%c2, %c7_49, %c0_50] : memref<18x32x128xbf16, #tpu.memory_space<vmem>>, vector<16x16x128xbf16>
    %65 = vector.shape_cast %64 : vector<16x16x128xbf16> to vector<256x128xbf16>
    %c768 = arith.constant 768 : index
    %c0_51 = arith.constant 0 : index
    %66 = vector.load %arg5[%c768, %c0_51] : memref<1152x128xbf16, #tpu.memory_space<vmem>>, vector<128x128xbf16>
    %cst_52 = arith.constant dense<0.000000e+00> : vector<256x128xf32>
    %67 = tpu.matmul %65, %66, %cst_52 {dimension_numbers = #tpu.dot_dimension_numbers<[1], [0], [0], [1], [0, 0, 1, 1], [], []>} : vector<256x128xbf16>, vector<128x128xbf16>, vector<256x128xf32> -> vector<256x128xf32>
    %68 = arith.addf %63, %67 : vector<256x128xf32>
    %c2_53 = arith.constant 2 : index
    %c8_54 = arith.constant 8 : index
    %c0_55 = arith.constant 0 : index
    %69 = vector.load %arg8[%c2_53, %c8_54, %c0_55] : memref<18x32x128xbf16, #tpu.memory_space<vmem>>, vector<16x16x128xbf16>
    %70 = vector.shape_cast %69 : vector<16x16x128xbf16> to vector<256x128xbf16>
    %c896 = arith.constant 896 : index
    %c0_56 = arith.constant 0 : index
    %71 = vector.load %arg5[%c896, %c0_56] : memref<1152x128xbf16, #tpu.memory_space<vmem>>, vector<128x128xbf16>
    %cst_57 = arith.constant dense<0.000000e+00> : vector<256x128xf32>
    %72 = tpu.matmul %70, %71, %cst_57 {dimension_numbers = #tpu.dot_dimension_numbers<[1], [0], [0], [1], [0, 0, 1, 1], [], []>} : vector<256x128xbf16>, vector<128x128xbf16>, vector<256x128xf32> -> vector<256x128xf32>
    %73 = arith.addf %68, %72 : vector<256x128xf32>
    %c2_58 = arith.constant 2 : index
    %c9_59 = arith.constant 9 : index
    %c0_60 = arith.constant 0 : index
    %74 = vector.load %arg8[%c2_58, %c9_59, %c0_60] : memref<18x32x128xbf16, #tpu.memory_space<vmem>>, vector<16x16x128xbf16>
    %75 = vector.shape_cast %74 : vector<16x16x128xbf16> to vector<256x128xbf16>
    %c1024 = arith.constant 1024 : index
    %c0_61 = arith.constant 0 : index
    %76 = vector.load %arg5[%c1024, %c0_61] : memref<1152x128xbf16, #tpu.memory_space<vmem>>, vector<128x128xbf16>
    %cst_62 = arith.constant dense<0.000000e+00> : vector<256x128xf32>
    %77 = tpu.matmul %75, %76, %cst_62 {dimension_numbers = #tpu.dot_dimension_numbers<[1], [0], [0], [1], [0, 0, 1, 1], [], []>} : vector<256x128xbf16>, vector<128x128xbf16>, vector<256x128xf32> -> vector<256x128xf32>
    %78 = arith.addf %73, %77 : vector<256x128xf32>
    %79 = vector.shape_cast %78 : vector<256x128xf32> to vector<1x256x128xf32>
    %80 = arith.truncf %79 : vector<1x256x128xf32> to vector<1x256x128xbf16>
    %c0_63 = arith.constant 0 : index
    %c0_64 = arith.constant 0 : index
    %c0_65 = arith.constant 0 : index
    %81 = vector.load %arg6[%c0_63, %c0_64, %c0_65] : memref<1x256x128xbf16, #tpu.memory_space<vmem>>, vector<1x256x128xbf16>
    tpu.vector_store %arg6[%c0_63, %c0_64, %c0_65], %80 {strides = array<i32>} : memref<1x256x128xbf16, #tpu.memory_space<vmem>>, vector<1x256x128xbf16>,
    %cst_66 = arith.constant dense<0.000000e+00> : vector<128xf32>
    %82 = vector.multi_reduction <add>, %78, %cst_66 [0] : vector<256x128xf32> to vector<128xf32>
    %83 = vector.shape_cast %82 : vector<128xf32> to vector<1x128xf32>
    %84 = arith.mulf %78, %78 : vector<256x128xf32>
    %cst_67 = arith.constant dense<0.000000e+00> : vector<128xf32>
    %85 = vector.multi_reduction <add>, %84, %cst_67 [0] : vector<256x128xf32> to vector<128xf32>
    %86 = vector.shape_cast %85 : vector<128xf32> to vector<1x128xf32>
    %87 = tpu.concatenate %83, %86 in 0 : vector<1x128xf32>, vector<1x128xf32> -> vector<2x128xf32>
    %88 = vector.shape_cast %87 : vector<2x128xf32> to vector<1x2x128xf32>
    %c0_68 = arith.constant 0 : index
    %c0_69 = arith.constant 0 : index
    %c0_70 = arith.constant 0 : index
    %89 = vector.load %arg7[%c0_68, %c0_69, %c0_70] : memref<1x2x128xf32, #tpu.memory_space<vmem>>, vector<1x2x128xf32>
    tpu.vector_store %arg7[%c0_68, %c0_69, %c0_70], %88 {strides = array<i32>} : memref<1x2x128xf32, #tpu.memory_space<vmem>>, vector<1x2x128xf32>,
    return
  }
  func.func @transform_0(%arg0: i32) -> (i32, i32, i32, i32) {
    %c0_i32 = arith.constant 0 : i32
    %c0_i32_0 = arith.constant 0 : i32
    %c0_i32_1 = arith.constant 0 : i32
    %c0_i32_2 = arith.constant 0 : i32
    return %arg0, %c0_i32, %c0_i32_0, %c0_i32_1 : i32, i32, i32, i32
  }
  func.func @transform_1(%arg0: i32) -> (i32, i32, i32) {
    %c0_i32 = arith.constant 0 : i32
    %c0_i32_0 = arith.constant 0 : i32
    %c0_i32_1 = arith.constant 0 : i32
    %c0_i32_2 = arith.constant 0 : i32
    return %c0_i32, %c0_i32_0, %c0_i32_1 : i32, i32, i32
  }
  func.func @transform_2(%arg0: i32) -> (i32, i32) {
    %c0_i32 = arith.constant 0 : i32
    %c0_i32_0 = arith.constant 0 : i32
    %c0_i32_1 = arith.constant 0 : i32
    return %c0_i32, %c0_i32_0 : i32, i32
  }
  func.func @transform_3(%arg0: i32) -> (i32, i32) {
    %c0_i32 = arith.constant 0 : i32
    %c0_i32_0 = arith.constant 0 : i32
    %c0_i32_1 = arith.constant 0 : i32
    return %c0_i32, %c0_i32_0 : i32, i32
  }
  func.func @transform_4(%arg0: i32) -> (i32, i32) {
    %c0_i32 = arith.constant 0 : i32
    %c0_i32_0 = arith.constant 0 : i32
    %c0_i32_1 = arith.constant 0 : i32
    return %c0_i32, %c0_i32_0 : i32, i32
  }
  func.func @transform_5(%arg0: i32) -> (i32, i32, i32) {
    %c0_i32 = arith.constant 0 : i32
    %c0_i32_0 = arith.constant 0 : i32
    %c0_i32_1 = arith.constant 0 : i32
    return %arg0, %c0_i32, %c0_i32_0 : i32, i32, i32
  }
  func.func @transform_6(%arg0: i32) -> (i32, i32, i32) {
    %c0_i32 = arith.constant 0 : i32
    %c0_i32_0 = arith.constant 0 : i32
    %c0_i32_1 = arith.constant 0 : i32
    return %arg0, %c0_i32, %c0_i32_0 : i32, i32, i32
  }
}

module attributes {stable_mosaic.version = 11 : i64} {
  func.func @_conv3_kernel(%arg0: i32, %arg1: memref<512x128xbf16, #tpu.memory_space<vmem>>, %arg2: memref<2x2x128xf32, #tpu.memory_space<vmem>>, %arg3: memref<1x128xf32, #tpu.memory_space<vmem>>, %arg4: memref<1x128xf32, #tpu.memory_space<vmem>>, %arg5: memref<128x16xbf16, #tpu.memory_space<vmem>>, %arg6: memref<512x16xbf16, #tpu.memory_space<vmem>>, %arg7: memref<1x2x16xf32, #tpu.memory_space<vmem>>) attributes {dimension_semantics = [#tpu.dimension_semantics<parallel>], iteration_bounds = array<i64: 1>, scalar_prefetch = 0 : i64, scratch_operands = 0 : i64, tpu.core_type = #tpu.core_type<tc>, window_params = [{transform_indices = @transform_0, window_bounds = array<i64: 512, 128>}, {pipeline_mode = #tpu.pipeline_mode<synchronous>, transform_indices = @transform_1, window_bounds = array<i64: 2, 2, 128>}, {pipeline_mode = #tpu.pipeline_mode<synchronous>, transform_indices = @transform_2, window_bounds = array<i64: 1, 128>}, {pipeline_mode = #tpu.pipeline_mode<synchronous>, transform_indices = @transform_3, window_bounds = array<i64: 1, 128>}, {pipeline_mode = #tpu.pipeline_mode<synchronous>, transform_indices = @transform_4, window_bounds = array<i64: 128, 16>}, {transform_indices = @transform_5, window_bounds = array<i64: 512, 16>}, {transform_indices = @transform_6, window_bounds = array<i64: 1, 2, 16>}]} {
    %c0 = arith.constant 0 : index
    %c0_0 = arith.constant 0 : index
    %c0_1 = arith.constant 0 : index
    %0 = vector.load %arg2[%c0, %c0_0, %c0_1] : memref<2x2x128xf32, #tpu.memory_space<vmem>>, vector<2x2x128xf32>
    %cst = arith.constant dense<0.000000e+00> : vector<2x128xf32>
    %1 = vector.multi_reduction <add>, %0, %cst [0] : vector<2x2x128xf32> to vector<2x128xf32>
    %c0_2 = arith.constant 0 : index
    %c0_3 = arith.constant 0 : index
    %2 = vector.load %arg3[%c0_2, %c0_3] : memref<1x128xf32, #tpu.memory_space<vmem>>, vector<1x128xf32>
    %c0_4 = arith.constant 0 : index
    %c0_5 = arith.constant 0 : index
    %3 = vector.load %arg4[%c0_4, %c0_5] : memref<1x128xf32, #tpu.memory_space<vmem>>, vector<1x128xf32>
    %4 = vector.extract_strided_slice %1 {offsets = [0, 0], sizes = [1, 128], strides = [1, 1]} : vector<2x128xf32> to vector<1x128xf32>
    %cst_6 = arith.constant 0.001953125 : f32
    %5 = vector.broadcast %cst_6 : f32 to vector<1x128xf32>
    %6 = arith.mulf %4, %5 : vector<1x128xf32>
    %7 = vector.extract_strided_slice %1 {offsets = [1, 0], sizes = [1, 128], strides = [1, 1]} : vector<2x128xf32> to vector<1x128xf32>
    %cst_7 = arith.constant 0.001953125 : f32
    %8 = vector.broadcast %cst_7 : f32 to vector<1x128xf32>
    %9 = arith.mulf %7, %8 : vector<1x128xf32>
    %10 = arith.mulf %6, %6 : vector<1x128xf32>
    %11 = arith.subf %9, %10 : vector<1x128xf32>
    %cst_8 = arith.constant 0.000000e+00 : f32
    %12 = vector.broadcast %cst_8 : f32 to vector<1x128xf32>
    %13 = arith.maximumf %11, %12 : vector<1x128xf32>
    %cst_9 = arith.constant 9.99999974E-6 : f32
    %14 = vector.broadcast %cst_9 : f32 to vector<1x128xf32>
    %15 = arith.addf %13, %14 : vector<1x128xf32>
    %16 = math.rsqrt %15 : vector<1x128xf32>
    %17 = arith.mulf %2, %16 : vector<1x128xf32>
    %18 = arith.mulf %6, %17 : vector<1x128xf32>
    %19 = arith.subf %3, %18 : vector<1x128xf32>
    %c0_10 = arith.constant 0 : index
    %c0_11 = arith.constant 0 : index
    %20 = vector.load %arg1[%c0_10, %c0_11] : memref<512x128xbf16, #tpu.memory_space<vmem>>, vector<512x128xbf16>
    %21 = arith.extf %20 : vector<512x128xbf16> to vector<512x128xf32>
    %22 = vector.broadcast %17 : vector<1x128xf32> to vector<512x128xf32>
    %23 = arith.mulf %21, %22 : vector<512x128xf32>
    %24 = vector.broadcast %19 : vector<1x128xf32> to vector<512x128xf32>
    %25 = arith.addf %23, %24 : vector<512x128xf32>
    %cst_12 = arith.constant 0.000000e+00 : f32
    %26 = vector.broadcast %cst_12 : f32 to vector<512x128xf32>
    %27 = arith.maximumf %25, %26 : vector<512x128xf32>
    %28 = arith.truncf %27 : vector<512x128xf32> to vector<512x128xbf16>
    %c0_13 = arith.constant 0 : index
    %c0_14 = arith.constant 0 : index
    %29 = vector.load %arg5[%c0_13, %c0_14] : memref<128x16xbf16, #tpu.memory_space<vmem>>, vector<128x16xbf16>
    %cst_15 = arith.constant dense<0.000000e+00> : vector<512x16xf32>
    %30 = tpu.matmul %28, %29, %cst_15 {dimension_numbers = #tpu.dot_dimension_numbers<[1], [0], [0], [1], [0, 0, 1, 1], [], []>} : vector<512x128xbf16>, vector<128x16xbf16>, vector<512x16xf32> -> vector<512x16xf32>
    %31 = arith.truncf %30 : vector<512x16xf32> to vector<512x16xbf16>
    %c0_16 = arith.constant 0 : index
    %c0_17 = arith.constant 0 : index
    %32 = vector.load %arg6[%c0_16, %c0_17] : memref<512x16xbf16, #tpu.memory_space<vmem>>, vector<512x16xbf16>
    tpu.vector_store %arg6[%c0_16, %c0_17], %31 {strides = array<i32>} : memref<512x16xbf16, #tpu.memory_space<vmem>>, vector<512x16xbf16>,
    %cst_18 = arith.constant dense<0.000000e+00> : vector<16xf32>
    %33 = vector.multi_reduction <add>, %30, %cst_18 [0] : vector<512x16xf32> to vector<16xf32>
    %34 = vector.shape_cast %33 : vector<16xf32> to vector<1x16xf32>
    %35 = arith.mulf %30, %30 : vector<512x16xf32>
    %cst_19 = arith.constant dense<0.000000e+00> : vector<16xf32>
    %36 = vector.multi_reduction <add>, %35, %cst_19 [0] : vector<512x16xf32> to vector<16xf32>
    %37 = vector.shape_cast %36 : vector<16xf32> to vector<1x16xf32>
    %38 = tpu.concatenate %34, %37 in 0 : vector<1x16xf32>, vector<1x16xf32> -> vector<2x16xf32>
    %39 = vector.shape_cast %38 : vector<2x16xf32> to vector<1x2x16xf32>
    %c0_20 = arith.constant 0 : index
    %c0_21 = arith.constant 0 : index
    %c0_22 = arith.constant 0 : index
    %40 = vector.load %arg7[%c0_20, %c0_21, %c0_22] : memref<1x2x16xf32, #tpu.memory_space<vmem>>, vector<1x2x16xf32>
    tpu.vector_store %arg7[%c0_20, %c0_21, %c0_22], %39 {strides = array<i32>} : memref<1x2x16xf32, #tpu.memory_space<vmem>>, vector<1x2x16xf32>,
    return
  }
  func.func @transform_0(%arg0: i32) -> (i32, i32) {
    %c0_i32 = arith.constant 0 : i32
    %c0_i32_0 = arith.constant 0 : i32
    return %arg0, %c0_i32 : i32, i32
  }
  func.func @transform_1(%arg0: i32) -> (i32, i32, i32) {
    %c0_i32 = arith.constant 0 : i32
    %c0_i32_0 = arith.constant 0 : i32
    %c0_i32_1 = arith.constant 0 : i32
    %c0_i32_2 = arith.constant 0 : i32
    return %c0_i32, %c0_i32_0, %c0_i32_1 : i32, i32, i32
  }
  func.func @transform_2(%arg0: i32) -> (i32, i32) {
    %c0_i32 = arith.constant 0 : i32
    %c0_i32_0 = arith.constant 0 : i32
    %c0_i32_1 = arith.constant 0 : i32
    return %c0_i32, %c0_i32_0 : i32, i32
  }
  func.func @transform_3(%arg0: i32) -> (i32, i32) {
    %c0_i32 = arith.constant 0 : i32
    %c0_i32_0 = arith.constant 0 : i32
    %c0_i32_1 = arith.constant 0 : i32
    return %c0_i32, %c0_i32_0 : i32, i32
  }
  func.func @transform_4(%arg0: i32) -> (i32, i32) {
    %c0_i32 = arith.constant 0 : i32
    %c0_i32_0 = arith.constant 0 : i32
    %c0_i32_1 = arith.constant 0 : i32
    return %c0_i32, %c0_i32_0 : i32, i32
  }
  func.func @transform_5(%arg0: i32) -> (i32, i32) {
    %c0_i32 = arith.constant 0 : i32
    %c0_i32_0 = arith.constant 0 : i32
    return %arg0, %c0_i32 : i32, i32
  }
  func.func @transform_6(%arg0: i32) -> (i32, i32, i32) {
    %c0_i32 = arith.constant 0 : i32
    %c0_i32_0 = arith.constant 0 : i32
    %c0_i32_1 = arith.constant 0 : i32
    return %arg0, %c0_i32, %c0_i32_0 : i32, i32, i32
  }
}

module attributes {stable_mosaic.version = 11 : i64} {
  func.func @_finalize_kernel(%arg0: i32, %arg1: memref<512x16xbf16, #tpu.memory_space<vmem>>, %arg2: memref<1x2x16xf32, #tpu.memory_space<vmem>>, %arg3: memref<1x16xf32, #tpu.memory_space<vmem>>, %arg4: memref<1x16xf32, #tpu.memory_space<vmem>>, %arg5: memref<512x16xbf16, #tpu.memory_space<vmem>>, %arg6: memref<512x16xbf16, #tpu.memory_space<vmem>>) attributes {dimension_semantics = [#tpu.dimension_semantics<parallel>], iteration_bounds = array<i64: 1>, scalar_prefetch = 0 : i64, scratch_operands = 0 : i64, tpu.core_type = #tpu.core_type<tc>, window_params = [{transform_indices = @transform_0, window_bounds = array<i64: 512, 16>}, {pipeline_mode = #tpu.pipeline_mode<synchronous>, transform_indices = @transform_1, window_bounds = array<i64: 1, 2, 16>}, {pipeline_mode = #tpu.pipeline_mode<synchronous>, transform_indices = @transform_2, window_bounds = array<i64: 1, 16>}, {pipeline_mode = #tpu.pipeline_mode<synchronous>, transform_indices = @transform_3, window_bounds = array<i64: 1, 16>}, {transform_indices = @transform_4, window_bounds = array<i64: 512, 16>}, {transform_indices = @transform_5, window_bounds = array<i64: 512, 16>}]} {
    %c0 = arith.constant 0 : index
    %c0_0 = arith.constant 0 : index
    %c0_1 = arith.constant 0 : index
    %0 = vector.load %arg2[%c0, %c0_0, %c0_1] : memref<1x2x16xf32, #tpu.memory_space<vmem>>, vector<1x2x16xf32>
    %cst = arith.constant dense<0.000000e+00> : vector<2x16xf32>
    %1 = vector.multi_reduction <add>, %0, %cst [0] : vector<1x2x16xf32> to vector<2x16xf32>
    %c0_2 = arith.constant 0 : index
    %c0_3 = arith.constant 0 : index
    %2 = vector.load %arg3[%c0_2, %c0_3] : memref<1x16xf32, #tpu.memory_space<vmem>>, vector<1x16xf32>
    %c0_4 = arith.constant 0 : index
    %c0_5 = arith.constant 0 : index
    %3 = vector.load %arg4[%c0_4, %c0_5] : memref<1x16xf32, #tpu.memory_space<vmem>>, vector<1x16xf32>
    %4 = vector.extract_strided_slice %1 {offsets = [0, 0], sizes = [1, 16], strides = [1, 1]} : vector<2x16xf32> to vector<1x16xf32>
    %cst_6 = arith.constant 0.001953125 : f32
    %5 = vector.broadcast %cst_6 : f32 to vector<1x16xf32>
    %6 = arith.mulf %4, %5 : vector<1x16xf32>
    %7 = vector.extract_strided_slice %1 {offsets = [1, 0], sizes = [1, 16], strides = [1, 1]} : vector<2x16xf32> to vector<1x16xf32>
    %cst_7 = arith.constant 0.001953125 : f32
    %8 = vector.broadcast %cst_7 : f32 to vector<1x16xf32>
    %9 = arith.mulf %7, %8 : vector<1x16xf32>
    %10 = arith.mulf %6, %6 : vector<1x16xf32>
    %11 = arith.subf %9, %10 : vector<1x16xf32>
    %cst_8 = arith.constant 0.000000e+00 : f32
    %12 = vector.broadcast %cst_8 : f32 to vector<1x16xf32>
    %13 = arith.maximumf %11, %12 : vector<1x16xf32>
    %cst_9 = arith.constant 9.99999974E-6 : f32
    %14 = vector.broadcast %cst_9 : f32 to vector<1x16xf32>
    %15 = arith.addf %13, %14 : vector<1x16xf32>
    %16 = math.rsqrt %15 : vector<1x16xf32>
    %17 = arith.mulf %2, %16 : vector<1x16xf32>
    %18 = arith.mulf %6, %17 : vector<1x16xf32>
    %19 = arith.subf %3, %18 : vector<1x16xf32>
    %c0_10 = arith.constant 0 : index
    %c0_11 = arith.constant 0 : index
    %20 = vector.load %arg1[%c0_10, %c0_11] : memref<512x16xbf16, #tpu.memory_space<vmem>>, vector<512x16xbf16>
    %21 = arith.extf %20 : vector<512x16xbf16> to vector<512x16xf32>
    %22 = vector.broadcast %17 : vector<1x16xf32> to vector<512x16xf32>
    %23 = arith.mulf %21, %22 : vector<512x16xf32>
    %24 = vector.broadcast %19 : vector<1x16xf32> to vector<512x16xf32>
    %25 = arith.addf %23, %24 : vector<512x16xf32>
    %c0_12 = arith.constant 0 : index
    %c0_13 = arith.constant 0 : index
    %26 = vector.load %arg5[%c0_12, %c0_13] : memref<512x16xbf16, #tpu.memory_space<vmem>>, vector<512x16xbf16>
    %27 = arith.extf %26 : vector<512x16xbf16> to vector<512x16xf32>
    %28 = arith.addf %25, %27 : vector<512x16xf32>
    %cst_14 = arith.constant 0.000000e+00 : f32
    %29 = vector.broadcast %cst_14 : f32 to vector<512x16xf32>
    %30 = arith.maximumf %28, %29 : vector<512x16xf32>
    %31 = arith.truncf %30 : vector<512x16xf32> to vector<512x16xbf16>
    %c0_15 = arith.constant 0 : index
    %c0_16 = arith.constant 0 : index
    %32 = vector.load %arg6[%c0_15, %c0_16] : memref<512x16xbf16, #tpu.memory_space<vmem>>, vector<512x16xbf16>
    tpu.vector_store %arg6[%c0_15, %c0_16], %31 {strides = array<i32>} : memref<512x16xbf16, #tpu.memory_space<vmem>>, vector<512x16xbf16>,
    return
  }
  func.func @transform_0(%arg0: i32) -> (i32, i32) {
    %c0_i32 = arith.constant 0 : i32
    %c0_i32_0 = arith.constant 0 : i32
    return %arg0, %c0_i32 : i32, i32
  }
  func.func @transform_1(%arg0: i32) -> (i32, i32, i32) {
    %c0_i32 = arith.constant 0 : i32
    %c0_i32_0 = arith.constant 0 : i32
    %c0_i32_1 = arith.constant 0 : i32
    %c0_i32_2 = arith.constant 0 : i32
    return %c0_i32, %c0_i32_0, %c0_i32_1 : i32, i32, i32
  }
  func.func @transform_2(%arg0: i32) -> (i32, i32) {
    %c0_i32 = arith.constant 0 : i32
    %c0_i32_0 = arith.constant 0 : i32
    %c0_i32_1 = arith.constant 0 : i32
    return %c0_i32, %c0_i32_0 : i32, i32
  }
  func.func @transform_3(%arg0: i32) -> (i32, i32) {
    %c0_i32 = arith.constant 0 : i32
    %c0_i32_0 = arith.constant 0 : i32
    %c0_i32_1 = arith.constant 0 : i32
    return %c0_i32, %c0_i32_0 : i32, i32
  }
  func.func @transform_4(%arg0: i32) -> (i32, i32) {
    %c0_i32 = arith.constant 0 : i32
    %c0_i32_0 = arith.constant 0 : i32
    return %arg0, %c0_i32 : i32, i32
  }
  func.func @transform_5(%arg0: i32) -> (i32, i32) {
    %c0_i32 = arith.constant 0 : i32
    %c0_i32_0 = arith.constant 0 : i32
    return %arg0, %c0_i32 : i32, i32
  }
}

</mosaic_0001>

<bundles_post_ra>
// kernel: bottleneck_forward.4
= control target key start
LH: loop header
LB: loop body
LE: loop exit
PB: predicated region body
PF: predicated region fallthrough
CT: control target
= control target key end

     0   :  { %vm246_vm0 = vcmask 130048   ;;  %vm1154_vm1 = vcmask 1040384   ;;  %s2125_s1 = inlined_call_operand.vmem [shape: bf16[16,128], index: 1, kind: input, shape index: {}]   ;;  %s2126_s0 = inlined_call_operand.vmem [shape: bf16[512,16], index: 0, kind: input, shape index: {}]   ;;  %s2127_s2 = inlined_call_operand.vmem [shape: bf16[512,128], index: 2, kind: output, shape index: {0}]   ;;  %s2128_s3 = inlined_call_operand.vmem [shape: f32[1,2,128], index: 3, kind: output, shape index: {1}]  }
   0x1   :  { %v1650_v0 = vld [vmem:[%s2125_s1] sm:$0xff]   ;;  %v1652_v2 = vld [vmem:[%s2126_s0 + $0x8] sm:$0xff]   ;;  %v1653_v3 = vld [vmem:[%s2126_s0 + $0x10] sm:$0xff]  }
   0x2   :  { %v1651_v1 = vld [vmem:[%s2126_s0] sm:$0xff]   ;;  %1582 = vmatprep.subr.bf16.mxu0 %v1650_v0  ;;  %1648 = vmatprep.subr.bf16.mxu1 %v1650_v0  ;;  %v1654_v4 = vld [vmem:[%s2126_s0 + $0x18] sm:$0xff]   ;;  %v1656_v6 = vld [vmem:[%s2126_s0 + $0x28] sm:$0xff]  }
   0x3   :  { %1583 = vmatpush3.bf16.msra.mxu0 %v1650_v0  ;;  %1584 = vmatprep.mubr.msk.bf16.mxu0 %vm246_vm0, %v1651_v1  ;;  %v1655_v5 = vld [vmem:[%s2126_s0 + $0x20] sm:$0xff]   ;;  %v1657_v7 = vld [vmem:[%s2126_s0 + $0x30] sm:$0xff]   ;;  %v1668_v9 = vld [vmem:[%s2126_s0 + $0x88] sm:$0xff]  }
   0x4   :  { %1649 = vmatpush3.bf16.msra.mxu1 %v1650_v0  ;;  %v1667_v8 = vld [vmem:[%s2126_s0 + $0x80] sm:$0xff]   ;;  %v1669_v10 = vld [vmem:[%s2126_s0 + $0x90] sm:$0xff]   ;;  %v1670_v11 = vld [vmem:[%s2126_s0 + $0x98] sm:$0xff]  }
   0x5   :  { %1616 = vmatprep.mubr.msk.bf16.mxu1 %vm246_vm0, %v1667_v8  ;;  %v1671_v12 = vld [vmem:[%s2126_s0 + $0xa0] sm:$0xff]   ;;  %v1658_v13 = vld [vmem:[%s2126_s0 + $0x38] sm:$0xff]   ;;  %v1672_v15 = vld [vmem:[%s2126_s0 + $0xa8] sm:$0xff]  }
   0x6   :  { %1585 = vmatmul.mubr.msk.bf16.vlgmr.msra.gmra.mrb[0].mxu0 %vm246_vm0, %v1652_v2  ;;  %v1659_v14 = vld [vmem:[%s2126_s0 + $0x40] sm:$0xff]   ;;  %v1673_v16 = vld [vmem:[%s2126_s0 + $0xb0] sm:$0xff]   ;;  %v1660_v17 = vld [vmem:[%s2126_s0 + $0x48] sm:$0xff]  }
   0x7   :  { %1588 = vmatprep.mubr.msk.bf16.mxu0 %vm246_vm0, %v1653_v3  ;;  %1617 = vmatmul.mubr.msk.bf16.vlgmr.msra.gmra.mrb[0].mxu1 %vm246_vm0, %v1668_v9  ;;  %v1661_v18 = vld [vmem:[%s2126_s0 + $0x50] sm:$0xff]   ;;  %v1674_v19 = vld [vmem:[%s2126_s0 + $0xb8] sm:$0xff]   ;;  %v1675_v20 = vld [vmem:[%s2126_s0 + $0xc0] sm:$0xff]  }
   0x8   :  { %1620 = vmatprep.mubr.msk.bf16.mxu1 %vm246_vm0, %v1669_v10  ;;  %v1662_v21 = vld [vmem:[%s2126_s0 + $0x58] sm:$0xff]   ;;  %v1663_v22 = vld [vmem:[%s2126_s0 + $0x60] sm:$0xff]   ;;  %v1676_v23 = vld [vmem:[%s2126_s0 + $0xc8] sm:$0xff]  }
   0x9   :  { %v1677_v24 = vld [vmem:[%s2126_s0 + $0xd0] sm:$0xff]   ;;  %v1664_v25 = vld [vmem:[%s2126_s0 + $0x68] sm:$0xff]   ;;  %v1678_v27 = vld [vmem:[%s2126_s0 + $0xd8] sm:$0xff]  }
   0xa   :  { %v1665_v26 = vld [vmem:[%s2126_s0 + $0x70] sm:$0xff]   ;;  %v1679_v28 = vld [vmem:[%s2126_s0 + $0xe0] sm:$0xff]   ;;  %v1666_v29 = vld [vmem:[%s2126_s0 + $0x78] sm:$0xff]  }
   0xb   :  { %v1680_v30 = vld [vmem:[%s2126_s0 + $0xe8] sm:$0xff]   ;;  %v1681_v31 = vld [vmem:[%s2126_s0 + $0xf0] sm:$0xff]   ;;  %v1682_v32 = vld [vmem:[%s2126_s0 + $0xf8] sm:$0xff]  }
   0xe   :  { %1589 = vmatmul.mubr.msk.bf16.gmra.mrb[4].mxu0 %vm246_vm0, %v1654_v4 }
   0xf   :  { %1592 = vmatprep.mubr.msk.bf16.mxu0 %vm246_vm0, %v1655_v5  ;;  %1621 = vmatmul.mubr.msk.bf16.gmra.mrb[4].mxu1 %vm246_vm0, %v1670_v11 }
  0x10   :  { %1624 = vmatprep.mubr.msk.bf16.mxu1 %vm246_vm0, %v1671_v12 }
  0x16   :  { %1593 = vmatmul.mubr.msk.bf16.gmra.mrb[8].mxu0 %vm246_vm0, %v1656_v6 }
  0x17   :  { %1596 = vmatprep.mubr.msk.bf16.mxu0 %vm246_vm0, %v1657_v7  ;;  %1625 = vmatmul.mubr.msk.bf16.gmra.mrb[8].mxu1 %vm246_vm0, %v1672_v15 }
  0x18   :  { %1628 = vmatprep.mubr.msk.bf16.mxu1 %vm246_vm0, %v1673_v16 }
  0x1e   :  { %1597 = vmatmul.mubr.msk.bf16.gmra.mrb[12].mxu0 %vm246_vm0, %v1658_v13 }
  0x1f   :  { %1600 = vmatprep.mubr.msk.bf16.mxu0 %vm246_vm0, %v1659_v14  ;;  %1629 = vmatmul.mubr.msk.bf16.gmra.mrb[12].mxu1 %vm246_vm0, %v1674_v19 }
  0x20   :  { %1632 = vmatprep.mubr.msk.bf16.mxu1 %vm246_vm0, %v1675_v20 }
  0x26   :  { %1601 = vmatmul.mubr.msk.bf16.gmra.mrb[16].mxu0 %vm246_vm0, %v1660_v17 }
  0x27   :  { %1604 = vmatprep.mubr.msk.bf16.mxu0 %vm246_vm0, %v1661_v18  ;;  %1633 = vmatmul.mubr.msk.bf16.gmra.mrb[16].mxu1 %vm246_vm0, %v1676_v23 }
  0x28   :  { %1636 = vmatprep.mubr.msk.bf16.mxu1 %vm246_vm0, %v1677_v24 }
  0x2e   :  { %1605 = vmatmul.mubr.msk.bf16.gmra.mrb[20].mxu0 %vm246_vm0, %v1662_v21 }
  0x2f   :  { %1608 = vmatprep.mubr.msk.bf16.mxu0 %vm246_vm0, %v1663_v22  ;;  %1637 = vmatmul.mubr.msk.bf16.gmra.mrb[20].mxu1 %vm246_vm0, %v1678_v27 }
  0x30   :  { %1640 = vmatprep.mubr.msk.bf16.mxu1 %vm246_vm0, %v1679_v28 }
  0x36   :  { %1609 = vmatmul.mubr.msk.bf16.gmra.mrb[24].mxu0 %vm246_vm0, %v1664_v25 }
  0x37   :  { %1612 = vmatprep.mubr.msk.bf16.mxu0 %vm246_vm0, %v1665_v26  ;;  %1641 = vmatmul.mubr.msk.bf16.gmra.mrb[24].mxu1 %vm246_vm0, %v1680_v30 }
  0x38   :  { %1644 = vmatprep.mubr.msk.bf16.mxu1 %vm246_vm0, %v1681_v31 }
  0x3e   :  { %1613 = vmatmul.mubr.msk.bf16.gmra.mrb[28].mxu0 %vm246_vm0, %v1666_v29 }
  0x3f   :  { %1645 = vmatmul.mubr.msk.bf16.gmra.mrb[28].mxu1 %vm246_vm0, %v1682_v32 }
  0xd9   :  { %v1586_v33 = vpop.f32.mrb[0].mxu0 }
  0xda   :  { %v377_v34 = vpop.f32.mrb[1].mxu0  ;;  %v1023_v42 = vmul.f32 %v1586_v33, %v1586_v33  ;;  %v1846_v63 = vpop.f32.mrb[0].mxu1 }
  0xdb   :  { %v1587_v35 = vpop.f32.mrb[2].mxu0  ;;  %v1021_v38 = vmul.f32 %v377_v34, %v377_v34  ;;  %v1848_v0 = vpop.f32.mrb[1].mxu1 }
  0xdc   :  { %v1366_v36 = vpack.c.bf16 %v1587_v35, %v1586_v33  ;;  %v380_v37 = vpop.f32.mrb[3].mxu0  ;;  %v1024_v45 = vmul.f32 %v1587_v35, %v1587_v35  ;;  %v1850_v5 = vpop.f32.mrb[2].mxu1 }
  0xdd   :  { %v1361_v39 = vpack.c.bf16 %v380_v37, %v377_v34  ;;  %v952_v40 = vadd.f32 %v380_v37, %v377_v34  ;;  %v1022_v41 = vmul.f32 %v380_v37, %v380_v37  ;;  %v1446_v7 = vpack.c.bf16 %v1850_v5, %v1846_v63  ;;  %v1854_v8 = vpop.f32.mrb[3].mxu1 }
  0xde   :  { %1518 = vst [vmem:[%s2127_s2 + $0x8] sm:$0xff] %v1366_v36   ;;  %v1441_v13 = vpack.c.bf16 %v1854_v8, %v1848_v0 }
  0xdf   :  { %1362 = vst [vmem:[%s2127_s2] sm:$0xff] %v1361_v39   ;;  %v953_v43 = vadd.f32 %v1586_v33, %v952_v40  ;;  %v1085_v44 = vadd.f32 %v1022_v41, %v1021_v38  ;;  %1534 = vst [vmem:[%s2127_s2 + $0x88] sm:$0xff] %v1446_v7  }
  0xe0   :  { %1533 = vst [vmem:[%s2127_s2 + $0x80] sm:$0xff] %v1441_v13  }
  0xe1   :  { %v1086_v46 = vadd.f32 %v1085_v44, %v1023_v42  ;;  %v1590_v47 = vpop.f32.mrb[4].mxu0  ;;  %v954_v48 = vadd.f32 %v1587_v35, %v953_v43 }
  0xe2   :  { %v393_v49 = vpop.f32.mrb[5].mxu0  ;;  %v1027_v60 = vmul.f32 %v1590_v47, %v1590_v47  ;;  %v1870_v23 = vpop.f32.mrb[4].mxu1 }
  0xe3   :  { %v955_v50 = vadd.f32 %v954_v48, %v393_v49  ;;  %v1025_v51 = vmul.f32 %v393_v49, %v393_v49  ;;  %v1087_v52 = vadd.f32 %v1086_v46, %v1024_v45  ;;  %v1591_v53 = vpop.f32.mrb[6].mxu0  ;;  %v1872_v24 = vpop.f32.mrb[5].mxu1 }
  0xe4   :  { %v1376_v54 = vpack.c.bf16 %v1591_v53, %v1590_v47  ;;  %v396_v55 = vpop.f32.mrb[7].mxu0  ;;  %v1028_v1 = vmul.f32 %v1591_v53, %v1591_v53  ;;  %v1874_v29 = vpop.f32.mrb[6].mxu1 }
  0xe5   :  { %v1088_v56 = vadd.f32 %v1087_v52, %v1025_v51  ;;  %v1371_v57 = vpack.c.bf16 %v396_v55, %v393_v49  ;;  %v956_v58 = vadd.f32 %v955_v50, %v396_v55  ;;  %v1026_v59 = vmul.f32 %v396_v55, %v396_v55  ;;  %v1878_v32 = vpop.f32.mrb[7].mxu1 }
  0xe6   :  { %1520 = vst [vmem:[%s2127_s2 + $0x18] sm:$0xff] %v1376_v54   ;;  %v1456_v31 = vpack.c.bf16 %v1874_v29, %v1870_v23  ;;  %v1451_v37 = vpack.c.bf16 %v1878_v32, %v1872_v24 }
  0xe7   :  { %1519 = vst [vmem:[%s2127_s2 + $0x10] sm:$0xff] %v1371_v57   ;;  %v957_v61 = vadd.f32 %v1590_v47, %v956_v58  ;;  %v1089_v62 = vadd.f32 %v1088_v56, %v1026_v59 }
  0xe8   :  { %1536 = vst [vmem:[%s2127_s2 + $0x98] sm:$0xff] %v1456_v31   ;;  %1535 = vst [vmem:[%s2127_s2 + $0x90] sm:$0xff] %v1451_v37  }
  0xe9   :  { %v1090_v2 = vadd.f32 %v1089_v62, %v1027_v60  ;;  %v1594_v3 = vpop.f32.mrb[8].mxu0  ;;  %v958_v4 = vadd.f32 %v1591_v53, %v957_v61 }
  0xea   :  { %v409_v6 = vpop.f32.mrb[9].mxu0  ;;  %v1031_v20 = vmul.f32 %v1594_v3, %v1594_v3  ;;  %v1894_v47 = vpop.f32.mrb[8].mxu1 }
  0xeb   :  { %v959_v9 = vadd.f32 %v958_v4, %v409_v6  ;;  %v1029_v10 = vmul.f32 %v409_v6, %v409_v6  ;;  %v1091_v11 = vadd.f32 %v1090_v2, %v1028_v1  ;;  %v1595_v12 = vpop.f32.mrb[10].mxu0  ;;  %v1896_v48 = vpop.f32.mrb[9].mxu1 }
  0xec   :  { %v1386_v14 = vpack.c.bf16 %v1595_v12, %v1594_v3  ;;  %v412_v15 = vpop.f32.mrb[11].mxu0  ;;  %v1032_v25 = vmul.f32 %v1595_v12, %v1595_v12  ;;  %v1898_v53 = vpop.f32.mrb[10].mxu1 }
  0xed   :  { %v1092_v16 = vadd.f32 %v1091_v11, %v1029_v10  ;;  %v1381_v17 = vpack.c.bf16 %v412_v15, %v409_v6  ;;  %v960_v18 = vadd.f32 %v959_v9, %v412_v15  ;;  %v1030_v19 = vmul.f32 %v412_v15, %v412_v15  ;;  %v1902_v56 = vpop.f32.mrb[11].mxu1 }
  0xee   :  { %1522 = vst [vmem:[%s2127_s2 + $0x28] sm:$0xff] %v1386_v14   ;;  %v1466_v55 = vpack.c.bf16 %v1898_v53, %v1894_v47  ;;  %v1461_v61 = vpack.c.bf16 %v1902_v56, %v1896_v48 }
  0xef   :  { %1521 = vst [vmem:[%s2127_s2 + $0x20] sm:$0xff] %v1381_v17   ;;  %v961_v21 = vadd.f32 %v1594_v3, %v960_v18  ;;  %v1093_v22 = vadd.f32 %v1092_v16, %v1030_v19 }
  0xf0   :  { %1538 = vst [vmem:[%s2127_s2 + $0xa8] sm:$0xff] %v1466_v55   ;;  %1537 = vst [vmem:[%s2127_s2 + $0xa0] sm:$0xff] %v1461_v61  }
  0xf1   :  { %v1094_v26 = vadd.f32 %v1093_v22, %v1031_v20  ;;  %v1598_v27 = vpop.f32.mrb[12].mxu0  ;;  %v962_v28 = vadd.f32 %v1595_v12, %v961_v21 }
  0xf2   :  { %v425_v30 = vpop.f32.mrb[13].mxu0  ;;  %v1035_v44 = vmul.f32 %v1598_v27, %v1598_v27  ;;  %v1918_v11 = vpop.f32.mrb[12].mxu1 }
  0xf3   :  { %v963_v33 = vadd.f32 %v962_v28, %v425_v30  ;;  %v1033_v34 = vmul.f32 %v425_v30, %v425_v30  ;;  %v1095_v35 = vadd.f32 %v1094_v26, %v1032_v25  ;;  %v1599_v36 = vpop.f32.mrb[14].mxu0  ;;  %v1920_v12 = vpop.f32.mrb[13].mxu1 }
  0xf4   :  { %v1396_v38 = vpack.c.bf16 %v1599_v36, %v1598_v27  ;;  %v428_v39 = vpop.f32.mrb[15].mxu0  ;;  %v1036_v49 = vmul.f32 %v1599_v36, %v1599_v36  ;;  %v1922_v17 = vpop.f32.mrb[14].mxu1 }
  0xf5   :  { %v1096_v40 = vadd.f32 %v1095_v35, %v1033_v34  ;;  %v1391_v41 = vpack.c.bf16 %v428_v39, %v425_v30  ;;  %v964_v42 = vadd.f32 %v963_v33, %v428_v39  ;;  %v1034_v43 = vmul.f32 %v428_v39, %v428_v39  ;;  %v1926_v20 = vpop.f32.mrb[15].mxu1 }
  0xf6   :  { %1524 = vst [vmem:[%s2127_s2 + $0x38] sm:$0xff] %v1396_v38   ;;  %v1476_v19 = vpack.c.bf16 %v1922_v17, %v1918_v11 }
  0xf7   :  { %1523 = vst [vmem:[%s2127_s2 + $0x30] sm:$0xff] %v1391_v41   ;;  %v965_v45 = vadd.f32 %v1598_v27, %v964_v42  ;;  %v1097_v46 = vadd.f32 %v1096_v40, %v1034_v43  ;;  %v1471_v27 = vpack.c.bf16 %v1926_v20, %v1920_v12 }
  0xf8   :  { %1540 = vst [vmem:[%s2127_s2 + $0xb8] sm:$0xff] %v1476_v19  }
  0xf9   :  { %v1098_v50 = vadd.f32 %v1097_v46, %v1035_v44  ;;  %v1602_v51 = vpop.f32.mrb[16].mxu0  ;;  %v966_v52 = vadd.f32 %v1599_v36, %v965_v45  ;;  %1539 = vst [vmem:[%s2127_s2 + $0xb0] sm:$0xff] %v1471_v27  }
  0xfa   :  { %v441_v54 = vpop.f32.mrb[17].mxu0  ;;  %v1039_v7 = vmul.f32 %v1602_v51, %v1602_v51  ;;  %v1942_v39 = vpop.f32.mrb[16].mxu1 }
  0xfb   :  { %v967_v57 = vadd.f32 %v966_v52, %v441_v54  ;;  %v1037_v58 = vmul.f32 %v441_v54, %v441_v54  ;;  %v1099_v59 = vadd.f32 %v1098_v50, %v1036_v49  ;;  %v1603_v60 = vpop.f32.mrb[18].mxu0  ;;  %v1944_v40 = vpop.f32.mrb[17].mxu1 }
  0xfc   :  { %v1406_v62 = vpack.c.bf16 %v1603_v60, %v1602_v51  ;;  %v444_v1 = vpop.f32.mrb[19].mxu0  ;;  %v1040_v13 = vmul.f32 %v1603_v60, %v1603_v60  ;;  %v1946_v45 = vpop.f32.mrb[18].mxu1 }
  0xfd   :  { %v1100_v2 = vadd.f32 %v1099_v59, %v1037_v58  ;;  %v1401_v3 = vpack.c.bf16 %v444_v1, %v441_v54  ;;  %v968_v4 = vadd.f32 %v967_v57, %v444_v1  ;;  %v1038_v6 = vmul.f32 %v444_v1, %v444_v1  ;;  %v1950_v50 = vpop.f32.mrb[19].mxu1 }
  0xfe   :  { %1526 = vst [vmem:[%s2127_s2 + $0x48] sm:$0xff] %v1406_v62   ;;  %v1486_v49 = vpack.c.bf16 %v1946_v45, %v1942_v39  ;;  %v1481_v57 = vpack.c.bf16 %v1950_v50, %v1944_v40 }
  0xff   :  { %1525 = vst [vmem:[%s2127_s2 + $0x40] sm:$0xff] %v1401_v3   ;;  %v969_v9 = vadd.f32 %v1602_v51, %v968_v4  ;;  %v1101_v10 = vadd.f32 %v1100_v2, %v1038_v6 }
 0x100   :  { %1542 = vst [vmem:[%s2127_s2 + $0xc8] sm:$0xff] %v1486_v49   ;;  %1541 = vst [vmem:[%s2127_s2 + $0xc0] sm:$0xff] %v1481_v57   ;;  %v1053_v49 = vmul.f32 %v1848_v0, %v1848_v0 }
 0x101   :  { %v1102_v14 = vadd.f32 %v1101_v10, %v1039_v7  ;;  %v1606_v15 = vpop.f32.mrb[20].mxu0  ;;  %v970_v16 = vadd.f32 %v1603_v60, %v969_v9 }
 0x102   :  { %v457_v18 = vpop.f32.mrb[21].mxu0  ;;  %v1043_v36 = vmul.f32 %v1606_v15, %v1606_v15  ;;  %v1966_v6 = vpop.f32.mrb[20].mxu1 }
 0x103   :  { %v971_v21 = vadd.f32 %v970_v16, %v457_v18  ;;  %v1041_v22 = vmul.f32 %v457_v18, %v457_v18  ;;  %v1103_v25 = vadd.f32 %v1102_v14, %v1040_v13  ;;  %v1607_v26 = vpop.f32.mrb[22].mxu0  ;;  %v1968_v7 = vpop.f32.mrb[21].mxu1 }
 0x104   :  { %v1416_v28 = vpack.c.bf16 %v1607_v26, %v1606_v15  ;;  %v460_v30 = vpop.f32.mrb[23].mxu0  ;;  %v1044_v41 = vmul.f32 %v1607_v26, %v1607_v26 }
 0x105   :  { %v1104_v31 = vadd.f32 %v1103_v25, %v1041_v22  ;;  %v1411_v33 = vpack.c.bf16 %v460_v30, %v457_v18  ;;  %v972_v34 = vadd.f32 %v971_v21, %v460_v30  ;;  %v1042_v35 = vmul.f32 %v460_v30, %v460_v30 }
 0x106   :  { %1528 = vst [vmem:[%s2127_s2 + $0x58] sm:$0xff] %v1416_v28  }
 0x107   :  { %1527 = vst [vmem:[%s2127_s2 + $0x50] sm:$0xff] %v1411_v33   ;;  %v973_v37 = vadd.f32 %v1606_v15, %v972_v34  ;;  %v1105_v38 = vadd.f32 %v1104_v31, %v1042_v35  ;;  %v1970_v15 = vpop.f32.mrb[22].mxu1 }
 0x108   :  { %v1496_v18 = vpack.c.bf16 %v1970_v15, %v1966_v6  ;;  %v1974_v19 = vpop.f32.mrb[23].mxu1 }
 0x109   :  { %v1106_v42 = vadd.f32 %v1105_v38, %v1043_v36  ;;  %v1610_v43 = vpop.f32.mrb[24].mxu0  ;;  %v974_v44 = vadd.f32 %v1607_v26, %v973_v37  ;;  %v1491_v27 = vpack.c.bf16 %v1974_v19, %v1968_v7 }
 0x10a   :  { %v473_v46 = vpop.f32.mrb[25].mxu0  ;;  %v1047_v2 = vmul.f32 %v1610_v43, %v1610_v43  ;;  %1544 = vst [vmem:[%s2127_s2 + $0xd8] sm:$0xff] %v1496_v18  }
 0x10b   :  { %v975_v51 = vadd.f32 %v974_v44, %v473_v46  ;;  %v1045_v52 = vmul.f32 %v473_v46, %v473_v46  ;;  %v1107_v54 = vadd.f32 %v1106_v42, %v1044_v41  ;;  %v1611_v55 = vpop.f32.mrb[26].mxu0  ;;  %1543 = vst [vmem:[%s2127_s2 + $0xd0] sm:$0xff] %v1491_v27   ;;  %v1990_v41 = vpop.f32.mrb[24].mxu1 }
 0x10c   :  { %v1426_v58 = vpack.c.bf16 %v1611_v55, %v1610_v43  ;;  %v476_v59 = vpop.f32.mrb[27].mxu0  ;;  %v1048_v9 = vmul.f32 %v1611_v55, %v1611_v55  ;;  %v1992_v42 = vpop.f32.mrb[25].mxu1 }
 0x10d   :  { %v1108_v60 = vadd.f32 %v1107_v54, %v1045_v52  ;;  %v1421_v61 = vpack.c.bf16 %v476_v59, %v473_v46  ;;  %v976_v62 = vadd.f32 %v975_v51, %v476_v59  ;;  %v1046_v1 = vmul.f32 %v476_v59, %v476_v59  ;;  %v1996_v51 = vpop.f32.mrb[26].mxu1 }
 0x10e   :  { %1530 = vst [vmem:[%s2127_s2 + $0x68] sm:$0xff] %v1426_v58   ;;  %v1506_v52 = vpack.c.bf16 %v1996_v51, %v1990_v41  ;;  %v2000_v54 = vpop.f32.mrb[27].mxu1 }
 0x10f   :  { %1529 = vst [vmem:[%s2127_s2 + $0x60] sm:$0xff] %v1421_v61   ;;  %v977_v3 = vadd.f32 %v1610_v43, %v976_v62  ;;  %v1109_v4 = vadd.f32 %v1108_v60, %v1046_v1  ;;  %v1501_v58 = vpack.c.bf16 %v2000_v54, %v1992_v42  ;;  %v1054_v61 = vmul.f32 %v1854_v8, %v1854_v8 }
 0x110   :  { %1546 = vst [vmem:[%s2127_s2 + $0xe8] sm:$0xff] %v1506_v52  }
 0x111   :  { %v1110_v10 = vadd.f32 %v1109_v4, %v1047_v2  ;;  %v1614_v13 = vpop.f32.mrb[28].mxu0  ;;  %v978_v14 = vadd.f32 %v1611_v55, %v977_v3  ;;  %1545 = vst [vmem:[%s2127_s2 + $0xe0] sm:$0xff] %v1501_v58   ;;  %v1056_v4 = vmul.f32 %v1850_v5, %v1850_v5 }
 0x112   :  { %v489_v16 = vpop.f32.mrb[29].mxu0  ;;  %v1051_v36 = vmul.f32 %v1614_v13, %v1614_v13  ;;  %v2017_v2 = vpop.f32.mrb[28].mxu1 }
 0x113   :  { %v979_v21 = vadd.f32 %v978_v14, %v489_v16  ;;  %v1049_v22 = vmul.f32 %v489_v16, %v489_v16  ;;  %v1111_v25 = vadd.f32 %v1110_v10, %v1048_v9  ;;  %v1615_v26 = vpop.f32.mrb[30].mxu0  ;;  %v2019_v3 = vpop.f32.mrb[29].mxu1  ;;  %v1057_v10 = vmul.f32 %v1872_v24, %v1872_v24 }
 0x114   :  { %v1436_v28 = vpack.c.bf16 %v1615_v26, %v1614_v13  ;;  %v492_v30 = vpop.f32.mrb[31].mxu0  ;;  %v1052_v43 = vmul.f32 %v1615_v26, %v1615_v26 }
 0x115   :  { %v1112_v31 = vadd.f32 %v1111_v25, %v1049_v22  ;;  %v1431_v33 = vpack.c.bf16 %v492_v30, %v489_v16  ;;  %v980_v34 = vadd.f32 %v979_v21, %v492_v30  ;;  %v1050_v35 = vmul.f32 %v492_v30, %v492_v30 }
 0x116   :  { %1532 = vst [vmem:[%s2127_s2 + $0x78] sm:$0xff] %v1436_v28   ;;  %v1058_v25 = vmul.f32 %v1878_v32, %v1878_v32  ;;  %v1060_v28 = vmul.f32 %v1874_v29, %v1874_v29 }
 0x117   :  { %1531 = vst [vmem:[%s2127_s2 + $0x70] sm:$0xff] %v1431_v33   ;;  %v981_v37 = vadd.f32 %v1614_v13, %v980_v34  ;;  %v1113_v38 = vadd.f32 %v1112_v31, %v1050_v35  ;;  %v2026_v13 = vpop.f32.mrb[30].mxu1  ;;  %v1061_v33 = vmul.f32 %v1896_v48, %v1896_v48 }
 0x118   :  { %v1516_v14 = vpack.c.bf16 %v2026_v13, %v2017_v2 }
 0x119   :  { %v1114_v44 = vadd.f32 %v1113_v38, %v1051_v36  ;;  %v982_v46 = vadd.f32 %v1615_v26, %v981_v37  ;;  %v1062_v37 = vmul.f32 %v1902_v56, %v1902_v56 }
 0x11a   :  { %1548 = vst [vmem:[%s2127_s2 + $0xf8] sm:$0xff] %v1516_v14  }
 0x11b   :  { %v983_v55 = vadd.f32 %v982_v46, %v1848_v0  ;;  %v1115_v57 = vadd.f32 %v1114_v44, %v1052_v43  ;;  %v1055_v0 = vmul.f32 %v1846_v63, %v1846_v63 }
 0x11d   :  { %v1116_v59 = vadd.f32 %v1115_v57, %v1053_v49  ;;  %v984_v60 = vadd.f32 %v983_v55, %v1854_v8  ;;  %v1066_v57 = vmul.f32 %v1926_v20, %v1926_v20 }
 0x11f   :  { %v985_v62 = vadd.f32 %v1846_v63, %v984_v60  ;;  %v1117_v1 = vadd.f32 %v1116_v59, %v1054_v61  ;;  %v2030_v63 = vpop.f32.mrb[31].mxu1 }
 0x120   :  { %v1511_v21 = vpack.c.bf16 %v2030_v63, %v2019_v3 }
 0x121   :  { %v1118_v9 = vadd.f32 %v1117_v1, %v1055_v0  ;;  %v986_v8 = vadd.f32 %v1850_v5, %v985_v62 }
 0x122   :  { %1547 = vst [vmem:[%s2127_s2 + $0xf0] sm:$0xff] %v1511_v21  }
 0x123   :  { %v987_v16 = vadd.f32 %v986_v8, %v1872_v24  ;;  %v1119_v18 = vadd.f32 %v1118_v9, %v1056_v4  ;;  %v1059_v24 = vmul.f32 %v1870_v23, %v1870_v23  ;;  %v1070_v4 = vmul.f32 %v1950_v50, %v1950_v50 }
 0x125   :  { %v1120_v5 = vadd.f32 %v1119_v18, %v1057_v10  ;;  %v988_v22 = vadd.f32 %v987_v16, %v1878_v32 }
 0x127   :  { %v989_v26 = vadd.f32 %v1870_v23, %v988_v22  ;;  %v1121_v27 = vadd.f32 %v1120_v5, %v1058_v25  ;;  %v1063_v23 = vmul.f32 %v1894_v47, %v1894_v47  ;;  %v1074_v5 = vmul.f32 %v1974_v19, %v1974_v19 }
 0x129   :  { %v1122_v30 = vadd.f32 %v1121_v27, %v1059_v24  ;;  %v990_v31 = vadd.f32 %v1874_v29, %v989_v26  ;;  %v1064_v29 = vmul.f32 %v1898_v53, %v1898_v53 }
 0x12b   :  { %v991_v32 = vadd.f32 %v990_v31, %v1896_v48  ;;  %v1123_v34 = vadd.f32 %v1122_v30, %v1060_v28  ;;  %v1065_v48 = vmul.f32 %v1920_v12, %v1920_v12  ;;  %v1078_v31 = vmul.f32 %v2000_v54, %v2000_v54 }
 0x12d   :  { %v1124_v35 = vadd.f32 %v1123_v34, %v1061_v33  ;;  %v992_v36 = vadd.f32 %v991_v32, %v1902_v56 }
 0x12f   :  { %v993_v38 = vadd.f32 %v1894_v47, %v992_v36  ;;  %v1125_v43 = vadd.f32 %v1124_v35, %v1062_v37  ;;  %v1067_v47 = vmul.f32 %v1918_v11, %v1918_v11 }
 0x131   :  { %v1126_v44 = vadd.f32 %v1125_v43, %v1063_v23  ;;  %v994_v46 = vadd.f32 %v1898_v53, %v993_v38  ;;  %v1068_v53 = vmul.f32 %v1922_v17, %v1922_v17  ;;  %v1082_v38 = vmul.f32 %v2030_v63, %v2030_v63 }
 0x133   :  { %v995_v49 = vadd.f32 %v994_v46, %v1920_v12  ;;  %v1127_v52 = vadd.f32 %v1126_v44, %v1064_v29  ;;  %v1069_v12 = vmul.f32 %v1944_v40, %v1944_v40 }
 0x135   :  { %v1128_v55 = vadd.f32 %v1127_v52, %v1065_v48  ;;  %v996_v56 = vadd.f32 %v995_v49, %v1926_v20 }
 0x137   :  { %v997_v58 = vadd.f32 %v1918_v11, %v996_v56  ;;  %v1129_v59 = vadd.f32 %v1128_v55, %v1066_v57  ;;  %v1071_v11 = vmul.f32 %v1942_v39, %v1942_v39 }
 0x139   :  { %v1130_v60 = vadd.f32 %v1129_v59, %v1067_v47  ;;  %v998_v61 = vadd.f32 %v1922_v17, %v997_v58  ;;  %v1072_v17 = vmul.f32 %v1946_v45, %v1946_v45 }
 0x13b   :  { %v999_v0 = vadd.f32 %v998_v61, %v1944_v40  ;;  %v1131_v62 = vadd.f32 %v1130_v60, %v1068_v53  ;;  %v1073_v40 = vmul.f32 %v1968_v7, %v1968_v7 }
 0x13d   :  { %v1132_v1 = vadd.f32 %v1131_v62, %v1069_v12  ;;  %v1000_v20 = vadd.f32 %v999_v0, %v1950_v50 }
 0x13f   :  { %v1001_v9 = vadd.f32 %v1942_v39, %v1000_v20  ;;  %v1133_v8 = vadd.f32 %v1132_v1, %v1070_v4  ;;  %v1075_v39 = vmul.f32 %v1966_v6, %v1966_v6 }
 0x141   :  { %v1134_v10 = vadd.f32 %v1133_v8, %v1071_v11  ;;  %v1002_v14 = vadd.f32 %v1946_v45, %v1001_v9  ;;  %v1076_v45 = vmul.f32 %v1970_v15, %v1970_v15 }
 0x143   :  { %v1003_v16 = vadd.f32 %v1002_v14, %v1968_v7  ;;  %v1135_v18 = vadd.f32 %v1134_v10, %v1072_v17  ;;  %v1077_v7 = vmul.f32 %v1992_v42, %v1992_v42 }
 0x145   :  { %v1136_v21 = vadd.f32 %v1135_v18, %v1073_v40  ;;  %v1004_v50 = vadd.f32 %v1003_v16, %v1974_v19 }
 0x147   :  { %v1005_v22 = vadd.f32 %v1966_v6, %v1004_v50  ;;  %v1137_v25 = vadd.f32 %v1136_v21, %v1074_v5  ;;  %v1079_v6 = vmul.f32 %v1990_v41, %v1990_v41 }
 0x149   :  { %v1138_v24 = vadd.f32 %v1137_v25, %v1075_v39  ;;  %v1006_v26 = vadd.f32 %v1970_v15, %v1005_v22  ;;  %v1080_v15 = vmul.f32 %v1996_v51, %v1996_v51 }
 0x14b   :  { %v1007_v27 = vadd.f32 %v1006_v26, %v1992_v42  ;;  %v1139_v28 = vadd.f32 %v1138_v24, %v1076_v45  ;;  %v1081_v42 = vmul.f32 %v2019_v3, %v2019_v3 }
 0x14d   :  { %v1140_v30 = vadd.f32 %v1139_v28, %v1077_v7  ;;  %v1008_v19 = vadd.f32 %v1007_v27, %v2000_v54 }
 0x14f   :  { %v1009_v33 = vadd.f32 %v1990_v41, %v1008_v19  ;;  %v1141_v32 = vadd.f32 %v1140_v30, %v1078_v31  ;;  %v1083_v41 = vmul.f32 %v2017_v2, %v2017_v2 }
 0x151   :  { %v1142_v34 = vadd.f32 %v1141_v32, %v1079_v6  ;;  %v1010_v35 = vadd.f32 %v1996_v51, %v1009_v33  ;;  %v1084_v51 = vmul.f32 %v2026_v13, %v2026_v13 }
 0x153   :  { %v1011_v36 = vadd.f32 %v1010_v35, %v2019_v3  ;;  %v1143_v37 = vadd.f32 %v1142_v34, %v1080_v15 }
 0x155   :  { %v1144_v23 = vadd.f32 %v1143_v37, %v1081_v42  ;;  %v1012_v54 = vadd.f32 %v1011_v36, %v2030_v63 }
 0x157   :  { %v1013_v43 = vadd.f32 %v2017_v2, %v1012_v54  ;;  %v1145_v29 = vadd.f32 %v1144_v23, %v1082_v38 }
 0x159   :  { %v1014_v44 = vadd.f32 %v2026_v13, %v1013_v43  ;;  %v1146_v46 = vadd.f32 %v1145_v29, %v1083_v41 }
 0x15b   :  { %v1015_v3 = vrot.slane %v1014_v44, 4  ;;  %v1147_v48 = vadd.f32 %v1146_v46, %v1084_v51 }
 0x15d   :  { %v1016_v49 = vadd.f32 %v1015_v3, %v1014_v44  ;;  %v1148_v52 = vrot.slane %v1147_v48, 4 }
 0x15f   :  { %v1017_v55 = vrot.slane %v1016_v49, 2  ;;  %v1149_v56 = vadd.f32 %v1148_v52, %v1147_v48 }
 0x161   :  { %v1018_v57 = vadd.f32 %v1017_v55, %v1016_v49  ;;  %v1150_v63 = vrot.slane %v1149_v56, 2 }
 0x163   :  { %v1019_v47 = vrot.slane %v1018_v57, 1  ;;  %v1151_v58 = vadd.f32 %v1150_v63, %v1149_v56 }
 0x165   :  { %v1152_v59 = vrot.slane %v1151_v58, 1  ;;  %v1020_v2 = vadd.f32 %v1019_v47, %v1018_v57 }
 0x167   :  { %v1153_v53 = vadd.f32 %v1152_v59, %v1151_v58 }
 0x169   :  { %v1155_v60 = vsel %vm1154_vm1, %v1020_v2, %v1153_v53 }
 0x16a   :  { %1156 = vst [vmem:[%s2128_s3] sm:$0x3] %v1155_v60 }

// kernel: bottleneck_forward.6
= control target key start
LH: loop header
LB: loop body
LE: loop exit
PB: predicated region body
PF: predicated region fallthrough
CT: control target
= control target key end

     0   :  { %vm25_vm0 = vcmask 1041408   ;;  %v1883_v18 = vmov 1966171168   ;;  %v44_v20 = vlaneseq  ;;  %vm1033_vm1 = vcmask 125952   ;;  %s3109_s4 = inlined_call_operand.vmem [shape: bf16[128,16], index: 4, kind: input, shape index: {}]   ;;  %s3110_s1 = inlined_call_operand.vmem [shape: f32[2,2,128], index: 1, kind: input, shape index: {}]   ;;  %s3111_s0 = inlined_call_operand.vmem [shape: bf16[512,128], index: 0, kind: input, shape index: {}]   ;;  %s3112_s2 = inlined_call_operand.vmem [shape: f32[1,128], index: 2, kind: input, shape index: {}]   ;;  %s3113_s3 = inlined_call_operand.vmem [shape: f32[1,128], index: 3, kind: input, shape index: {}]   ;;  %s3114_s5 = inlined_call_operand.vmem [shape: bf16[512,16], index: 5, kind: output, shape index: {0}]   ;;  %s3115_s6 = inlined_call_operand.vmem [shape: f32[1,2,16], index: 6, kind: output, shape index: {1}]  }
   0x1   :  { %v1873_v0 = vld [vmem:[%s3109_s4] sm:$0xff]   ;;  %v1874_v1 = vld [vmem:[%s3109_s4 + $0x8] sm:$0xff]   ;;  %v1875_v2 = vld [vmem:[%s3109_s4 + $0x10] sm:$0xff]   ;;  %v42_v19 = vunpack.c.l.s4 %v1883_v18  ;;  %vm1098_vm2 = vcmask 130048   ;;  %vm1429_vm3 = vcmask 1040384   ;;  %vm1431_vm4 = vcmask 123904  }
   0x2   :  { %1776 = vmatprep.subr.bf16.mxu0 %v1873_v0  ;;  %1856 = vmatprep.subr.bf16.mxu1 %v1873_v0  ;;  %v1876_v3 = vld [vmem:[%s3109_s4 + $0x18] sm:$0xff]   ;;  %v23_v4 = vld [vmem:[%s3110_s1] sm:$0x3]  ;;  %v24_v5 = vld [vmem:[%s3110_s1 + $0x2] sm:$0x3]  ;;  %v1954_v23 = vshrl.u32 %v44_v20, 7 }
   0x3   :  { %1777 = vmatpush3.bf16.msra.mxu0 %v1873_v0  ;;  %1864 = vmatpush3.bf16.msra.mxu1 %v1873_v0  ;;  %v26_v6 = vsel %vm25_vm0, %v23_v4, 0.0  ;;  %v27_v7 = vsel %vm25_vm0, %v24_v5, 0.0  ;;  %v1877_v9 = vld [vmem:[%s3109_s4 + $0x20] sm:$0xff]   ;;  %v1878_v12 = vld [vmem:[%s3109_s4 + $0x28] sm:$0xff]   ;;  %v1879_v15 = vld [vmem:[%s3109_s4 + $0x30] sm:$0xff]   ;;  %v43_v22 = vunpack.c.0.s8 %v42_v19 }
   0x4   :  { %1778 = vmatprep.subr.bf16.mxu0 %v1874_v1  ;;  %1857 = vmatprep.subr.bf16.mxu1 %v1874_v1  ;;  %v28_v8 = vadd.f32 %v27_v7, %v26_v6  ;;  %v1880_v21 = vld [vmem:[%s3109_s4 + $0x38] sm:$0xff]   ;;  %v1959_v24 = vld [vmem:[%s3111_s0] sm:$0xff]   ;;  %v1964_v25 = vld [vmem:[%s3111_s0 + $0x8] sm:$0xff]   ;;  %v191_v32 = vsub.s32 0, %v1954_v23 }
   0x5   :  { %v1969_v26 = vld [vmem:[%s3111_s0 + $0x10] sm:$0xff]   ;;  %v1974_v27 = vld [vmem:[%s3111_s0 + $0x18] sm:$0xff]   ;;  %v1979_v28 = vld [vmem:[%s3111_s0 + $0x20] sm:$0xff]   ;;  %v46_v29 = vsub.s32 %v43_v22, %v1954_v23  ;;  %v1579_v30 = vunpack.c.l.bf16 %v1959_v24  ;;  %v1580_v31 = vunpack.c.h.bf16 %v1959_v24  ;;  %v1583_v35 = vunpack.c.l.bf16 %v1964_v25 }
   0x6   :  { %v1940_v10 = vmul.f32 0.001953125, %v28_v8  ;;  %v1988_v33 = vld [vmem:[%s3111_s0 + $0x28] sm:$0xff]   ;;  %v1993_v34 = vld [vmem:[%s3111_s0 + $0x30] sm:$0xff]   ;;  %v1584_v36 = vunpack.c.h.bf16 %v1964_v25  ;;  %v1587_v37 = vunpack.c.l.bf16 %v1969_v26  ;;  %v1588_v38 = vunpack.c.h.bf16 %v1969_v26  ;;  %v2002_v39 = vld [vmem:[%s3111_s0 + $0x38] sm:$0xff]  }
   0x7   :  { %1779 = vmatpush3.bf16.msra.mxu0 %v1874_v1  ;;  %1865 = vmatpush3.bf16.msra.mxu1 %v1874_v1  ;;  %v2007_v40 = vld [vmem:[%s3111_s0 + $0x40] sm:$0xff]   ;;  %v1591_v41 = vunpack.c.l.bf16 %v1974_v27  ;;  %v1592_v42 = vunpack.c.h.bf16 %v1974_v27  ;;  %v1595_v43 = vunpack.c.l.bf16 %v1979_v28  ;;  %v1596_v44 = vunpack.c.h.bf16 %v1979_v28  ;;  %v2016_v45 = vld [vmem:[%s3111_s0 + $0x48] sm:$0xff]   ;;  %v2021_v46 = vld [vmem:[%s3111_s0 + $0x50] sm:$0xff]  }
   0x8   :  { %1780 = vmatprep.subr.bf16.mxu0 %v1875_v2  ;;  %1858 = vmatprep.subr.bf16.mxu1 %v1875_v2  ;;  %v32_v11 = vmul.f32 %v1940_v10, %v1940_v10  ;;  %v1599_v48 = vunpack.c.l.bf16 %v1988_v33  ;;  %v1600_v49 = vunpack.c.h.bf16 %v1988_v33  ;;  %v1603_v50 = vunpack.c.l.bf16 %v1993_v34  ;;  %v2030_v52 = vld [vmem:[%s3111_s0 + $0x58] sm:$0xff]   ;;  %v2038_v57 = vld [vmem:[%s3111_s0 + $0x60] sm:$0xff]   ;;  %v2043_v58 = vld [vmem:[%s3111_s0 + $0x68] sm:$0xff]  }
   0x9   :  { %v1604_v51 = vunpack.c.h.bf16 %v1993_v34  ;;  %v1607_v54 = vunpack.c.l.bf16 %v2002_v39  ;;  %v1608_v55 = vunpack.c.h.bf16 %v2002_v39  ;;  %v1611_v56 = vunpack.c.l.bf16 %v2007_v40  ;;  %v2052_v63 = vld [vmem:[%s3111_s0 + $0x70] sm:$0xff]   ;;  %v2057_v0 = vld [vmem:[%s3111_s0 + $0x78] sm:$0xff]   ;;  %v2065_v5 = vld [vmem:[%s3111_s0 + $0x80] sm:$0xff]  }
   0xa   :  { %v34_v13 = vrot.slane %v32_v11, 7  ;;  %v1612_v59 = vunpack.c.h.bf16 %v2007_v40  ;;  %v1615_v60 = vunpack.c.l.bf16 %v2016_v45  ;;  %v1616_v61 = vunpack.c.h.bf16 %v2016_v45  ;;  %v2070_v6 = vld [vmem:[%s3111_s0 + $0x88] sm:$0xff]   ;;  %v29_v7 = vld [vmem:[%s3112_s2] sm:$0x1]  ;;  %v2090_v18 = vld [vmem:[%s3111_s0 + $0x98] sm:$0xff]  }
   0xb   :  { %1781 = vmatpush3.bf16.msra.mxu0 %v1875_v2  ;;  %1866 = vmatpush3.bf16.msra.mxu1 %v1875_v2  ;;  %v1619_v62 = vunpack.c.l.bf16 %v2021_v46  ;;  %v1620_v2 = vunpack.c.h.bf16 %v2021_v46  ;;  %v1624_v4 = vunpack.c.h.bf16 %v2030_v52  ;;  %v1627_v8 = vunpack.c.l.bf16 %v2038_v57  ;;  %v2095_v19 = vld [vmem:[%s3111_s0 + $0xa0] sm:$0xff]   ;;  %v2112_v20 = vld [vmem:[%s3111_s0 + $0xb0] sm:$0xff]  }
   0xc   :  { %1782 = vmatprep.subr.bf16.mxu0 %v1876_v3  ;;  %1859 = vmatprep.subr.bf16.mxu1 %v1876_v3  ;;  %v36_v14 = vsub.f32 %v1940_v10, %v34_v13  ;;  %v2082_v13 = vld [vmem:[%s3111_s0 + $0x90] sm:$0xff]  }
   0xd   :  { %v2258_v40 = vld [vmem:[%s3111_s0 + $0xf0] sm:$0xff]  }
   0xe   :  { %v37_v16 = vmax.f32 %v36_v14, 0.0 }
   0xf   :  { %1783 = vmatpush3.bf16.msra.mxu0 %v1876_v3  ;;  %1867 = vmatpush3.bf16.msra.mxu1 %v1876_v3  ;;  %v1623_v3 = vunpack.c.l.bf16 %v2030_v52 }
  0x10   :  { %1784 = vmatprep.subr.bf16.mxu0 %v1877_v9  ;;  %1860 = vmatprep.subr.bf16.mxu1 %v1877_v9  ;;  %v38_v17 = vadd.f32 1e-05, %v37_v16  ;;  %v2154_v16 = vld [vmem:[%s3111_s0 + $0xc8] sm:$0xff]  }
  0x12   :  { %1881 = vrsqrt.f32 %v38_v17 }
  0x13   :  { %1785 = vmatpush3.bf16.msra.mxu0 %v1877_v9  ;;  %1868 = vmatpush3.bf16.msra.mxu1 %v1877_v9  ;;  %v1628_v9 = vunpack.c.h.bf16 %v2038_v57  ;;  %v3116_v57 = vunpack.c.l.bf16 %v2043_v58 }
  0x14   :  { %1786 = vmatprep.subr.bf16.mxu0 %v1878_v12  ;;  %1861 = vmatprep.subr.bf16.mxu1 %v1878_v12 }
  0x17   :  { %1787 = vmatpush3.bf16.msra.mxu0 %v1878_v12  ;;  %1869 = vmatpush3.bf16.msra.mxu1 %v1878_v12 }
  0x18   :  { %1788 = vmatprep.subr.bf16.mxu0 %v1879_v15  ;;  %1862 = vmatprep.subr.bf16.mxu1 %v1879_v15 }
  0x1b   :  { %1789 = vmatpush3.bf16.msra.mxu0 %v1879_v15  ;;  %1870 = vmatpush3.bf16.msra.mxu1 %v1879_v15 }
  0x1c   :  { %1790 = vmatprep.subr.bf16.mxu0 %v1880_v21  ;;  %1863 = vmatprep.subr.bf16.mxu1 %v1880_v21  ;;  %v1882_v47 = vpop.eup %1881 }
  0x1d   :  { %v47_v53 = vrot.slane %v1882_v47, %v46_v29  ;;  %v2104_v47 = vld [vmem:[%s3111_s0 + $0xa8] sm:$0xff]  }
  0x1f   :  { %1791 = vmatpush3.bf16.msra.mxu0 %v1880_v21  ;;  %1871 = vmatpush3.bf16.msra.mxu1 %v1880_v21  ;;  %v48_v1 = vcombine.high %v47_v53, %v47_v53  ;;  %v1663_v21 = vunpack.c.l.bf16 %v2104_v47 }
  0x21   :  { %v55_v14 = vrot.slane %v48_v1, %v46_v29  ;;  %v2117_v29 = vld [vmem:[%s3111_s0 + $0xb8] sm:$0xff]  }
  0x23   :  { %v57_v53 = vmul.f32 %v55_v14, %v29_v7  ;;  %v30_v7 = vld [vmem:[%s3113_s3] sm:$0x1] }
  0x25   :  { %v58_v22 = vmul.f32 %v57_v53, %v1940_v10  ;;  %v2129_v15 = vrot.slane %v57_v53, %v191_v32  ;;  %v2140_v10 = vld [vmem:[%s3111_s0 + $0xc0] sm:$0xff]  }
  0x27   :  { %v59_v1 = vsub.f32 %v30_v7, %v58_v22  ;;  %v194_v53 = vmul.f32 %v1579_v30, %v2129_v15  ;;  %v195_v11 = vmul.f32 %v1580_v31, %v2129_v15  ;;  %v196_v17 = vmul.f32 %v1583_v35, %v2129_v15 }
  0x28   :  { %v197_v22 = vmul.f32 %v1584_v36, %v2129_v15  ;;  %v198_v30 = vmul.f32 %v1587_v37, %v2129_v15  ;;  %v199_v24 = vmul.f32 %v1588_v38, %v2129_v15  ;;  %v200_v31 = vmul.f32 %v1591_v41, %v2129_v15 }
  0x29   :  { %v2170_v35 = vrot.slane %v59_v1, %v191_v32  ;;  %v201_v25 = vmul.f32 %v1592_v42, %v2129_v15  ;;  %v202_v26 = vmul.f32 %v1595_v43, %v2129_v15  ;;  %v203_v38 = vmul.f32 %v1596_v44, %v2129_v15  ;;  %v2192_v43 = vld [vmem:[%s3111_s0 + $0xd0] sm:$0xff]  }
  0x2a   :  { %v1683_v14 = vunpack.c.l.bf16 %v2192_v43  ;;  %v207_v33 = vmul.f32 %v1604_v51, %v2129_v15  ;;  %v211_v34 = vmul.f32 %v1612_v59, %v2129_v15  ;;  %v217_v46 = vmul.f32 %v1624_v4, %v2129_v15  ;;  %v2292_v4 = vld [vmem:[%s3111_s0 + $0xf8] sm:$0xff]  }
  0x2b   :  { %v264_v41 = vadd.f32 %v2170_v35, %v194_v53  ;;  %v265_v27 = vadd.f32 %v2170_v35, %v195_v11  ;;  %v266_v42 = vadd.f32 %v2170_v35, %v196_v17  ;;  %v267_v1 = vadd.f32 %v2170_v35, %v197_v22  ;;  %v2201_v17 = vld [vmem:[%s3111_s0 + $0xd8] sm:$0xff]  }
  0x2c   :  { %v268_v28 = vadd.f32 %v2170_v35, %v198_v30  ;;  %v269_v44 = vadd.f32 %v2170_v35, %v199_v24  ;;  %v270_v7 = vadd.f32 %v2170_v35, %v200_v31  ;;  %v271_v32 = vadd.f32 %v2170_v35, %v201_v25  ;;  %v2208_v24 = vld [vmem:[%s3111_s0 + $0xe0] sm:$0xff]  }
  0x2d   :  { %v328_v53 = vmax.f32 %v264_v41, 0.0  ;;  %v329_v23 = vmax.f32 %v265_v27, 0.0  ;;  %v330_v11 = vmax.f32 %v266_v42, 0.0  ;;  %v331_v37 = vmax.f32 %v267_v1, 0.0 }
  0x2e   :  { %v332_v22 = vmax.f32 %v268_v28, 0.0  ;;  %v333_v36 = vmax.f32 %v269_v44, 0.0  ;;  %v272_v41 = vadd.f32 %v2170_v35, %v202_v26  ;;  %v273_v27 = vadd.f32 %v2170_v35, %v203_v38 }
  0x2f   :  { %v392_v31 = vpack.c.bf16 %v329_v23, %v328_v53  ;;  %v393_v25 = vpack.c.bf16 %v331_v37, %v330_v11  ;;  %v334_v1 = vmax.f32 %v270_v7, 0.0  ;;  %v335_v12 = vmax.f32 %v271_v32, 0.0 }
  0x30   :  { %v394_v42 = vpack.c.bf16 %v333_v36, %v332_v22  ;;  %v1687_v28 = vunpack.c.l.bf16 %v2201_v17  ;;  %v204_v44 = vmul.f32 %v1599_v48, %v2129_v15  ;;  %v205_v30 = vmul.f32 %v1600_v49, %v2129_v15  ;;  %v2224_v36 = vld [vmem:[%s3111_s0 + $0xe8] sm:$0xff]  }
  0x31   :  { %1792 = vmatprep.mubr.bf16.mxu0 %v392_v31  ;;  %v1688_v37 = vunpack.c.h.bf16 %v2201_v17  ;;  %v1691_v26 = vunpack.c.l.bf16 %v2208_v24  ;;  %v336_v38 = vmax.f32 %v272_v41, 0.0  ;;  %v337_v23 = vmax.f32 %v273_v27, 0.0 }
  0x32   :  { %1793 = vmatmul.mubr.bf16.vlgmr.msra.gmra.mrb[0].mxu0 %v393_v25  ;;  %v206_v48 = vmul.f32 %v1603_v50, %v2129_v15  ;;  %v208_v49 = vmul.f32 %v1607_v54, %v2129_v15  ;;  %v209_v32 = vmul.f32 %v1608_v55, %v2129_v15  ;;  %v210_v7 = vmul.f32 %v1611_v56, %v2129_v15 }
  0x33   :  { %1796 = vmatprep.mubr.bf16.mxu0 %v394_v42  ;;  %v1692_v53 = vunpack.c.h.bf16 %v2208_v24  ;;  %v395_v50 = vpack.c.bf16 %v335_v12, %v334_v1  ;;  %v1695_v51 = vunpack.c.l.bf16 %v2224_v36  ;;  %v1696_v11 = vunpack.c.h.bf16 %v2224_v36 }
  0x34   :  { %v274_v54 = vadd.f32 %v2170_v35, %v204_v44  ;;  %v275_v39 = vadd.f32 %v2170_v35, %v205_v30  ;;  %v212_v55 = vmul.f32 %v1615_v60, %v2129_v15  ;;  %v213_v56 = vmul.f32 %v1616_v61, %v2129_v15 }
  0x35   :  { %v396_v59 = vpack.c.bf16 %v337_v23, %v336_v38  ;;  %v276_v12 = vadd.f32 %v2170_v35, %v206_v48  ;;  %v277_v22 = vadd.f32 %v2170_v35, %v207_v33  ;;  %v214_v30 = vmul.f32 %v1619_v62, %v2129_v15 }
  0x36   :  { %v278_v60 = vadd.f32 %v2170_v35, %v208_v49  ;;  %v279_v31 = vadd.f32 %v2170_v35, %v209_v32  ;;  %v280_v45 = vadd.f32 %v2170_v35, %v210_v7  ;;  %v215_v61 = vmul.f32 %v1620_v2, %v2129_v15 }
  0x37   :  { %v281_v25 = vadd.f32 %v2170_v35, %v211_v34  ;;  %v282_v41 = vadd.f32 %v2170_v35, %v212_v55  ;;  %v283_v27 = vadd.f32 %v2170_v35, %v213_v56  ;;  %v1699_v42 = vunpack.c.l.bf16 %v2258_v40 }
  0x38   :  { %v284_v62 = vadd.f32 %v2170_v35, %v214_v30  ;;  %v285_v1 = vadd.f32 %v2170_v35, %v215_v61  ;;  %v216_v44 = vmul.f32 %v1623_v3, %v2129_v15  ;;  %v338_v2 = vmax.f32 %v274_v54, 0.0 }
  0x39   :  { %v339_v38 = vmax.f32 %v275_v39, 0.0  ;;  %v340_v23 = vmax.f32 %v276_v12, 0.0  ;;  %v218_v48 = vmul.f32 %v1627_v8, %v2129_v15  ;;  %v341_v33 = vmax.f32 %v277_v22, 0.0 }
  0x3a   :  { %1797 = vmatmul.mubr.bf16.gmra.mrb[4].mxu0 %v395_v50  ;;  %v342_v49 = vmax.f32 %v278_v60, 0.0  ;;  %v343_v32 = vmax.f32 %v279_v31, 0.0  ;;  %v344_v7 = vmax.f32 %v280_v45, 0.0  ;;  %v345_v34 = vmax.f32 %v281_v25, 0.0 }
  0x3b   :  { %1800 = vmatprep.mubr.bf16.mxu0 %v396_v59  ;;  %v346_v55 = vmax.f32 %v282_v41, 0.0  ;;  %v347_v3 = vmax.f32 %v283_v27, 0.0  ;;  %v219_v52 = vmul.f32 %v1628_v9, %v2129_v15  ;;  %v348_v50 = vmax.f32 %v284_v62, 0.0 }
  0x3c   :  { %v349_v54 = vmax.f32 %v285_v1, 0.0  ;;  %v2295_v8 = vadd.f32 %v2170_v35, %v216_v44  ;;  %v2298_v39 = vadd.f32 %v2170_v35, %v217_v46  ;;  %v397_v56 = vpack.c.bf16 %v339_v38, %v338_v2 }
  0x3d   :  { %v2301_v59 = vadd.f32 %v2170_v35, %v218_v48  ;;  %v220_v9 = vmul.f32 %v3116_v57, %v2129_v15  ;;  %v1700_v12 = vunpack.c.h.bf16 %v2258_v40  ;;  %v398_v22 = vpack.c.bf16 %v341_v33, %v340_v23 }
  0x3e   :  { %v3117_v30 = vunpack.c.h.bf16 %v2043_v58  ;;  %v1703_v31 = vunpack.c.l.bf16 %v2292_v4  ;;  %v1704_v45 = vunpack.c.h.bf16 %v2292_v4  ;;  %v399_v61 = vpack.c.bf16 %v343_v32, %v342_v49 }
  0x3f   :  { %v400_v25 = vpack.c.bf16 %v345_v34, %v344_v7  ;;  %v2312_v41 = vpack.c.bf16 %v347_v3, %v346_v55  ;;  %v2315_v27 = vadd.f32 %v2170_v35, %v219_v52  ;;  %v2317_v62 = vpack.c.bf16 %v349_v54, %v348_v50 }
  0x40   :  { %v221_v60 = vmul.f32 %v3117_v30, %v2129_v15  ;;  %v350_v1 = vmax.f32 %v2295_v8, 0.0  ;;  %v351_v44 = vmax.f32 %v2298_v39, 0.0  ;;  %v3118_v58 = vunpack.c.l.bf16 %v2065_v5 }
  0x41   :  { %v352_v2 = vmax.f32 %v2301_v59, 0.0  ;;  %v2326_v38 = vadd.f32 %v2170_v35, %v220_v9  ;;  %v3119_v23 = vunpack.c.l.bf16 %v2052_v63  ;;  %v3120_v33 = vunpack.c.h.bf16 %v2065_v5 }
  0x42   :  { %v226_v46 = vmul.f32 %v3118_v58, %v2129_v15  ;;  %1801 = vmatmul.mubr.bf16.gmra.mrb[8].mxu0 %v397_v56  ;;  %v2335_v32 = vadd.f32 %v2170_v35, %v221_v60  ;;  %v3121_v34 = vunpack.c.l.bf16 %v2070_v6  ;;  %v3122_v3 = vunpack.c.h.bf16 %v2070_v6 }
  0x43   :  { %v222_v48 = vmul.f32 %v3119_v23, %v2129_v15  ;;  %v227_v49 = vmul.f32 %v3120_v33, %v2129_v15  ;;  %1804 = vmatprep.mubr.bf16.mxu0 %v398_v22  ;;  %v353_v50 = vmax.f32 %v2315_v27, 0.0  ;;  %v3123_v5 = vunpack.c.h.bf16 %v2052_v63 }
  0x44   :  { %v296_v7 = vadd.f32 %v2170_v35, %v226_v46  ;;  %v228_v55 = vmul.f32 %v3121_v34, %v2129_v15  ;;  %v229_v52 = vmul.f32 %v3122_v3, %v2129_v15  ;;  %v3124_v57 = vunpack.c.l.bf16 %v2082_v13 }
  0x45   :  { %v223_v54 = vmul.f32 %v3123_v5, %v2129_v15  ;;  %v297_v56 = vadd.f32 %v2170_v35, %v227_v49  ;;  %v3125_v6 = vunpack.c.h.bf16 %v2082_v13  ;;  %v2358_v27 = vadd.f32 %v2170_v35, %v222_v48 }
  0x46   :  { %v230_v9 = vmul.f32 %v3124_v57, %v2129_v15  ;;  %v360_v22 = vmax.f32 %v296_v7, 0.0  ;;  %v298_v30 = vadd.f32 %v2170_v35, %v228_v55  ;;  %v299_v60 = vadd.f32 %v2170_v35, %v229_v52 }
  0x47   :  { %v231_v58 = vmul.f32 %v3125_v6, %v2129_v15  ;;  %v361_v63 = vmax.f32 %v297_v56, 0.0  ;;  %v3126_v23 = vunpack.c.l.bf16 %v2090_v18  ;;  %v3127_v55 = vunpack.c.h.bf16 %v2090_v18 }
  0x48   :  { %v300_v46 = vadd.f32 %v2170_v35, %v230_v9  ;;  %v362_v49 = vmax.f32 %v298_v30, 0.0  ;;  %v363_v7 = vmax.f32 %v299_v60, 0.0  ;;  %v3128_v5 = vunpack.c.l.bf16 %v2095_v19 }
  0x49   :  { %v232_v33 = vmul.f32 %v3126_v23, %v2129_v15  ;;  %v301_v34 = vadd.f32 %v2170_v35, %v231_v58  ;;  %v233_v3 = vmul.f32 %v3127_v55, %v2129_v15  ;;  %v408_v13 = vpack.c.bf16 %v361_v63, %v360_v22 }
  0x4a   :  { %v364_v52 = vmax.f32 %v300_v46, 0.0  ;;  %v234_v56 = vmul.f32 %v3128_v5, %v2129_v15  ;;  %v409_v57 = vpack.c.bf16 %v363_v7, %v362_v49  ;;  %v3129_v30 = vunpack.c.h.bf16 %v2095_v19  ;;  %1805 = vmatmul.mubr.bf16.gmra.mrb[12].mxu0 %v399_v61 }
  0x4b   :  { %v302_v48 = vadd.f32 %v2170_v35, %v232_v33  ;;  %v365_v9 = vmax.f32 %v301_v34, 0.0  ;;  %v303_v6 = vadd.f32 %v2170_v35, %v233_v3  ;;  %1824 = vmatprep.mubr.bf16.mxu1 %v408_v13  ;;  %v236_v58 = vmul.f32 %v1663_v21, %v2129_v15  ;;  %1808 = vmatprep.mubr.bf16.mxu0 %v400_v25 }
  0x4c   :  { %v235_v60 = vmul.f32 %v3129_v30, %v2129_v15  ;;  %v304_v22 = vadd.f32 %v2170_v35, %v234_v56  ;;  %v3130_v63 = vunpack.c.h.bf16 %v2104_v47  ;;  %1825 = vmatmul.mubr.bf16.vlgmr.msra.gmra.mrb[0].mxu1 %v409_v57  ;;  %v3131_v61 = vunpack.c.l.bf16 %v2112_v20 }
  0x4d   :  { %v366_v18 = vmax.f32 %v302_v48, 0.0  ;;  %v410_v23 = vpack.c.bf16 %v365_v9, %v364_v52  ;;  %v367_v33 = vmax.f32 %v303_v6, 0.0  ;;  %v306_v34 = vadd.f32 %v2170_v35, %v236_v58 }
  0x4e   :  { %v237_v46 = vmul.f32 %v3130_v63, %v2129_v15  ;;  %v305_v19 = vadd.f32 %v2170_v35, %v235_v60  ;;  %v238_v49 = vmul.f32 %v3131_v61, %v2129_v15  ;;  %v368_v7 = vmax.f32 %v304_v22, 0.0 }
  0x4f   :  { %v3132_v21 = vunpack.c.h.bf16 %v2112_v20  ;;  %v3133_v25 = vunpack.c.l.bf16 %v2057_v0  ;;  %1828 = vmatprep.mubr.bf16.mxu1 %v410_v23  ;;  %v3134_v48 = vunpack.c.l.bf16 %v2117_v29  ;;  %v354_v56 = vmax.f32 %v2326_v38, 0.0 }
  0x50   :  { %v307_v55 = vadd.f32 %v2170_v35, %v237_v46  ;;  %v369_v13 = vmax.f32 %v305_v19, 0.0  ;;  %v308_v52 = vadd.f32 %v2170_v35, %v238_v49  ;;  %v355_v57 = vmax.f32 %v2335_v32, 0.0 }
  0x51   :  { %v239_v47 = vmul.f32 %v3132_v21, %v2129_v15  ;;  %v224_v3 = vmul.f32 %v3133_v25, %v2129_v15  ;;  %v240_v5 = vmul.f32 %v3134_v48, %v2129_v15  ;;  %v3135_v20 = vunpack.c.h.bf16 %v2117_v29 }
  0x52   :  { %v2406_v30 = vadd.f32 %v2170_v35, %v223_v54  ;;  %v3136_v60 = vunpack.c.h.bf16 %v2057_v0  ;;  %v411_v58 = vpack.c.bf16 %v367_v33, %v366_v18  ;;  %v3137_v63 = vunpack.c.l.bf16 %v2140_v10  ;;  %1809 = vmatmul.mubr.bf16.gmra.mrb[16].mxu0 %v2312_v41 }
  0x53   :  { %v309_v9 = vadd.f32 %v2170_v35, %v239_v47  ;;  %v241_v6 = vmul.f32 %v3135_v20, %v2129_v15  ;;  %v412_v46 = vpack.c.bf16 %v369_v13, %v368_v7  ;;  %v370_v32 = vmax.f32 %v306_v34, 0.0  ;;  %1812 = vmatprep.mubr.bf16.mxu0 %v2317_v62 }
  0x54   :  { %v225_v22 = vmul.f32 %v3136_v60, %v2129_v15  ;;  %v242_v38 = vmul.f32 %v3137_v63, %v2129_v15  ;;  %v371_v23 = vmax.f32 %v307_v55, 0.0  ;;  %v2415_v19 = vadd.f32 %v2170_v35, %v240_v5  ;;  %1829 = vmatmul.mubr.bf16.gmra.mrb[4].mxu1 %v411_v58 }
  0x55   :  { %v403_v29 = vpack.c.bf16 %v351_v44, %v350_v1  ;;  %v372_v54 = vmax.f32 %v308_v52, 0.0  ;;  %v373_v61 = vmax.f32 %v309_v9, 0.0  ;;  %v3138_v0 = vunpack.c.h.bf16 %v2140_v10  ;;  %1832 = vmatprep.mubr.bf16.mxu1 %v412_v46 }
  0x56   :  { %v404_v33 = vpack.c.bf16 %v353_v50, %v352_v2  ;;  %v356_v49 = vmax.f32 %v2358_v27, 0.0  ;;  %v2429_v7 = vadd.f32 %v2170_v35, %v224_v3  ;;  %v311_v8 = vadd.f32 %v2170_v35, %v241_v6 }
  0x57   :  { %v243_v18 = vmul.f32 %v3138_v0, %v2129_v15  ;;  %v405_v39 = vpack.c.bf16 %v355_v57, %v354_v56  ;;  %v357_v1 = vmax.f32 %v2406_v30, 0.0  ;;  %v2435_v10 = vadd.f32 %v2170_v35, %v225_v22 }
  0x58   :  { %v312_v41 = vadd.f32 %v2170_v35, %v242_v38  ;;  %v413_v59 = vpack.c.bf16 %v371_v23, %v370_v32  ;;  %v374_v44 = vmax.f32 %v2415_v19, 0.0  ;;  %v3139_v2 = vunpack.c.l.bf16 %v2154_v16 }
  0x59   :  { %v248_v62 = vmul.f32 %v1687_v28, %v2129_v15  ;;  %v414_v27 = vpack.c.bf16 %v373_v61, %v372_v54  ;;  %v313_v34 = vadd.f32 %v2170_v35, %v243_v18  ;;  %v3140_v55 = vunpack.c.h.bf16 %v2154_v16 }
  0x5a   :  { %v244_v50 = vmul.f32 %v3139_v2, %v2129_v15  ;;  %v249_v47 = vmul.f32 %v1688_v37, %v2129_v15  ;;  %v375_v25 = vmax.f32 %v311_v8, 0.0  ;;  %v246_v3 = vmul.f32 %v1683_v14, %v2129_v15  ;;  %1813 = vmatmul.mubr.bf16.gmra.mrb[20].mxu0 %v403_v29 }
  0x5b   :  { %v245_v21 = vmul.f32 %v3140_v55, %v2129_v15  ;;  %v318_v13 = vadd.f32 %v2170_v35, %v248_v62  ;;  %v250_v28 = vmul.f32 %v1691_v26, %v2129_v15  ;;  %v376_v52 = vmax.f32 %v312_v41, 0.0  ;;  %1816 = vmatprep.mubr.bf16.mxu0 %v404_v33 }
  0x5c   :  { %v3141_v16 = vunpack.c.h.bf16 %v2192_v43  ;;  %v319_v5 = vadd.f32 %v2170_v35, %v249_v47  ;;  %v251_v17 = vmul.f32 %v1692_v53, %v2129_v15  ;;  %v252_v56 = vmul.f32 %v1695_v51, %v2129_v15  ;;  %1833 = vmatmul.mubr.bf16.gmra.mrb[8].mxu1 %v413_v59 }
  0x5d   :  { %v382_v37 = vmax.f32 %v318_v13, 0.0  ;;  %v320_v14 = vadd.f32 %v2170_v35, %v250_v28  ;;  %v253_v26 = vmul.f32 %v1696_v11, %v2129_v15  ;;  %v377_v57 = vmax.f32 %v313_v34, 0.0  ;;  %1836 = vmatprep.mubr.bf16.mxu1 %v414_v27 }
  0x5e   :  { %v247_v48 = vmul.f32 %v3141_v16, %v2129_v15  ;;  %v383_v43 = vmax.f32 %v319_v5, 0.0  ;;  %v321_v9 = vadd.f32 %v2170_v35, %v251_v17  ;;  %v254_v24 = vmul.f32 %v1699_v42, %v2129_v15 }
  0x5f   :  { %v384_v53 = vmax.f32 %v320_v14, 0.0  ;;  %v322_v20 = vadd.f32 %v2170_v35, %v252_v56  ;;  %v323_v6 = vadd.f32 %v2170_v35, %v253_v26  ;;  %v255_v51 = vmul.f32 %v1700_v12, %v2129_v15 }
  0x60   :  { %v419_v36 = vpack.c.bf16 %v383_v43, %v382_v37  ;;  %v385_v11 = vmax.f32 %v321_v9, 0.0  ;;  %v324_v30 = vadd.f32 %v2170_v35, %v254_v24  ;;  %v256_v42 = vmul.f32 %v1703_v31, %v2129_v15 }
  0x61   :  { %v386_v60 = vmax.f32 %v322_v20, 0.0  ;;  %v387_v22 = vmax.f32 %v323_v6, 0.0  ;;  %v325_v58 = vadd.f32 %v2170_v35, %v255_v51  ;;  %v257_v40 = vmul.f32 %v1704_v45, %v2129_v15 }
  0x62   :  { %v406_v12 = vpack.c.bf16 %v357_v1, %v356_v49  ;;  %v420_v63 = vpack.c.bf16 %v385_v11, %v384_v53  ;;  %v388_v38 = vmax.f32 %v324_v30, 0.0  ;;  %v326_v46 = vadd.f32 %v2170_v35, %v256_v42  ;;  %1817 = vmatmul.mubr.bf16.gmra.mrb[24].mxu0 %v405_v39 }
  0x63   :  { %v314_v32 = vadd.f32 %v2170_v35, %v244_v50  ;;  %v421_v23 = vpack.c.bf16 %v387_v22, %v386_v60  ;;  %v389_v19 = vmax.f32 %v325_v58, 0.0  ;;  %v327_v31 = vadd.f32 %v2170_v35, %v257_v40 }
  0x64   :  { %v415_v29 = vpack.c.bf16 %v375_v25, %v374_v44  ;;  %v315_v54 = vadd.f32 %v2170_v35, %v245_v21  ;;  %v316_v61 = vadd.f32 %v2170_v35, %v246_v3  ;;  %v390_v0 = vmax.f32 %v326_v46, 0.0  ;;  %1820 = vmatprep.mubr.bf16.mxu0 %v406_v12 }
  0x65   :  { %v416_v18 = vpack.c.bf16 %v377_v57, %v376_v52  ;;  %v317_v15 = vadd.f32 %v2170_v35, %v247_v48  ;;  %v422_v4 = vpack.c.bf16 %v389_v19, %v388_v38  ;;  %v391_v45 = vmax.f32 %v327_v31, 0.0 }
  0x66   :  { %v358_v33 = vmax.f32 %v2429_v7, 0.0  ;;  %v359_v49 = vmax.f32 %v2435_v10, 0.0  ;;  %1837 = vmatmul.mubr.bf16.gmra.mrb[12].mxu1 %v415_v29  ;;  %v378_v1 = vmax.f32 %v314_v32, 0.0  ;;  %v379_v41 = vmax.f32 %v315_v54, 0.0 }
  0x67   :  { %v423_v8 = vpack.c.bf16 %v391_v45, %v390_v0  ;;  %1840 = vmatprep.mubr.bf16.mxu1 %v416_v18  ;;  %v380_v59 = vmax.f32 %v316_v61, 0.0  ;;  %v381_v44 = vmax.f32 %v317_v15, 0.0 }
  0x68   :  { %v407_v2 = vpack.c.bf16 %v359_v49, %v358_v33  ;;  %v417_v50 = vpack.c.bf16 %v379_v41, %v378_v1 }
  0x69   :  { %v418_v62 = vpack.c.bf16 %v381_v44, %v380_v59 }
  0x6a   :  { %1821 = vmatmul.mubr.bf16.gmra.mrb[28].mxu0 %v407_v2 }
  0x6e   :  { %1841 = vmatmul.mubr.bf16.gmra.mrb[16].mxu1 %v417_v50 }
  0x6f   :  { %1844 = vmatprep.mubr.bf16.mxu1 %v418_v62 }
  0x76   :  { %1845 = vmatmul.mubr.bf16.gmra.mrb[20].mxu1 %v419_v36 }
  0x77   :  { %1848 = vmatprep.mubr.bf16.mxu1 %v420_v63 }
  0x7e   :  { %1849 = vmatmul.mubr.bf16.gmra.mrb[24].mxu1 %v421_v23 }
  0x7f   :  { %1852 = vmatprep.mubr.bf16.mxu1 %v422_v4 }
  0x86   :  { %1853 = vmatmul.mubr.bf16.gmra.mrb[28].mxu1 %v423_v8 }
 0x105   :  { %v1794_v35 = vpop.f32.mrb[0].mxu0 }
 0x106   :  { %v1515_v7 = vpack.c.bf16 %v1794_v35, %v1794_v35  ;;  %v522_v39 = vpop.f32.mrb[1].mxu0  ;;  %v1234_v55 = vmul.f32 %v1794_v35, %v1794_v35  ;;  %v1102_v48 = vsel %vm1098_vm2, %v1794_v35, 0.0 }
 0x107   :  { %v1513_v10 = vpack.c.bf16 %v522_v39, %v522_v39  ;;  %v1232_v27 = vmul.f32 %v522_v39, %v522_v39  ;;  %v1795_v34 = vpop.f32.mrb[2].mxu0  ;;  %v1099_v25 = vsel %vm1098_vm2, %v522_v39, 0.0 }
 0x108   :  { %1036 = vst.msk [vmem:[%s3114_s5 + $0x8] sm:$0xf] %vm1033_vm1, %v1515_v7  ;;  %v1516_v21 = vpack.c.bf16 %v1795_v34, %v1795_v34  ;;  %v525_v47 = vpop.f32.mrb[3].mxu0  ;;  %v1235_v52 = vmul.f32 %v1795_v34, %v1795_v34  ;;  %v1299_v56 = vsel %vm1098_vm2, %v1234_v55, 0.0  ;;  %v1104_v57 = vsel %vm1098_vm2, %v1795_v34, 0.0 }
 0x109   :  { %1034 = vst.msk [vmem:[%s3114_s5] sm:$0xf] %vm1033_vm1, %v1513_v10  ;;  %v1514_v3 = vpack.c.bf16 %v525_v47, %v525_v47  ;;  %v1100_v13 = vsel %vm1098_vm2, %v525_v47, 0.0  ;;  %v1233_v28 = vmul.f32 %v525_v47, %v525_v47  ;;  %v1296_v5 = vsel %vm1098_vm2, %v1232_v27, 0.0 }
 0x10a   :  { %1037 = vst.msk [vmem:[%s3114_s5 + $0xc] sm:$0xf] %vm1033_vm1, %v1516_v21  ;;  %v1101_v16 = vadd.f32 %v1100_v13, %v1099_v25  ;;  %v1301_v43 = vsel %vm1098_vm2, %v1235_v52, 0.0 }
 0x10b   :  { %1035 = vst.msk [vmem:[%s3114_s5 + $0x4] sm:$0xf] %vm1033_vm1, %v1514_v3  ;;  %v1297_v17 = vsel %vm1098_vm2, %v1233_v28, 0.0 }
 0x10c   :  { %v1103_v37 = vadd.f32 %v1102_v48, %v1101_v16  ;;  %v1298_v14 = vadd.f32 %v1297_v17, %v1296_v5 }
 0x10d   :  { %v1798_v26 = vpop.f32.mrb[4].mxu0 }
 0x10e   :  { %v1300_v9 = vadd.f32 %v1299_v56, %v1298_v14  ;;  %v1519_v24 = vpack.c.bf16 %v1798_v26, %v1798_v26  ;;  %v538_v53 = vpop.f32.mrb[5].mxu0  ;;  %v1105_v6 = vadd.f32 %v1104_v57, %v1103_v37  ;;  %v1238_v12 = vmul.f32 %v1798_v26, %v1798_v26 }
 0x10f   :  { %v1517_v20 = vpack.c.bf16 %v538_v53, %v538_v53  ;;  %v1106_v51 = vsel %vm1098_vm2, %v538_v53, 0.0  ;;  %v1236_v36 = vmul.f32 %v538_v53, %v538_v53  ;;  %v1799_v11 = vpop.f32.mrb[6].mxu0  ;;  %v1110_v23 = vsel %vm1098_vm2, %v1798_v26, 0.0 }
 0x110   :  { %1040 = vst.msk [vmem:[%s3114_s5 + $0x18] sm:$0xf] %vm1033_vm1, %v1519_v24  ;;  %v1302_v30 = vadd.f32 %v1301_v43, %v1300_v9  ;;  %v1520_v42 = vpack.c.bf16 %v1799_v11, %v1799_v11  ;;  %v541_v60 = vpop.f32.mrb[7].mxu0  ;;  %v1107_v22 = vadd.f32 %v1106_v51, %v1105_v6  ;;  %v1239_v19 = vmul.f32 %v1799_v11, %v1799_v11 }
 0x111   :  { %1038 = vst.msk [vmem:[%s3114_s5 + $0x10] sm:$0xf] %vm1033_vm1, %v1517_v20  ;;  %v1303_v58 = vsel %vm1098_vm2, %v1236_v36, 0.0  ;;  %v1518_v40 = vpack.c.bf16 %v541_v60, %v541_v60  ;;  %v1108_v38 = vsel %vm1098_vm2, %v541_v60, 0.0  ;;  %v1237_v46 = vmul.f32 %v541_v60, %v541_v60 }
 0x112   :  { %v1304_v63 = vadd.f32 %v1303_v58, %v1302_v30  ;;  %1041 = vst.msk [vmem:[%s3114_s5 + $0x1c] sm:$0xf] %vm1033_vm1, %v1520_v42  ;;  %v1109_v32 = vadd.f32 %v1108_v38, %v1107_v22  ;;  %v1307_v0 = vsel %vm1098_vm2, %v1238_v12, 0.0  ;;  %v1112_v18 = vsel %vm1098_vm2, %v1799_v11, 0.0 }
 0x113   :  { %1039 = vst.msk [vmem:[%s3114_s5 + $0x14] sm:$0xf] %vm1033_vm1, %v1518_v40  ;;  %v1305_v31 = vsel %vm1098_vm2, %v1237_v46, 0.0  ;;  %v1309_v41 = vsel %vm1098_vm2, %v1239_v19, 0.0 }
 0x114   :  { %v1111_v29 = vadd.f32 %v1110_v23, %v1109_v32  ;;  %v1306_v54 = vadd.f32 %v1305_v31, %v1304_v63 }
 0x115   :  { %v1802_v61 = vpop.f32.mrb[8].mxu0 }
 0x116   :  { %v1523_v15 = vpack.c.bf16 %v1802_v61, %v1802_v61  ;;  %v554_v4 = vpop.f32.mrb[9].mxu0  ;;  %v1308_v45 = vadd.f32 %v1307_v0, %v1306_v54  ;;  %v1113_v49 = vadd.f32 %v1112_v18, %v1111_v29  ;;  %v1242_v7 = vmul.f32 %v1802_v61, %v1802_v61 }
 0x117   :  { %v1521_v33 = vpack.c.bf16 %v554_v4, %v554_v4  ;;  %v1114_v8 = vsel %vm1098_vm2, %v554_v4, 0.0  ;;  %v1803_v1 = vpop.f32.mrb[10].mxu0  ;;  %v1240_v59 = vmul.f32 %v554_v4, %v554_v4  ;;  %v1118_v21 = vsel %vm1098_vm2, %v1802_v61, 0.0 }
 0x118   :  { %1044 = vst.msk [vmem:[%s3114_s5 + $0x28] sm:$0xf] %vm1033_vm1, %v1523_v15  ;;  %v1524_v44 = vpack.c.bf16 %v1803_v1, %v1803_v1  ;;  %v557_v2 = vpop.f32.mrb[11].mxu0  ;;  %v1115_v50 = vadd.f32 %v1114_v8, %v1113_v49  ;;  %v1310_v62 = vadd.f32 %v1309_v41, %v1308_v45  ;;  %v1243_v47 = vmul.f32 %v1803_v1, %v1803_v1 }
 0x119   :  { %1042 = vst.msk [vmem:[%s3114_s5 + $0x20] sm:$0xf] %vm1033_vm1, %v1521_v33  ;;  %v1522_v35 = vpack.c.bf16 %v557_v2, %v557_v2  ;;  %v1311_v39 = vsel %vm1098_vm2, %v1240_v59, 0.0  ;;  %v1116_v10 = vsel %vm1098_vm2, %v557_v2, 0.0  ;;  %v1241_v27 = vmul.f32 %v557_v2, %v557_v2 }
 0x11a   :  { %1045 = vst.msk [vmem:[%s3114_s5 + $0x2c] sm:$0xf] %vm1033_vm1, %v1524_v44  ;;  %v1312_v34 = vadd.f32 %v1311_v39, %v1310_v62  ;;  %v1117_v55 = vadd.f32 %v1116_v10, %v1115_v50  ;;  %v1315_v52 = vsel %vm1098_vm2, %v1242_v7, 0.0  ;;  %v1120_v16 = vsel %vm1098_vm2, %v1803_v1, 0.0 }
 0x11b   :  { %1043 = vst.msk [vmem:[%s3114_s5 + $0x24] sm:$0xf] %vm1033_vm1, %v1522_v35  ;;  %v1313_v25 = vsel %vm1098_vm2, %v1241_v27, 0.0  ;;  %v1317_v9 = vsel %vm1098_vm2, %v1243_v47, 0.0 }
 0x11c   :  { %v1119_v3 = vadd.f32 %v1118_v21, %v1117_v55  ;;  %v1314_v13 = vadd.f32 %v1313_v25, %v1312_v34 }
 0x11d   :  { %v1806_v28 = vpop.f32.mrb[12].mxu0 }
 0x11e   :  { %v1527_v48 = vpack.c.bf16 %v1806_v28, %v1806_v28  ;;  %v570_v5 = vpop.f32.mrb[13].mxu0  ;;  %v1316_v37 = vadd.f32 %v1315_v52, %v1314_v13  ;;  %v1121_v56 = vadd.f32 %v1120_v16, %v1119_v3  ;;  %v1246_v51 = vmul.f32 %v1806_v28, %v1806_v28 }
 0x11f   :  { %v2569_v17 = vpop.f32.mrb[0].mxu1  ;;  %v1525_v14 = vpack.c.bf16 %v570_v5, %v570_v5  ;;  %v1122_v26 = vsel %vm1098_vm2, %v570_v5, 0.0  ;;  %v1807_v57 = vpop.f32.mrb[14].mxu0  ;;  %v1244_v24 = vmul.f32 %v570_v5, %v570_v5  ;;  %v1126_v38 = vsel %vm1098_vm2, %v1806_v28, 0.0 }
 0x120   :  { %v2572_v43 = vpop.f32.mrb[1].mxu1  ;;  %1048 = vst.msk [vmem:[%s3114_s5 + $0x38] sm:$0xf] %vm1033_vm1, %v1527_v48  ;;  %v1528_v53 = vpack.c.bf16 %v1807_v57, %v1807_v57  ;;  %v573_v20 = vpop.f32.mrb[15].mxu0  ;;  %v1123_v36 = vadd.f32 %v1122_v26, %v1121_v56  ;;  %v1318_v11 = vadd.f32 %v1317_v9, %v1316_v37  ;;  %v1547_v40 = vpack.c.bf16 %v2569_v17, %v2569_v17 }
 0x121   :  { %v2579_v6 = vpop.f32.mrb[2].mxu1  ;;  %1046 = vst.msk [vmem:[%s3114_s5 + $0x30] sm:$0xf] %vm1033_vm1, %v1525_v14  ;;  %v1526_v30 = vpack.c.bf16 %v573_v20, %v573_v20  ;;  %v1319_v60 = vsel %vm1098_vm2, %v1244_v24, 0.0  ;;  %v1124_v22 = vsel %vm1098_vm2, %v573_v20, 0.0  ;;  %v1245_v58 = vmul.f32 %v573_v20, %v573_v20 }
 0x122   :  { %v2585_v42 = vpop.f32.mrb[3].mxu1  ;;  %1049 = vst.msk [vmem:[%s3114_s5 + $0x3c] sm:$0xf] %vm1033_vm1, %v1528_v53  ;;  %v1320_v12 = vadd.f32 %v1319_v60, %v1318_v11  ;;  %v1125_v63 = vadd.f32 %v1124_v22, %v1123_v36  ;;  %v1247_v46 = vmul.f32 %v1807_v57, %v1807_v57  ;;  %1068 = vst.msk [vmem:[%s3114_s5 + $0x88] sm:$0xf] %vm1033_vm1, %v1547_v40  ;;  %v1323_v61 = vsel %vm1098_vm2, %v1246_v51, 0.0 }
 0x123   :  { %1047 = vst.msk [vmem:[%s3114_s5 + $0x34] sm:$0xf] %vm1033_vm1, %v1526_v30  ;;  %v1321_v32 = vsel %vm1098_vm2, %v1245_v58, 0.0  ;;  %v1545_v23 = vpack.c.bf16 %v2572_v43, %v2572_v43  ;;  %v1548_v54 = vpack.c.bf16 %v2579_v6, %v2579_v6  ;;  %v1128_v0 = vsel %vm1098_vm2, %v1807_v57, 0.0 }
 0x124   :  { %v1127_v19 = vadd.f32 %v1126_v38, %v1125_v63  ;;  %v1322_v31 = vadd.f32 %v1321_v32, %v1320_v12  ;;  %v1325_v59 = vsel %vm1098_vm2, %v1247_v46, 0.0  ;;  %v1546_v52 = vpack.c.bf16 %v2585_v42, %v2585_v42 }
 0x125   :  { %v1810_v29 = vpop.f32.mrb[16].mxu0  ;;  %1066 = vst.msk [vmem:[%s3114_s5 + $0x80] sm:$0xf] %vm1033_vm1, %v1545_v23  ;;  %1069 = vst.msk [vmem:[%s3114_s5 + $0x8c] sm:$0xf] %vm1033_vm1, %v1548_v54 }
 0x126   :  { %v1531_v18 = vpack.c.bf16 %v1810_v29, %v1810_v29  ;;  %v586_v15 = vpop.f32.mrb[17].mxu0  ;;  %v1324_v45 = vadd.f32 %v1323_v61, %v1322_v31  ;;  %v1129_v49 = vadd.f32 %v1128_v0, %v1127_v19  ;;  %v1250_v27 = vmul.f32 %v1810_v29, %v1810_v29  ;;  %1067 = vst.msk [vmem:[%s3114_s5 + $0x84] sm:$0xf] %vm1033_vm1, %v1546_v52 }
 0x127   :  { %v2615_v4 = vpop.f32.mrb[4].mxu1  ;;  %v1529_v33 = vpack.c.bf16 %v586_v15, %v586_v15  ;;  %v1130_v8 = vsel %vm1098_vm2, %v586_v15, 0.0  ;;  %v1811_v1 = vpop.f32.mrb[18].mxu0  ;;  %v1248_v44 = vmul.f32 %v586_v15, %v586_v15  ;;  %v1134_v3 = vsel %vm1098_vm2, %v1810_v29, 0.0 }
 0x128   :  { %v2622_v41 = vpop.f32.mrb[5].mxu1  ;;  %1052 = vst.msk [vmem:[%s3114_s5 + $0x48] sm:$0xf] %vm1033_vm1, %v1531_v18  ;;  %v1532_v2 = vpack.c.bf16 %v1811_v1, %v1811_v1  ;;  %v589_v50 = vpop.f32.mrb[19].mxu0  ;;  %v1131_v35 = vadd.f32 %v1130_v8, %v1129_v49  ;;  %v1326_v7 = vadd.f32 %v1325_v59, %v1324_v45  ;;  %v1251_v13 = vmul.f32 %v1811_v1, %v1811_v1 }
 0x129   :  { %v2629_v62 = vpop.f32.mrb[6].mxu1  ;;  %1050 = vst.msk [vmem:[%s3114_s5 + $0x40] sm:$0xf] %vm1033_vm1, %v1529_v33  ;;  %v1530_v39 = vpack.c.bf16 %v589_v50, %v589_v50  ;;  %v1327_v34 = vsel %vm1098_vm2, %v1248_v44, 0.0  ;;  %v1132_v55 = vsel %vm1098_vm2, %v589_v50, 0.0  ;;  %v1249_v21 = vmul.f32 %v589_v50, %v589_v50 }
 0x12a   :  { %v2635_v10 = vpop.f32.mrb[7].mxu1  ;;  %1053 = vst.msk [vmem:[%s3114_s5 + $0x4c] sm:$0xf] %vm1033_vm1, %v1532_v2  ;;  %v1328_v47 = vadd.f32 %v1327_v34, %v1326_v7  ;;  %v1133_v25 = vadd.f32 %v1132_v55, %v1131_v35  ;;  %v1551_v37 = vpack.c.bf16 %v2615_v4, %v2615_v4  ;;  %v1331_v14 = vsel %vm1098_vm2, %v1250_v27, 0.0 }
 0x12b   :  { %1051 = vst.msk [vmem:[%s3114_s5 + $0x44] sm:$0xf] %vm1033_vm1, %v1530_v39  ;;  %v1329_v28 = vsel %vm1098_vm2, %v1249_v21, 0.0  ;;  %v1136_v56 = vsel %vm1098_vm2, %v1811_v1, 0.0  ;;  %v1333_v30 = vsel %vm1098_vm2, %v1251_v13, 0.0  ;;  %v1549_v15 = vpack.c.bf16 %v2622_v41, %v2622_v41 }
 0x12c   :  { %v1135_v16 = vadd.f32 %v1134_v3, %v1133_v25  ;;  %v1330_v48 = vadd.f32 %v1329_v28, %v1328_v47  ;;  %1072 = vst.msk [vmem:[%s3114_s5 + $0x98] sm:$0xf] %vm1033_vm1, %v1551_v37  ;;  %v1552_v8 = vpack.c.bf16 %v2629_v62, %v2629_v62 }
 0x12d   :  { %v1814_v5 = vpop.f32.mrb[20].mxu0  ;;  %1070 = vst.msk [vmem:[%s3114_s5 + $0x90] sm:$0xf] %vm1033_vm1, %v1549_v15 }
 0x12e   :  { %v1535_v26 = vpack.c.bf16 %v1814_v5, %v1814_v5  ;;  %v602_v57 = vpop.f32.mrb[21].mxu0  ;;  %v1332_v24 = vadd.f32 %v1331_v14, %v1330_v48  ;;  %v1137_v20 = vadd.f32 %v1136_v56, %v1135_v16  ;;  %v1254_v32 = vmul.f32 %v1814_v5, %v1814_v5  ;;  %1073 = vst.msk [vmem:[%s3114_s5 + $0x9c] sm:$0xf] %vm1033_vm1, %v1552_v8 }
 0x12f   :  { %v2659_v9 = vpop.f32.mrb[8].mxu1  ;;  %v1533_v53 = vpack.c.bf16 %v602_v57, %v602_v57  ;;  %v1138_v51 = vsel %vm1098_vm2, %v602_v57, 0.0  ;;  %v1815_v36 = vpop.f32.mrb[22].mxu0  ;;  %v1252_v60 = vmul.f32 %v602_v57, %v602_v57  ;;  %v1142_v61 = vsel %vm1098_vm2, %v1814_v5, 0.0 }
 0x130   :  { %v2666_v11 = vpop.f32.mrb[9].mxu1  ;;  %1056 = vst.msk [vmem:[%s3114_s5 + $0x58] sm:$0xf] %vm1033_vm1, %v1535_v26  ;;  %v1536_v22 = vpack.c.bf16 %v1815_v36, %v1815_v36  ;;  %v605_v58 = vpop.f32.mrb[23].mxu0  ;;  %v1139_v12 = vadd.f32 %v1138_v51, %v1137_v20  ;;  %v1334_v63 = vadd.f32 %v1333_v30, %v1332_v24  ;;  %v1255_v0 = vmul.f32 %v1815_v36, %v1815_v36 }
 0x131   :  { %v2673_v40 = vpop.f32.mrb[10].mxu1  ;;  %1054 = vst.msk [vmem:[%s3114_s5 + $0x50] sm:$0xf] %vm1033_vm1, %v1533_v53  ;;  %v1534_v38 = vpack.c.bf16 %v605_v58, %v605_v58  ;;  %v1335_v23 = vsel %vm1098_vm2, %v1252_v60, 0.0  ;;  %v1140_v19 = vsel %vm1098_vm2, %v605_v58, 0.0  ;;  %v1253_v31 = vmul.f32 %v605_v58, %v605_v58 }
 0x132   :  { %v2679_v46 = vpop.f32.mrb[11].mxu1  ;;  %1057 = vst.msk [vmem:[%s3114_s5 + $0x5c] sm:$0xf] %vm1033_vm1, %v1536_v22  ;;  %v1336_v29 = vadd.f32 %v1335_v23, %v1334_v63  ;;  %v1141_v54 = vadd.f32 %v1140_v19, %v1139_v12  ;;  %v1339_v1 = vsel %vm1098_vm2, %v1254_v32, 0.0  ;;  %v1144_v59 = vsel %vm1098_vm2, %v1815_v36, 0.0 }
 0x133   :  { %1055 = vst.msk [vmem:[%s3114_s5 + $0x54] sm:$0xf] %vm1033_vm1, %v1534_v38  ;;  %v1337_v18 = vsel %vm1098_vm2, %v1253_v31, 0.0  ;;  %v1341_v21 = vsel %vm1098_vm2, %v1255_v0, 0.0  ;;  %v1550_v51 = vpack.c.bf16 %v2635_v10, %v2635_v10  ;;  %v1555_v22 = vpack.c.bf16 %v2659_v9, %v2659_v9 }
 0x134   :  { %v1143_v45 = vadd.f32 %v1142_v61, %v1141_v54  ;;  %v1338_v33 = vadd.f32 %v1337_v18, %v1336_v29 }
 0x135   :  { %v1818_v49 = vpop.f32.mrb[24].mxu0  ;;  %1071 = vst.msk [vmem:[%s3114_s5 + $0x94] sm:$0xf] %vm1033_vm1, %v1550_v51  ;;  %1076 = vst.msk [vmem:[%s3114_s5 + $0xa8] sm:$0xf] %vm1033_vm1, %v1555_v22  ;;  %v1265_v51 = vmul.f32 %v2585_v42, %v2585_v42 }
 0x136   :  { %v1539_v44 = vpack.c.bf16 %v1818_v49, %v1818_v49  ;;  %v618_v2 = vpop.f32.mrb[25].mxu0  ;;  %v1340_v35 = vadd.f32 %v1339_v1, %v1338_v33  ;;  %v1145_v39 = vadd.f32 %v1144_v59, %v1143_v45  ;;  %v1258_v5 = vmul.f32 %v1818_v49, %v1818_v49 }
 0x137   :  { %v1537_v7 = vpack.c.bf16 %v618_v2, %v618_v2  ;;  %v1146_v27 = vsel %vm1098_vm2, %v618_v2, 0.0  ;;  %v1819_v34 = vpop.f32.mrb[26].mxu0  ;;  %v1256_v47 = vmul.f32 %v618_v2, %v618_v2  ;;  %v1150_v24 = vsel %vm1098_vm2, %v1818_v49, 0.0 }
 0x138   :  { %1060 = vst.msk [vmem:[%s3114_s5 + $0x68] sm:$0xf] %vm1033_vm1, %v1539_v44  ;;  %v1540_v25 = vpack.c.bf16 %v1819_v34, %v1819_v34  ;;  %v621_v3 = vpop.f32.mrb[27].mxu0  ;;  %v1147_v28 = vadd.f32 %v1146_v27, %v1145_v39  ;;  %v1342_v52 = vadd.f32 %v1341_v21, %v1340_v35  ;;  %v1259_v53 = vmul.f32 %v1819_v34, %v1819_v34 }
 0x139   :  { %v2703_v50 = vpop.f32.mrb[12].mxu1  ;;  %1058 = vst.msk [vmem:[%s3114_s5 + $0x60] sm:$0xf] %vm1033_vm1, %v1537_v7  ;;  %v1538_v16 = vpack.c.bf16 %v621_v3, %v621_v3  ;;  %v1343_v37 = vsel %vm1098_vm2, %v1256_v47, 0.0  ;;  %v1148_v14 = vsel %vm1098_vm2, %v621_v3, 0.0  ;;  %v1257_v56 = vmul.f32 %v621_v3, %v621_v3 }
 0x13a   :  { %v2710_v55 = vpop.f32.mrb[13].mxu1  ;;  %1061 = vst.msk [vmem:[%s3114_s5 + $0x6c] sm:$0xf] %vm1033_vm1, %v1540_v25  ;;  %v1344_v26 = vadd.f32 %v1343_v37, %v1342_v52  ;;  %v1149_v57 = vadd.f32 %v1148_v14, %v1147_v28  ;;  %v1347_v58 = vsel %vm1098_vm2, %v1258_v5, 0.0  ;;  %v1152_v12 = vsel %vm1098_vm2, %v1819_v34, 0.0 }
 0x13b   :  { %v2717_v13 = vpop.f32.mrb[14].mxu1  ;;  %1059 = vst.msk [vmem:[%s3114_s5 + $0x64] sm:$0xf] %vm1033_vm1, %v1538_v16  ;;  %v1345_v20 = vsel %vm1098_vm2, %v1257_v56, 0.0  ;;  %v1349_v0 = vsel %vm1098_vm2, %v1259_v53, 0.0  ;;  %v1264_v34 = vmul.f32 %v2572_v43, %v2572_v43  ;;  %v1553_v3 = vpack.c.bf16 %v2666_v11, %v2666_v11 }
 0x13c   :  { %v2723_v48 = vpop.f32.mrb[15].mxu1  ;;  %v1151_v36 = vadd.f32 %v1150_v24, %v1149_v57  ;;  %v1346_v30 = vadd.f32 %v1345_v20, %v1344_v26  ;;  %v1556_v16 = vpack.c.bf16 %v2673_v40, %v2673_v40  ;;  %v1162_v14 = vsel %vm1098_vm2, %v2572_v43, 0.0 }
 0x13d   :  { %v1822_v60 = vpop.f32.mrb[28].mxu0  ;;  %1074 = vst.msk [vmem:[%s3114_s5 + $0xa0] sm:$0xf] %vm1033_vm1, %v1553_v3  ;;  %v1554_v56 = vpack.c.bf16 %v2679_v46, %v2679_v46  ;;  %v1359_v20 = vsel %vm1098_vm2, %v1264_v34, 0.0 }
 0x13e   :  { %v1543_v63 = vpack.c.bf16 %v1822_v60, %v1822_v60  ;;  %v634_v38 = vpop.f32.mrb[29].mxu0  ;;  %v1348_v23 = vadd.f32 %v1347_v58, %v1346_v30  ;;  %v1153_v31 = vadd.f32 %v1152_v12, %v1151_v36  ;;  %v1262_v44 = vmul.f32 %v1822_v60, %v1822_v60  ;;  %1077 = vst.msk [vmem:[%s3114_s5 + $0xac] sm:$0xf] %vm1033_vm1, %v1556_v16 }
 0x13f   :  { %v1541_v19 = vpack.c.bf16 %v634_v38, %v634_v38  ;;  %v1154_v29 = vsel %vm1098_vm2, %v634_v38, 0.0  ;;  %v1823_v54 = vpop.f32.mrb[30].mxu0  ;;  %v1260_v18 = vmul.f32 %v634_v38, %v634_v38  ;;  %v1158_v21 = vsel %vm1098_vm2, %v1822_v60, 0.0  ;;  %1075 = vst.msk [vmem:[%s3114_s5 + $0xa4] sm:$0xf] %vm1033_vm1, %v1554_v56 }
 0x140   :  { %1064 = vst.msk [vmem:[%s3114_s5 + $0x78] sm:$0xf] %vm1033_vm1, %v1543_v63  ;;  %v1544_v15 = vpack.c.bf16 %v1823_v54, %v1823_v54  ;;  %v637_v45 = vpop.f32.mrb[31].mxu0  ;;  %v1155_v49 = vadd.f32 %v1154_v29, %v1153_v31  ;;  %v1350_v8 = vadd.f32 %v1349_v0, %v1348_v23  ;;  %v1263_v47 = vmul.f32 %v1823_v54, %v1823_v54 }
 0x141   :  { %v2747_v32 = vpop.f32.mrb[16].mxu1  ;;  %1062 = vst.msk [vmem:[%s3114_s5 + $0x70] sm:$0xf] %vm1033_vm1, %v1541_v19  ;;  %v1542_v1 = vpack.c.bf16 %v637_v45, %v637_v45  ;;  %v1351_v2 = vsel %vm1098_vm2, %v1260_v18, 0.0  ;;  %v1156_v35 = vsel %vm1098_vm2, %v637_v45, 0.0  ;;  %v1261_v7 = vmul.f32 %v637_v45, %v637_v45 }
 0x142   :  { %v2754_v61 = vpop.f32.mrb[17].mxu1  ;;  %1065 = vst.msk [vmem:[%s3114_s5 + $0x7c] sm:$0xf] %vm1033_vm1, %v1544_v15  ;;  %v1352_v39 = vadd.f32 %v1351_v2, %v1350_v8  ;;  %v1157_v27 = vadd.f32 %v1156_v35, %v1155_v49  ;;  %v1355_v5 = vsel %vm1098_vm2, %v1262_v44, 0.0  ;;  %v1160_v37 = vsel %vm1098_vm2, %v1823_v54, 0.0 }
 0x143   :  { %v2761_v33 = vpop.f32.mrb[18].mxu1  ;;  %1063 = vst.msk [vmem:[%s3114_s5 + $0x74] sm:$0xf] %vm1033_vm1, %v1542_v1  ;;  %v1353_v25 = vsel %vm1098_vm2, %v1261_v7, 0.0  ;;  %v1357_v43 = vsel %vm1098_vm2, %v1263_v47, 0.0  ;;  %v1559_v36 = vpack.c.bf16 %v2703_v50, %v2703_v50  ;;  %v1557_v58 = vpack.c.bf16 %v2710_v55, %v2710_v55 }
 0x144   :  { %v2767_v59 = vpop.f32.mrb[19].mxu1  ;;  %v1159_v28 = vadd.f32 %v1158_v21, %v1157_v27  ;;  %v1354_v52 = vadd.f32 %v1353_v25, %v1352_v39  ;;  %v1266_v63 = vmul.f32 %v2569_v17, %v2569_v17  ;;  %v1164_v38 = vsel %vm1098_vm2, %v2585_v42, 0.0 }
 0x145   :  { %1080 = vst.msk [vmem:[%s3114_s5 + $0xb8] sm:$0xf] %vm1033_vm1, %v1559_v36  ;;  %v1560_v23 = vpack.c.bf16 %v2717_v13, %v2717_v13  ;;  %v1166_v19 = vsel %vm1098_vm2, %v2569_v17, 0.0  ;;  %1078 = vst.msk [vmem:[%s3114_s5 + $0xb0] sm:$0xf] %vm1033_vm1, %v1557_v58  ;;  %v1267_v42 = vmul.f32 %v2579_v6, %v2579_v6  ;;  %v1361_v54 = vsel %vm1098_vm2, %v1265_v51, 0.0 }
 0x146   :  { %v1356_v57 = vadd.f32 %v1355_v5, %v1354_v52  ;;  %v1161_v24 = vadd.f32 %v1160_v37, %v1159_v28  ;;  %v1268_v0 = vmul.f32 %v2622_v41, %v2622_v41  ;;  %v1558_v17 = vpack.c.bf16 %v2723_v48, %v2723_v48 }
 0x147   :  { %1081 = vst.msk [vmem:[%s3114_s5 + $0xbc] sm:$0xf] %vm1033_vm1, %v1560_v23  ;;  %v1563_v45 = vpack.c.bf16 %v2747_v32, %v2747_v32  ;;  %v1363_v49 = vsel %vm1098_vm2, %v1266_v63, 0.0  ;;  %v1168_v8 = vsel %vm1098_vm2, %v2579_v6, 0.0  ;;  %v1170_v1 = vsel %vm1098_vm2, %v2622_v41, 0.0 }
 0x148   :  { %v1163_v60 = vadd.f32 %v1162_v14, %v1161_v24  ;;  %v1358_v22 = vadd.f32 %v1357_v43, %v1356_v57  ;;  %1079 = vst.msk [vmem:[%s3114_s5 + $0xb4] sm:$0xf] %vm1033_vm1, %v1558_v17  ;;  %v1561_v44 = vpack.c.bf16 %v2754_v61, %v2754_v61  ;;  %v1365_v41 = vsel %vm1098_vm2, %v1267_v42, 0.0 }
 0x149   :  { %v2797_v26 = vpop.f32.mrb[20].mxu1  ;;  %1084 = vst.msk [vmem:[%s3114_s5 + $0xc8] sm:$0xf] %vm1033_vm1, %v1563_v45  ;;  %v1367_v39 = vsel %vm1098_vm2, %v1268_v0, 0.0  ;;  %v1269_v27 = vmul.f32 %v2635_v10, %v2635_v10  ;;  %v1564_v34 = vpack.c.bf16 %v2761_v33, %v2761_v33  ;;  %v1562_v3 = vpack.c.bf16 %v2767_v59, %v2767_v59 }
 0x14a   :  { %v2803_v53 = vpop.f32.mrb[21].mxu1  ;;  %v1360_v31 = vadd.f32 %v1359_v20, %v1358_v22  ;;  %v1165_v29 = vadd.f32 %v1164_v38, %v1163_v60  ;;  %1082 = vst.msk [vmem:[%s3114_s5 + $0xc0] sm:$0xf] %vm1033_vm1, %v1561_v44  ;;  %v1270_v52 = vmul.f32 %v2615_v4, %v2615_v4  ;;  %v1172_v16 = vsel %vm1098_vm2, %v2635_v10, 0.0 }
 0x14b   :  { %v2815_v30 = vpop.f32.mrb[22].mxu1  ;;  %1085 = vst.msk [vmem:[%s3114_s5 + $0xcc] sm:$0xf] %vm1033_vm1, %v1564_v34  ;;  %v1567_v5 = vpack.c.bf16 %v2797_v26, %v2797_v26  ;;  %v1174_v37 = vsel %vm1098_vm2, %v2615_v4, 0.0  ;;  %1083 = vst.msk [vmem:[%s3114_s5 + $0xc4] sm:$0xf] %vm1033_vm1, %v1562_v3  ;;  %v1271_v10 = vmul.f32 %v2629_v62, %v2629_v62  ;;  %v1272_v24 = vmul.f32 %v2666_v11, %v2666_v11 }
 0x14c   :  { %v2819_v12 = vpop.f32.mrb[23].mxu1  ;;  %v1167_v18 = vadd.f32 %v1166_v19, %v1165_v29  ;;  %v1362_v15 = vadd.f32 %v1361_v54, %v1360_v31  ;;  %v1369_v57 = vsel %vm1098_vm2, %v1269_v27, 0.0  ;;  %v1565_v4 = vpack.c.bf16 %v2803_v53, %v2803_v53 }
 0x14d   :  { %1088 = vst.msk [vmem:[%s3114_s5 + $0xd8] sm:$0xf] %vm1033_vm1, %v1567_v5  ;;  %v1568_v51 = vpack.c.bf16 %v2815_v30, %v2815_v30  ;;  %v1371_v36 = vsel %vm1098_vm2, %v1270_v52, 0.0  ;;  %v1176_v60 = vsel %vm1098_vm2, %v2629_v62, 0.0  ;;  %v1178_v22 = vsel %vm1098_vm2, %v2666_v11, 0.0 }
 0x14e   :  { %v1364_v35 = vadd.f32 %v1363_v49, %v1362_v15  ;;  %v1169_v7 = vadd.f32 %v1168_v8, %v1167_v18  ;;  %1086 = vst.msk [vmem:[%s3114_s5 + $0xd0] sm:$0xf] %vm1033_vm1, %v1565_v4  ;;  %v1566_v58 = vpack.c.bf16 %v2819_v12, %v2819_v12  ;;  %v1373_v11 = vsel %vm1098_vm2, %v1271_v10, 0.0 }
 0x14f   :  { %1089 = vst.msk [vmem:[%s3114_s5 + $0xdc] sm:$0xf] %vm1033_vm1, %v1568_v51  ;;  %v1375_v19 = vsel %vm1098_vm2, %v1272_v24, 0.0  ;;  %v1273_v31 = vmul.f32 %v2679_v46, %v2679_v46  ;;  %v1274_v15 = vmul.f32 %v2659_v9, %v2659_v9  ;;  %v1180_v45 = vsel %vm1098_vm2, %v2679_v46, 0.0 }
 0x150   :  { %v1171_v47 = vadd.f32 %v1170_v1, %v1169_v7  ;;  %v1366_v25 = vadd.f32 %v1365_v41, %v1364_v35  ;;  %1087 = vst.msk [vmem:[%s3114_s5 + $0xd4] sm:$0xf] %vm1033_vm1, %v1566_v58  ;;  %v1182_v8 = vsel %vm1098_vm2, %v2659_v9, 0.0  ;;  %v1275_v46 = vmul.f32 %v2673_v40, %v2673_v40 }
 0x151   :  { %v2861_v2 = vpop.f32.mrb[24].mxu1  ;;  %v1377_v35 = vsel %vm1098_vm2, %v1273_v31, 0.0  ;;  %v1276_v7 = vmul.f32 %v2710_v55, %v2710_v55  ;;  %v1379_v34 = vsel %vm1098_vm2, %v1274_v15, 0.0  ;;  %v1188_v24 = vsel %vm1098_vm2, %v2723_v48, 0.0 }
 0x152   :  { %v2867_v6 = vpop.f32.mrb[25].mxu1  ;;  %v1368_v14 = vadd.f32 %v1367_v39, %v1366_v25  ;;  %v1173_v56 = vadd.f32 %v1172_v16, %v1171_v47  ;;  %v1571_v29 = vpack.c.bf16 %v2861_v2, %v2861_v2  ;;  %v1184_v47 = vsel %vm1098_vm2, %v2673_v40, 0.0 }
 0x153   :  { %v2879_v21 = vpop.f32.mrb[26].mxu1  ;;  %v1569_v17 = vpack.c.bf16 %v2867_v6, %v2867_v6  ;;  %v1186_v25 = vsel %vm1098_vm2, %v2710_v55, 0.0  ;;  %v1381_v40 = vsel %vm1098_vm2, %v1275_v46, 0.0  ;;  %v1383_v5 = vsel %vm1098_vm2, %v1276_v7, 0.0 }
 0x154   :  { %v2883_v28 = vpop.f32.mrb[27].mxu1  ;;  %v1175_v43 = vadd.f32 %v1174_v37, %v1173_v56  ;;  %v1370_v20 = vadd.f32 %v1369_v57, %v1368_v14  ;;  %1092 = vst.msk [vmem:[%s3114_s5 + $0xe8] sm:$0xf] %vm1033_vm1, %v1571_v29  ;;  %v1572_v49 = vpack.c.bf16 %v2879_v21, %v2879_v21  ;;  %v1277_v55 = vmul.f32 %v2723_v48, %v2723_v48 }
 0x155   :  { %1090 = vst.msk [vmem:[%s3114_s5 + $0xe0] sm:$0xf] %vm1033_vm1, %v1569_v17  ;;  %v1570_v9 = vpack.c.bf16 %v2883_v28, %v2883_v28  ;;  %v1278_v57 = vmul.f32 %v2703_v50, %v2703_v50  ;;  %v1279_v51 = vmul.f32 %v2717_v13, %v2717_v13  ;;  %v1281_v29 = vmul.f32 %v2767_v59, %v2767_v59 }
 0x156   :  { %v1372_v38 = vadd.f32 %v1371_v36, %v1370_v20  ;;  %v1177_v23 = vadd.f32 %v1176_v60, %v1175_v43  ;;  %1093 = vst.msk [vmem:[%s3114_s5 + $0xec] sm:$0xf] %vm1033_vm1, %v1572_v49  ;;  %v1190_v20 = vsel %vm1098_vm2, %v2703_v50, 0.0  ;;  %v1385_v48 = vsel %vm1098_vm2, %v1277_v55, 0.0 }
 0x157   :  { %1091 = vst.msk [vmem:[%s3114_s5 + $0xe4] sm:$0xf] %vm1033_vm1, %v1570_v9  ;;  %v1280_v36 = vmul.f32 %v2754_v61, %v2754_v61  ;;  %v1387_v58 = vsel %vm1098_vm2, %v1278_v57, 0.0  ;;  %v1282_v17 = vmul.f32 %v2747_v32, %v2747_v32  ;;  %v1283_v49 = vmul.f32 %v2761_v33, %v2761_v33 }
 0x158   :  { %v1179_v54 = vadd.f32 %v1178_v22, %v1177_v23  ;;  %v1374_v0 = vadd.f32 %v1373_v11, %v1372_v38  ;;  %v1192_v38 = vsel %vm1098_vm2, %v2717_v13, 0.0  ;;  %v1194_v23 = vsel %vm1098_vm2, %v2754_v61, 0.0 }
 0x159   :  { %v2925_v63 = vpop.f32.mrb[28].mxu1  ;;  %v1391_v31 = vsel %vm1098_vm2, %v1280_v36, 0.0  ;;  %v1196_v13 = vsel %vm1098_vm2, %v2767_v59, 0.0  ;;  %v1198_v61 = vsel %vm1098_vm2, %v2747_v32, 0.0  ;;  %v1200_v59 = vsel %vm1098_vm2, %v2761_v33, 0.0 }
 0x15a   :  { %v2931_v62 = vpop.f32.mrb[29].mxu1  ;;  %v1376_v1 = vadd.f32 %v1375_v19, %v1374_v0  ;;  %v1181_v44 = vadd.f32 %v1180_v45, %v1179_v54  ;;  %v1575_v27 = vpack.c.bf16 %v2925_v63, %v2925_v63  ;;  %v1389_v19 = vsel %vm1098_vm2, %v1279_v51, 0.0 }
 0x15b   :  { %v2943_v42 = vpop.f32.mrb[30].mxu1  ;;  %v1573_v3 = vpack.c.bf16 %v2931_v62, %v2931_v62  ;;  %v1202_v7 = vsel %vm1098_vm2, %v2803_v53, 0.0  ;;  %v1204_v33 = vsel %vm1098_vm2, %v2819_v12, 0.0  ;;  %v1290_v51 = vmul.f32 %v2861_v2, %v2861_v2 }
 0x15c   :  { %v2947_v18 = vpop.f32.mrb[31].mxu1  ;;  %v1183_v41 = vadd.f32 %v1182_v8, %v1181_v44  ;;  %v1378_v39 = vadd.f32 %v1377_v35, %v1376_v1  ;;  %1096 = vst.msk [vmem:[%s3114_s5 + $0xf8] sm:$0xf] %vm1033_vm1, %v1575_v27  ;;  %v1576_v37 = vpack.c.bf16 %v2943_v42, %v2943_v42  ;;  %v1393_v8 = vsel %vm1098_vm2, %v1281_v29, 0.0 }
 0x15d   :  { %1094 = vst.msk [vmem:[%s3114_s5 + $0xf0] sm:$0xf] %vm1033_vm1, %v1573_v3  ;;  %v1574_v10 = vpack.c.bf16 %v2947_v18, %v2947_v18  ;;  %v1284_v1 = vmul.f32 %v2803_v53, %v2803_v53  ;;  %v1395_v35 = vsel %vm1098_vm2, %v1282_v17, 0.0  ;;  %v1285_v27 = vmul.f32 %v2819_v12, %v2819_v12 }
 0x15e   :  { %v1380_v52 = vadd.f32 %v1379_v34, %v1378_v39  ;;  %v1185_v16 = vadd.f32 %v1184_v47, %v1183_v41  ;;  %1097 = vst.msk [vmem:[%s3114_s5 + $0xfc] sm:$0xf] %vm1033_vm1, %v1576_v37  ;;  %v1397_v41 = vsel %vm1098_vm2, %v1283_v49, 0.0  ;;  %v1206_v53 = vsel %vm1098_vm2, %v2797_v26, 0.0 }
 0x15f   :  { %1095 = vst.msk [vmem:[%s3114_s5 + $0xf4] sm:$0xf] %vm1033_vm1, %v1574_v10  ;;  %v1399_v39 = vsel %vm1098_vm2, %v1284_v1, 0.0  ;;  %v1208_v12 = vsel %vm1098_vm2, %v2815_v30, 0.0 }
 0x160   :  { %v1187_v14 = vadd.f32 %v1186_v25, %v1185_v16  ;;  %v1382_v56 = vadd.f32 %v1381_v40, %v1380_v52  ;;  %v1286_v25 = vmul.f32 %v2797_v26, %v2797_v26  ;;  %v1287_v16 = vmul.f32 %v2815_v30, %v2815_v30 }
 0x161   :  { %v1401_v40 = vsel %vm1098_vm2, %v1285_v27, 0.0  ;;  %v1212_v30 = vsel %vm1098_vm2, %v2883_v28, 0.0 }
 0x162   :  { %v1384_v4 = vadd.f32 %v1383_v5, %v1382_v56  ;;  %v1189_v43 = vadd.f32 %v1188_v24, %v1187_v14  ;;  %v1288_v5 = vmul.f32 %v2867_v6, %v2867_v6  ;;  %v1403_v14 = vsel %vm1098_vm2, %v1286_v25, 0.0 }
 0x163   :  { %v1210_v56 = vsel %vm1098_vm2, %v2867_v6, 0.0  ;;  %v1405_v57 = vsel %vm1098_vm2, %v1287_v16, 0.0  ;;  %v1214_v6 = vsel %vm1098_vm2, %v2861_v2, 0.0 }
 0x164   :  { %v1191_v60 = vadd.f32 %v1190_v20, %v1189_v43  ;;  %v1386_v22 = vadd.f32 %v1385_v48, %v1384_v4  ;;  %v1407_v24 = vsel %vm1098_vm2, %v1288_v5, 0.0  ;;  %v1289_v4 = vmul.f32 %v2883_v28, %v2883_v28 }
 0x165   :  { %v1216_v28 = vsel %vm1098_vm2, %v2879_v21, 0.0 }
 0x166   :  { %v1388_v11 = vadd.f32 %v1387_v58, %v1386_v22  ;;  %v1193_v50 = vadd.f32 %v1192_v38, %v1191_v60  ;;  %v1291_v60 = vmul.f32 %v2879_v21, %v2879_v21  ;;  %v1409_v22 = vsel %vm1098_vm2, %v1289_v4, 0.0 }
 0x167   :  { %v1292_v58 = vmul.f32 %v2931_v62, %v2931_v62  ;;  %v1220_v21 = vsel %vm1098_vm2, %v2947_v18, 0.0 }
 0x168   :  { %v1195_v54 = vadd.f32 %v1194_v23, %v1193_v50  ;;  %v1390_v0 = vadd.f32 %v1389_v19, %v1388_v11  ;;  %v1411_v11 = vsel %vm1098_vm2, %v1290_v51, 0.0  ;;  %v1218_v50 = vsel %vm1098_vm2, %v2931_v62, 0.0 }
 0x169   :  { %v1415_v29 = vsel %vm1098_vm2, %v1292_v58, 0.0  ;;  %v1222_v62 = vsel %vm1098_vm2, %v2925_v63, 0.0 }
 0x16a   :  { %v1392_v15 = vadd.f32 %v1391_v31, %v1390_v0  ;;  %v1197_v45 = vadd.f32 %v1196_v13, %v1195_v54  ;;  %v1413_v31 = vsel %vm1098_vm2, %v1291_v60, 0.0  ;;  %v1293_v54 = vmul.f32 %v2947_v18, %v2947_v18 }
 0x16b   :  { %v1294_v13 = vmul.f32 %v2925_v63, %v2925_v63 }
 0x16c   :  { %v1199_v44 = vadd.f32 %v1198_v61, %v1197_v45  ;;  %v1394_v46 = vadd.f32 %v1393_v8, %v1392_v15  ;;  %v1295_v61 = vmul.f32 %v2943_v42, %v2943_v42  ;;  %v1417_v49 = vsel %vm1098_vm2, %v1293_v54, 0.0 }
 0x16e   :  { %v1396_v9 = vadd.f32 %v1395_v35, %v1394_v46  ;;  %v1201_v32 = vadd.f32 %v1200_v59, %v1199_v44  ;;  %v1419_v44 = vsel %vm1098_vm2, %v1294_v13, 0.0  ;;  %v1224_v46 = vsel %vm1098_vm2, %v2943_v42, 0.0 }
 0x16f   :  { %v1421_v18 = vsel %vm1098_vm2, %v1295_v61, 0.0 }
 0x170   :  { %v1203_v34 = vadd.f32 %v1202_v7, %v1201_v32  ;;  %v1398_v47 = vadd.f32 %v1397_v41, %v1396_v9 }
 0x172   :  { %v1400_v3 = vadd.f32 %v1399_v39, %v1398_v47  ;;  %v1205_v52 = vadd.f32 %v1204_v33, %v1203_v34 }
 0x174   :  { %v1207_v55 = vadd.f32 %v1206_v53, %v1205_v52  ;;  %v1402_v37 = vadd.f32 %v1401_v40, %v1400_v3 }
 0x176   :  { %v1404_v10 = vadd.f32 %v1403_v14, %v1402_v37  ;;  %v1209_v26 = vadd.f32 %v1208_v12, %v1207_v55 }
 0x178   :  { %v1211_v43 = vadd.f32 %v1210_v56, %v1209_v26  ;;  %v1406_v20 = vadd.f32 %v1405_v57, %v1404_v10 }
 0x17a   :  { %v1408_v48 = vadd.f32 %v1407_v24, %v1406_v20  ;;  %v1213_v36 = vadd.f32 %v1212_v30, %v1211_v43 }
 0x17c   :  { %v1215_v38 = vadd.f32 %v1214_v6, %v1213_v36  ;;  %v1410_v23 = vadd.f32 %v1409_v22, %v1408_v48 }
 0x17e   :  { %v1412_v19 = vadd.f32 %v1411_v11, %v1410_v23  ;;  %v1217_v2 = vadd.f32 %v1216_v28, %v1215_v38 }
 0x180   :  { %v1219_v0 = vadd.f32 %v1218_v50, %v1217_v2  ;;  %v1414_v17 = vadd.f32 %v1413_v31, %v1412_v19 }
 0x182   :  { %v1416_v15 = vadd.f32 %v1415_v29, %v1414_v17  ;;  %v1221_v45 = vadd.f32 %v1220_v21, %v1219_v0 }
 0x184   :  { %v1223_v8 = vadd.f32 %v1222_v62, %v1221_v45  ;;  %v1418_v1 = vadd.f32 %v1417_v49, %v1416_v15 }
 0x186   :  { %v1225_v35 = vadd.f32 %v1224_v46, %v1223_v8  ;;  %v1420_v59 = vadd.f32 %v1419_v44, %v1418_v1 }
 0x188   :  { %v1226_v7 = vrot.slane %v1225_v35, 4  ;;  %v1422_v9 = vadd.f32 %v1421_v18, %v1420_v59 }
 0x18a   :  { %v1227_v32 = vadd.f32 %v1226_v7, %v1225_v35  ;;  %v1423_v63 = vrot.slane %v1422_v9, 4 }
 0x18c   :  { %v1228_v41 = vrot.slane %v1227_v32, 2  ;;  %v1424_v39 = vadd.f32 %v1423_v63, %v1422_v9 }
 0x18e   :  { %v1229_v27 = vadd.f32 %v1228_v41, %v1227_v32  ;;  %v1425_v34 = vrot.slane %v1424_v39, 2 }
 0x190   :  { %v1230_v47 = vrot.slane %v1229_v27, 1  ;;  %v1426_v25 = vadd.f32 %v1425_v34, %v1424_v39 }
 0x192   :  { %v1427_v33 = vrot.slane %v1426_v25, 1  ;;  %v1231_v3 = vadd.f32 %v1230_v47, %v1229_v27 }
 0x194   :  { %v1428_v52 = vadd.f32 %v1427_v33, %v1426_v25 }
 0x196   :  { %v1430_v42 = vsel %vm1429_vm3, %v1231_v3, %v1428_v52 }
 0x197   :  { %1432 = vst.msk [vmem:[%s3115_s6] sm:$0x3] %vm1431_vm4, %v1430_v42 }

// kernel: bottleneck_forward.7
= control target key start
LH: loop header
LB: loop body
LE: loop exit
PB: predicated region body
PF: predicated region fallthrough
CT: control target
= control target key end

     0   :  { %v37_v0 = vlaneseq  ;;  %v1351_v2 = vmov 1966171168   ;;  %vm833_vm0 = vcmask 125952   ;;  %s2443_s0 = inlined_call_operand.vmem [shape: bf16[512,16], index: 0, kind: input, shape index: {}]   ;;  %s2444_s1 = inlined_call_operand.vmem [shape: f32[1,2,16], index: 1, kind: input, shape index: {}]   ;;  %s2445_s4 = inlined_call_operand.vmem [shape: bf16[512,16], index: 4, kind: input, shape index: {}]   ;;  %s2446_s2 = inlined_call_operand.vmem [shape: f32[1,16], index: 2, kind: input, shape index: {}]   ;;  %s2447_s3 = inlined_call_operand.vmem [shape: f32[1,16], index: 3, kind: input, shape index: {}]   ;;  %s2448_s5 = inlined_call_operand.vmem [shape: bf16[512,16], index: 5, kind: output, shape index: {}]  }
   0x1   :  { %v20_v1 = vld [vmem:[%s2444_s1] sm:$0x3]  ;;  %v35_v3 = vunpack.c.l.s4 %v1351_v2  ;;  %v1402_v8 = vld [vmem:[%s2443_s0 + $0x8] sm:$0xff]   ;;  %v1415_v14 = vld [vmem:[%s2443_s0 + $0x10] sm:$0xff]  }
   0x2   :  { %v1385_v4 = vmul.f32 0.001953125, %v20_v1  ;;  %v1387_v5 = vshrl.u32 %v37_v0, 7  ;;  %v1392_v6 = vld [vmem:[%s2443_s0] sm:$0xff]   ;;  %v1410_v13 = vld [vmem:[%s2445_s4 + $0x8] sm:$0xff]   ;;  %v1420_v15 = vld [vmem:[%s2445_s4 + $0x10] sm:$0xff]  }
   0x3   :  { %v1397_v7 = vld [vmem:[%s2445_s4] sm:$0xff]   ;;  %v36_v9 = vunpack.c.0.s8 %v35_v3  ;;  %v1430_v20 = vld [vmem:[%s2443_s0 + $0x18] sm:$0xff]   ;;  %v1459_v32 = vld [vmem:[%s2443_s0 + $0x28] sm:$0xff]  }
   0x4   :  { %v25_v16 = vmul.f32 %v1385_v4, %v1385_v4  ;;  %v1435_v21 = vld [vmem:[%s2445_s4 + $0x18] sm:$0xff]   ;;  %v1446_v26 = vld [vmem:[%s2443_s0 + $0x20] sm:$0xff]   ;;  %v1464_v33 = vld [vmem:[%s2445_s4 + $0x28] sm:$0xff]   ;;  %v2506_v17 = vsub.s32 0, %v1387_v5 }
   0x5   :  { %v1438_v22 = vsub.s32 %v36_v9, %v1387_v5  ;;  %v1451_v27 = vld [vmem:[%s2445_s4 + $0x20] sm:$0xff]   ;;  %v1473_v38 = vld [vmem:[%s2443_s0 + $0x30] sm:$0xff]   ;;  %v1487_v44 = vld [vmem:[%s2443_s0 + $0x38] sm:$0xff]  }
   0x6   :  { %v27_v28 = vrot.slane %v25_v16, 7  ;;  %v1482_v43 = vld [vmem:[%s2445_s4 + $0x30] sm:$0xff]   ;;  %v1496_v49 = vld [vmem:[%s2445_s4 + $0x38] sm:$0xff]   ;;  %v1504_v54 = vld [vmem:[%s2443_s0 + $0x40] sm:$0xff]  }
   0x7   :  { %v1509_v55 = vld [vmem:[%s2445_s4 + $0x40] sm:$0xff]   ;;  %v1518_v60 = vld [vmem:[%s2443_s0 + $0x48] sm:$0xff]   ;;  %v1531_v2 = vld [vmem:[%s2443_s0 + $0x50] sm:$0xff]  }
   0x8   :  { %v29_v39 = vsub.f32 %v1385_v4, %v27_v28  ;;  %v1523_v61 = vld [vmem:[%s2445_s4 + $0x48] sm:$0xff]   ;;  %v1536_v3 = vld [vmem:[%s2445_s4 + $0x50] sm:$0xff]   ;;  %v1550_v1 = vld [vmem:[%s2445_s4 + $0x58] sm:$0xff]  }
   0x9   :  { %v1563_v28 = vld [vmem:[%s2445_s4 + $0x60] sm:$0xff]   ;;  %v1572_v16 = vld [vmem:[%s2443_s0 + $0x68] sm:$0xff]   ;;  %v1586_v9 = vld [vmem:[%s2443_s0 + $0x70] sm:$0xff]  }
   0xa   :  { %v30_v50 = vmax.f32 %v29_v39, 0.0  ;;  %v1558_v39 = vld [vmem:[%s2443_s0 + $0x60] sm:$0xff]   ;;  %v1577_v56 = vld [vmem:[%s2445_s4 + $0x68] sm:$0xff]   ;;  %v1591_v48 = vld [vmem:[%s2445_s4 + $0x70] sm:$0xff]  }
   0xb   :  { %v1600_v63 = vld [vmem:[%s2443_s0 + $0x78] sm:$0xff]   ;;  %v1619_v59 = vld [vmem:[%s2445_s4 + $0x80] sm:$0xff]   ;;  %v1628_v58 = vld [vmem:[%s2443_s0 + $0x88] sm:$0xff]  }
   0xc   :  { %v31_v62 = vadd.f32 1e-05, %v30_v50  ;;  %v1545_v50 = vld [vmem:[%s2443_s0 + $0x58] sm:$0xff]   ;;  %v1633_v36 = vld [vmem:[%s2445_s4 + $0x88] sm:$0xff]   ;;  %v1642_v52 = vld [vmem:[%s2443_s0 + $0x90] sm:$0xff]  }
   0xd   :  { %v1605_v42 = vld [vmem:[%s2445_s4 + $0x78] sm:$0xff]   ;;  %v1647_v30 = vld [vmem:[%s2445_s4 + $0x90] sm:$0xff]   ;;  %v1670_v0 = vld [vmem:[%s2443_s0 + $0xa0] sm:$0xff]  }
   0xe   :  { %1349 = vrsqrt.f32 %v31_v62  ;;  %v1614_v62 = vld [vmem:[%s2443_s0 + $0x80] sm:$0xff]   ;;  %2487 = vst [vmem:[#allocation2_spill] sm:$0xff] %v1647_v30  ;;  %v1656_v46 = vld [vmem:[%s2443_s0 + $0x98] sm:$0xff]   ;;  %2489 = vst [vmem:[#allocation4_spill] sm:$0xff] %v1670_v0 }
   0xf   :  { %v1661_v23 = vld [vmem:[%s2445_s4 + $0x98] sm:$0xff]   ;;  %v1675_v11 = vld [vmem:[%s2445_s4 + $0xa0] sm:$0xff]   ;;  %v1684_v40 = vld [vmem:[%s2443_s0 + $0xa8] sm:$0xff]  }
  0x10   :  { %2488 = vst [vmem:[#allocation3_spill] sm:$0xff] %v1661_v23  ;;  %2490 = vst [vmem:[#allocation5_spill] sm:$0xff] %v1675_v11  ;;  %v1689_v53 = vld [vmem:[%s2445_s4 + $0xa8] sm:$0xff]   ;;  %v1698_v34 = vld [vmem:[%s2443_s0 + $0xb0] sm:$0xff]   ;;  %v2510_v11 = vunpack.c.h.bf16 %v1402_v8 }
  0x11   :  { %2491 = vst [vmem:[#allocation6_spill] sm:$0xff] %v1684_v40  ;;  %2492 = vst [vmem:[#allocation7_spill] sm:$0xff] %v1689_v53  ;;  %v1707_v47 = vld [vmem:[%s2445_s4 + $0xb0] sm:$0xff]   ;;  %v1712_v18 = vld [vmem:[%s2443_s0 + $0xb8] sm:$0xff]  }
  0x12   :  { %2493 = vst [vmem:[#allocation8_spill] sm:$0xff] %v1698_v34  ;;  %2494 = vst [vmem:[#allocation9_spill] sm:$0xff] %v1707_v47  ;;  %v1721_v35 = vld [vmem:[%s2445_s4 + $0xb8] sm:$0xff]   ;;  %v1734_v37 = vld [vmem:[%s2445_s4 + $0xc0] sm:$0xff]  }
  0x13   :  { %2495 = vst [vmem:[#allocation10_spill] sm:$0xff] %v1712_v18  ;;  %2496 = vst [vmem:[#allocation11_spill] sm:$0xff] %v1721_v35  ;;  %v1746_v25 = vld [vmem:[%s2443_s0 + $0xc8] sm:$0xff]   ;;  %v1760_v41 = vld [vmem:[%s2443_s0 + $0xd0] sm:$0xff]  }
  0x14   :  { %2498 = vst [vmem:[#allocation13_spill] sm:$0xff] %v1734_v37  ;;  %2499 = vst [vmem:[#allocation14_spill] sm:$0xff] %v1746_v25  ;;  %v1751_v19 = vld [vmem:[%s2445_s4 + $0xc8] sm:$0xff]   ;;  %v1765_v10 = vld [vmem:[%s2445_s4 + $0xd0] sm:$0xff]   ;;  %v2509_v25 = vunpack.c.l.bf16 %v1402_v8  ;;  %v2515_v8 = vunpack.c.h.bf16 %v1430_v20 }
  0x15   :  { %2500 = vst [vmem:[#allocation15_spill] sm:$0xff] %v1751_v19  ;;  %2501 = vst [vmem:[#allocation16_spill] sm:$0xff] %v1760_v41  ;;  %v1774_v24 = vld [vmem:[%s2443_s0 + $0xd8] sm:$0xff]   ;;  %v1787_v31 = vld [vmem:[%s2443_s0 + $0xe0] sm:$0xff]   ;;  %v2522_v41 = vunpack.c.l.bf16 %v1397_v7 }
  0x16   :  { %2502 = vst [vmem:[#allocation17_spill] sm:$0xff] %v1765_v10  ;;  %2503 = vst [vmem:[#allocation18_spill] sm:$0xff] %v1774_v24 }
  0x17   :  { %2505 = vst [vmem:[#allocation20_spill] sm:$0xff] %v1787_v31  ;;  %v2516_v31 = vunpack.c.l.bf16 %v1446_v26 }
  0x18   :  { %v1350_v51 = vpop.eup %1349 }
  0x19   :  { %v40_v45 = vrot.slane %v1350_v51, %v1438_v22  ;;  %v1729_v51 = vld [vmem:[%s2443_s0 + $0xc0] sm:$0xff]  }
  0x1a   :  { %2497 = vst [vmem:[#allocation12_spill] sm:$0xff] %v1729_v51 }
  0x1b   :  { %v41_v57 = vcombine.high %v40_v45, %v40_v45  ;;  %v22_v45 = vld [vmem:[%s2446_s2] sm:$0x1] }
  0x1d   :  { %v48_v12 = vrot.slane %v41_v57, %v1438_v22  ;;  %v1782_v22 = vld [vmem:[%s2445_s4 + $0xd8] sm:$0xff]  }
  0x1e   :  { %2504 = vst [vmem:[#allocation19_spill] sm:$0xff] %v1782_v22  ;;  %v2518_v22 = vunpack.c.l.bf16 %v1459_v32 }
  0x1f   :  { %v50_v29 = vmul.f32 %v48_v12, %v22_v45  ;;  %v23_v12 = vld [vmem:[%s2447_s3] sm:$0x1]  ;;  %v2514_v45 = vsub.s32 0, %v1387_v5  ;;  %v2519_v5 = vunpack.c.h.bf16 %v1459_v32 }
  0x21   :  { %v51_v57 = vmul.f32 %v50_v29, %v1385_v4  ;;  %v1799_v37 = vrot.slane %v50_v29, %v2506_v17  ;;  %v2507_v4 = vunpack.c.l.bf16 %v1392_v6  ;;  %v2508_v17 = vunpack.c.h.bf16 %v1392_v6 }
  0x22   :  { %v2513_v6 = vunpack.c.l.bf16 %v1430_v20  ;;  %v2520_v20 = vunpack.c.l.bf16 %v1473_v38 }
  0x23   :  { %v52_v19 = vsub.f32 %v23_v12, %v51_v57  ;;  %v187_v35 = vmul.f32 %v2507_v4, %v1799_v37  ;;  %v188_v29 = vmul.f32 %v2508_v17, %v1799_v37  ;;  %v189_v51 = vmul.f32 %v2509_v25, %v1799_v37 }
  0x24   :  { %v190_v47 = vmul.f32 %v2510_v11, %v1799_v37  ;;  %v2511_v57 = vunpack.c.l.bf16 %v1415_v14  ;;  %v2512_v4 = vunpack.c.h.bf16 %v1415_v14  ;;  %v193_v17 = vmul.f32 %v2513_v6, %v1799_v37 }
  0x25   :  { %v1830_v25 = vrot.slane %v52_v19, %v2514_v45  ;;  %v194_v11 = vmul.f32 %v2515_v8, %v1799_v37  ;;  %v2517_v14 = vunpack.c.h.bf16 %v1446_v26  ;;  %v197_v6 = vmul.f32 %v2518_v22, %v1799_v37 }
  0x26   :  { %v191_v12 = vmul.f32 %v2511_v57, %v1799_v37  ;;  %v192_v53 = vmul.f32 %v2512_v4, %v1799_v37  ;;  %v195_v57 = vmul.f32 %v2516_v31, %v1799_v37  ;;  %v198_v19 = vmul.f32 %v2519_v5, %v1799_v37 }
  0x27   :  { %v196_v4 = vmul.f32 %v2517_v14, %v1799_v37  ;;  %v199_v45 = vmul.f32 %v2520_v20, %v1799_v37  ;;  %v2521_v8 = vunpack.c.h.bf16 %v1473_v38  ;;  %v257_v10 = vadd.f32 %v1830_v25, %v187_v35 }
  0x28   :  { %v258_v26 = vadd.f32 %v1830_v25, %v188_v29  ;;  %v259_v14 = vadd.f32 %v1830_v25, %v189_v51  ;;  %v260_v22 = vadd.f32 %v1830_v25, %v190_v47  ;;  %v261_v24 = vadd.f32 %v1830_v25, %v191_v12 }
  0x29   :  { %v200_v31 = vmul.f32 %v2521_v8, %v1799_v37  ;;  %v262_v32 = vadd.f32 %v1830_v25, %v192_v53  ;;  %v263_v5 = vadd.f32 %v1830_v25, %v193_v17  ;;  %v264_v20 = vadd.f32 %v1830_v25, %v194_v11 }
  0x2a   :  { %v449_v38 = vadd.f32 %v2522_v41, %v257_v10  ;;  %v2523_v8 = vunpack.c.h.bf16 %v1397_v7  ;;  %v2524_v29 = vunpack.c.l.bf16 %v1410_v13  ;;  %v2525_v51 = vunpack.c.h.bf16 %v1410_v13 }
  0x2b   :  { %v2526_v12 = vunpack.c.l.bf16 %v1420_v15  ;;  %v2527_v53 = vunpack.c.h.bf16 %v1420_v15  ;;  %v2528_v11 = vunpack.c.l.bf16 %v1435_v21  ;;  %v2529_v10 = vunpack.c.h.bf16 %v1435_v21 }
  0x2c   :  { %v450_v35 = vadd.f32 %v2523_v8, %v258_v26  ;;  %v451_v18 = vadd.f32 %v2524_v29, %v259_v14  ;;  %v452_v47 = vadd.f32 %v2525_v51, %v260_v22  ;;  %v513_v7 = vmax.f32 %v449_v38, 0.0 }
  0x2d   :  { %v453_v34 = vadd.f32 %v2526_v12, %v261_v24  ;;  %v454_v17 = vadd.f32 %v2527_v53, %v262_v32  ;;  %v455_v40 = vadd.f32 %v2528_v11, %v263_v5  ;;  %v456_v41 = vadd.f32 %v2529_v10, %v264_v20 }
  0x2e   :  { %v514_v26 = vmax.f32 %v450_v35, 0.0  ;;  %v515_v8 = vmax.f32 %v451_v18, 0.0  ;;  %v516_v0 = vmax.f32 %v452_v47, 0.0  ;;  %v966_v51 = vpack.c.bf16 %v513_v7, %v513_v7 }
  0x2f   :  { %v517_v14 = vmax.f32 %v453_v34, 0.0  ;;  %v518_v29 = vmax.f32 %v454_v17, 0.0  ;;  %v519_v13 = vmax.f32 %v455_v40, 0.0  ;;  %v520_v22 = vmax.f32 %v456_v41, 0.0 }
  0x30   :  { %v967_v23 = vpack.c.bf16 %v514_v26, %v514_v26  ;;  %v968_v24 = vpack.c.bf16 %v515_v8, %v515_v8  ;;  %v969_v12 = vpack.c.bf16 %v516_v0, %v516_v0  ;;  %834 = vst.msk [vmem:[%s2448_s5] sm:$0xf] %vm833_vm0, %v966_v51  ;;  %v265_v18 = vadd.f32 %v1830_v25, %v195_v57 }
  0x31   :  { %v970_v15 = vpack.c.bf16 %v517_v14, %v517_v14  ;;  %v971_v32 = vpack.c.bf16 %v518_v29, %v518_v29  ;;  %v972_v53 = vpack.c.bf16 %v519_v13, %v519_v13  ;;  %v973_v30 = vpack.c.bf16 %v520_v22, %v520_v22 }
  0x32   :  { %835 = vst.msk [vmem:[%s2448_s5 + $0x4] sm:$0xf] %vm833_vm0, %v967_v23  ;;  %836 = vst.msk [vmem:[%s2448_s5 + $0x8] sm:$0xf] %vm833_vm0, %v968_v24  ;;  %v266_v21 = vadd.f32 %v1830_v25, %v196_v4  ;;  %v267_v34 = vadd.f32 %v1830_v25, %v197_v6  ;;  %v268_v40 = vadd.f32 %v1830_v25, %v198_v19  ;;  %v2530_v57 = vunpack.c.l.bf16 %v1487_v44 }
  0x33   :  { %837 = vst.msk [vmem:[%s2448_s5 + $0xc] sm:$0xf] %vm833_vm0, %v969_v12  ;;  %838 = vst.msk [vmem:[%s2448_s5 + $0x10] sm:$0xf] %vm833_vm0, %v970_v15  ;;  %v269_v23 = vadd.f32 %v1830_v25, %v199_v45  ;;  %v270_v0 = vadd.f32 %v1830_v25, %v200_v31  ;;  %v2531_v6 = vunpack.c.h.bf16 %v1487_v44  ;;  %v2532_v5 = vunpack.c.l.bf16 %v1451_v27 }
  0x34   :  { %839 = vst.msk [vmem:[%s2448_s5 + $0x14] sm:$0xf] %vm833_vm0, %v971_v32  ;;  %840 = vst.msk [vmem:[%s2448_s5 + $0x18] sm:$0xf] %vm833_vm0, %v972_v53  ;;  %v201_v4 = vmul.f32 %v2530_v57, %v1799_v37  ;;  %v2533_v38 = vunpack.c.h.bf16 %v1451_v27  ;;  %v2535_v45 = vunpack.c.h.bf16 %v1464_v33  ;;  %v2536_v17 = vunpack.c.l.bf16 %v1482_v43 }
  0x35   :  { %841 = vst.msk [vmem:[%s2448_s5 + $0x1c] sm:$0xf] %vm833_vm0, %v973_v30  ;;  %v202_v19 = vmul.f32 %v2531_v6, %v1799_v37  ;;  %v457_v20 = vadd.f32 %v2532_v5, %v265_v18  ;;  %v2534_v30 = vunpack.c.l.bf16 %v1464_v33  ;;  %v2537_v10 = vunpack.c.h.bf16 %v1482_v43 }
  0x36   :  { %v458_v35 = vadd.f32 %v2533_v38, %v266_v21  ;;  %v460_v31 = vadd.f32 %v2535_v45, %v268_v40  ;;  %v461_v11 = vadd.f32 %v2536_v17, %v269_v23  ;;  %v271_v44 = vadd.f32 %v1830_v25, %v201_v4 }
  0x37   :  { %v459_v47 = vadd.f32 %v2534_v30, %v267_v34  ;;  %v462_v41 = vadd.f32 %v2537_v10, %v270_v0  ;;  %v272_v7 = vadd.f32 %v1830_v25, %v202_v19  ;;  %v521_v26 = vmax.f32 %v457_v20, 0.0 }
  0x38   :  { %v522_v8 = vmax.f32 %v458_v35, 0.0  ;;  %v524_v14 = vmax.f32 %v460_v31, 0.0  ;;  %v525_v29 = vmax.f32 %v461_v11, 0.0  ;;  %v2538_v22 = vunpack.c.l.bf16 %v1496_v49 }
  0x39   :  { %v523_v27 = vmax.f32 %v459_v47, 0.0  ;;  %v526_v13 = vmax.f32 %v462_v41, 0.0  ;;  %v2539_v51 = vunpack.c.h.bf16 %v1496_v49  ;;  %v974_v12 = vpack.c.bf16 %v521_v26, %v521_v26 }
  0x3a   :  { %v463_v33 = vadd.f32 %v2538_v22, %v271_v44  ;;  %v975_v15 = vpack.c.bf16 %v522_v8, %v522_v8  ;;  %v977_v32 = vpack.c.bf16 %v524_v14, %v524_v14  ;;  %v978_v53 = vpack.c.bf16 %v525_v29, %v525_v29 }
  0x3b   :  { %v464_v24 = vadd.f32 %v2539_v51, %v272_v7  ;;  %v976_v43 = vpack.c.bf16 %v523_v27, %v523_v27  ;;  %v979_v18 = vpack.c.bf16 %v526_v13, %v526_v13  ;;  %842 = vst.msk [vmem:[%s2448_s5 + $0x20] sm:$0xf] %vm833_vm0, %v974_v12  ;;  %v2540_v49 = vunpack.c.l.bf16 %v1504_v54 }
  0x3c   :  { %v527_v21 = vmax.f32 %v463_v33, 0.0  ;;  %843 = vst.msk [vmem:[%s2448_s5 + $0x24] sm:$0xf] %vm833_vm0, %v975_v15  ;;  %845 = vst.msk [vmem:[%s2448_s5 + $0x2c] sm:$0xf] %vm833_vm0, %v977_v32  ;;  %v2541_v23 = vunpack.c.h.bf16 %v1504_v54  ;;  %v2542_v57 = vunpack.c.l.bf16 %v1518_v60  ;;  %v2543_v6 = vunpack.c.h.bf16 %v1518_v60 }
  0x3d   :  { %v528_v34 = vmax.f32 %v464_v24, 0.0  ;;  %844 = vst.msk [vmem:[%s2448_s5 + $0x28] sm:$0xf] %vm833_vm0, %v976_v43  ;;  %v203_v40 = vmul.f32 %v2540_v49, %v1799_v37  ;;  %846 = vst.msk [vmem:[%s2448_s5 + $0x30] sm:$0xf] %vm833_vm0, %v978_v53  ;;  %v2544_v20 = vunpack.c.l.bf16 %v1531_v2  ;;  %v2545_v60 = vunpack.c.h.bf16 %v1531_v2 }
  0x3e   :  { %v204_v0 = vmul.f32 %v2541_v23, %v1799_v37  ;;  %v205_v4 = vmul.f32 %v2542_v57, %v1799_v37  ;;  %v206_v19 = vmul.f32 %v2543_v6, %v1799_v37  ;;  %847 = vst.msk [vmem:[%s2448_s5 + $0x34] sm:$0xf] %vm833_vm0, %v979_v18  ;;  %v980_v54 = vpack.c.bf16 %v527_v21, %v527_v21 }
  0x3f   :  { %v981_v5 = vpack.c.bf16 %v528_v34, %v528_v34  ;;  %v207_v38 = vmul.f32 %v2544_v20, %v1799_v37  ;;  %v208_v35 = vmul.f32 %v2545_v60, %v1799_v37  ;;  %v273_v30 = vadd.f32 %v1830_v25, %v203_v40 }
  0x40   :  { %v274_v47 = vadd.f32 %v1830_v25, %v204_v0  ;;  %v275_v45 = vadd.f32 %v1830_v25, %v205_v4  ;;  %v276_v31 = vadd.f32 %v1830_v25, %v206_v19  ;;  %848 = vst.msk [vmem:[%s2448_s5 + $0x38] sm:$0xf] %vm833_vm0, %v980_v54  ;;  %v2546_v11 = vunpack.c.l.bf16 %v1545_v50 }
  0x41   :  { %849 = vst.msk [vmem:[%s2448_s5 + $0x3c] sm:$0xf] %vm833_vm0, %v981_v5  ;;  %v277_v2 = vadd.f32 %v1830_v25, %v207_v38  ;;  %v278_v17 = vadd.f32 %v1830_v25, %v208_v35  ;;  %v2547_v41 = vunpack.c.h.bf16 %v1545_v50  ;;  %v2548_v7 = vunpack.c.l.bf16 %v1509_v55 }
  0x42   :  { %v209_v10 = vmul.f32 %v2546_v11, %v1799_v37  ;;  %v2549_v8 = vunpack.c.h.bf16 %v1509_v55  ;;  %v2550_v14 = vunpack.c.l.bf16 %v1523_v61  ;;  %v2551_v13 = vunpack.c.h.bf16 %v1523_v61 }
  0x43   :  { %v210_v44 = vmul.f32 %v2547_v41, %v1799_v37  ;;  %v465_v26 = vadd.f32 %v2548_v7, %v273_v30  ;;  %v2552_v33 = vunpack.c.l.bf16 %v1536_v3  ;;  %v2553_v24 = vunpack.c.h.bf16 %v1536_v3 }
  0x44   :  { %v466_v27 = vadd.f32 %v2549_v8, %v274_v47  ;;  %v467_v29 = vadd.f32 %v2550_v14, %v275_v45  ;;  %v468_v22 = vadd.f32 %v2551_v13, %v276_v31  ;;  %v279_v50 = vadd.f32 %v1830_v25, %v209_v10 }
  0x45   :  { %v469_v51 = vadd.f32 %v2552_v33, %v277_v2  ;;  %v470_v12 = vadd.f32 %v2553_v24, %v278_v17  ;;  %v280_v15 = vadd.f32 %v1830_v25, %v210_v44  ;;  %v529_v43 = vmax.f32 %v465_v26, 0.0 }
  0x46   :  { %v530_v32 = vmax.f32 %v466_v27, 0.0  ;;  %v531_v55 = vmax.f32 %v467_v29, 0.0  ;;  %v532_v53 = vmax.f32 %v468_v22, 0.0  ;;  %v2554_v34 = vunpack.c.l.bf16 %v1550_v1 }
  0x47   :  { %v533_v18 = vmax.f32 %v469_v51, 0.0  ;;  %v534_v21 = vmax.f32 %v470_v12, 0.0  ;;  %v2555_v49 = vunpack.c.h.bf16 %v1550_v1  ;;  %v982_v23 = vpack.c.bf16 %v529_v43, %v529_v43 }
  0x48   :  { %v471_v61 = vadd.f32 %v2554_v34, %v279_v50  ;;  %v983_v0 = vpack.c.bf16 %v530_v32, %v530_v32  ;;  %v984_v3 = vpack.c.bf16 %v531_v55, %v531_v55  ;;  %v985_v57 = vpack.c.bf16 %v532_v53, %v532_v53 }
  0x49   :  { %v472_v40 = vadd.f32 %v2555_v49, %v280_v15  ;;  %v986_v4 = vpack.c.bf16 %v533_v18, %v533_v18  ;;  %v987_v6 = vpack.c.bf16 %v534_v21, %v534_v21  ;;  %850 = vst.msk [vmem:[%s2448_s5 + $0x40] sm:$0xf] %vm833_vm0, %v982_v23  ;;  %v2556_v1 = vunpack.c.l.bf16 %v1558_v39 }
  0x4a   :  { %v535_v19 = vmax.f32 %v471_v61, 0.0  ;;  %851 = vst.msk [vmem:[%s2448_s5 + $0x44] sm:$0xf] %vm833_vm0, %v983_v0  ;;  %852 = vst.msk [vmem:[%s2448_s5 + $0x48] sm:$0xf] %vm833_vm0, %v984_v3  ;;  %v2557_v20 = vunpack.c.h.bf16 %v1558_v39  ;;  %v2558_v60 = vunpack.c.l.bf16 %v1572_v16  ;;  %v2559_v30 = vunpack.c.h.bf16 %v1572_v16 }
  0x4b   :  { %v536_v54 = vmax.f32 %v472_v40, 0.0  ;;  %853 = vst.msk [vmem:[%s2448_s5 + $0x4c] sm:$0xf] %vm833_vm0, %v985_v57  ;;  %v211_v5 = vmul.f32 %v2556_v1, %v1799_v37  ;;  %854 = vst.msk [vmem:[%s2448_s5 + $0x50] sm:$0xf] %vm833_vm0, %v986_v4  ;;  %v2560_v31 = vunpack.c.l.bf16 %v1586_v9  ;;  %v2561_v16 = vunpack.c.h.bf16 %v1586_v9 }
  0x4c   :  { %v212_v38 = vmul.f32 %v2557_v20, %v1799_v37  ;;  %v213_v35 = vmul.f32 %v2558_v60, %v1799_v37  ;;  %v214_v47 = vmul.f32 %v2559_v30, %v1799_v37  ;;  %855 = vst.msk [vmem:[%s2448_s5 + $0x54] sm:$0xf] %vm833_vm0, %v987_v6  ;;  %v988_v39 = vpack.c.bf16 %v535_v19, %v535_v19 }
  0x4d   :  { %v989_v45 = vpack.c.bf16 %v536_v54, %v536_v54  ;;  %v215_v2 = vmul.f32 %v2560_v31, %v1799_v37  ;;  %v216_v17 = vmul.f32 %v2561_v16, %v1799_v37  ;;  %v281_v11 = vadd.f32 %v1830_v25, %v211_v5 }
  0x4e   :  { %v282_v10 = vadd.f32 %v1830_v25, %v212_v38  ;;  %v283_v41 = vadd.f32 %v1830_v25, %v213_v35  ;;  %v284_v44 = vadd.f32 %v1830_v25, %v214_v47  ;;  %856 = vst.msk [vmem:[%s2448_s5 + $0x58] sm:$0xf] %vm833_vm0, %v988_v39  ;;  %v2562_v26 = vunpack.c.l.bf16 %v1600_v63 }
  0x4f   :  { %857 = vst.msk [vmem:[%s2448_s5 + $0x5c] sm:$0xf] %vm833_vm0, %v989_v45  ;;  %v285_v9 = vadd.f32 %v1830_v25, %v215_v2  ;;  %v286_v7 = vadd.f32 %v1830_v25, %v216_v17  ;;  %v2563_v27 = vunpack.c.h.bf16 %v1600_v63  ;;  %v2564_v29 = vunpack.c.l.bf16 %v1563_v28 }
  0x50   :  { %v217_v8 = vmul.f32 %v2562_v26, %v1799_v37  ;;  %v2565_v22 = vunpack.c.h.bf16 %v1563_v28  ;;  %v2566_v51 = vunpack.c.l.bf16 %v1577_v56  ;;  %v2567_v12 = vunpack.c.h.bf16 %v1577_v56 }
  0x51   :  { %v218_v14 = vmul.f32 %v2563_v27, %v1799_v37  ;;  %v473_v13 = vadd.f32 %v2564_v29, %v281_v11  ;;  %v2568_v15 = vunpack.c.l.bf16 %v1591_v48  ;;  %v2569_v32 = vunpack.c.h.bf16 %v1591_v48 }
  0x52   :  { %v474_v33 = vadd.f32 %v2565_v22, %v282_v10  ;;  %v475_v24 = vadd.f32 %v2566_v51, %v283_v41  ;;  %v476_v50 = vadd.f32 %v2567_v12, %v284_v44  ;;  %v287_v63 = vadd.f32 %v1830_v25, %v217_v8 }
  0x53   :  { %v477_v43 = vadd.f32 %v2568_v15, %v285_v9  ;;  %v478_v55 = vadd.f32 %v2569_v32, %v286_v7  ;;  %v288_v53 = vadd.f32 %v1830_v25, %v218_v14  ;;  %v537_v18 = vmax.f32 %v473_v13, 0.0 }
  0x54   :  { %v538_v21 = vmax.f32 %v474_v33, 0.0  ;;  %v539_v28 = vmax.f32 %v475_v24, 0.0  ;;  %v540_v34 = vmax.f32 %v476_v50, 0.0  ;;  %v2570_v40 = vunpack.c.l.bf16 %v1605_v42  ;;  %v2584_v24 = vld [vmem:[#allocation2_spill] sm:$0xff] }
  0x55   :  { %v541_v61 = vmax.f32 %v477_v43, 0.0  ;;  %v542_v49 = vmax.f32 %v478_v55, 0.0  ;;  %v2571_v23 = vunpack.c.h.bf16 %v1605_v42  ;;  %v990_v3 = vpack.c.bf16 %v537_v18, %v537_v18 }
  0x56   :  { %v479_v56 = vadd.f32 %v2570_v40, %v287_v63  ;;  %v991_v57 = vpack.c.bf16 %v538_v21, %v538_v21  ;;  %v992_v48 = vpack.c.bf16 %v539_v28, %v539_v28  ;;  %v993_v4 = vpack.c.bf16 %v540_v34, %v540_v34  ;;  %v2587_v28 = vld [vmem:[#allocation3_spill] sm:$0xff] }
  0x57   :  { %v480_v0 = vadd.f32 %v2571_v23, %v288_v53  ;;  %v994_v6 = vpack.c.bf16 %v541_v61, %v541_v61  ;;  %v995_v19 = vpack.c.bf16 %v542_v49, %v542_v49  ;;  %858 = vst.msk [vmem:[%s2448_s5 + $0x60] sm:$0xf] %vm833_vm0, %v990_v3  ;;  %v2572_v42 = vunpack.c.l.bf16 %v1614_v62 }
  0x58   :  { %v543_v54 = vmax.f32 %v479_v56, 0.0  ;;  %859 = vst.msk [vmem:[%s2448_s5 + $0x64] sm:$0xf] %vm833_vm0, %v991_v57  ;;  %860 = vst.msk [vmem:[%s2448_s5 + $0x68] sm:$0xf] %vm833_vm0, %v992_v48  ;;  %v2573_v20 = vunpack.c.h.bf16 %v1614_v62  ;;  %v2574_v60 = vunpack.c.l.bf16 %v1628_v58  ;;  %v2575_v30 = vunpack.c.h.bf16 %v1628_v58 }
  0x59   :  { %v544_v1 = vmax.f32 %v480_v0, 0.0  ;;  %861 = vst.msk [vmem:[%s2448_s5 + $0x6c] sm:$0xf] %vm833_vm0, %v993_v4  ;;  %v219_v5 = vmul.f32 %v2572_v42, %v1799_v37  ;;  %862 = vst.msk [vmem:[%s2448_s5 + $0x70] sm:$0xf] %vm833_vm0, %v994_v6  ;;  %v2576_v45 = vunpack.c.l.bf16 %v1642_v52  ;;  %v2577_v58 = vunpack.c.h.bf16 %v1642_v52  ;;  %v2590_v6 = vld [vmem:[#allocation4_spill] sm:$0xff] }
  0x5a   :  { %v220_v38 = vmul.f32 %v2573_v20, %v1799_v37  ;;  %v221_v35 = vmul.f32 %v2574_v60, %v1799_v37  ;;  %v222_v47 = vmul.f32 %v2575_v30, %v1799_v37  ;;  %863 = vst.msk [vmem:[%s2448_s5 + $0x74] sm:$0xf] %vm833_vm0, %v995_v19  ;;  %v996_v62 = vpack.c.bf16 %v543_v54, %v543_v54 }
  0x5b   :  { %v997_v39 = vpack.c.bf16 %v544_v1, %v544_v1  ;;  %v223_v31 = vmul.f32 %v2576_v45, %v1799_v37  ;;  %v224_v2 = vmul.f32 %v2577_v58, %v1799_v37  ;;  %v289_v16 = vadd.f32 %v1830_v25, %v219_v5  ;;  %v2593_v5 = vld [vmem:[#allocation6_spill] sm:$0xff] }
  0x5c   :  { %v290_v17 = vadd.f32 %v1830_v25, %v220_v38  ;;  %v291_v11 = vadd.f32 %v1830_v25, %v221_v35  ;;  %v292_v10 = vadd.f32 %v1830_v25, %v222_v47  ;;  %864 = vst.msk [vmem:[%s2448_s5 + $0x78] sm:$0xf] %vm833_vm0, %v996_v62  ;;  %v2578_v44 = vunpack.c.l.bf16 %v1656_v46  ;;  %v2596_v62 = vld [vmem:[#allocation8_spill] sm:$0xff] }
  0x5d   :  { %865 = vst.msk [vmem:[%s2448_s5 + $0x7c] sm:$0xf] %vm833_vm0, %v997_v39  ;;  %v293_v52 = vadd.f32 %v1830_v25, %v223_v31  ;;  %v294_v41 = vadd.f32 %v1830_v25, %v224_v2  ;;  %v2579_v7 = vunpack.c.h.bf16 %v1656_v46  ;;  %v2580_v8 = vunpack.c.l.bf16 %v1619_v59 }
  0x5e   :  { %v225_v9 = vmul.f32 %v2578_v44, %v1799_v37  ;;  %v2581_v14 = vunpack.c.h.bf16 %v1619_v59  ;;  %v2582_v13 = vunpack.c.l.bf16 %v1633_v36  ;;  %v2583_v33 = vunpack.c.h.bf16 %v1633_v36 }
  0x5f   :  { %v226_v26 = vmul.f32 %v2579_v7, %v1799_v37  ;;  %v481_v27 = vadd.f32 %v2580_v8, %v289_v16  ;;  %v2585_v12 = vunpack.c.l.bf16 %v2584_v24  ;;  %v2586_v15 = vunpack.c.h.bf16 %v2584_v24  ;;  %v2602_v8 = vld [vmem:[#allocation5_spill] sm:$0xff] }
  0x60   :  { %v482_v29 = vadd.f32 %v2581_v14, %v290_v17  ;;  %v483_v22 = vadd.f32 %v2582_v13, %v291_v11  ;;  %v484_v51 = vadd.f32 %v2583_v33, %v292_v10  ;;  %v295_v46 = vadd.f32 %v1830_v25, %v225_v9 }
  0x61   :  { %v485_v50 = vadd.f32 %v2585_v12, %v293_v52  ;;  %v486_v43 = vadd.f32 %v2586_v15, %v294_v41  ;;  %v296_v32 = vadd.f32 %v1830_v25, %v226_v26  ;;  %v545_v55 = vmax.f32 %v481_v27, 0.0  ;;  %v2599_v41 = vld [vmem:[#allocation10_spill] sm:$0xff] }
  0x62   :  { %v546_v63 = vmax.f32 %v482_v29, 0.0  ;;  %v547_v59 = vmax.f32 %v483_v22, 0.0  ;;  %v548_v53 = vmax.f32 %v484_v51, 0.0  ;;  %v2588_v34 = vunpack.c.l.bf16 %v2587_v28  ;;  %v2605_v22 = vld [vmem:[#allocation7_spill] sm:$0xff] }
  0x63   :  { %v549_v18 = vmax.f32 %v485_v50, 0.0  ;;  %v550_v21 = vmax.f32 %v486_v43, 0.0  ;;  %v2589_v61 = vunpack.c.h.bf16 %v2587_v28  ;;  %v998_v40 = vpack.c.bf16 %v545_v55, %v545_v55  ;;  %v2608_v50 = vld [vmem:[#allocation9_spill] sm:$0xff] }
  0x64   :  { %v487_v36 = vadd.f32 %v2588_v34, %v295_v46  ;;  %v999_v56 = vpack.c.bf16 %v546_v63, %v546_v63  ;;  %v1000_v23 = vpack.c.bf16 %v547_v59, %v547_v59  ;;  %v1001_v0 = vpack.c.bf16 %v548_v53, %v548_v53 }
  0x65   :  { %v488_v49 = vadd.f32 %v2589_v61, %v296_v32  ;;  %v1002_v3 = vpack.c.bf16 %v549_v18, %v549_v18  ;;  %v1003_v57 = vpack.c.bf16 %v550_v21, %v550_v21  ;;  %866 = vst.msk [vmem:[%s2448_s5 + $0x80] sm:$0xf] %vm833_vm0, %v998_v40  ;;  %v2591_v19 = vunpack.c.l.bf16 %v2590_v6 }
  0x66   :  { %v551_v48 = vmax.f32 %v487_v36, 0.0  ;;  %867 = vst.msk [vmem:[%s2448_s5 + $0x84] sm:$0xf] %vm833_vm0, %v999_v56  ;;  %868 = vst.msk [vmem:[%s2448_s5 + $0x88] sm:$0xf] %vm833_vm0, %v1000_v23  ;;  %v2592_v1 = vunpack.c.h.bf16 %v2590_v6  ;;  %v2594_v20 = vunpack.c.l.bf16 %v2593_v5  ;;  %v2595_v60 = vunpack.c.h.bf16 %v2593_v5  ;;  %v2611_v36 = vld [vmem:[#allocation11_spill] sm:$0xff] }
  0x67   :  { %v552_v4 = vmax.f32 %v488_v49, 0.0  ;;  %869 = vst.msk [vmem:[%s2448_s5 + $0x8c] sm:$0xf] %vm833_vm0, %v1001_v0  ;;  %v227_v54 = vmul.f32 %v2591_v19, %v1799_v37  ;;  %870 = vst.msk [vmem:[%s2448_s5 + $0x90] sm:$0xf] %vm833_vm0, %v1002_v3  ;;  %v2597_v39 = vunpack.c.l.bf16 %v2596_v62  ;;  %v2598_v31 = vunpack.c.h.bf16 %v2596_v62 }
  0x68   :  { %v228_v42 = vmul.f32 %v2592_v1, %v1799_v37  ;;  %v229_v38 = vmul.f32 %v2594_v20, %v1799_v37  ;;  %v230_v35 = vmul.f32 %v2595_v60, %v1799_v37  ;;  %871 = vst.msk [vmem:[%s2448_s5 + $0x94] sm:$0xf] %vm833_vm0, %v1003_v57  ;;  %v1004_v30 = vpack.c.bf16 %v551_v48, %v551_v48 }
  0x69   :  { %v1005_v47 = vpack.c.bf16 %v552_v4, %v552_v4  ;;  %v231_v45 = vmul.f32 %v2597_v39, %v1799_v37  ;;  %v232_v58 = vmul.f32 %v2598_v31, %v1799_v37  ;;  %v297_v2 = vadd.f32 %v1830_v25, %v227_v54  ;;  %v2614_v54 = vld [vmem:[#allocation12_spill] sm:$0xff] }
  0x6a   :  { %v298_v16 = vadd.f32 %v1830_v25, %v228_v42  ;;  %v299_v17 = vadd.f32 %v1830_v25, %v229_v38  ;;  %v300_v11 = vadd.f32 %v1830_v25, %v230_v35  ;;  %872 = vst.msk [vmem:[%s2448_s5 + $0x98] sm:$0xf] %vm833_vm0, %v1004_v30  ;;  %v2600_v44 = vunpack.c.l.bf16 %v2599_v41  ;;  %v2617_v38 = vld [vmem:[#allocation14_spill] sm:$0xff] }
  0x6b   :  { %873 = vst.msk [vmem:[%s2448_s5 + $0x9c] sm:$0xf] %vm833_vm0, %v1005_v47  ;;  %v301_v10 = vadd.f32 %v1830_v25, %v231_v45  ;;  %v302_v52 = vadd.f32 %v1830_v25, %v232_v58  ;;  %v2601_v7 = vunpack.c.h.bf16 %v2599_v41  ;;  %v2603_v27 = vunpack.c.l.bf16 %v2602_v8  ;;  %v2620_v45 = vld [vmem:[#allocation16_spill] sm:$0xff] }
  0x6c   :  { %v233_v9 = vmul.f32 %v2600_v44, %v1799_v37  ;;  %v2604_v29 = vunpack.c.h.bf16 %v2602_v8  ;;  %v2606_v33 = vunpack.c.l.bf16 %v2605_v22  ;;  %v2607_v24 = vunpack.c.h.bf16 %v2605_v22 }
  0x6d   :  { %v234_v26 = vmul.f32 %v2601_v7, %v1799_v37  ;;  %v489_v14 = vadd.f32 %v2603_v27, %v297_v2  ;;  %v2609_v15 = vunpack.c.l.bf16 %v2608_v50  ;;  %v2610_v46 = vunpack.c.h.bf16 %v2608_v50 }
  0x6e   :  { %v490_v13 = vadd.f32 %v2604_v29, %v298_v16  ;;  %v491_v51 = vadd.f32 %v2606_v33, %v299_v17  ;;  %v492_v12 = vadd.f32 %v2607_v24, %v300_v11  ;;  %v303_v55 = vadd.f32 %v1830_v25, %v233_v9  ;;  %v2623_v9 = vld [vmem:[#allocation18_spill] sm:$0xff] }
  0x6f   :  { %v493_v43 = vadd.f32 %v2609_v15, %v301_v10  ;;  %v494_v32 = vadd.f32 %v2610_v46, %v302_v52  ;;  %v304_v63 = vadd.f32 %v1830_v25, %v234_v26  ;;  %v553_v59 = vmax.f32 %v489_v14, 0.0  ;;  %v2626_v14 = vld [vmem:[#allocation13_spill] sm:$0xff] }
  0x70   :  { %v554_v53 = vmax.f32 %v490_v13, 0.0  ;;  %v555_v18 = vmax.f32 %v491_v51, 0.0  ;;  %v556_v21 = vmax.f32 %v492_v12, 0.0  ;;  %v2612_v61 = vunpack.c.l.bf16 %v2611_v36  ;;  %v2629_v51 = vld [vmem:[#allocation15_spill] sm:$0xff] }
  0x71   :  { %v557_v28 = vmax.f32 %v493_v43, 0.0  ;;  %v558_v34 = vmax.f32 %v494_v32, 0.0  ;;  %v2613_v40 = vunpack.c.h.bf16 %v2611_v36  ;;  %v1006_v23 = vpack.c.bf16 %v553_v59, %v553_v59  ;;  %v2632_v43 = vld [vmem:[#allocation17_spill] sm:$0xff] }
  0x72   :  { %v495_v49 = vadd.f32 %v2612_v61, %v303_v55  ;;  %v1007_v0 = vpack.c.bf16 %v554_v53, %v554_v53  ;;  %v1008_v3 = vpack.c.bf16 %v555_v18, %v555_v18  ;;  %v1009_v57 = vpack.c.bf16 %v556_v21, %v556_v21 }
  0x73   :  { %v496_v56 = vadd.f32 %v2613_v40, %v304_v63  ;;  %v1010_v48 = vpack.c.bf16 %v557_v28, %v557_v28  ;;  %v1011_v4 = vpack.c.bf16 %v558_v34, %v558_v34  ;;  %874 = vst.msk [vmem:[%s2448_s5 + $0xa0] sm:$0xf] %vm833_vm0, %v1006_v23  ;;  %v2615_v1 = vunpack.c.l.bf16 %v2614_v54 }
  0x74   :  { %v559_v6 = vmax.f32 %v495_v49, 0.0  ;;  %875 = vst.msk [vmem:[%s2448_s5 + $0xa4] sm:$0xf] %vm833_vm0, %v1007_v0  ;;  %876 = vst.msk [vmem:[%s2448_s5 + $0xa8] sm:$0xf] %vm833_vm0, %v1008_v3  ;;  %v2616_v5 = vunpack.c.h.bf16 %v2614_v54  ;;  %v2618_v60 = vunpack.c.l.bf16 %v2617_v38  ;;  %v2619_v30 = vunpack.c.h.bf16 %v2617_v38  ;;  %v2635_v49 = vld [vmem:[#allocation19_spill] sm:$0xff] }
  0x75   :  { %v560_v19 = vmax.f32 %v496_v56, 0.0  ;;  %877 = vst.msk [vmem:[%s2448_s5 + $0xac] sm:$0xf] %vm833_vm0, %v1009_v57  ;;  %v235_v42 = vmul.f32 %v2615_v1, %v1799_v37  ;;  %878 = vst.msk [vmem:[%s2448_s5 + $0xb0] sm:$0xf] %vm833_vm0, %v1010_v48  ;;  %v2621_v31 = vunpack.c.l.bf16 %v2620_v45  ;;  %v2622_v2 = vunpack.c.h.bf16 %v2620_v45  ;;  %v1344_v3 = vld [vmem:[%s2445_s4 + $0xe0] sm:$0xff]  }
  0x76   :  { %v236_v20 = vmul.f32 %v2616_v5, %v1799_v37  ;;  %v237_v35 = vmul.f32 %v2618_v60, %v1799_v37  ;;  %v238_v47 = vmul.f32 %v2619_v30, %v1799_v37  ;;  %879 = vst.msk [vmem:[%s2448_s5 + $0xb4] sm:$0xf] %vm833_vm0, %v1011_v4  ;;  %v1012_v62 = vpack.c.bf16 %v559_v6, %v559_v6  ;;  %v1345_v54 = vld [vmem:[%s2445_s4 + $0xe8] sm:$0xff]   ;;  %v2638_v38 = vld [vmem:[#allocation20_spill] sm:$0xff] }
  0x77   :  { %v1013_v39 = vpack.c.bf16 %v560_v19, %v560_v19  ;;  %v239_v58 = vmul.f32 %v2621_v31, %v1799_v37  ;;  %v240_v16 = vmul.f32 %v2622_v2, %v1799_v37  ;;  %v305_v17 = vadd.f32 %v1830_v25, %v235_v42  ;;  %v1314_v19 = vld [vmem:[%s2443_s0 + $0xe8] sm:$0xff]   ;;  %v1346_v45 = vld [vmem:[%s2445_s4 + $0xf0] sm:$0xff]  }
  0x78   :  { %v306_v11 = vadd.f32 %v1830_v25, %v236_v20  ;;  %v307_v10 = vadd.f32 %v1830_v25, %v237_v35  ;;  %v308_v52 = vadd.f32 %v1830_v25, %v238_v47  ;;  %880 = vst.msk [vmem:[%s2448_s5 + $0xb8] sm:$0xf] %vm833_vm0, %v1012_v62  ;;  %v2624_v7 = vunpack.c.l.bf16 %v2623_v9 }
  0x79   :  { %881 = vst.msk [vmem:[%s2448_s5 + $0xbc] sm:$0xf] %vm833_vm0, %v1013_v39  ;;  %v309_v41 = vadd.f32 %v1830_v25, %v239_v58  ;;  %v310_v44 = vadd.f32 %v1830_v25, %v240_v16  ;;  %v2625_v8 = vunpack.c.h.bf16 %v2623_v9  ;;  %v2627_v29 = vunpack.c.l.bf16 %v2626_v14  ;;  %v1315_v39 = vld [vmem:[%s2443_s0 + $0xf0] sm:$0xff]  }
  0x7a   :  { %v241_v26 = vmul.f32 %v2624_v7, %v1799_v37  ;;  %v2628_v22 = vunpack.c.h.bf16 %v2626_v14  ;;  %v2630_v24 = vunpack.c.l.bf16 %v2629_v51  ;;  %v2631_v50 = vunpack.c.h.bf16 %v2629_v51 }
  0x7b   :  { %v242_v27 = vmul.f32 %v2625_v8, %v1799_v37  ;;  %v497_v13 = vadd.f32 %v2627_v29, %v305_v17  ;;  %v2633_v46 = vunpack.c.l.bf16 %v2632_v43  ;;  %v2634_v55 = vunpack.c.h.bf16 %v2632_v43  ;;  %v1347_v8 = vld [vmem:[%s2445_s4 + $0xf8] sm:$0xff]  }
  0x7c   :  { %v498_v33 = vadd.f32 %v2628_v22, %v306_v11  ;;  %v499_v12 = vadd.f32 %v2630_v24, %v307_v10  ;;  %v500_v15 = vadd.f32 %v2631_v50, %v308_v52  ;;  %v311_v59 = vadd.f32 %v1830_v25, %v241_v26 }
  0x7d   :  { %v501_v32 = vadd.f32 %v2633_v46, %v309_v41  ;;  %v502_v63 = vadd.f32 %v2634_v55, %v310_v44  ;;  %v312_v53 = vadd.f32 %v1830_v25, %v242_v27  ;;  %v561_v18 = vmax.f32 %v497_v13, 0.0  ;;  %v1316_v41 = vld [vmem:[%s2443_s0 + $0xf8] sm:$0xff]  }
  0x7e   :  { %v562_v21 = vmax.f32 %v498_v33, 0.0  ;;  %v563_v28 = vmax.f32 %v499_v12, 0.0  ;;  %v564_v34 = vmax.f32 %v500_v15, 0.0  ;;  %v2636_v40 = vunpack.c.l.bf16 %v2635_v49 }
  0x7f   :  { %v565_v36 = vmax.f32 %v501_v32, 0.0  ;;  %v566_v61 = vmax.f32 %v502_v63, 0.0  ;;  %v2637_v23 = vunpack.c.h.bf16 %v2635_v49  ;;  %v1014_v57 = vpack.c.bf16 %v561_v18, %v561_v18 }
  0x80   :  { %v503_v56 = vadd.f32 %v2636_v40, %v311_v59  ;;  %v1015_v48 = vpack.c.bf16 %v562_v21, %v562_v21  ;;  %v1016_v4 = vpack.c.bf16 %v563_v28, %v563_v28  ;;  %v1017_v6 = vpack.c.bf16 %v564_v34, %v564_v34 }
  0x81   :  { %v504_v0 = vadd.f32 %v2637_v23, %v312_v53  ;;  %v1018_v1 = vpack.c.bf16 %v565_v36, %v565_v36  ;;  %v1019_v42 = vpack.c.bf16 %v566_v61, %v566_v61  ;;  %882 = vst.msk [vmem:[%s2448_s5 + $0xc0] sm:$0xf] %vm833_vm0, %v1014_v57  ;;  %v2639_v60 = vunpack.c.l.bf16 %v2638_v38 }
  0x82   :  { %v567_v5 = vmax.f32 %v503_v56, 0.0  ;;  %883 = vst.msk [vmem:[%s2448_s5 + $0xc4] sm:$0xf] %vm833_vm0, %v1015_v48  ;;  %884 = vst.msk [vmem:[%s2448_s5 + $0xc8] sm:$0xf] %vm833_vm0, %v1016_v4  ;;  %v1272_v30 = vunpack.c.l.bf16 %v1344_v3  ;;  %v1145_v47 = vunpack.c.h.bf16 %v2638_v38  ;;  %v1273_v62 = vunpack.c.h.bf16 %v1344_v3 }
  0x83   :  { %v568_v20 = vmax.f32 %v504_v0, 0.0  ;;  %885 = vst.msk [vmem:[%s2448_s5 + $0xcc] sm:$0xf] %vm833_vm0, %v1017_v6  ;;  %v243_v35 = vmul.f32 %v2639_v60, %v1799_v37  ;;  %886 = vst.msk [vmem:[%s2448_s5 + $0xd0] sm:$0xf] %vm833_vm0, %v1018_v1  ;;  %v1148_v2 = vunpack.c.l.bf16 %v1314_v19  ;;  %v1276_v16 = vunpack.c.l.bf16 %v1345_v54 }
  0x84   :  { %887 = vst.msk [vmem:[%s2448_s5 + $0xd4] sm:$0xf] %vm833_vm0, %v1019_v42  ;;  %v1020_v31 = vpack.c.bf16 %v567_v5, %v567_v5  ;;  %v244_v11 = vmul.f32 %v1145_v47, %v1799_v37  ;;  %v1149_v10 = vunpack.c.h.bf16 %v1314_v19  ;;  %v1277_v52 = vunpack.c.h.bf16 %v1345_v54 }
  0x85   :  { %v1021_v58 = vpack.c.bf16 %v568_v20, %v568_v20  ;;  %v313_v17 = vadd.f32 %v1830_v25, %v243_v35  ;;  %v245_v44 = vmul.f32 %v1148_v2, %v1799_v37  ;;  %v1152_v9 = vunpack.c.l.bf16 %v1315_v39 }
  0x86   :  { %888 = vst.msk [vmem:[%s2448_s5 + $0xd8] sm:$0xf] %vm833_vm0, %v1020_v31  ;;  %v1280_v7 = vunpack.c.l.bf16 %v1346_v45  ;;  %v1153_v26 = vunpack.c.h.bf16 %v1315_v39  ;;  %v314_v14 = vadd.f32 %v1830_v25, %v244_v11  ;;  %v246_v29 = vmul.f32 %v1149_v10, %v1799_v37 }
  0x87   :  { %889 = vst.msk [vmem:[%s2448_s5 + $0xdc] sm:$0xf] %vm833_vm0, %v1021_v58  ;;  %v505_v27 = vadd.f32 %v1272_v30, %v313_v17  ;;  %v1281_v13 = vunpack.c.h.bf16 %v1346_v45  ;;  %v315_v22 = vadd.f32 %v1830_v25, %v245_v44  ;;  %v247_v33 = vmul.f32 %v1152_v9, %v1799_v37 }
  0x88   :  { %v248_v51 = vmul.f32 %v1153_v26, %v1799_v37  ;;  %v1156_v24 = vunpack.c.l.bf16 %v1316_v41  ;;  %v506_v50 = vadd.f32 %v1273_v62, %v314_v14  ;;  %v316_v15 = vadd.f32 %v1830_v25, %v246_v29 }
  0x89   :  { %v569_v12 = vmax.f32 %v505_v27, 0.0  ;;  %v1284_v43 = vunpack.c.l.bf16 %v1347_v8  ;;  %v507_v46 = vadd.f32 %v1276_v16, %v315_v22  ;;  %v317_v32 = vadd.f32 %v1830_v25, %v247_v33 }
  0x8a   :  { %v318_v55 = vadd.f32 %v1830_v25, %v248_v51  ;;  %v249_v63 = vmul.f32 %v1156_v24, %v1799_v37  ;;  %v570_v53 = vmax.f32 %v506_v50, 0.0  ;;  %v508_v18 = vadd.f32 %v1277_v52, %v316_v15 }
  0x8b   :  { %v1022_v59 = vpack.c.bf16 %v569_v12, %v569_v12  ;;  %v1157_v21 = vunpack.c.h.bf16 %v1316_v41  ;;  %v571_v28 = vmax.f32 %v507_v46, 0.0  ;;  %v509_v34 = vadd.f32 %v1280_v7, %v317_v32 }
  0x8c   :  { %v510_v36 = vadd.f32 %v1281_v13, %v318_v55  ;;  %v319_v61 = vadd.f32 %v1830_v25, %v249_v63  ;;  %v1023_v49 = vpack.c.bf16 %v570_v53, %v570_v53  ;;  %v572_v40 = vmax.f32 %v508_v18, 0.0 }
  0x8d   :  { %890 = vst.msk [vmem:[%s2448_s5 + $0xe0] sm:$0xf] %vm833_vm0, %v1022_v59  ;;  %v250_v56 = vmul.f32 %v1157_v21, %v1799_v37  ;;  %v1285_v23 = vunpack.c.h.bf16 %v1347_v8  ;;  %v1024_v0 = vpack.c.bf16 %v571_v28, %v571_v28  ;;  %v573_v3 = vmax.f32 %v509_v34, 0.0 }
  0x8e   :  { %v574_v57 = vmax.f32 %v510_v36, 0.0  ;;  %v511_v48 = vadd.f32 %v1284_v43, %v319_v61  ;;  %891 = vst.msk [vmem:[%s2448_s5 + $0xe4] sm:$0xf] %vm833_vm0, %v1023_v49  ;;  %v1025_v4 = vpack.c.bf16 %v572_v40, %v572_v40 }
  0x8f   :  { %v320_v6 = vadd.f32 %v1830_v25, %v250_v56  ;;  %892 = vst.msk [vmem:[%s2448_s5 + $0xe8] sm:$0xf] %vm833_vm0, %v1024_v0  ;;  %v1026_v19 = vpack.c.bf16 %v573_v3, %v573_v3 }
  0x90   :  { %v1027_v37 = vpack.c.bf16 %v574_v57, %v574_v57  ;;  %v575_v54 = vmax.f32 %v511_v48, 0.0  ;;  %893 = vst.msk [vmem:[%s2448_s5 + $0xec] sm:$0xf] %vm833_vm0, %v1025_v4 }
  0x91   :  { %v512_v1 = vadd.f32 %v1285_v23, %v320_v6  ;;  %894 = vst.msk [vmem:[%s2448_s5 + $0xf0] sm:$0xf] %vm833_vm0, %v1026_v19 }
  0x92   :  { %895 = vst.msk [vmem:[%s2448_s5 + $0xf4] sm:$0xf] %vm833_vm0, %v1027_v37  ;;  %v1028_v25 = vpack.c.bf16 %v575_v54, %v575_v54 }
  0x93   :  { %v576_v42 = vmax.f32 %v512_v1, 0.0 }
  0x94   :  { %896 = vst.msk [vmem:[%s2448_s5 + $0xf8] sm:$0xf] %vm833_vm0, %v1028_v25 }
  0x95   :  { %v1029_v5 = vpack.c.bf16 %v576_v42, %v576_v42 }
  0x97   :  { %897 = vst.msk [vmem:[%s2448_s5 + $0xfc] sm:$0xf] %vm833_vm0, %v1029_v5 }

// kernel: bottleneck_forward.5
= control target key start
LH: loop header
LB: loop body
LE: loop exit
PB: predicated region body
PF: predicated region fallthrough
CT: control target
= control target key end

     0   :  { %s6831_s21 = smov 0   ;;  %s7932_s0 = inlined_call_operand.vmem [shape: bf16[2,16,16,128], index: 0, kind: input, shape index: {}]   ;;  %s7933_s1 = inlined_call_operand.vmem [shape: f32[1,2,128], index: 1, kind: input, shape index: {}]   ;;  %s7934_s2 = inlined_call_operand.vmem [shape: f32[1,128], index: 2, kind: input, shape index: {}]   ;;  %s7935_s3 = inlined_call_operand.vmem [shape: f32[1,128], index: 3, kind: input, shape index: {}]   ;;  %s7936_s4 = inlined_call_operand.vmem [shape: bf16[1152,128], index: 4, kind: input, shape index: {}]   ;;  %s7937_s5 = inlined_call_operand.vmem [shape: bf16[2,256,128], index: 5, kind: output, shape index: {0}]   ;;  %s7938_s6 = inlined_call_operand.vmem [shape: f32[2,2,128], index: 6, kind: output, shape index: {1}]  }
   0x1 LB: > { %s5418_s22 = sadd.s32 4294967295, %s6792_s21   ;;  %p5422_p0 = scmp.ge.s32.totalorder %s6792_s21, 1  ;;  %s6792_s21 = sphi %s6831_s21, %s17_s21  }
   0x2   : > { %p215_p1 = scmp.lt.s32.totalorder %s6792_s21, 3 }
   0x4   : > { %p216_p2 = pnand %p5422_p0, %p215_p1 }
   0x6   : > { %219 = sbr.rel (%p216_p2) target bundleno = 632 (0x278), region = 40 }
   0xd   : > { %v6672_v0 = vld [vmem:[%s7936_s4 + $0x40] sm:$0xff]   ;;  %v6794_v2 = vmov 0   ;;  %v6674_v3 = vld [vmem:[%s7936_s4 + $0x48] sm:$0xff]   ;;  %v6676_v5 = vld [vmem:[%s7936_s4 + $0x50] sm:$0xff]   ;;  %vm987_vm0 = vcmask 1043456   ;;  %p249_p3 = scmp.lt.s32.totalorder %s5418_s22, 1  ;;  %v317_v32 = vlaneseq }
   0xe   : > { %v6673_v1 = vld [vmem:[%s7936_s4 + $0x100] sm:$0xff]   ;;  %264 = vst [vmem:[#allocation2] sm:$0xff] %v6794_v2  ;;  %265 = vst [vmem:[#allocation2 + $0x8] sm:$0xff] %v6794_v2  ;;  %5958 = vmatprep.subr.bf16.mxu1 %v6672_v0  ;;  %v6675_v4 = vld [vmem:[%s7936_s4 + $0x108] sm:$0xff]   ;;  %v6795_v30 = vmov 1966171168  }
   0xf   : > { %266 = vst [vmem:[#allocation2 + $0x10] sm:$0xff] %v6794_v2  ;;  %267 = vst [vmem:[#allocation2 + $0x18] sm:$0xff] %v6794_v2  ;;  %6150 = vmatprep.subr.bf16.mxu0 %v6673_v1  ;;  %5959 = vmatpush3.bf16.msra.mxu1 %v6672_v0  ;;  %v6677_v6 = vld [vmem:[%s7936_s4 + $0x110] sm:$0xff]   ;;  %v6678_v7 = vld [vmem:[%s7936_s4 + $0x58] sm:$0xff]   ;;  %s7944_s22 = smov (!%p249_p3, %s5418_s22), 1  ;;  %v315_v31 = vunpack.c.l.s4 %v6795_v30  ;;  %v6921_v35 = vshrl.u32 %v317_v32, 7 }
  0x10   : > { %268 = vst [vmem:[#allocation2 + $0x20] sm:$0xff] %v6794_v2  ;;  %269 = vst [vmem:[#allocation2 + $0x28] sm:$0xff] %v6794_v2  ;;  %6151 = vmatpush3.bf16.msra.mxu0 %v6673_v1  ;;  %5960 = vmatprep.subr.bf16.mxu1 %v6674_v3  ;;  %v6679_v8 = vld [vmem:[%s7936_s4 + $0x118] sm:$0xff]   ;;  %v6680_v9 = vld [vmem:[%s7936_s4 + $0x60] sm:$0xff]   ;;  %s5534_s13 = sshll.u32 %s7944_s22, 7  ;;  %vm5329_vm3 = vcmask 1040384  }
  0x11   : > { %270 = vst [vmem:[#allocation2 + $0x30] sm:$0xff] %v6794_v2  ;;  %271 = vst [vmem:[#allocation2 + $0x38] sm:$0xff] %v6794_v2  ;;  %6152 = vmatprep.subr.bf16.mxu0 %v6675_v4  ;;  %v6681_v10 = vld [vmem:[%s7936_s4 + $0x120] sm:$0xff]   ;;  %v6682_v11 = vld [vmem:[%s7936_s4 + $0x68] sm:$0xff]   ;;  %s6918_s18 = scalar_lea.vmem %s7932_s0, %s5534_s13  ;;  %v316_v34 = vunpack.c.0.s8 %v315_v31  ;;  %v400_v42 = vsub.s32 0, %v6921_v35  ;;  %s7903_s26 = scalar_lea.vmem %s7937_s5, %s5534_s13 }
  0x12   : > { %272 = vst [vmem:[#allocation2 + $0x40] sm:$0xff] %v6794_v2  ;;  %273 = vst [vmem:[#allocation2 + $0x48] sm:$0xff] %v6794_v2  ;;  %v300_v14 = vld [vmem:[%s7933_s1] sm:$0x3]  ;;  %v6683_v15 = vld [vmem:[%s7936_s4 + $0x128] sm:$0xff]   ;;  %s5427_s13 = sshll.u32 %s7944_s22, 1 }
  0x13   : > { %274 = vst [vmem:[#allocation2 + $0x50] sm:$0xff] %v6794_v2  ;;  %275 = vst [vmem:[#allocation2 + $0x58] sm:$0xff] %v6794_v2  ;;  %5961 = vmatpush3.bf16.msra.mxu1 %v6674_v3  ;;  %v6878_v18 = vmul.f32 0.001953125, %v300_v14  ;;  %v6684_v20 = vld [vmem:[%s7936_s4 + $0x70] sm:$0xff]   ;;  %v6686_v24 = vld [vmem:[%s7936_s4 + $0x78] sm:$0xff]   ;;  %v319_v40 = vsub.s32 %v316_v34, %v6921_v35  ;;  %s262_s29 = scalar_lea.vmem %s7938_s6, %s5427_s13 }
  0x14   : > { %276 = vst [vmem:[#allocation2 + $0x60] sm:$0xff] %v6794_v2  ;;  %277 = vst [vmem:[#allocation2 + $0x68] sm:$0xff] %v6794_v2  ;;  %6153 = vmatpush3.bf16.msra.mxu0 %v6675_v4  ;;  %5962 = vmatprep.subr.bf16.mxu1 %v6676_v5  ;;  %v6685_v22 = vld [vmem:[%s7936_s4 + $0x130] sm:$0xff]   ;;  %v6687_v26 = vld [vmem:[%s7936_s4 + $0x138] sm:$0xff]   ;;  %vm634_vm1 = vsmask.f32 4352 }
  0x15   : > { %278 = vst [vmem:[#allocation2 + $0x70] sm:$0xff] %v6794_v2  ;;  %279 = vst [vmem:[#allocation2 + $0x78] sm:$0xff] %v6794_v2  ;;  %6154 = vmatprep.subr.bf16.mxu0 %v6677_v6  ;;  %v603_v12 = vld [vmem:[#allocation2 + $0x8] sm:$0xf]  ;;  %v939_v13 = vld [vmem:[#allocation2] sm:$0xf0]  ;;  %v305_v21 = vmul.f32 %v6878_v18, %v6878_v18 }
  0x16   : > { %280 = vst [vmem:[#allocation2 + $0x80] sm:$0xff] %v6794_v2  ;;  %281 = vst [vmem:[#allocation2 + $0x88] sm:$0xff] %v6794_v2  ;;  %v988_v16 = vrot.slane %v939_v13, 4  ;;  %v989_v17 = vrot.slane %v603_v12, 4  ;;  %v6905_v29 = vld [vmem:[%s7936_s4] sm:$0xff]   ;;  %v644_v36 = vshrl.u32 %v603_v12, 16 }
  0x17   : > { %282 = vst [vmem:[#allocation2 + $0x90] sm:$0xff] %v6794_v2  ;;  %283 = vst [vmem:[#allocation2 + $0x98] sm:$0xff] %v6794_v2  ;;  %5963 = vmatpush3.bf16.msra.mxu1 %v6676_v5  ;;  %v307_v23 = vrot.slane %v305_v21, 7  ;;  %v6911_v33 = vld [vmem:[%s7936_s4 + $0x140] sm:$0xff]   ;;  %v647_v38 = vshll.u32 %v603_v12, 16  ;;  %v6928_v39 = vld [vmem:[%s6918_s18 + $0x8] sm:$0xff]  }
  0x18   : > { %284 = vst [vmem:[#allocation2 + $0xa0] sm:$0xff] %v6794_v2  ;;  %285 = vst [vmem:[#allocation2 + $0xa8] sm:$0xff] %v6794_v2  ;;  %6155 = vmatpush3.bf16.msra.mxu0 %v6677_v6  ;;  %5964 = vmatprep.subr.bf16.mxu1 %v6678_v7  ;;  %v990_v19 = vsel %vm987_vm0, %v988_v16, %v989_v17  ;;  %v6925_v37 = vld [vmem:[%s6918_s18] sm:$0xff]   ;;  %v6932_v41 = vld [vmem:[%s6918_s18 + $0x10] sm:$0xff]   ;;  %v646_v45 = vrot.slane %v644_v36, 3  ;;  %v5574_v51 = vunpack.c.l.bf16 %v6928_v39  ;;  %v5575_v55 = vunpack.c.h.bf16 %v6928_v39 }
  0x19   : > { %286 = vst [vmem:[#allocation2 + $0xb0] sm:$0xff] %v6794_v2  ;;  %287 = vst [vmem:[#allocation2 + $0xb8] sm:$0xff] %v6794_v2  ;;  %6156 = vmatprep.subr.bf16.mxu0 %v6679_v8  ;;  %5974 = vmatprep.mubr.bf16.mxu1 %v990_v19  ;;  %v309_v25 = vsub.f32 %v6878_v18, %v307_v23  ;;  %v6936_v43 = vld [vmem:[%s6918_s18 + $0x18] sm:$0xff]   ;;  %v6939_v44 = vld [vmem:[%s6918_s18 + $0x20] sm:$0xff]   ;;  %v649_v47 = vrot.slane %v647_v38, 4  ;;  %v5570_v49 = vunpack.c.l.bf16 %v6925_v37  ;;  %v5571_v50 = vunpack.c.h.bf16 %v6925_v37 }
  0x1a   : > { %288 = vst [vmem:[#allocation2 + $0xc0] sm:$0xff] %v6794_v2  ;;  %289 = vst [vmem:[#allocation2 + $0xc8] sm:$0xff] %v6794_v2  ;;  %v6942_v46 = vld [vmem:[%s6918_s18 + $0x28] sm:$0xff]   ;;  %v6948_v52 = vld [vmem:[%s6918_s18 + $0x30] sm:$0xff]   ;;  %v5578_v56 = vunpack.c.l.bf16 %v6932_v41  ;;  %v5579_v57 = vunpack.c.h.bf16 %v6932_v41  ;;  %v5582_v60 = vunpack.c.l.bf16 %v6936_v43  ;;  %v5583_v61 = vunpack.c.h.bf16 %v6936_v43 }
  0x1b   : > { %290 = vst [vmem:[#allocation2 + $0xd0] sm:$0xff] %v6794_v2  ;;  %291 = vst [vmem:[#allocation2 + $0xd8] sm:$0xff] %v6794_v2  ;;  %5965 = vmatpush3.bf16.msra.mxu1 %v6678_v7  ;;  %v310_v27 = vmax.f32 %v309_v25, 0.0  ;;  %v6951_v53 = vld [vmem:[%s6918_s18 + $0x38] sm:$0xff]   ;;  %v6957_v58 = vld [vmem:[%s6918_s18 + $0x40] sm:$0xff]   ;;  %v5586_v62 = vunpack.c.l.bf16 %v6939_v44  ;;  %v5587_v63 = vunpack.c.h.bf16 %v6939_v44  ;;  %v5591_v3 = vunpack.c.h.bf16 %v6942_v46 }
  0x1c   : > { %292 = vst [vmem:[#allocation2 + $0xe0] sm:$0xff] %v6794_v2  ;;  %293 = vst [vmem:[#allocation2 + $0xe8] sm:$0xff] %v6794_v2  ;;  %6157 = vmatpush3.bf16.msra.mxu0 %v6679_v8  ;;  %5966 = vmatprep.subr.bf16.mxu1 %v6680_v9  ;;  %v302_v59 = vld [vmem:[%s7934_s2] sm:$0x1]  ;;  %v6967_v0 = vld [vmem:[%s6918_s18 + $0x48] sm:$0xff]   ;;  %v650_v6 = vor.u32 %v649_v47, %v646_v45  ;;  %v5594_v7 = vunpack.c.l.bf16 %v6948_v52  ;;  %v5595_v8 = vunpack.c.h.bf16 %v6948_v52  ;;  %v5598_v14 = vunpack.c.l.bf16 %v6951_v53 }
  0x1d   : > { %294 = vst [vmem:[#allocation2 + $0xf0] sm:$0xff] %v6794_v2  ;;  %295 = vst [vmem:[#allocation2 + $0xf8] sm:$0xff] %v6794_v2  ;;  %6158 = vmatprep.subr.bf16.mxu0 %v6681_v10  ;;  %v311_v28 = vadd.f32 1e-05, %v310_v27  ;;  %v6972_v4 = vld [vmem:[%s6918_s18 + $0x50] sm:$0xff]   ;;  %v5602_v16 = vunpack.c.l.bf16 %v6957_v58  ;;  %v5603_v17 = vunpack.c.h.bf16 %v6957_v58  ;;  %v5606_v19 = vunpack.c.l.bf16 %v6967_v0 }
  0x1e   : > { %296 = vst [vmem:[#allocation2 + $0x100] sm:$0xff] %v6794_v2  ;;  %297 = vst [vmem:[#allocation2 + $0x108] sm:$0xff] %v6794_v2  ;;  %v602_v5 = vld [vmem:[#allocation2] sm:$0xf8]  ;;  %v6991_v21 = vld [vmem:[%s6918_s18 + $0x70] sm:$0xff]   ;;  %v5607_v25 = vunpack.c.h.bf16 %v6967_v0  ;;  %v5611_v27 = vunpack.c.h.bf16 %v6972_v4 }
  0x1f   : > { %298 = vst [vmem:[#allocation2 + $0x110] sm:$0xff] %v6794_v2  ;;  %299 = vst [vmem:[#allocation2 + $0x118] sm:$0xff] %v6794_v2  ;;  %5967 = vmatpush3.bf16.msra.mxu1 %v6680_v9  ;;  %6744 = vrsqrt.f32 %v311_v28  ;;  %v5590_v2 = vunpack.c.l.bf16 %v6942_v46  ;;  %v6977_v9 = vld [vmem:[%s6918_s18 + $0x58] sm:$0xff]   ;;  %v639_v12 = vshll.u32 %v602_v5, 16  ;;  %v303_v28 = vld [vmem:[%s7935_s3] sm:$0x1]  ;;  %v5626_v41 = vunpack.c.l.bf16 %v6991_v21 }
  0x20   : > { %6159 = vmatpush3.bf16.msra.mxu0 %v6681_v10  ;;  %5968 = vmatprep.subr.bf16.mxu1 %v6682_v11  ;;  %v6980_v10 = vld [vmem:[%s6918_s18 + $0x60] sm:$0xff]   ;;  %v5614_v30 = vunpack.c.l.bf16 %v6977_v9  ;;  %v5615_v31 = vunpack.c.h.bf16 %v6977_v9  ;;  %v7167_v9 = vld [vmem:[%s7936_s4 + $0x18] sm:$0xff]   ;;  %vm1502_vm2 = vsmask.f32 3328 }
  0x21   : > { %6160 = vmatprep.subr.bf16.mxu0 %v6683_v15  ;;  %v641_v23 = vrot.slane %v639_v12, 4  ;;  %v5618_v32 = vunpack.c.l.bf16 %v6980_v10  ;;  %v5619_v38 = vunpack.c.h.bf16 %v6980_v10 }
  0x23   : > { %5969 = vmatpush3.bf16.msra.mxu1 %v6682_v11  ;;  %v636_v11 = vshrl.u32 %v602_v5, 16 }
  0x24   : > { %6161 = vmatpush3.bf16.msra.mxu0 %v6683_v15  ;;  %5970 = vmatprep.subr.bf16.mxu1 %v6684_v20  ;;  %v5599_v15 = vunpack.c.h.bf16 %v6951_v53 }
  0x25   : > { %6162 = vmatprep.subr.bf16.mxu0 %v6685_v22 }
  0x27   : > { %5971 = vmatpush3.bf16.msra.mxu1 %v6684_v20  ;;  %v6988_v20 = vld [vmem:[%s6918_s18 + $0x68] sm:$0xff]  }
  0x28   : > { %6163 = vmatpush3.bf16.msra.mxu0 %v6685_v22  ;;  %5972 = vmatprep.subr.bf16.mxu1 %v6686_v24  ;;  %v638_v22 = vrot.slane %v636_v11, 3  ;;  %v5622_v39 = vunpack.c.l.bf16 %v6988_v20 }
  0x29   : > { %6164 = vmatprep.subr.bf16.mxu0 %v6687_v26  ;;  %v6745_v48 = vpop.eup %6744 }
  0x2a   : > { %v320_v54 = vrot.slane %v6745_v48, %v319_v40  ;;  %v642_v34 = vor.u32 %v641_v23, %v638_v22 }
  0x2b   : > { %5973 = vmatpush3.bf16.msra.mxu1 %v6686_v24 }
  0x2c   : > { %6165 = vmatpush3.bf16.msra.mxu0 %v6687_v26  ;;  %6006 = vmatprep.subr.bf16.mxu1 %v6905_v29  ;;  %v321_v1 = vcombine.high %v320_v54, %v320_v54  ;;  %v5610_v26 = vunpack.c.l.bf16 %v6972_v4  ;;  %v7013_v44 = vsel %vm634_vm1, %v642_v34, %v650_v6 }
  0x2d   : > { %6198 = vmatprep.subr.bf16.mxu0 %v6911_v33 }
  0x2e   : > { %v328_v13 = vrot.slane %v321_v1, %v319_v40  ;;  %v5623_v40 = vunpack.c.h.bf16 %v6988_v20 }
  0x30   : > { %v330_v24 = vmul.f32 %v328_v13, %v302_v59 }
  0x32   : > { %v331_v36 = vmul.f32 %v330_v24, %v6878_v18  ;;  %v7005_v37 = vrot.slane %v330_v24, %v400_v42 }
  0x34   : > { %v332_v45 = vsub.f32 %v303_v28, %v331_v36  ;;  %v403_v18 = vmul.f32 %v5570_v49, %v7005_v37  ;;  %v404_v46 = vmul.f32 %v5571_v50, %v7005_v37  ;;  %v405_v47 = vmul.f32 %v5574_v51, %v7005_v37 }
  0x35   : > { %v406_v48 = vmul.f32 %v5575_v55, %v7005_v37  ;;  %v407_v52 = vmul.f32 %v5578_v56, %v7005_v37  ;;  %v408_v54 = vmul.f32 %v5579_v57, %v7005_v37  ;;  %v409_v59 = vmul.f32 %v5582_v60, %v7005_v37 }
  0x36   : > { %v7024_v1 = vrot.slane %v332_v45, %v400_v42  ;;  %v410_v5 = vmul.f32 %v5583_v61, %v7005_v37  ;;  %v411_v49 = vmul.f32 %v5586_v62, %v7005_v37  ;;  %v412_v50 = vmul.f32 %v5587_v63, %v7005_v37 }
  0x37   : > { %v413_v51 = vmul.f32 %v5590_v2, %v7005_v37  ;;  %v414_v55 = vmul.f32 %v5591_v3, %v7005_v37  ;;  %v415_v56 = vmul.f32 %v5594_v7, %v7005_v37  ;;  %v416_v57 = vmul.f32 %v5595_v8, %v7005_v37 }
  0x38   : > { %v441_v60 = vadd.f32 %v7024_v1, %v403_v18  ;;  %v442_v35 = vadd.f32 %v7024_v1, %v404_v46  ;;  %v443_v42 = vadd.f32 %v7024_v1, %v405_v47  ;;  %v444_v61 = vadd.f32 %v7024_v1, %v406_v48 }
  0x39   : > { %v445_v62 = vadd.f32 %v7024_v1, %v407_v52  ;;  %v446_v63 = vadd.f32 %v7024_v1, %v408_v54  ;;  %v447_v2 = vadd.f32 %v7024_v1, %v409_v59  ;;  %v448_v3 = vadd.f32 %v7024_v1, %v410_v5 }
  0x3a   : > { %v473_v6 = vmax.f32 %v441_v60, 0.0  ;;  %v474_v7 = vmax.f32 %v442_v35, 0.0  ;;  %v475_v11 = vmax.f32 %v443_v42, 0.0  ;;  %v476_v8 = vmax.f32 %v444_v61, 0.0 }
  0x3b   : > { %v477_v12 = vmax.f32 %v445_v62, 0.0  ;;  %v478_v13 = vmax.f32 %v446_v63, 0.0  ;;  %v479_v22 = vmax.f32 %v447_v2, 0.0  ;;  %v480_v23 = vmax.f32 %v448_v3, 0.0 }
  0x3c   : > { %v505_v24 = vpack.c.bf16 %v474_v7, %v473_v6  ;;  %v506_v28 = vpack.c.bf16 %v476_v8, %v475_v11  ;;  %v449_v34 = vadd.f32 %v7024_v1, %v411_v49  ;;  %v450_v36 = vadd.f32 %v7024_v1, %v412_v50 }
  0x3d   : > { %v507_v45 = vpack.c.bf16 %v478_v13, %v477_v12  ;;  %v508_v18 = vpack.c.bf16 %v480_v23, %v479_v22  ;;  %v451_v46 = vadd.f32 %v7024_v1, %v413_v51  ;;  %v452_v47 = vadd.f32 %v7024_v1, %v414_v55 }
  0x3e   : > { %v537_v48 = vrot.slane %v505_v24, 4  ;;  %v538_v52 = vrot.slane %v506_v28, 4  ;;  %v481_v54 = vmax.f32 %v449_v34, 0.0  ;;  %v482_v59 = vmax.f32 %v450_v36, 0.0  ;;  %v7084_v36 = vld [vmem:[%s7936_s4 + $0x8] sm:$0xff]  }
  0x3f   : > { %v539_v5 = vrot.slane %v507_v45, 4  ;;  %v540_v60 = vrot.slane %v508_v18, 4  ;;  %v483_v35 = vmax.f32 %v451_v46, 0.0  ;;  %v484_v42 = vmax.f32 %v452_v47, 0.0 }
  0x40   : > { %570 = vst [vmem:[#allocation2 + $0x18] ss:$-4 sps:$4 sm:$0xff] %v537_v48   ;;  %572 = vst [vmem:[#allocation2 + $0x28] ss:$-4 sps:$4 sm:$0xff] %v538_v52   ;;  %v509_v61 = vpack.c.bf16 %v482_v59, %v481_v54  ;;  %v453_v49 = vadd.f32 %v7024_v1, %v415_v56  ;;  %v454_v50 = vadd.f32 %v7024_v1, %v416_v57 }
  0x41   : > { %v417_v51 = vmul.f32 %v5598_v14, %v7005_v37  ;;  %574 = vst [vmem:[#allocation2 + $0x38] ss:$-4 sps:$4 sm:$0xff] %v539_v5   ;;  %576 = vst [vmem:[#allocation2 + $0x48] ss:$-4 sps:$4 sm:$0xff] %v540_v60   ;;  %v510_v55 = vpack.c.bf16 %v484_v42, %v483_v35  ;;  %v418_v62 = vmul.f32 %v5599_v15, %v7005_v37 }
  0x42   : > { %v419_v63 = vmul.f32 %v5602_v16, %v7005_v37  ;;  %v420_v56 = vmul.f32 %v5603_v17, %v7005_v37  ;;  %v541_v57 = vrot.slane %v509_v61, 4  ;;  %v485_v2 = vmax.f32 %v453_v49, 0.0 }
  0x43   : > { %v486_v3 = vmax.f32 %v454_v50, 0.0  ;;  %v455_v14 = vadd.f32 %v7024_v1, %v417_v51  ;;  %v542_v6 = vrot.slane %v510_v55, 4  ;;  %v456_v7 = vadd.f32 %v7024_v1, %v418_v62 }
  0x44   : > { %v457_v11 = vadd.f32 %v7024_v1, %v419_v63  ;;  %v458_v53 = vadd.f32 %v7024_v1, %v420_v56  ;;  %578 = vst [vmem:[#allocation2 + $0x58] ss:$-4 sps:$4 sm:$0xff] %v541_v57   ;;  %v421_v58 = vmul.f32 %v5606_v19, %v7005_v37  ;;  %v422_v16 = vmul.f32 %v5607_v25, %v7005_v37  ;;  %v7112_v56 = vld [vmem:[%s7936_s4 + $0x148] sm:$0xff]  }
  0x45   : > { %v511_v15 = vpack.c.bf16 %v486_v3, %v485_v2  ;;  %v487_v8 = vmax.f32 %v455_v14, 0.0  ;;  %580 = vst [vmem:[#allocation2 + $0x68] ss:$-4 sps:$4 sm:$0xff] %v542_v6   ;;  %v488_v17 = vmax.f32 %v456_v7, 0.0  ;;  %v423_v22 = vmul.f32 %v5610_v26, %v7005_v37 }
  0x46   : > { %v489_v12 = vmax.f32 %v457_v11, 0.0  ;;  %v490_v13 = vmax.f32 %v458_v53, 0.0  ;;  %v7073_v24 = vadd.f32 %v7024_v1, %v421_v58  ;;  %v7076_v28 = vadd.f32 %v7024_v1, %v422_v16  ;;  %v7122_v11 = vld [vmem:[%s7936_s4 + $0x10] sm:$0xff]  }
  0x47   : > { %v543_v23 = vrot.slane %v511_v15, 4  ;;  %v424_v0 = vmul.f32 %v5611_v27, %v7005_v37  ;;  %v605_v19 = vld [vmem:[#allocation2 + $0x18] sm:$0xf]  ;;  %v940_v25 = vld [vmem:[#allocation2 + $0x10] sm:$0xf0]  ;;  %v7086_v26 = vpack.c.bf16 %v488_v17, %v487_v8  ;;  %v7091_v18 = vadd.f32 %v7024_v1, %v423_v22 }
  0x48   : > { %v2049_v34 = vld [vmem:[#allocation2 + $0x18] sm:$0xf]  ;;  %v7088_v45 = vpack.c.bf16 %v490_v13, %v489_v12  ;;  %v425_v4 = vmul.f32 %v5614_v30, %v7005_v37  ;;  %v661_v27 = vshrl.u32 %v605_v19, 16  ;;  %v664_v46 = vshll.u32 %v605_v19, 16  ;;  %v7096_v52 = vld [vmem:[#allocation2 + $0x10] sm:$0xf0] }
  0x49   : > { %v991_v47 = vrot.slane %v940_v25, 4  ;;  %v992_v48 = vrot.slane %v605_v19, 4  ;;  %582 = vst [vmem:[#allocation2 + $0x78] ss:$-4 sps:$4 sm:$0xff] %v543_v23   ;;  %v1521_v54 = vshrl.u32 %v940_v25, 16  ;;  %v1524_v59 = vshll.u32 %v940_v25, 16 }
  0x4a   : > { %v2673_v5 = vrot.slane %v7096_v52, 4  ;;  %v2674_v60 = vrot.slane %v2049_v34, 4  ;;  %v2051_v35 = vld [vmem:[#allocation2 + $0x28] sm:$0xf]  ;;  %v7099_v42 = vrot.slane %v661_v27, 3  ;;  %v7101_v61 = vrot.slane %v664_v46, 4 }
  0x4b   : > { %v993_v49 = vsel %vm987_vm0, %v991_v47, %v992_v48  ;;  %v2106_v30 = vshrl.u32 %v2051_v35, 16  ;;  %v2626_v50 = vld [vmem:[#allocation2 + $0x20] sm:$0xf0]  ;;  %v7104_v51 = vrot.slane %v1521_v54, 4  ;;  %v7106_v55 = vrot.slane %v1524_v59, 5  ;;  %v7145_v47 = vld [vmem:[%s7936_s4 + $0x150] sm:$0xff]  }
  0x4c   : > { %5975 = vmatmul.mubr.bf16.vlgmr.msra.gmra.mrb[0].mxu1 %v993_v49  ;;  %v2675_v62 = vsel %vm987_vm0, %v2673_v5, %v2674_v60  ;;  %v2109_v63 = vshll.u32 %v2051_v35, 16  ;;  %v7114_v57 = vld [vmem:[#allocation2 + $0x28] sm:$0xf]  ;;  %v2676_v3 = vrot.slane %v2626_v50, 4  ;;  %v2677_v14 = vrot.slane %v2051_v35, 4 }
  0x4d   : > { %6166 = vmatprep.mubr.bf16.mxu0 %v2675_v62  ;;  %6007 = vmatpush3.bf16.msra.mxu1 %v6905_v29  ;;  %v7117_v2 = vrot.slane %v2106_v30, 3  ;;  %v3028_v6 = vshrl.u32 %v2626_v50, 16  ;;  %v941_v7 = vld [vmem:[#allocation2 + $0x20] sm:$0xf0]  ;;  %v3031_v15 = vshll.u32 %v2626_v50, 16  ;;  %v995_v58 = vrot.slane %v7114_v57, 4 }
  0x4e   : > { %v7124_v53 = vrot.slane %v2109_v63, 4  ;;  %v994_v8 = vrot.slane %v941_v7, 4  ;;  %v7127_v16 = vld [vmem:[#allocation2 + $0x38] sm:$0xf]  ;;  %6008 = vmatprep.subr.bf16.mxu1 %v7084_v36  ;;  %v2678_v29 = vsel %vm987_vm0, %v2676_v3, %v2677_v14  ;;  %v942_v12 = vld [vmem:[#allocation2 + $0x30] sm:$0xf0]  ;;  %v7135_v23 = vadd.f32 %v7024_v1, %v424_v0 }
  0x4f   : > { %v7131_v17 = vrot.slane %v3028_v6, 4  ;;  %v998_v13 = vrot.slane %v7127_v16, 4  ;;  %v2053_v22 = vld [vmem:[#allocation2 + $0x38] sm:$0xf]  ;;  %6167 = vmatmul.mubr.bf16.vlgmr.msra.gmra.mrb[0].mxu0 %v2678_v29  ;;  %v7137_v19 = vrot.slane %v3031_v15, 5  ;;  %v997_v34 = vrot.slane %v942_v12, 4 }
  0x50   : > { %7939 = vst [vmem:[#allocation3_spill] sm:$0xff] %v7124_v53  ;;  %v996_v25 = vsel %vm987_vm0, %v994_v8, %v995_v58  ;;  %v7140_v27 = vld [vmem:[#allocation2 + $0x30] sm:$0xf0]  ;;  %v2680_v46 = vrot.slane %v2053_v22, 4  ;;  %6199 = vmatpush3.bf16.msra.mxu0 %v6911_v33  ;;  %v2055_v48 = vld [vmem:[#allocation2 + $0x48] sm:$0xf]  ;;  %v426_v5 = vmul.f32 %v5615_v31, %v7005_v37  ;;  %v7156_v60 = vadd.f32 %v7024_v1, %v425_v4 }
  0x51   : > { %5978 = vmatprep.mubr.bf16.mxu1 %v996_v25  ;;  %v2679_v0 = vrot.slane %v7140_v27, 4  ;;  %v7149_v54 = vld [vmem:[#allocation2 + $0x40] sm:$0xf0]  ;;  %v544_v59 = vrot.slane %v7086_v26, 4  ;;  %6200 = vmatprep.subr.bf16.mxu0 %v7112_v56  ;;  %v999_v35 = vsel %vm987_vm0, %v997_v34, %v998_v13  ;;  %v2683_v49 = vrot.slane %v2055_v48, 4  ;;  %v7183_v6 = vld [vmem:[%s7936_s4 + $0x158] sm:$0xff]  }
  0x52   : > { %6009 = vmatpush3.bf16.msra.mxu1 %v7084_v36  ;;  %v2682_v33 = vrot.slane %v7149_v54, 4  ;;  %v7162_v30 = vld [vmem:[#allocation2 + $0x48] sm:$0xf]  ;;  %v943_v50 = vld [vmem:[#allocation2 + $0x40] sm:$0xf0]  ;;  %v7177_v3 = vadd.f32 %v7024_v1, %v426_v5  ;;  %v427_v29 = vmul.f32 %v5618_v32, %v7005_v37  ;;  %v493_v31 = vmax.f32 %v7091_v18, 0.0 }
  0x53   : > { %v2681_v26 = vsel %vm987_vm0, %v2679_v0, %v2680_v46  ;;  %v1000_v4 = vrot.slane %v943_v50, 4  ;;  %v1001_v62 = vrot.slane %v7162_v30, 4  ;;  %v7173_v36 = vld [vmem:[#allocation2 + $0x58] sm:$0xf]  ;;  %v944_v63 = vld [vmem:[#allocation2 + $0x50] sm:$0xf0]  ;;  %6010 = vmatprep.subr.bf16.mxu1 %v7122_v11  ;;  %v428_v46 = vmul.f32 %v5619_v38, %v7005_v37 }
  0x54   : > { %584 = vst [vmem:[#allocation2 + $0x88] ss:$-4 sps:$4 sm:$0xff] %v544_v59   ;;  %5979 = vmatmul.mubr.bf16.gmra.mrb[4].mxu1 %v999_v35  ;;  %6170 = vmatprep.mubr.bf16.mxu0 %v2681_v26  ;;  %v2684_v14 = vsel %vm987_vm0, %v2682_v33, %v2683_v49  ;;  %v1003_v7 = vrot.slane %v944_v63, 4  ;;  %v1004_v15 = vrot.slane %v7173_v36, 4  ;;  %v2057_v8 = vld [vmem:[#allocation2 + $0x58] sm:$0xf]  ;;  %v7208_v35 = vadd.f32 %v7024_v1, %v427_v29 }
  0x55   : > { %v7186_v58 = vld [vmem:[#allocation2 + $0x50] sm:$0xf0]  ;;  %6201 = vmatpush3.bf16.msra.mxu0 %v7112_v56  ;;  %v1002_v12 = vsel %vm987_vm0, %v1000_v4, %v1001_v62  ;;  %v2686_v22 = vrot.slane %v2057_v8, 4  ;;  %v2059_v25 = vld [vmem:[#allocation2 + $0x68] sm:$0xf]  ;;  %v6700_v5 = vld [vmem:[%s7936_s4 + $0x20] sm:$0xff]   ;;  %v7216_v26 = vadd.f32 %v7024_v1, %v428_v46 }
  0x56   : > { %v2685_v13 = vrot.slane %v7186_v58, 4  ;;  %v7194_v34 = vld [vmem:[#allocation2 + $0x60] sm:$0xf0]  ;;  %6202 = vmatprep.subr.bf16.mxu0 %v7145_v47  ;;  %5982 = vmatprep.mubr.bf16.mxu1 %v1002_v12  ;;  %v1005_v0 = vsel %vm987_vm0, %v1003_v7, %v1004_v15  ;;  %v2689_v56 = vrot.slane %v2059_v25, 4  ;;  %v7202_v48 = vld [vmem:[#allocation2 + $0x68] sm:$0xf] }
  0x57   : > { %v2688_v32 = vrot.slane %v7194_v34, 4  ;;  %v945_v59 = vld [vmem:[#allocation2 + $0x60] sm:$0xf0]  ;;  %6011 = vmatpush3.bf16.msra.mxu1 %v7122_v11  ;;  %v1007_v33 = vrot.slane %v7202_v48, 4  ;;  %v7213_v49 = vld [vmem:[#allocation2 + $0x78] sm:$0xf]  ;;  %6171 = vmatmul.mubr.bf16.gmra.mrb[4].mxu0 %v2684_v14  ;;  %v429_v11 = vmul.f32 %v5622_v39, %v7005_v37 }
  0x58   : > { %v2687_v10 = vsel %vm987_vm0, %v2685_v13, %v2686_v22  ;;  %v1006_v38 = vrot.slane %v945_v59, 4  ;;  %v946_v50 = vld [vmem:[#allocation2 + $0x70] sm:$0xf0]  ;;  %v1010_v63 = vrot.slane %v7213_v49, 4  ;;  %6012 = vmatprep.subr.bf16.mxu1 %v7167_v9  ;;  %v2061_v7 = vld [vmem:[#allocation2 + $0x78] sm:$0xf] }
  0x59   : > { %v2690_v4 = vsel %vm987_vm0, %v2688_v32, %v2689_v56  ;;  %v1009_v62 = vrot.slane %v946_v50, 4  ;;  %v7221_v15 = vld [vmem:[#allocation2 + $0x70] sm:$0xf0]  ;;  %6203 = vmatpush3.bf16.msra.mxu0 %v7145_v47  ;;  %6174 = vmatprep.mubr.bf16.mxu0 %v2687_v10  ;;  %v6695_v14 = vld [vmem:[%s7936_s4 + $0x160] sm:$0xff]   ;;  %v2692_v12 = vrot.slane %v2061_v7, 4  ;;  %v545_v13 = vrot.slane %v7088_v45, 4 }
  0x5a   : > { %v1008_v8 = vsel %vm987_vm0, %v1006_v38, %v1007_v33  ;;  %v2691_v29 = vrot.slane %v7221_v15, 4  ;;  %v2994_v22 = vld [vmem:[#allocation2 + $0x18] sm:$0x1f]  ;;  %6204 = vmatprep.subr.bf16.mxu0 %v7183_v6  ;;  %v7244_v32 = vmul.f32 %v5623_v40, %v7005_v37  ;;  %v7247_v56 = vadd.f32 %v7024_v1, %v429_v11  ;;  %v6702_v40 = vld [vmem:[%s7936_s4 + $0x28] sm:$0xff]  }
  0x5b   : > { %v7235_v25 = vsel %vm987_vm0, %v1009_v62, %v1010_v63  ;;  %v2063_v39 = vld [vmem:[#allocation2 + $0x88] sm:$0xf]  ;;  %v7237_v47 = vld [vmem:[#allocation2 + $0x80] sm:$0xf0]  ;;  %v7252_v45 = vmul.f32 %v5626_v41, %v7005_v37  ;;  %6013 = vmatpush3.bf16.msra.mxu1 %v7167_v9  ;;  %586 = vst [vmem:[#allocation2 + $0x98] ss:$-4 sps:$4 sm:$0xff] %v545_v13  }
  0x5c   : > { %v7239_v46 = vld [vmem:[#allocation2 + $0x88] sm:$0xf]  ;;  %v2693_v59 = vsel %vm987_vm0, %v2691_v29, %v2692_v12  ;;  %v2694_v10 = vrot.slane %v7237_v47, 4  ;;  %v2695_v38 = vrot.slane %v2063_v39, 4  ;;  %v947_v33 = vld [vmem:[#allocation2 + $0x80] sm:$0xf0]  ;;  %5983 = vmatmul.mubr.bf16.gmra.mrb[8].mxu1 %v1005_v0  ;;  %6014 = vmatprep.subr.bf16.mxu1 %v6700_v5 }
  0x5d   : > { %v1013_v20 = vrot.slane %v7239_v46, 4  ;;  %v1012_v50 = vrot.slane %v947_v33, 4  ;;  %v3011_v41 = vshrl.u32 %v7096_v52, 16  ;;  %v3014_v62 = vshll.u32 %v7096_v52, 16  ;;  %v2995_v9 = vld [vmem:[#allocation2 + $0x28] sm:$0x1f]  ;;  %6205 = vmatpush3.bf16.msra.mxu0 %v7183_v6  ;;  %5986 = vmatprep.mubr.bf16.mxu1 %v1008_v8 }
  0x5e   : > { %v3019_v63 = vshrl.u32 %v2994_v22, 16  ;;  %v7265_v7 = vsel %vm987_vm0, %v2694_v10, %v2695_v38  ;;  %v3022_v11 = vshll.u32 %v2994_v22, 16  ;;  %v3036_v29 = vshrl.u32 %v2995_v9, 16  ;;  %6206 = vmatprep.subr.bf16.mxu0 %v6695_v14  ;;  %v6696_v0 = vld [vmem:[%s7936_s4 + $0x168] sm:$0xff]   ;;  %v2996_v38 = vld [vmem:[#allocation2 + $0x38] sm:$0x1f] }
  0x5f   : > { %v3039_v12 = vshll.u32 %v2995_v9, 16  ;;  %v1014_v13 = vsel %vm987_vm0, %v1012_v50, %v1013_v20  ;;  %v3013_v39 = vrot.slane %v3011_v41, 4  ;;  %v3016_v52 = vrot.slane %v3014_v62, 5  ;;  %6015 = vmatpush3.bf16.msra.mxu1 %v6700_v5  ;;  %6175 = vmatmul.mubr.bf16.gmra.mrb[8].mxu0 %v2690_v4  ;;  %v6704_v20 = vld [vmem:[%s7936_s4 + $0x30] sm:$0xff]  }
  0x60   : > { %v3021_v33 = vrot.slane %v3019_v63, 4  ;;  %v3024_v43 = vrot.slane %v3022_v11, 5  ;;  %v3038_v6 = vrot.slane %v3036_v29, 4  ;;  %v491_v10 = vmax.f32 %v7073_v24, 0.0  ;;  %6016 = vmatprep.subr.bf16.mxu1 %v6702_v40  ;;  %6178 = vmatprep.mubr.bf16.mxu0 %v2693_v59  ;;  %v6698_v24 = vld [vmem:[%s7936_s4 + $0x170] sm:$0xff]  }
  0x61   : > { %v3041_v8 = vrot.slane %v3039_v12, 5  ;;  %v3017_v22 = vor.u32 %v3016_v52, %v3013_v39  ;;  %v492_v9 = vmax.f32 %v7076_v28, 0.0  ;;  %v494_v53 = vmax.f32 %v7135_v23, 0.0  ;;  %6207 = vmatpush3.bf16.msra.mxu0 %v6695_v14 }
  0x62   : > { %v3025_v5 = vor.u32 %v3024_v43, %v3021_v33  ;;  %v3045_v50 = vshrl.u32 %v7140_v27, 16  ;;  %v3048_v28 = vshll.u32 %v7140_v27, 16  ;;  %6208 = vmatprep.subr.bf16.mxu0 %v6696_v0  ;;  %v7283_v18 = vld [vmem:[#allocation2 + $0x98] sm:$0xf]  ;;  %v948_v23 = vld [vmem:[#allocation2 + $0x90] sm:$0xf0]  ;;  %v7940_v43 = vor.u32 %v7137_v19, %v7131_v17 }
  0x63   : > { %v3042_v4 = vor.u32 %v3041_v8, %v3038_v6  ;;  %v514_v41 = vpack.c.bf16 %v492_v9, %v491_v10  ;;  %v515_v62 = vpack.c.bf16 %v494_v53, %v493_v31  ;;  %v3053_v63 = vshrl.u32 %v2996_v38, 16  ;;  %6017 = vmatpush3.bf16.msra.mxu1 %v6702_v40  ;;  %v2997_v27 = vld [vmem:[#allocation2 + $0x48] sm:$0x1f]  ;;  %v6706_v33 = vld [vmem:[%s7936_s4 + $0x38] sm:$0xff]  }
  0x64   : > { %v3056_v11 = vshll.u32 %v2996_v38, 16  ;;  %v1015_v14 = vrot.slane %v948_v23, 4  ;;  %v1016_v59 = vrot.slane %v7283_v18, 4  ;;  %v3026_v29 = vsel %vm1502_vm2, %v3017_v22, %v3025_v5  ;;  %5987 = vmatmul.mubr.bf16.gmra.mrb[12].mxu1 %v7235_v25  ;;  %6018 = vmatprep.subr.bf16.mxu1 %v6704_v20  ;;  %v6699_v25 = vld [vmem:[%s7936_s4 + $0x178] sm:$0xff]  }
  0x65   : > { %v7291_v12 = vsel %vm1502_vm2, %v7940_v43, %v3042_v4  ;;  %v546_v39 = vrot.slane %v514_v41, 4  ;;  %v547_v52 = vrot.slane %v515_v62, 4  ;;  %v3047_v53 = vrot.slane %v3045_v50, 4  ;;  %6209 = vmatpush3.bf16.msra.mxu0 %v6696_v0  ;;  %5990 = vmatprep.mubr.bf16.mxu1 %v1014_v13  ;;  %v2998_v4 = vld [vmem:[#allocation2 + $0x58] sm:$0x1f] }
  0x66   : > { %v3050_v31 = vrot.slane %v3048_v28, 5  ;;  %v1017_v17 = vsel %vm987_vm0, %v1015_v14, %v1016_v59  ;;  %v3055_v19 = vrot.slane %v3053_v63, 4  ;;  %v3058_v6 = vrot.slane %v3056_v11, 5  ;;  %6210 = vmatprep.subr.bf16.mxu0 %v6698_v24 }
  0x67   : > { %v3062_v40 = vshrl.u32 %v7149_v54, 16  ;;  %588 = vst [vmem:[#allocation2 + $0xa8] ss:$-4 sps:$4 sm:$0xff] %v546_v39   ;;  %590 = vst [vmem:[#allocation2 + $0xb8] ss:$-4 sps:$4 sm:$0xff] %v547_v52   ;;  %v3065_v10 = vshll.u32 %v7149_v54, 16  ;;  %6019 = vmatpush3.bf16.msra.mxu1 %v6704_v20  ;;  %6179 = vmatmul.mubr.bf16.gmra.mrb[12].mxu0 %v7265_v7 }
  0x68   : > { %v3051_v8 = vor.u32 %v3050_v31, %v3047_v53  ;;  %v3070_v38 = vshrl.u32 %v2997_v27, 16  ;;  %v3073_v22 = vshll.u32 %v2997_v27, 16  ;;  %v3059_v0 = vor.u32 %v3058_v6, %v3055_v19  ;;  %6020 = vmatprep.subr.bf16.mxu1 %v6706_v33  ;;  %v7310_v54 = vld [vmem:[%s7936_s4 + $0x80] sm:$0xff]   ;;  %6214 = vmatprep.mubr.bf16.mxu0 %v3026_v29  ;;  %v2999_v53 = vld [vmem:[#allocation2 + $0x68] sm:$0x1f] }
  0x69   : > { %v3064_v13 = vrot.slane %v3062_v40, 4  ;;  %v495_v9 = vmax.f32 %v7156_v60, 0.0  ;;  %v496_v5 = vmax.f32 %v7177_v3, 0.0  ;;  %v3067_v50 = vrot.slane %v3065_v10, 5  ;;  %6211 = vmatpush3.bf16.msra.mxu0 %v6698_v24 }
  0x6a   : > { %v3072_v28 = vrot.slane %v3070_v38, 4  ;;  %v3075_v23 = vrot.slane %v3073_v22, 5  ;;  %v497_v41 = vmax.f32 %v7208_v35, 0.0  ;;  %v3060_v60 = vsel %vm1502_vm2, %v3051_v8, %v3059_v0  ;;  %6212 = vmatprep.subr.bf16.mxu0 %v6699_v25  ;;  %v6701_v35 = vld [vmem:[%s7936_s4 + $0x180] sm:$0xff]  }
  0x6b   : > { %v516_v3 = vpack.c.bf16 %v496_v5, %v495_v9  ;;  %v498_v20 = vmax.f32 %v7216_v26, 0.0  ;;  %v3079_v7 = vshrl.u32 %v7186_v58, 16  ;;  %v3068_v62 = vor.u32 %v3067_v50, %v3064_v13  ;;  %6021 = vmatpush3.bf16.msra.mxu1 %v6706_v33  ;;  %v6703_v26 = vld [vmem:[%s7936_s4 + $0x188] sm:$0xff]  }
  0x6c   : > { %v3076_v63 = vor.u32 %v3075_v23, %v3072_v28  ;;  %v3082_v11 = vshll.u32 %v7186_v58, 16  ;;  %v3087_v14 = vshrl.u32 %v2998_v4, 16  ;;  %v3090_v43 = vshll.u32 %v2998_v4, 16  ;;  %5991 = vmatmul.mubr.bf16.gmra.mrb[16].mxu1 %v1017_v17  ;;  %6054 = vmatprep.subr.bf16.mxu1 %v7310_v54 }
  0x6d   : > { %v548_v59 = vrot.slane %v516_v3, 4  ;;  %v517_v24 = vpack.c.bf16 %v498_v20, %v497_v41  ;;  %v3081_v29 = vrot.slane %v3079_v7, 4  ;;  %v3096_v31 = vshrl.u32 %v7194_v34, 16  ;;  %6213 = vmatpush3.bf16.msra.mxu0 %v6699_v25 }
  0x6e   : > { %v7323_v27 = vsel %vm1502_vm2, %v3068_v62, %v3076_v63  ;;  %v3084_v39 = vrot.slane %v3082_v11, 5  ;;  %v3089_v52 = vrot.slane %v3087_v14, 4  ;;  %v7327_v58 = vld [vmem:[#allocation2 + $0xa8] sm:$0xf]  ;;  %v949_v19 = vld [vmem:[#allocation2 + $0xa0] sm:$0xf0]  ;;  %v468_v17 = vadd.f32 %v7024_v1, %v7244_v32  ;;  %6246 = vmatprep.subr.bf16.mxu0 %v6701_v35 }
  0x6f   : > { %v7329_v33 = vld [vmem:[#allocation2 + $0xb8] sm:$0xf]  ;;  %592 = vst [vmem:[#allocation2 + $0xc8] ss:$-4 sps:$4 sm:$0xff] %v548_v59   ;;  %v7941_v6 = vunpack.c.h.bf16 %v6991_v21  ;;  %v469_v8 = vadd.f32 %v7024_v1, %v7252_v45  ;;  %v667_v10 = vor.u32 %v7101_v61, %v7099_v42  ;;  %v1018_v25 = vrot.slane %v949_v19, 4 }
  0x70   : > { %v1019_v38 = vrot.slane %v7327_v58, 4  ;;  %v950_v22 = vld [vmem:[#allocation2 + $0xb0] sm:$0xf0]  ;;  %v1022_v0 = vrot.slane %v7329_v33, 4  ;;  %v549_v13 = vrot.slane %v517_v24, 4  ;;  %v3085_v32 = vor.u32 %v3084_v39, %v3081_v29  ;;  %6215 = vmatmul.mubr.bf16.vlgmr.msra.gmra.mrb[0].mxu0 %v7291_v12 }
  0x71   : > { %v432_v40 = vmul.f32 %v7941_v6, %v7005_v37  ;;  %v1021_v9 = vrot.slane %v950_v22, 4  ;;  %v3092_v5 = vrot.slane %v3090_v43, 5  ;;  %v3098_v4 = vrot.slane %v3096_v31, 4  ;;  %6247 = vmatpush3.bf16.msra.mxu0 %v6701_v35  ;;  %6218 = vmatprep.mubr.bf16.mxu0 %v3060_v60  ;;  %v6705_v12 = vld [vmem:[%s7936_s4 + $0x190] sm:$0xff]   ;;  %v3000_v59 = vld [vmem:[#allocation2 + $0x78] sm:$0x1f] }
  0x72   : > { %v1020_v21 = vsel %vm987_vm0, %v1018_v25, %v1019_v38  ;;  %594 = vst [vmem:[#allocation2 + $0xd8] ss:$-4 sps:$4 sm:$0xff] %v549_v13   ;;  %v3099_v45 = vshll.u32 %v7194_v34, 16  ;;  %v3104_v50 = vshrl.u32 %v2999_v53, 16  ;;  %v3107_v28 = vshll.u32 %v2999_v53, 16  ;;  %6248 = vmatprep.subr.bf16.mxu0 %v6703_v26 }
  0x73   : > { %5994 = vmatprep.mubr.bf16.mxu1 %v1020_v21  ;;  %v1023_v23 = vsel %vm987_vm0, %v1021_v9, %v1022_v0  ;;  %v3093_v41 = vor.u32 %v3092_v5, %v3089_v52  ;;  %v499_v3 = vmax.f32 %v7247_v56, 0.0  ;;  %v500_v20 = vmax.f32 %v468_v17, 0.0  ;;  %v7354_v56 = vld [vmem:[%s6918_s18 + $0x78] sm:$0xff]   ;;  %v3001_v0 = vld [vmem:[#allocation2 + $0x88] sm:$0x1f] }
  0x74   : > { %v3101_v7 = vrot.slane %v3099_v45, 5  ;;  %v3106_v62 = vrot.slane %v3104_v50, 4  ;;  %v3109_v34 = vrot.slane %v3107_v28, 5  ;;  %v470_v63 = vadd.f32 %v7024_v1, %v432_v40  ;;  %5995 = vmatmul.mubr.bf16.gmra.mrb[20].mxu1 %v1023_v23  ;;  %v6707_v40 = vld [vmem:[%s7936_s4 + $0x198] sm:$0xff]   ;;  %v604_v13 = vld [vmem:[#allocation2 + $0x10] sm:$0xf8] }
  0x75   : > { %v3094_v35 = vsel %vm1502_vm2, %v3085_v32, %v3093_v41  ;;  %v518_v11 = vpack.c.bf16 %v500_v20, %v499_v3  ;;  %v501_v14 = vmax.f32 %v469_v8, 0.0  ;;  %v3113_v24 = vshrl.u32 %v7221_v15, 16  ;;  %6249 = vmatpush3.bf16.msra.mxu0 %v6703_v26  ;;  %v2633_v23 = vld [vmem:[#allocation2 + $0x90] sm:$0xf0] }
  0x76   : > { %v7356_v60 = vld [vmem:[#allocation2 + $0xc8] sm:$0xf]  ;;  %v951_v29 = vld [vmem:[#allocation2 + $0xc0] sm:$0xf0]  ;;  %v3102_v43 = vor.u32 %v3101_v7, %v3098_v4  ;;  %v3110_v39 = vor.u32 %v3109_v34, %v3106_v62  ;;  %v502_v52 = vmax.f32 %v470_v63, 0.0  ;;  %v3116_v53 = vshll.u32 %v7221_v15, 16  ;;  %6250 = vmatprep.subr.bf16.mxu0 %v6705_v12 }
  0x77   : > { %v1024_v31 = vrot.slane %v951_v29, 4  ;;  %v1025_v19 = vrot.slane %v7356_v60, 4  ;;  %v550_v17 = vrot.slane %v518_v11, 4  ;;  %v3115_v6 = vrot.slane %v3113_v24, 4  ;;  %v6709_v11 = vld [vmem:[%s7936_s4 + $0x1a0] sm:$0xff]  }
  0x78   : > { %v3111_v8 = vsel %vm1502_vm2, %v3102_v43, %v3110_v39  ;;  %v519_v25 = vpack.c.bf16 %v502_v52, %v501_v14  ;;  %v3118_v38 = vrot.slane %v3116_v53, 5  ;;  %v3121_v22 = vshrl.u32 %v3000_v59, 16  ;;  %6219 = vmatmul.mubr.bf16.gmra.mrb[4].mxu0 %v7323_v27 }
  0x79   : > { %v1026_v15 = vsel %vm987_vm0, %v1024_v31, %v1025_v19  ;;  %v7365_v26 = vld [vmem:[#allocation2 + $0xd8] sm:$0xf]  ;;  %v952_v9 = vld [vmem:[#allocation2 + $0xd0] sm:$0xf0]  ;;  %596 = vst [vmem:[#allocation2 + $0xe8] ss:$-4 sps:$4 sm:$0xff] %v550_v17   ;;  %v5630_v4 = vunpack.c.l.bf16 %v7354_v56  ;;  %6222 = vmatprep.mubr.bf16.mxu0 %v3094_v35  ;;  %6251 = vmatpush3.bf16.msra.mxu0 %v6705_v12 }
  0x7a   : > { %v3124_v32 = vshll.u32 %v3000_v59, 16  ;;  %v3130_v5 = vshrl.u32 %v7237_v47, 16  ;;  %5998 = vmatprep.mubr.bf16.mxu1 %v1026_v15  ;;  %v1027_v21 = vrot.slane %v952_v9, 4  ;;  %v1028_v45 = vrot.slane %v7365_v26, 4  ;;  %6252 = vmatprep.subr.bf16.mxu0 %v6707_v40  ;;  %v3002_v12 = vld [vmem:[#allocation2 + $0x98] sm:$0x1f] }
  0x7b   : > { %v551_v50 = vrot.slane %v519_v25, 4  ;;  %v3119_v28 = vor.u32 %v3118_v38, %v3115_v6  ;;  %v3123_v41 = vrot.slane %v3121_v22, 4  ;;  %v3133_v7 = vshll.u32 %v7237_v47, 16  ;;  %v2634_v17 = vld [vmem:[#allocation2 + $0xa0] sm:$0xf0]  ;;  %v6711_v6 = vld [vmem:[%s7936_s4 + $0x1a8] sm:$0xff]  }
  0x7c   : > { %v3126_v3 = vrot.slane %v3124_v32, 5  ;;  %v3132_v20 = vrot.slane %v3130_v5, 4  ;;  %v1029_v62 = vsel %vm987_vm0, %v1027_v21, %v1028_v45  ;;  %v3138_v34 = vshrl.u32 %v3001_v0, 16  ;;  %v3003_v21 = vld [vmem:[#allocation2 + $0xa8] sm:$0x1f] }
  0x7d   : > { %598 = vst [vmem:[#allocation2 + $0xf8] ss:$-4 sps:$4 sm:$0xff] %v551_v50   ;;  %v3141_v27 = vshll.u32 %v3001_v0, 16  ;;  %v653_v63 = vshrl.u32 %v604_v13, 16  ;;  %v3135_v59 = vrot.slane %v3133_v7, 5  ;;  %v656_v35 = vshll.u32 %v604_v13, 16  ;;  %5999 = vmatmul.mubr.bf16.gmra.mrb[24].mxu1 %v1029_v62  ;;  %6253 = vmatpush3.bf16.msra.mxu0 %v6707_v40 }
  0x7e   : > { %v3127_v14 = vor.u32 %v3126_v3, %v3123_v41  ;;  %v3147_v24 = vshrl.u32 %v2633_v23, 16  ;;  %v3140_v29 = vrot.slane %v3138_v34, 4  ;;  %v3150_v39 = vshll.u32 %v2633_v23, 16  ;;  %6254 = vmatprep.subr.bf16.mxu0 %v6709_v11  ;;  %v606_v41 = vld [vmem:[#allocation2 + $0x20] sm:$0xf8] }
  0x7f   : > { %v3143_v43 = vrot.slane %v3141_v27, 5  ;;  %v655_v47 = vrot.slane %v653_v63, 3  ;;  %v3136_v53 = vor.u32 %v3135_v59, %v3132_v20  ;;  %v658_v31 = vrot.slane %v656_v35, 4  ;;  %v6713_v35 = vld [vmem:[%s7936_s4 + $0x1b0] sm:$0xff]  }
  0x80   : > { %v3128_v52 = vsel %vm1502_vm2, %v3119_v28, %v3127_v14  ;;  %v3149_v19 = vrot.slane %v3147_v24, 4  ;;  %v7380_v25 = vld [vmem:[#allocation2 + $0xe8] sm:$0xf]  ;;  %v953_v38 = vld [vmem:[#allocation2 + $0xe0] sm:$0xf0]  ;;  %v3152_v0 = vrot.slane %v3150_v39, 5  ;;  %v5631_v15 = vunpack.c.h.bf16 %v7354_v56  ;;  %6223 = vmatmul.mubr.bf16.gmra.mrb[8].mxu0 %v3111_v8 }
  0x81   : > { %v3144_v22 = vor.u32 %v3143_v43, %v3140_v29  ;;  %v3155_v13 = vshrl.u32 %v3002_v12, 16  ;;  %v1030_v9 = vrot.slane %v953_v38, 4  ;;  %v1031_v32 = vrot.slane %v7380_v25, 4  ;;  %6226 = vmatprep.mubr.bf16.mxu0 %v3128_v52  ;;  %6255 = vmatpush3.bf16.msra.mxu0 %v6709_v11  ;;  %v3556_v56 = vld [vmem:[#allocation2 + $0x20] sm:$0xf8] }
  0x82   : > { %v659_v40 = vor.u32 %v658_v31, %v655_v47  ;;  %v3158_v5 = vshll.u32 %v3002_v12, 16  ;;  %v3153_v50 = vor.u32 %v3152_v0, %v3149_v19  ;;  %v3164_v23 = vshrl.u32 %v2634_v17, 16  ;;  %6256 = vmatprep.subr.bf16.mxu0 %v6711_v6  ;;  %v2635_v19 = vld [vmem:[#allocation2 + $0xb0] sm:$0xf0] }
  0x83   : > { %v3145_v45 = vsel %vm1502_vm2, %v3136_v53, %v3144_v22  ;;  %v3157_v28 = vrot.slane %v3155_v13, 4  ;;  %v1032_v3 = vsel %vm987_vm0, %v1030_v9, %v1031_v32  ;;  %v3167_v8 = vshll.u32 %v2634_v17, 16  ;;  %v6715_v13 = vld [vmem:[%s7936_s4 + $0x1b8] sm:$0xff]  }
  0x84   : > { %v7386_v20 = vld [vmem:[#allocation2 + $0xf8] sm:$0xf]  ;;  %v954_v7 = vld [vmem:[#allocation2 + $0xf0] sm:$0xf0]  ;;  %v7392_v62 = vsel %vm634_vm1, %v659_v40, %v667_v10  ;;  %v3160_v34 = vrot.slane %v3158_v5, 5  ;;  %6002 = vmatprep.mubr.bf16.mxu1 %v1032_v3  ;;  %v3166_v14 = vrot.slane %v3164_v23, 4 }
  0x85   : > { %v1033_v27 = vrot.slane %v954_v7, 4  ;;  %v1034_v63 = vrot.slane %v7386_v20, 4  ;;  %v3172_v59 = vshrl.u32 %v3003_v21, 16  ;;  %v3169_v24 = vrot.slane %v3167_v8, 5  ;;  %v608_v10 = vld [vmem:[#allocation2 + $0x30] sm:$0xf8]  ;;  %6257 = vmatpush3.bf16.msra.mxu0 %v6711_v6 }
  0x86   : > { %v3161_v12 = vor.u32 %v3160_v34, %v3157_v28  ;;  %v3175_v42 = vshll.u32 %v3003_v21, 16  ;;  %v670_v61 = vshrl.u32 %v606_v41, 16  ;;  %v673_v11 = vshll.u32 %v606_v41, 16  ;;  %6258 = vmatprep.subr.bf16.mxu0 %v6713_v35  ;;  %v3004_v21 = vld [vmem:[#allocation2 + $0xb8] sm:$0x1f] }
  0x87   : > { %v1035_v29 = vsel %vm987_vm0, %v1033_v27, %v1034_v63  ;;  %v3174_v43 = vrot.slane %v3172_v59, 4  ;;  %v678_v47 = vshrl.u32 %v7114_v57, 16  ;;  %v3170_v52 = vor.u32 %v3169_v24, %v3166_v14  ;;  %v2636_v23 = vld [vmem:[#allocation2 + $0xc0] sm:$0xf0]  ;;  %v3005_v14 = vld [vmem:[#allocation2 + $0xc8] sm:$0x1f] }
  0x88   : > { %6003 = vmatmul.mubr.bf16.gmra.mrb[28].mxu1 %v1035_v29  ;;  %v3162_v39 = vsel %vm1502_vm2, %v3153_v50, %v3161_v12  ;;  %v3177_v53 = vrot.slane %v3175_v42, 5  ;;  %v672_v31 = vrot.slane %v670_v61, 3  ;;  %v675_v17 = vrot.slane %v673_v11, 4  ;;  %6227 = vmatmul.mubr.bf16.gmra.mrb[12].mxu0 %v3145_v45  ;;  %v6710_v59 = vld [vmem:[%s7936_s4 + $0x88] sm:$0xff]   ;;  %v610_v42 = vld [vmem:[#allocation2 + $0x40] sm:$0xf8] }
  0x89   : > { %6022 = vmatprep.mubr.bf16.mxu1 %v7013_v44  ;;  %v680_v38 = vrot.slane %v678_v47, 3  ;;  %v681_v22 = vshll.u32 %v7114_v57, 16  ;;  %v687_v0 = vshrl.u32 %v608_v10, 16  ;;  %v690_v32 = vshll.u32 %v608_v10, 16  ;;  %6230 = vmatprep.mubr.bf16.mxu0 %v3162_v39  ;;  %v7415_v61 = vld [vmem:[%s7936_s4 + $0x1c0] sm:$0xff]  }
  0x8a   : > { %v3178_v9 = vor.u32 %v3177_v53, %v3174_v43  ;;  %v695_v40 = vshrl.u32 %v7127_v16, 16  ;;  %v698_v5 = vshll.u32 %v7127_v16, 16  ;;  %v676_v6 = vor.u32 %v675_v17, %v672_v31  ;;  %6259 = vmatpush3.bf16.msra.mxu0 %v6713_v35 }
  0x8b   : > { %v683_v44 = vrot.slane %v681_v22, 4  ;;  %v689_v50 = vrot.slane %v687_v0, 3  ;;  %v3181_v28 = vshrl.u32 %v2635_v19, 16  ;;  %v692_v41 = vrot.slane %v690_v32, 4  ;;  %6260 = vmatprep.subr.bf16.mxu0 %v6715_v13  ;;  %v6712_v32 = vld [vmem:[%s7936_s4 + $0x90] sm:$0xff]  }
  0x8c   : > { %v3179_v57 = vsel %vm1502_vm2, %v3170_v52, %v3178_v9  ;;  %v697_v3 = vrot.slane %v695_v40, 3  ;;  %v700_v7 = vrot.slane %v698_v5, 4  ;;  %v3184_v27 = vshll.u32 %v2635_v19, 16 }
  0x8d   : > { %v684_v34 = vor.u32 %v683_v44, %v680_v38  ;;  %v3183_v8 = vrot.slane %v3181_v28, 4  ;;  %v3189_v63 = vshrl.u32 %v3004_v21, 16  ;;  %v693_v16 = vor.u32 %v692_v41, %v689_v50  ;;  %v612_v38 = vld [vmem:[#allocation2 + $0x50] sm:$0xf8] }
  0x8e   : > { %v701_v45 = vor.u32 %v700_v7, %v697_v3  ;;  %v3192_v12 = vshll.u32 %v3004_v21, 16  ;;  %v3198_v24 = vshrl.u32 %v2636_v23, 16  ;;  %v3186_v10 = vrot.slane %v3184_v27, 5  ;;  %6261 = vmatpush3.bf16.msra.mxu0 %v6715_v13  ;;  %v2637_v21 = vld [vmem:[#allocation2 + $0xd0] sm:$0xf0] }
  0x8f   : > { %v685_v35 = vsel %vm634_vm1, %v676_v6, %v684_v34  ;;  %v3191_v29 = vrot.slane %v3189_v63, 4  ;;  %v3201_v43 = vshll.u32 %v2636_v23, 16  ;;  %v3206_v52 = vshrl.u32 %v3005_v14, 16  ;;  %6294 = vmatprep.subr.bf16.mxu0 %v7415_v61  ;;  %v3006_v34 = vld [vmem:[#allocation2 + $0xd8] sm:$0x1f] }
  0x90   : > { %6023 = vmatmul.mubr.bf16.vlgmr.msra.gmra.mrb[0].mxu1 %v7392_v62  ;;  %v702_v11 = vsel %vm634_vm1, %v693_v16, %v701_v45  ;;  %v3194_v47 = vrot.slane %v3192_v12, 5  ;;  %v3200_v39 = vrot.slane %v3198_v24, 4  ;;  %v3187_v53 = vor.u32 %v3186_v10, %v3183_v8  ;;  %6231 = vmatmul.mubr.bf16.gmra.mrb[16].mxu0 %v3179_v57  ;;  %v2638_v63 = vld [vmem:[#allocation2 + $0xe0] sm:$0xf0] }
  0x91   : > { %6055 = vmatpush3.bf16.msra.mxu1 %v7310_v54  ;;  %6026 = vmatprep.mubr.bf16.mxu1 %v685_v35  ;;  %v3203_v31 = vrot.slane %v3201_v43, 5  ;;  %v3209_v19 = vshll.u32 %v3005_v14, 16  ;;  %v704_v17 = vshrl.u32 %v610_v42, 16  ;;  %v3208_v0 = vrot.slane %v3206_v52, 4  ;;  %v6714_v14 = vld [vmem:[%s7936_s4 + $0x98] sm:$0xff]  }
  0x92   : > { %6056 = vmatprep.subr.bf16.mxu1 %v6710_v59  ;;  %v3195_v22 = vor.u32 %v3194_v47, %v3191_v29  ;;  %v707_v9 = vshll.u32 %v610_v42, 16  ;;  %v712_v62 = vshrl.u32 %v7162_v30, 16  ;;  %v715_v5 = vshll.u32 %v7162_v30, 16  ;;  %v3007_v29 = vld [vmem:[#allocation2 + $0xe8] sm:$0x1f] }
  0x93   : > { %v3204_v54 = vor.u32 %v3203_v31, %v3200_v39  ;;  %v3211_v13 = vrot.slane %v3209_v19, 5  ;;  %v706_v40 = vrot.slane %v704_v17, 3  ;;  %v721_v28 = vshrl.u32 %v612_v38, 16  ;;  %v614_v52 = vld [vmem:[#allocation2 + $0x60] sm:$0xf8] }
  0x94   : > { %v3196_v6 = vsel %vm1502_vm2, %v3187_v53, %v3195_v22  ;;  %v709_v44 = vrot.slane %v707_v9, 4  ;;  %v714_v50 = vrot.slane %v712_v62, 3  ;;  %v717_v41 = vrot.slane %v715_v5, 4 }
  0x95   : > { %6234 = vmatprep.mubr.bf16.mxu0 %v3196_v6  ;;  %6057 = vmatpush3.bf16.msra.mxu1 %v6710_v59  ;;  %v3212_v23 = vor.u32 %v3211_v13, %v3208_v0  ;;  %v724_v3 = vshll.u32 %v612_v38, 16  ;;  %v729_v7 = vshrl.u32 %v7173_v36, 16  ;;  %v723_v8 = vrot.slane %v721_v28, 3 }
  0x96   : > { %v710_v57 = vor.u32 %v709_v44, %v706_v40  ;;  %v732_v27 = vshll.u32 %v7173_v36, 16  ;;  %6058 = vmatprep.subr.bf16.mxu1 %v6712_v32  ;;  %v3215_v30 = vshrl.u32 %v2637_v21, 16  ;;  %v718_v45 = vor.u32 %v717_v41, %v714_v50  ;;  %v616_v40 = vld [vmem:[#allocation2 + $0x70] sm:$0xf8] }
  0x97   : > { %v3213_v16 = vsel %vm1502_vm2, %v3204_v54, %v3212_v23  ;;  %v726_v59 = vrot.slane %v724_v3, 4  ;;  %v731_v12 = vrot.slane %v729_v7, 3  ;;  %v3218_v35 = vshll.u32 %v2637_v21, 16  ;;  %v6718_v3 = vld [vmem:[%s7936_s4 + $0xa8] sm:$0xff]  }
  0x98   : > { %6027 = vmatmul.mubr.bf16.gmra.mrb[4].mxu1 %v702_v11  ;;  %v734_v24 = vrot.slane %v732_v27, 4  ;;  %v3217_v42 = vrot.slane %v3215_v30, 4  ;;  %v3223_v10 = vshrl.u32 %v3006_v34, 16  ;;  %v719_v36 = vsel %vm634_vm1, %v710_v57, %v718_v45  ;;  %v6716_v11 = vld [vmem:[%s7936_s4 + $0xa0] sm:$0xff]   ;;  %6235 = vmatmul.mubr.bf16.gmra.mrb[20].mxu0 %v3213_v16  ;;  %v2639_v27 = vld [vmem:[#allocation2 + $0xf0] sm:$0xf0] }
  0x99   : > { %v727_v43 = vor.u32 %v726_v59, %v723_v8  ;;  %v3226_v47 = vshll.u32 %v3006_v34, 16  ;;  %6059 = vmatpush3.bf16.msra.mxu1 %v6712_v32  ;;  %v3232_v39 = vshrl.u32 %v2638_v63, 16  ;;  %6030 = vmatprep.mubr.bf16.mxu1 %v719_v36  ;;  %v3220_v31 = vrot.slane %v3218_v35, 5  ;;  %v3008_v45 = vld [vmem:[#allocation2 + $0xf8] sm:$0x1f]  ;;  %v6720_v36 = vld [vmem:[%s7936_s4 + $0xb0] sm:$0xff]  }
  0x9a   : > { %v735_v53 = vor.u32 %v734_v24, %v731_v12  ;;  %v3225_v19 = vrot.slane %v3223_v10, 4  ;;  %v3235_v17 = vshll.u32 %v2638_v63, 16  ;;  %6060 = vmatprep.subr.bf16.mxu1 %v6714_v14  ;;  %v3240_v0 = vshrl.u32 %v3007_v29, 16 }
  0x9b   : > { %v3228_v38 = vrot.slane %v3226_v47, 5  ;;  %v3234_v22 = vrot.slane %v3232_v39, 4  ;;  %v3243_v9 = vshll.u32 %v3007_v29, 16  ;;  %v3221_v32 = vor.u32 %v3220_v31, %v3217_v42 }
  0x9c   : > { %v736_v62 = vsel %vm634_vm1, %v727_v43, %v735_v53  ;;  %v3237_v54 = vrot.slane %v3235_v17, 5  ;;  %v738_v13 = vshrl.u32 %v614_v52, 16  ;;  %v3242_v21 = vrot.slane %v3240_v0, 4  ;;  %v618_v53 = vld [vmem:[#allocation2 + $0x80] sm:$0xf8] }
  0x9d   : > { %v3229_v5 = vor.u32 %v3228_v38, %v3225_v19  ;;  %v3245_v6 = vrot.slane %v3243_v9, 5  ;;  %v741_v44 = vshll.u32 %v614_v52, 16  ;;  %6061 = vmatpush3.bf16.msra.mxu1 %v6714_v14  ;;  %v746_v23 = vshrl.u32 %v7202_v48, 16  ;;  %v6722_v9 = vld [vmem:[%s7936_s4 + $0xb8] sm:$0xff]  }
  0x9e   : > { %v3238_v50 = vor.u32 %v3237_v54, %v3234_v22  ;;  %v740_v28 = vrot.slane %v738_v13, 3  ;;  %v749_v41 = vshll.u32 %v7202_v48, 16  ;;  %6062 = vmatprep.subr.bf16.mxu1 %v6716_v11  ;;  %v755_v8 = vshrl.u32 %v616_v40, 16 }
  0x9f   : > { %v3230_v7 = vsel %vm1502_vm2, %v3221_v32, %v3229_v5  ;;  %v3246_v34 = vor.u32 %v3245_v6, %v3242_v21  ;;  %v743_v57 = vrot.slane %v741_v44, 4  ;;  %v748_v30 = vrot.slane %v746_v23, 3 }
  0xa0   : > { %6031 = vmatmul.mubr.bf16.gmra.mrb[8].mxu1 %v736_v62  ;;  %6238 = vmatprep.mubr.bf16.mxu0 %v3230_v7  ;;  %v751_v63 = vrot.slane %v749_v41, 4  ;;  %v758_v14 = vshll.u32 %v616_v40, 16  ;;  %v763_v16 = vshrl.u32 %v7213_v49, 16  ;;  %v757_v12 = vrot.slane %v755_v8, 3  ;;  %v620_v40 = vld [vmem:[#allocation2 + $0x90] sm:$0xf8] }
  0xa1   : > { %v3247_v48 = vsel %vm1502_vm2, %v3238_v50, %v3246_v34  ;;  %v744_v59 = vor.u32 %v743_v57, %v740_v28  ;;  %v766_v24 = vshll.u32 %v7213_v49, 16  ;;  %6063 = vmatpush3.bf16.msra.mxu1 %v6716_v11  ;;  %v3249_v29 = vshrl.u32 %v2639_v27, 16  ;;  %v3557_v7 = vld [vmem:[#allocation2 + $0x28] sm:$0xf] }
  0xa2   : > { %v752_v42 = vor.u32 %v751_v63, %v748_v30  ;;  %v760_v35 = vrot.slane %v758_v14, 4  ;;  %v765_v10 = vrot.slane %v763_v16, 3  ;;  %6064 = vmatprep.subr.bf16.mxu1 %v6718_v3  ;;  %6239 = vmatmul.mubr.bf16.gmra.mrb[24].mxu0 %v3247_v48  ;;  %v3252_v47 = vshll.u32 %v2639_v27, 16  ;;  %v3558_v30 = vld [vmem:[#allocation2 + $0x30] sm:$0xf8] }
  0xa3   : > { %v768_v43 = vrot.slane %v766_v24, 4  ;;  %v3257_v39 = vshrl.u32 %v3008_v45, 16  ;;  %v3260_v52 = vshll.u32 %v3008_v45, 16  ;;  %v3251_v49 = vrot.slane %v3249_v29, 4  ;;  %v3559_v45 = vld [vmem:[#allocation2 + $0x38] sm:$0xf] }
  0xa4   : > { %v753_v31 = vsel %vm634_vm1, %v744_v59, %v752_v42  ;;  %v761_v19 = vor.u32 %v760_v35, %v757_v12  ;;  %v433_v17 = vmul.f32 %v5630_v4, %v7005_v37  ;;  %v3254_v38 = vrot.slane %v3252_v47, 5 }
  0xa5   : > { %6034 = vmatprep.mubr.bf16.mxu1 %v753_v31  ;;  %v769_v11 = vor.u32 %v768_v43, %v765_v10  ;;  %v3259_v22 = vrot.slane %v3257_v39, 4  ;;  %v3262_v0 = vrot.slane %v3260_v52, 5  ;;  %6065 = vmatpush3.bf16.msra.mxu1 %v6718_v3  ;;  %v434_v62 = vmul.f32 %v5631_v15, %v7005_v37 }
  0xa6   : > { %v471_v32 = vadd.f32 %v7024_v1, %v433_v17  ;;  %v772_v54 = vshrl.u32 %v618_v53, 16  ;;  %v775_v13 = vshll.u32 %v618_v53, 16  ;;  %6066 = vmatprep.subr.bf16.mxu1 %v6720_v36  ;;  %v3255_v5 = vor.u32 %v3254_v38, %v3251_v49 }
  0xa7   : > { %v770_v4 = vsel %vm634_vm1, %v761_v19, %v769_v11  ;;  %v3263_v21 = vor.u32 %v3262_v0, %v3259_v22  ;;  %v780_v6 = vshrl.u32 %v7239_v46, 16  ;;  %v472_v44 = vadd.f32 %v7024_v1, %v434_v62  ;;  %v7471_v1 = vld [vmem:[%s7936_s4 + $0xc0] sm:$0xff]  }
  0xa8   : > { %6035 = vmatmul.mubr.bf16.gmra.mrb[12].mxu1 %v770_v4  ;;  %v503_v50 = vmax.f32 %v471_v32, 0.0  ;;  %v774_v28 = vrot.slane %v772_v54, 3  ;;  %v777_v23 = vrot.slane %v775_v13, 4  ;;  %v783_v41 = vshll.u32 %v7239_v46, 16  ;;  %v624_v32 = vld [vmem:[#allocation2 + $0xb0] sm:$0xf8] }
  0xa9   : > { %v3264_v37 = vsel %vm1502_vm2, %v3255_v5, %v3263_v21  ;;  %v782_v15 = vrot.slane %v780_v6, 3  ;;  %v789_v3 = vshrl.u32 %v620_v40, 16  ;;  %6067 = vmatpush3.bf16.msra.mxu1 %v6720_v36  ;;  %v504_v34 = vmax.f32 %v472_v44, 0.0  ;;  %v622_v36 = vld [vmem:[#allocation2 + $0xa0] sm:$0xf8] }
  0xaa   : > { %6242 = vmatprep.mubr.bf16.mxu0 %v3264_v37  ;;  %v778_v57 = vor.u32 %v777_v23, %v774_v28  ;;  %v792_v8 = vshll.u32 %v620_v40, 16  ;;  %v797_v27 = vshrl.u32 %v7283_v18, 16  ;;  %6068 = vmatprep.subr.bf16.mxu1 %v6722_v9  ;;  %v785_v63 = vrot.slane %v783_v41, 4  ;;  %v3560_v37 = vld [vmem:[#allocation2 + $0x40] sm:$0xf8] }
  0xab   : > { %v791_v14 = vrot.slane %v789_v3, 3  ;;  %v800_v46 = vshll.u32 %v7283_v18, 16  ;;  %v3589_v16 = vshrl.u32 %v3556_v56, 16  ;;  %v520_v48 = vpack.c.bf16 %v504_v34, %v503_v50 }
  0xac   : > { %v794_v59 = vrot.slane %v792_v8, 4  ;;  %v799_v12 = vrot.slane %v797_v27, 3  ;;  %v3592_v24 = vshll.u32 %v3556_v56, 16  ;;  %v786_v42 = vor.u32 %v785_v63, %v782_v15 }
  0xad   : > { %v802_v35 = vrot.slane %v800_v46, 4  ;;  %v3591_v10 = vrot.slane %v3589_v16, 3  ;;  %v3597_v29 = vshrl.u32 %v3557_v7, 16  ;;  %6069 = vmatpush3.bf16.msra.mxu1 %v6722_v9  ;;  %v552_v43 = vrot.slane %v520_v48, 4 }
  0xae   : > { %v795_v47 = vor.u32 %v794_v59, %v791_v14  ;;  %v3594_v39 = vrot.slane %v3592_v24, 4  ;;  %v3600_v52 = vshll.u32 %v3557_v7, 16  ;;  %6102 = vmatprep.subr.bf16.mxu1 %v7471_v1  ;;  %v787_v18 = vsel %vm634_vm1, %v778_v57, %v786_v42  ;;  %v7485_v24 = vld [vmem:[#allocation2 + $0x48] sm:$0xf] }
  0xaf   : > { %v803_v53 = vor.u32 %v802_v35, %v799_v12  ;;  %v3599_v31 = vrot.slane %v3597_v29, 3  ;;  %v3606_v19 = vshrl.u32 %v3558_v30, 16  ;;  %600 = vst [vmem:[#allocation2 + $0x108] ss:$-4 sps:$4 sm:$0xff] %v552_v43   ;;  %6038 = vmatprep.mubr.bf16.mxu1 %v787_v18  ;;  %v3609_v11 = vshll.u32 %v3558_v30, 16 }
  0xb0   : > { %v3595_v49 = vor.u32 %v3594_v39, %v3591_v10  ;;  %v3602_v17 = vrot.slane %v3600_v52, 4  ;;  %v3614_v38 = vshrl.u32 %v3559_v45, 16  ;;  %v3617_v9 = vshll.u32 %v3559_v45, 16  ;;  %v7488_v52 = vld [vmem:[#allocation2 + $0x58] sm:$0xf] }
  0xb1   : > { %v804_v22 = vsel %vm634_vm1, %v795_v47, %v803_v53  ;;  %v3608_v0 = vrot.slane %v3606_v19, 3  ;;  %v806_v62 = vshrl.u32 %v622_v36, 16  ;;  %v3611_v13 = vrot.slane %v3609_v11, 4 }
  0xb2   : > { %6039 = vmatmul.mubr.bf16.gmra.mrb[16].mxu1 %v804_v22  ;;  %v3603_v54 = vor.u32 %v3602_v17, %v3599_v31  ;;  %v3616_v40 = vrot.slane %v3614_v38, 3  ;;  %v809_v4 = vshll.u32 %v622_v36, 16  ;;  %v3619_v5 = vrot.slane %v3617_v9, 4 }
  0xb3   : > { %v808_v21 = vrot.slane %v806_v62, 3  ;;  %v814_v6 = vshrl.u32 %v7327_v58, 16  ;;  %v817_v44 = vshll.u32 %v7327_v58, 16  ;;  %v3612_v28 = vor.u32 %v3611_v13, %v3608_v0 }
  0xb4   : > { %v3604_v50 = vsel %vm634_vm1, %v3595_v49, %v3603_v54  ;;  %v811_v23 = vrot.slane %v809_v4, 4  ;;  %v823_v56 = vshrl.u32 %v624_v32, 16  ;;  %v3620_v15 = vor.u32 %v3619_v5, %v3616_v40  ;;  %v626_v49 = vld [vmem:[#allocation2 + $0xc0] sm:$0xf8] }
  0xb5   : > { %v816_v41 = vrot.slane %v814_v6, 3  ;;  %v819_v3 = vrot.slane %v817_v44, 4  ;;  %v826_v7 = vshll.u32 %v624_v32, 16  ;;  %v831_v8 = vshrl.u32 %v7329_v33, 16 }
  0xb6   : > { %v812_v34 = vor.u32 %v811_v23, %v808_v21  ;;  %v825_v57 = vrot.slane %v823_v56, 3  ;;  %v834_v27 = vshll.u32 %v7329_v33, 16  ;;  %v2640_v30 = vld [vmem:[#allocation2 + $0x100] sm:$0xf0]  ;;  %v3009_v63 = vld [vmem:[#allocation2 + $0x108] sm:$0x1f]  ;;  %v7483_v58 = vsel %vm634_vm1, %v3612_v28, %v3620_v15 }
  0xb7   : > { %v820_v14 = vor.u32 %v819_v3, %v816_v41  ;;  %v828_v46 = vrot.slane %v826_v7, 4  ;;  %v3623_v16 = vshrl.u32 %v3560_v37, 16  ;;  %v3266_v45 = vshrl.u32 %v2640_v30, 16  ;;  %v3562_v33 = vld [vmem:[#allocation2 + $0x50] sm:$0xf8] }
  0xb8   : > { %v3269_v48 = vshll.u32 %v2640_v30, 16  ;;  %v3274_v59 = vshrl.u32 %v3009_v63, 16  ;;  %v3277_v12 = vshll.u32 %v3009_v63, 16  ;;  %v833_v10 = vrot.slane %v831_v8, 3  ;;  %v628_v28 = vld [vmem:[#allocation2 + $0xd0] sm:$0xf8] }
  0xb9   : > { %v821_v42 = vsel %vm634_vm1, %v812_v34, %v820_v14  ;;  %v829_v35 = vor.u32 %v828_v46, %v825_v57  ;;  %v836_v29 = vrot.slane %v834_v27, 4  ;;  %v3268_v36 = vrot.slane %v3266_v45, 4  ;;  %v3564_v41 = vld [vmem:[#allocation2 + $0x60] sm:$0xf8]  ;;  %v7500_v45 = vld [vmem:[#allocation2 + $0x68] sm:$0xf] }
  0xba   : > { %v3271_v43 = vrot.slane %v3269_v48, 5  ;;  %v3276_v47 = vrot.slane %v3274_v59, 4  ;;  %v3279_v39 = vrot.slane %v3277_v12, 5  ;;  %6042 = vmatprep.mubr.bf16.mxu1 %v821_v42  ;;  %v3625_v53 = vrot.slane %v3623_v16, 3 }
  0xbb   : > { %v837_v18 = vor.u32 %v836_v29, %v833_v10  ;;  %v3626_v31 = vshll.u32 %v3560_v37, 16  ;;  %v3631_v19 = vshrl.u32 %v7485_v24, 16  ;;  %v3634_v38 = vshll.u32 %v7485_v24, 16 }
  0xbc   : > { %v3272_v17 = vor.u32 %v3271_v43, %v3268_v36  ;;  %v3280_v11 = vor.u32 %v3279_v39, %v3276_v47  ;;  %v3640_v22 = vshrl.u32 %v3562_v33, 16  ;;  %v3643_v32 = vshll.u32 %v3562_v33, 16  ;;  %v7507_v43 = vld [vmem:[#allocation2 + $0x78] sm:$0xf] }
  0xbd   : > { %v838_v0 = vsel %vm634_vm1, %v829_v35, %v837_v18  ;;  %v3628_v9 = vrot.slane %v3626_v31, 4  ;;  %v3633_v62 = vrot.slane %v3631_v19, 3  ;;  %v3636_v13 = vrot.slane %v3634_v38, 4  ;;  %v3566_v35 = vld [vmem:[#allocation2 + $0x70] sm:$0xf8] }
  0xbe   : > { %v3281_v54 = vsel %vm1502_vm2, %v3272_v17, %v3280_v11  ;;  %6043 = vmatmul.mubr.bf16.gmra.mrb[20].mxu1 %v838_v0  ;;  %v3642_v40 = vrot.slane %v3640_v22, 3  ;;  %v3648_v4 = vshrl.u32 %v7488_v52, 16  ;;  %v3645_v21 = vrot.slane %v3643_v32, 4  ;;  %v630_v17 = vld [vmem:[#allocation2 + $0xe0] sm:$0xf8] }
  0xbf   : > { %6243 = vmatmul.mubr.bf16.gmra.mrb[28].mxu0 %v3281_v54  ;;  %v3629_v5 = vor.u32 %v3628_v9, %v3625_v53  ;;  %v3651_v6 = vshll.u32 %v7488_v52, 16  ;;  %v840_v44 = vshrl.u32 %v626_v49, 16  ;;  %v3637_v23 = vor.u32 %v3636_v13, %v3633_v62 }
  0xc0   : > { %6262 = vmatprep.mubr.bf16.mxu0 %v3604_v50  ;;  %v3650_v56 = vrot.slane %v3648_v4, 3  ;;  %v843_v37 = vshll.u32 %v626_v49, 16  ;;  %v848_v15 = vshrl.u32 %v7356_v60, 16  ;;  %v3646_v3 = vor.u32 %v3645_v21, %v3642_v40 }
  0xc1   : > { %v3653_v7 = vrot.slane %v3651_v6, 4  ;;  %v842_v34 = vrot.slane %v840_v44, 3  ;;  %v851_v57 = vshll.u32 %v7356_v60, 16  ;;  %v3638_v8 = vsel %vm634_vm1, %v3629_v5, %v3637_v23  ;;  %v6719_v60 = vld [vmem:[%s7936_s4 + $0x1c8] sm:$0xff]   ;;  %v632_v5 = vld [vmem:[#allocation2 + $0xf0] sm:$0xf8] }
  0xc2   : > { %v845_v27 = vrot.slane %v843_v37, 4  ;;  %v850_v30 = vrot.slane %v848_v15, 3  ;;  %v857_v63 = vshrl.u32 %v628_v28, 16  ;;  %v860_v16 = vshll.u32 %v628_v28, 16 }
  0xc3   : > { %v3654_v14 = vor.u32 %v3653_v7, %v3650_v56  ;;  %v853_v46 = vrot.slane %v851_v57, 4  ;;  %v865_v50 = vshrl.u32 %v7365_v26, 16  ;;  %v868_v12 = vshll.u32 %v7365_v26, 16  ;;  %v3568_v57 = vld [vmem:[#allocation2 + $0x80] sm:$0xf8] }
  0xc4   : > { %v846_v48 = vor.u32 %v845_v27, %v842_v34  ;;  %v859_v59 = vrot.slane %v857_v63, 3  ;;  %v3657_v42 = vshrl.u32 %v3564_v41, 16  ;;  %v862_v33 = vrot.slane %v860_v16, 4 }
  0xc5   : > { %v3655_v10 = vsel %vm634_vm1, %v3646_v3, %v3654_v14  ;;  %v854_v29 = vor.u32 %v853_v46, %v850_v30  ;;  %v867_v36 = vrot.slane %v865_v50, 3  ;;  %v870_v47 = vrot.slane %v868_v12, 4  ;;  %v7527_v46 = vld [vmem:[#allocation2 + $0x88] sm:$0xf] }
  0xc6   : > { %v3659_v39 = vrot.slane %v3657_v42, 3  ;;  %v3660_v18 = vshll.u32 %v3564_v41, 16  ;;  %v3665_v53 = vshrl.u32 %v7500_v45, 16  ;;  %v863_v31 = vor.u32 %v862_v33, %v859_v59  ;;  %v3570_v59 = vld [vmem:[#allocation2 + $0x90] sm:$0xf8] }
  0xc7   : > { %6263 = vmatmul.mubr.bf16.vlgmr.msra.gmra.mrb[0].mxu0 %v7483_v58  ;;  %v855_v26 = vsel %vm634_vm1, %v846_v48, %v854_v29  ;;  %v3668_v19 = vshll.u32 %v7500_v45, 16  ;;  %v3674_v49 = vshrl.u32 %v3566_v35, 16  ;;  %v871_v11 = vor.u32 %v870_v47, %v867_v36  ;;  %v6721_v58 = vld [vmem:[%s7936_s4 + $0x1d0] sm:$0xff]   ;;  %v6725_v29 = vld [vmem:[%s7936_s4 + $0x1e0] sm:$0xff]  }
  0xc8   : > { %6295 = vmatpush3.bf16.msra.mxu0 %v7415_v61  ;;  %6266 = vmatprep.mubr.bf16.mxu0 %v3638_v8  ;;  %v3662_v38 = vrot.slane %v3660_v18, 4  ;;  %v3667_v22 = vrot.slane %v3665_v53, 3  ;;  %v3677_v0 = vshll.u32 %v3566_v35, 16  ;;  %v3682_v32 = vshrl.u32 %v7507_v43, 16  ;;  %v6723_v8 = vld [vmem:[%s7936_s4 + $0x1d8] sm:$0xff]  }
  0xc9   : > { %6296 = vmatprep.subr.bf16.mxu0 %v6719_v60  ;;  %6046 = vmatprep.mubr.bf16.mxu1 %v855_v26  ;;  %v3670_v9 = vrot.slane %v3668_v19, 4  ;;  %v3676_v62 = vrot.slane %v3674_v49, 3  ;;  %v3685_v54 = vshll.u32 %v7507_v43, 16  ;;  %v872_v13 = vsel %vm634_vm1, %v863_v31, %v871_v11 }
  0xca   : > { %v3663_v61 = vor.u32 %v3662_v38, %v3659_v39  ;;  %v3679_v40 = vrot.slane %v3677_v0, 4  ;;  %v874_v4 = vshrl.u32 %v630_v17, 16  ;;  %6047 = vmatmul.mubr.bf16.gmra.mrb[24].mxu1 %v872_v13  ;;  %v3684_v6 = vrot.slane %v3682_v32, 3  ;;  %v7536_v39 = vld [vmem:[#allocation2 + $0x98] sm:$0xf] }
  0xcb   : > { %v3671_v21 = vor.u32 %v3670_v9, %v3667_v22  ;;  %v3687_v44 = vrot.slane %v3685_v54, 4  ;;  %v877_v28 = vshll.u32 %v630_v17, 16  ;;  %v882_v37 = vshrl.u32 %v7380_v25, 16  ;;  %v1486_v9 = vld [vmem:[#allocation2 + $0x8] sm:$0x1f] }
  0xcc   : > { %6297 = vmatpush3.bf16.msra.mxu0 %v6719_v60  ;;  %v3680_v23 = vor.u32 %v3679_v40, %v3676_v62  ;;  %v876_v56 = vrot.slane %v874_v4, 3  ;;  %v885_v15 = vshll.u32 %v7380_v25, 16  ;;  %v891_v34 = vshrl.u32 %v632_v5, 16  ;;  %v6746_v54 = vld [vmem:[#allocation2] sm:$0xf0] }
  0xcd   : > { %v3672_v41 = vsel %vm634_vm1, %v3663_v61, %v3671_v21  ;;  %6298 = vmatprep.subr.bf16.mxu0 %v6721_v58  ;;  %v3688_v3 = vor.u32 %v3687_v44, %v3684_v6  ;;  %v879_v7 = vrot.slane %v877_v28, 4  ;;  %v884_v27 = vrot.slane %v882_v37, 3  ;;  %v6727_v61 = vld [vmem:[%s7936_s4 + $0x1e8] sm:$0xff]   ;;  %v1487_v6 = vld [vmem:[#allocation2 + $0x18] sm:$0x1f] }
  0xce   : > { %v887_v30 = vrot.slane %v885_v15, 4  ;;  %v894_v63 = vshll.u32 %v632_v5, 16  ;;  %v899_v14 = vshrl.u32 %v7386_v20, 16  ;;  %v893_v50 = vrot.slane %v891_v34, 3  ;;  %v3572_v37 = vld [vmem:[#allocation2 + $0xa0] sm:$0xf8] }
  0xcf   : > { %6267 = vmatmul.mubr.bf16.gmra.mrb[4].mxu0 %v3655_v10  ;;  %v3689_v25 = vsel %vm634_vm1, %v3680_v23, %v3688_v3  ;;  %v880_v16 = vor.u32 %v879_v7, %v876_v56  ;;  %v902_v48 = vshll.u32 %v7386_v20, 16  ;;  %v3691_v60 = vshrl.u32 %v3568_v57, 16  ;;  %v7548_v34 = vld [vmem:[#allocation2 + $0xa8] sm:$0xf] }
  0xd0   : > { %6270 = vmatprep.mubr.bf16.mxu0 %v3672_v41  ;;  %6299 = vmatpush3.bf16.msra.mxu0 %v6721_v58  ;;  %v888_v12 = vor.u32 %v887_v30, %v884_v27  ;;  %v896_v42 = vrot.slane %v894_v63, 4  ;;  %v901_v35 = vrot.slane %v899_v14, 3  ;;  %v3694_v36 = vshll.u32 %v3568_v57, 16  ;;  %v6729_v57 = vld [vmem:[%s7936_s4 + $0x1f0] sm:$0xff]  }
  0xd1   : > { %v904_v33 = vrot.slane %v902_v48, 4  ;;  %v3699_v10 = vshrl.u32 %v7527_v46, 16  ;;  %v3702_v47 = vshll.u32 %v7527_v46, 16  ;;  %6300 = vmatprep.subr.bf16.mxu0 %v6723_v8  ;;  %v3693_v53 = vrot.slane %v3691_v60, 3  ;;  %v3574_v14 = vld [vmem:[#allocation2 + $0xb0] sm:$0xf8] }
  0xd2   : > { %v889_v20 = vsel %vm634_vm1, %v880_v16, %v888_v12  ;;  %v897_v18 = vor.u32 %v896_v42, %v893_v50  ;;  %v3708_v26 = vshrl.u32 %v3570_v59, 16  ;;  %v3696_v19 = vrot.slane %v3694_v36, 4  ;;  %v7555_v42 = vld [vmem:[#allocation2 + $0xb8] sm:$0xf] }
  0xd3   : > { %6050 = vmatprep.mubr.bf16.mxu1 %v889_v20  ;;  %v905_v31 = vor.u32 %v904_v33, %v901_v35  ;;  %v3701_v49 = vrot.slane %v3699_v10, 3  ;;  %v3704_v17 = vrot.slane %v3702_v47, 4  ;;  %v3711_v38 = vshll.u32 %v3570_v59, 16 }
  0xd4   : > { %v3710_v11 = vrot.slane %v3708_v26, 3  ;;  %v3716_v22 = vshrl.u32 %v7536_v39, 16  ;;  %v3719_v0 = vshll.u32 %v7536_v39, 16  ;;  %6301 = vmatpush3.bf16.msra.mxu0 %v6723_v8  ;;  %v3697_v62 = vor.u32 %v3696_v19, %v3693_v53  ;;  %v6731_v53 = vld [vmem:[%s7936_s4 + $0x1f8] sm:$0xff]  }
  0xd5   : > { %v906_v58 = vsel %vm634_vm1, %v897_v18, %v905_v31  ;;  %v3705_v32 = vor.u32 %v3704_v17, %v3701_v49  ;;  %v1504_v13 = vshrl.u32 %v6746_v54, 16  ;;  %6302 = vmatprep.subr.bf16.mxu0 %v6725_v29  ;;  %v3713_v40 = vrot.slane %v3711_v38, 4  ;;  %v1488_v18 = vld [vmem:[#allocation2 + $0x28] sm:$0x1f] }
  0xd6   : > { %6051 = vmatmul.mubr.bf16.gmra.mrb[28].mxu1 %v906_v58  ;;  %v3718_v4 = vrot.slane %v3716_v22, 3  ;;  %v3721_v5 = vrot.slane %v3719_v0, 4  ;;  %v1507_v21 = vshll.u32 %v6746_v54, 16  ;;  %v1512_v23 = vshrl.u32 %v1486_v9, 16  ;;  %v6726_v17 = vld [vmem:[%s7936_s4 + $0xc8] sm:$0xff]  }
  0xd7   : > { %6271 = vmatmul.mubr.bf16.gmra.mrb[8].mxu0 %v3689_v25  ;;  %v3706_v44 = vsel %vm634_vm1, %v3697_v62, %v3705_v32  ;;  %v1506_v28 = vrot.slane %v1504_v13, 4  ;;  %v1515_v56 = vshll.u32 %v1486_v9, 16  ;;  %v3714_v15 = vor.u32 %v3713_v40, %v3710_v11  ;;  %v6747_v0 = vld [vmem:[#allocation2 + $0x20] sm:$0xf0]  ;;  %v1489_v13 = vld [vmem:[#allocation2 + $0x38] sm:$0x1f] }
  0xd8   : > { %6274 = vmatprep.mubr.bf16.mxu0 %v3706_v44  ;;  %v3722_v41 = vor.u32 %v3721_v5, %v3718_v4  ;;  %v1509_v3 = vrot.slane %v1507_v21, 5  ;;  %v1527_v7 = vor.u32 %v7106_v55, %v7104_v51  ;;  %6303 = vmatpush3.bf16.msra.mxu0 %v6725_v29  ;;  %v1514_v8 = vrot.slane %v1512_v23, 4  ;;  %v3576_v21 = vld [vmem:[#allocation2 + $0xc0] sm:$0xf8] }
  0xd9   : > { %v1517_v27 = vrot.slane %v1515_v56, 5  ;;  %v1529_v30 = vshrl.u32 %v1487_v6, 16  ;;  %v1532_v63 = vshll.u32 %v1487_v6, 16  ;;  %6304 = vmatprep.subr.bf16.mxu0 %v6727_v61  ;;  %v3725_v50 = vshrl.u32 %v3572_v37, 16  ;;  %v7572_v6 = vld [vmem:[%s7936_s4 + $0x200] sm:$0xff]  }
  0xda   : > { %v3723_v25 = vsel %vm634_vm1, %v3714_v15, %v3722_v41  ;;  %v1510_v16 = vor.u32 %v1509_v3, %v1506_v28  ;;  %v3728_v48 = vshll.u32 %v3572_v37, 16  ;;  %v3733_v12 = vshrl.u32 %v7548_v34, 16  ;;  %v6748_v56 = vld [vmem:[#allocation2 + $0x30] sm:$0xf0] }
  0xdb   : > { %v1518_v59 = vor.u32 %v1517_v27, %v1514_v8  ;;  %v1531_v51 = vrot.slane %v1529_v30, 4  ;;  %v1534_v55 = vrot.slane %v1532_v63, 5  ;;  %v3727_v35 = vrot.slane %v3725_v50, 3 }
  0xdc   : > { %v3730_v60 = vrot.slane %v3728_v48, 4  ;;  %v3736_v29 = vshll.u32 %v7548_v34, 16  ;;  %v3742_v33 = vshrl.u32 %v3574_v14, 16  ;;  %6305 = vmatpush3.bf16.msra.mxu0 %v6727_v61  ;;  %v3735_v47 = vrot.slane %v3733_v12, 3 }
  0xdd   : > { %v1519_v36 = vsel %vm1502_vm2, %v1510_v16, %v1518_v59  ;;  %v1535_v10 = vor.u32 %v1534_v55, %v1531_v51  ;;  %v3745_v20 = vshll.u32 %v3574_v14, 16  ;;  %6306 = vmatprep.subr.bf16.mxu0 %v6729_v57  ;;  %v3750_v49 = vshrl.u32 %v7555_v42, 16  ;;  %v3578_v14 = vld [vmem:[#allocation2 + $0xd0] sm:$0xf8]  ;;  %v6730_v59 = vld [vmem:[%s7936_s4 + $0xd8] sm:$0xff]  }
  0xde   : > { %6070 = vmatprep.mubr.bf16.mxu1 %v1519_v36  ;;  %v3731_v26 = vor.u32 %v3730_v60, %v3727_v35  ;;  %v3738_v31 = vrot.slane %v3736_v29, 4  ;;  %v3744_v19 = vrot.slane %v3742_v33, 3  ;;  %v3753_v22 = vshll.u32 %v7555_v42, 16  ;;  %v7586_v60 = vld [vmem:[#allocation2 + $0xd8] sm:$0xf] }
  0xdf   : > { %6275 = vmatmul.mubr.bf16.gmra.mrb[12].mxu0 %v3723_v25  ;;  %v1536_v11 = vsel %vm1502_vm2, %v1527_v7, %v1535_v10  ;;  %v3747_v38 = vrot.slane %v3745_v20, 4  ;;  %v1538_v9 = vshrl.u32 %v6747_v0, 16  ;;  %v3752_v62 = vrot.slane %v3750_v49, 3 }
  0xe0   : > { %6071 = vmatmul.mubr.bf16.vlgmr.msra.gmra.mrb[0].mxu1 %v1536_v11  ;;  %v3739_v58 = vor.u32 %v3738_v31, %v3735_v47  ;;  %v1541_v32 = vshll.u32 %v6747_v0, 16  ;;  %v1546_v54 = vshrl.u32 %v1488_v18, 16  ;;  %6307 = vmatpush3.bf16.msra.mxu0 %v6729_v57  ;;  %v3755_v40 = vrot.slane %v3753_v22, 4  ;;  %v7578_v57 = vld [vmem:[#allocation2 + $0xc8] sm:$0xf] }
  0xe1   : > { %6103 = vmatpush3.bf16.msra.mxu1 %v7471_v1  ;;  %v3748_v61 = vor.u32 %v3747_v38, %v3744_v19  ;;  %v1540_v4 = vrot.slane %v1538_v9, 4  ;;  %v1549_v5 = vshll.u32 %v1488_v18, 16  ;;  %6308 = vmatprep.subr.bf16.mxu0 %v6731_v53  ;;  %v1555_v37 = vshrl.u32 %v6748_v56, 16  ;;  %v6728_v1 = vld [vmem:[%s7936_s4 + $0xd0] sm:$0xff]   ;;  %v6749_v0 = vld [vmem:[#allocation2 + $0x40] sm:$0xf0] }
  0xe2   : > { %v3740_v44 = vsel %vm634_vm1, %v3731_v26, %v3739_v58  ;;  %v1543_v28 = vrot.slane %v1541_v32, 5  ;;  %v1548_v23 = vrot.slane %v1546_v54, 4  ;;  %6104 = vmatprep.subr.bf16.mxu1 %v6726_v17  ;;  %v3756_v15 = vor.u32 %v3755_v40, %v3752_v62  ;;  %v6732_v58 = vld [vmem:[%s7936_s4 + $0xe0] sm:$0xff]  }
  0xe3   : > { %6278 = vmatprep.mubr.bf16.mxu0 %v3740_v44  ;;  %v1551_v41 = vrot.slane %v1549_v5, 5  ;;  %v1558_v3 = vshll.u32 %v6748_v56, 16  ;;  %v1563_v7 = vshrl.u32 %v1489_v13, 16  ;;  %v1557_v27 = vrot.slane %v1555_v37, 4  ;;  %v6750_v56 = vld [vmem:[#allocation2 + $0x50] sm:$0xf0] }
  0xe4   : > { %v1544_v8 = vor.u32 %v1543_v28, %v1540_v4  ;;  %v1566_v30 = vshll.u32 %v1489_v13, 16  ;;  %v3759_v63 = vshrl.u32 %v3576_v21, 16  ;;  %6309 = vmatpush3.bf16.msra.mxu0 %v6731_v53  ;;  %v3757_v25 = vsel %vm634_vm1, %v3748_v61, %v3756_v15  ;;  %v1491_v61 = vld [vmem:[#allocation2 + $0x58] sm:$0x1f]  ;;  %v6734_v15 = vld [vmem:[%s7936_s4 + $0xe8] sm:$0xff]  }
  0xe5   : > { %v1552_v16 = vor.u32 %v1551_v41, %v1548_v23  ;;  %v1560_v50 = vrot.slane %v1558_v3, 5  ;;  %v1565_v48 = vrot.slane %v1563_v7, 4  ;;  %6105 = vmatpush3.bf16.msra.mxu1 %v6726_v17  ;;  %6342 = vmatprep.subr.bf16.mxu0 %v7572_v6  ;;  %v3762_v12 = vshll.u32 %v3576_v21, 16  ;;  %v1490_v17 = vld [vmem:[#allocation2 + $0x48] sm:$0x1f] }
  0xe6   : > { %v1568_v51 = vrot.slane %v1566_v30, 5  ;;  %v3761_v55 = vrot.slane %v3759_v63, 3  ;;  %v3767_v35 = vshrl.u32 %v7578_v57, 16  ;;  %6106 = vmatprep.subr.bf16.mxu1 %v6728_v1  ;;  %v3770_v36 = vshll.u32 %v7578_v57, 16 }
  0xe7   : > { %6279 = vmatmul.mubr.bf16.gmra.mrb[16].mxu0 %v3757_v25  ;;  %v1553_v29 = vsel %vm1502_vm2, %v1544_v8, %v1552_v16  ;;  %v1561_v33 = vor.u32 %v1560_v50, %v1557_v27  ;;  %v3776_v10 = vshrl.u32 %v3578_v14, 16  ;;  %v3764_v20 = vrot.slane %v3762_v12, 4  ;;  %v7600_v27 = vld [vmem:[#allocation2 + $0xe8] sm:$0xf]  ;;  %v3582_v16 = vld [vmem:[#allocation2 + $0xf0] sm:$0xf8] }
  0xe8   : > { %6074 = vmatprep.mubr.bf16.mxu1 %v1553_v29  ;;  %v1569_v47 = vor.u32 %v1568_v51, %v1565_v48  ;;  %v3769_v18 = vrot.slane %v3767_v35, 3  ;;  %v3779_v53 = vshll.u32 %v3578_v14, 16  ;;  %v3772_v26 = vrot.slane %v3770_v36, 4 }
  0xe9   : > { %v3778_v31 = vrot.slane %v3776_v10, 3  ;;  %v3784_v19 = vshrl.u32 %v7586_v60, 16  ;;  %v3787_v49 = vshll.u32 %v7586_v60, 16  ;;  %6107 = vmatpush3.bf16.msra.mxu1 %v6728_v1  ;;  %v3765_v38 = vor.u32 %v3764_v20, %v3761_v55  ;;  %v3580_v1 = vld [vmem:[#allocation2 + $0xe0] sm:$0xf8] }
  0xea   : > { %v1570_v11 = vsel %vm1502_vm2, %v1561_v33, %v1569_v47  ;;  %v3781_v22 = vrot.slane %v3779_v53, 4  ;;  %v1572_v9 = vshrl.u32 %v6749_v0, 16  ;;  %6108 = vmatprep.subr.bf16.mxu1 %v6730_v59  ;;  %v3773_v62 = vor.u32 %v3772_v26, %v3769_v18  ;;  %v7605_v33 = vld [vmem:[#allocation2 + $0xf8] sm:$0xf]  ;;  %v6736_v18 = vld [vmem:[%s7936_s4 + $0xf0] sm:$0xff]  }
  0xeb   : > { %6075 = vmatmul.mubr.bf16.gmra.mrb[4].mxu1 %v1570_v11  ;;  %v3786_v32 = vrot.slane %v3784_v19, 3  ;;  %v3789_v54 = vrot.slane %v3787_v49, 4  ;;  %v1575_v13 = vshll.u32 %v6749_v0, 16  ;;  %v1580_v5 = vshrl.u32 %v1490_v17, 16 }
  0xec   : > { %v3782_v40 = vor.u32 %v3781_v22, %v3778_v31  ;;  %v1574_v4 = vrot.slane %v1572_v9, 4  ;;  %v1583_v21 = vshll.u32 %v1490_v17, 16  ;;  %v3774_v44 = vsel %vm634_vm1, %v3765_v38, %v3773_v62  ;;  %v1492_v22 = vld [vmem:[#allocation2 + $0x68] sm:$0x1f]  ;;  %v6751_v62 = vld [vmem:[#allocation2 + $0x60] sm:$0xf0] }
  0xed   : > { %v3790_v28 = vor.u32 %v3789_v54, %v3786_v32  ;;  %v1577_v23 = vrot.slane %v1575_v13, 5  ;;  %v1589_v37 = vshrl.u32 %v6750_v56, 16  ;;  %6109 = vmatpush3.bf16.msra.mxu1 %v6730_v59  ;;  %6282 = vmatprep.mubr.bf16.mxu0 %v3774_v44  ;;  %v1582_v41 = vrot.slane %v1580_v5, 4  ;;  %v1493_v54 = vld [vmem:[#allocation2 + $0x78] sm:$0x1f] }
  0xee   : > { %v1585_v3 = vrot.slane %v1583_v21, 5  ;;  %v1592_v7 = vshll.u32 %v6750_v56, 16  ;;  %v1597_v8 = vshrl.u32 %v1491_v61, 16  ;;  %6110 = vmatprep.subr.bf16.mxu1 %v6732_v58  ;;  %v1600_v25 = vshll.u32 %v1491_v61, 16  ;;  %v6738_v5 = vld [vmem:[%s7936_s4 + $0xf8] sm:$0xff]  }
  0xef   : > { %v3791_v30 = vsel %vm634_vm1, %v3782_v40, %v3790_v28  ;;  %v1578_v63 = vor.u32 %v1577_v23, %v1574_v4  ;;  %v1591_v14 = vrot.slane %v1589_v37, 4  ;;  %v3793_v51 = vshrl.u32 %v3580_v1, 16 }
  0xf0   : > { %6283 = vmatmul.mubr.bf16.gmra.mrb[20].mxu0 %v3791_v30  ;;  %v1586_v50 = vor.u32 %v1585_v3, %v1582_v41  ;;  %v1594_v48 = vrot.slane %v1592_v7, 5  ;;  %v1599_v59 = vrot.slane %v1597_v8, 4  ;;  %v1602_v55 = vrot.slane %v1600_v25, 5  ;;  %v3584_v3 = vld [vmem:[#allocation2 + $0x100] sm:$0xf8] }
  0xf1   : > { %v3796_v12 = vshll.u32 %v3580_v1, 16  ;;  %v3801_v35 = vshrl.u32 %v7600_v27, 16  ;;  %v3804_v29 = vshll.u32 %v7600_v27, 16  ;;  %6111 = vmatpush3.bf16.msra.mxu1 %v6732_v58  ;;  %v3795_v47 = vrot.slane %v3793_v51, 3 }
  0xf2   : > { %v1587_v36 = vsel %vm1502_vm2, %v1578_v63, %v1586_v50  ;;  %v1595_v10 = vor.u32 %v1594_v48, %v1591_v14  ;;  %v3810_v20 = vshrl.u32 %v3582_v16, 16  ;;  %6112 = vmatprep.subr.bf16.mxu1 %v6734_v15  ;;  %v1603_v53 = vor.u32 %v1602_v55, %v1599_v59  ;;  %v7618_v14 = vld [vmem:[#allocation2 + $0x108] sm:$0xf]  ;;  %v3586_v59 = vld [vmem:[#allocation2 + $0x110] sm:$0xf8] }
  0xf3   : > { %6078 = vmatprep.mubr.bf16.mxu1 %v1587_v36  ;;  %v3798_v26 = vrot.slane %v3796_v12, 4  ;;  %v3803_v31 = vrot.slane %v3801_v35, 3  ;;  %v3806_v19 = vrot.slane %v3804_v29, 4  ;;  %v3813_v17 = vshll.u32 %v3582_v16, 16 }
  0xf4   : > { %v3812_v49 = vrot.slane %v3810_v20, 3  ;;  %v3818_v11 = vshrl.u32 %v7605_v33, 16  ;;  %v3821_v38 = vshll.u32 %v7605_v33, 16  ;;  %v1604_v0 = vsel %vm1502_vm2, %v1595_v10, %v1603_v53  ;;  %v7623_v20 = vld [vmem:[#allocation2 + $0x118] sm:$0xf] }
  0xf5   : > { %v3799_v9 = vor.u32 %v3798_v26, %v3795_v47  ;;  %v3807_v58 = vor.u32 %v3806_v19, %v3803_v31  ;;  %v1606_v32 = vshrl.u32 %v6751_v62, 16  ;;  %6113 = vmatpush3.bf16.msra.mxu1 %v6734_v15  ;;  %v3815_v13 = vrot.slane %v3813_v17, 4  ;;  %v6752_v15 = vld [vmem:[#allocation2 + $0x70] sm:$0xf0] }
  0xf6   : > { %6079 = vmatmul.mubr.bf16.gmra.mrb[8].mxu1 %v1604_v0  ;;  %v3820_v61 = vrot.slane %v3818_v11, 3  ;;  %v3823_v40 = vrot.slane %v3821_v38, 4  ;;  %v1609_v4 = vshll.u32 %v6751_v62, 16  ;;  %6114 = vmatprep.subr.bf16.mxu1 %v6736_v18  ;;  %v1614_v28 = vshrl.u32 %v1492_v22, 16  ;;  %v7629_v38 = vld [vmem:[%s7936_s4 + $0x100] sm:$0xff]  }
  0xf7   : > { %v3808_v21 = vsel %vm634_vm1, %v3799_v9, %v3807_v58  ;;  %v1608_v44 = vrot.slane %v1606_v32, 4  ;;  %v1617_v23 = vshll.u32 %v1492_v22, 16  ;;  %v3816_v56 = vor.u32 %v3815_v13, %v3812_v49  ;;  %v1494_v62 = vld [vmem:[#allocation2 + $0x88] sm:$0x1f] }
  0xf8   : > { %6286 = vmatprep.mubr.bf16.mxu0 %v3808_v21  ;;  %v3824_v37 = vor.u32 %v3823_v40, %v3820_v61  ;;  %v1611_v1 = vrot.slane %v1609_v4, 5  ;;  %v1623_v41 = vshrl.u32 %v6752_v15, 16  ;;  %v1616_v7 = vrot.slane %v1614_v28, 4  ;;  %v6754_v61 = vld [vmem:[#allocation2 + $0x80] sm:$0xf0] }
  0xf9   : > { %v1619_v8 = vrot.slane %v1617_v23, 5  ;;  %v1626_v30 = vshll.u32 %v6752_v15, 16  ;;  %v1631_v63 = vshrl.u32 %v1493_v54, 16  ;;  %6115 = vmatpush3.bf16.msra.mxu1 %v6736_v18  ;;  %v1634_v48 = vshll.u32 %v1493_v54, 16  ;;  %v1495_v28 = vld [vmem:[#allocation2 + $0x98] sm:$0x1f] }
  0xfa   : > { %v3825_v25 = vsel %vm634_vm1, %v3816_v56, %v3824_v37  ;;  %v1612_v16 = vor.u32 %v1611_v1, %v1608_v44  ;;  %v1625_v50 = vrot.slane %v1623_v41, 4  ;;  %6116 = vmatprep.subr.bf16.mxu1 %v6738_v5  ;;  %v3827_v35 = vshrl.u32 %v3584_v3, 16 }
  0xfb   : > { %6287 = vmatmul.mubr.bf16.gmra.mrb[24].mxu0 %v3825_v25  ;;  %v1620_v51 = vor.u32 %v1619_v8, %v1616_v7  ;;  %v1628_v55 = vrot.slane %v1626_v30, 5  ;;  %v1633_v12 = vrot.slane %v1631_v63, 4  ;;  %v1636_v29 = vrot.slane %v1634_v48, 5  ;;  %v6755_v7 = vld [vmem:[#allocation2 + $0x90] sm:$0xf0] }
  0xfc   : > { %v3830_v36 = vshll.u32 %v3584_v3, 16  ;;  %v3835_v10 = vshrl.u32 %v7618_v14, 16  ;;  %v3838_v47 = vshll.u32 %v7618_v14, 16  ;;  %v3829_v26 = vrot.slane %v3827_v35, 3  ;;  %v7636_v30 = vld [vmem:[#allocation2 + $0x20] sm:$0xf0] }
  0xfd   : > { %v1621_v18 = vsel %vm1502_vm2, %v1612_v16, %v1620_v51  ;;  %v1629_v53 = vor.u32 %v1628_v55, %v1625_v50  ;;  %v3844_v31 = vshrl.u32 %v3586_v59, 16  ;;  %6117 = vmatpush3.bf16.msra.mxu1 %v6738_v5  ;;  %v1637_v19 = vor.u32 %v1636_v29, %v1633_v12  ;;  %v7638_v48 = vld [vmem:[#allocation2 + $0x30] sm:$0xf0] }
  0xfe   : > { %6082 = vmatprep.mubr.bf16.mxu1 %v1621_v18  ;;  %v3832_v49 = vrot.slane %v3830_v36, 4  ;;  %v3837_v17 = vrot.slane %v3835_v10, 3  ;;  %v3840_v11 = vrot.slane %v3838_v47, 4  ;;  %6390 = vmatprep.subr.bf16.mxu1 %v7629_v38  ;;  %v3847_v0 = vshll.u32 %v3586_v59, 16  ;;  %v1496_v47 = vld [vmem:[#allocation2 + $0xa8] sm:$0x1f] }
  0xff   : > { %v3846_v22 = vrot.slane %v3844_v31, 3  ;;  %v3852_v9 = vshrl.u32 %v7623_v20, 16  ;;  %v3855_v58 = vshll.u32 %v7623_v20, 16  ;;  %v1638_v32 = vsel %vm1502_vm2, %v1629_v53, %v1637_v19  ;;  %v6756_v53 = vld [vmem:[#allocation2 + $0x28] sm:$0xf] }
 0x100   : > { %v3833_v54 = vor.u32 %v3832_v49, %v3829_v26  ;;  %v3841_v13 = vor.u32 %v3840_v11, %v3837_v17  ;;  %v1640_v40 = vshrl.u32 %v6754_v61, 16  ;;  %6083 = vmatmul.mubr.bf16.gmra.mrb[12].mxu1 %v1638_v32  ;;  %v3849_v4 = vrot.slane %v3847_v0, 4  ;;  %v6757_v19 = vld [vmem:[#allocation2 + $0x38] sm:$0xf] }
 0x101   : > { %v3854_v5 = vrot.slane %v3852_v9, 3  ;;  %v3857_v21 = vrot.slane %v3855_v58, 4  ;;  %v1643_v44 = vshll.u32 %v6754_v61, 16  ;;  %v1648_v37 = vshrl.u32 %v1494_v62, 16  ;;  %v1497_v58 = vld [vmem:[#allocation2 + $0xb8] sm:$0x1f] }
 0x102   : > { %v3842_v23 = vsel %vm634_vm1, %v3833_v54, %v3841_v13  ;;  %v1642_v56 = vrot.slane %v1640_v40, 4  ;;  %v1651_v1 = vshll.u32 %v1494_v62, 16  ;;  %v3850_v15 = vor.u32 %v3849_v4, %v3846_v22  ;;  %v6758_v22 = vld [vmem:[#allocation2 + $0xa0] sm:$0xf0] }
 0x103   : > { %6290 = vmatprep.mubr.bf16.mxu0 %v3842_v23  ;;  %v3858_v41 = vor.u32 %v3857_v21, %v3854_v5  ;;  %v1645_v3 = vrot.slane %v1643_v44, 5  ;;  %v1657_v8 = vshrl.u32 %v6755_v7, 16  ;;  %v1650_v63 = vrot.slane %v1648_v37, 4  ;;  %v6759_v5 = vld [vmem:[#allocation2 + $0xb0] sm:$0xf0] }
 0x104   : > { %v1653_v25 = vrot.slane %v1651_v1, 5  ;;  %v1660_v16 = vshll.u32 %v6755_v7, 16  ;;  %v1665_v50 = vshrl.u32 %v1495_v28, 16  ;;  %v1668_v12 = vshll.u32 %v1495_v28, 16  ;;  %v7646_v44 = vld [vmem:[#allocation2 + $0x40] sm:$0xf0] }
 0x105   : > { %v3859_v59 = vsel %vm634_vm1, %v3850_v15, %v3858_v41  ;;  %v1646_v51 = vor.u32 %v1645_v3, %v1642_v56  ;;  %v1659_v55 = vrot.slane %v1657_v8, 4  ;;  %v4181_v10 = vrot.slane %v7636_v30, 4  ;;  %v7649_v1 = vld [vmem:[#allocation2 + $0x50] sm:$0xf0]  ;;  %v6735_v8 = vld [vmem:[%s7936_s4 + $0x208] sm:$0xff]  }
 0x106   : > { %6291 = vmatmul.mubr.bf16.gmra.mrb[28].mxu0 %v3859_v59  ;;  %v1654_v35 = vor.u32 %v1653_v25, %v1650_v63  ;;  %v1662_v29 = vrot.slane %v1660_v16, 5  ;;  %v1667_v36 = vrot.slane %v1665_v50, 4  ;;  %v1670_v18 = vrot.slane %v1668_v12, 5  ;;  %v1498_v59 = vld [vmem:[#allocation2 + $0xc8] sm:$0x1f] }
 0x107   : > { %v4182_v26 = vrot.slane %v6756_v53, 4  ;;  %v4184_v31 = vrot.slane %v7638_v48, 4  ;;  %v4185_v49 = vrot.slane %v6757_v19, 4  ;;  %v1674_v0 = vshrl.u32 %v6758_v22, 16  ;;  %v1499_v53 = vld [vmem:[#allocation2 + $0xd8] sm:$0x1f] }
 0x108   : > { %v1655_v17 = vsel %vm1502_vm2, %v1646_v51, %v1654_v35  ;;  %v1663_v11 = vor.u32 %v1662_v29, %v1659_v55  ;;  %v1677_v9 = vshll.u32 %v6758_v22, 16  ;;  %v1671_v62 = vor.u32 %v1670_v18, %v1667_v36 }
 0x109   : > { %6086 = vmatprep.mubr.bf16.mxu1 %v1655_v17  ;;  %v4183_v32 = vsel %vm987_vm0, %v4181_v10, %v4182_v26  ;;  %v4186_v54 = vsel %vm987_vm0, %v4184_v31, %v4185_v49  ;;  %v1682_v13 = vshrl.u32 %v1496_v47, 16  ;;  %v1676_v61 = vrot.slane %v1674_v0, 4  ;;  %v6760_v10 = vld [vmem:[#allocation2 + $0xc0] sm:$0xf0] }
 0x10a   : > { %6310 = vmatprep.mubr.bf16.mxu0 %v4183_v32  ;;  %v1679_v40 = vrot.slane %v1677_v9, 5  ;;  %v1685_v4 = vshll.u32 %v1496_v47, 16  ;;  %v1691_v21 = vshrl.u32 %v6759_v5, 16  ;;  %v1672_v28 = vsel %vm1502_vm2, %v1663_v11, %v1671_v62  ;;  %v6761_v11 = vld [vmem:[#allocation2 + $0xd0] sm:$0xf0] }
 0x10b   : > { %v1684_v23 = vrot.slane %v1682_v13, 4  ;;  %v1694_v56 = vshll.u32 %v6759_v5, 16  ;;  %v1699_v37 = vshrl.u32 %v1497_v58, 16  ;;  %6087 = vmatmul.mubr.bf16.gmra.mrb[16].mxu1 %v1672_v28  ;;  %v1702_v7 = vshll.u32 %v1497_v58, 16  ;;  %v7665_v0 = vld [vmem:[#allocation2 + $0x60] sm:$0xf0] }
 0x10c   : > { %v1680_v15 = vor.u32 %v1679_v40, %v1676_v61  ;;  %v1687_v41 = vrot.slane %v1685_v4, 5  ;;  %v1693_v3 = vrot.slane %v1691_v21, 4  ;;  %v4187_v16 = vrot.slane %v7646_v44, 4  ;;  %v6739_v5 = vld [vmem:[%s7936_s4 + $0x218] sm:$0xff]  }
 0x10d   : > { %v1696_v63 = vrot.slane %v1694_v56, 5  ;;  %v1701_v25 = vrot.slane %v1699_v37, 4  ;;  %v4188_v50 = vrot.slane %v7485_v24, 4  ;;  %v1704_v55 = vrot.slane %v1702_v7, 5  ;;  %v1500_v37 = vld [vmem:[#allocation2 + $0xe8] sm:$0x1f] }
 0x10e   : > { %6311 = vmatmul.mubr.bf16.vlgmr.msra.gmra.mrb[0].mxu0 %v4186_v54  ;;  %v1688_v51 = vor.u32 %v1687_v41, %v1684_v23  ;;  %v4190_v12 = vrot.slane %v7649_v1, 4  ;;  %v4191_v35 = vrot.slane %v7488_v52, 4  ;;  %v1708_v47 = vshrl.u32 %v6760_v10, 16  ;;  %v6737_v52 = vld [vmem:[%s7936_s4 + $0x210] sm:$0xff]  }
 0x10f   : > { %6343 = vmatpush3.bf16.msra.mxu0 %v7572_v6  ;;  %v1697_v29 = vor.u32 %v1696_v63, %v1693_v3  ;;  %v4189_v36 = vsel %vm987_vm0, %v4187_v16, %v4188_v50  ;;  %v1711_v18 = vshll.u32 %v6760_v10, 16  ;;  %v1705_v24 = vor.u32 %v1704_v55, %v1701_v25  ;;  %v7668_v54 = vld [vmem:[#allocation2 + $0x70] sm:$0xf0]  ;;  %v6762_v25 = vld [vmem:[#allocation2 + $0xe0] sm:$0xf0] }
 0x110   : > { %v1689_v26 = vsel %vm1502_vm2, %v1680_v15, %v1688_v51  ;;  %6314 = vmatprep.mubr.bf16.mxu0 %v4189_v36  ;;  %6344 = vmatprep.subr.bf16.mxu0 %v6735_v8  ;;  %v4192_v31 = vsel %vm987_vm0, %v4190_v12, %v4191_v35  ;;  %v1716_v19 = vshrl.u32 %v1498_v59, 16  ;;  %v1710_v6 = vrot.slane %v1708_v47, 4  ;;  %v6763_v10 = vld [vmem:[#allocation2 + $0xf0] sm:$0xf0] }
 0x111   : > { %6090 = vmatprep.mubr.bf16.mxu1 %v1689_v26  ;;  %v1713_v49 = vrot.slane %v1711_v18, 5  ;;  %v1719_v17 = vshll.u32 %v1498_v59, 16  ;;  %v1725_v22 = vshrl.u32 %v6761_v11, 16  ;;  %v1706_v9 = vsel %vm1502_vm2, %v1697_v29, %v1705_v24  ;;  %v1501_v59 = vld [vmem:[#allocation2 + $0xf8] sm:$0x1f] }
 0x112   : > { %v1718_v58 = vrot.slane %v1716_v19, 4  ;;  %v1728_v62 = vshll.u32 %v6761_v11, 16  ;;  %v1733_v32 = vshrl.u32 %v1499_v53, 16  ;;  %v1736_v4 = vshll.u32 %v1499_v53, 16  ;;  %v7683_v18 = vld [vmem:[#allocation2 + $0x80] sm:$0xf0] }
 0x113   : > { %6345 = vmatpush3.bf16.msra.mxu0 %v6735_v8  ;;  %v1714_v13 = vor.u32 %v1713_v49, %v1710_v6  ;;  %v1721_v61 = vrot.slane %v1719_v17, 5  ;;  %v1727_v40 = vrot.slane %v1725_v22, 4  ;;  %6091 = vmatmul.mubr.bf16.gmra.mrb[20].mxu1 %v1706_v9  ;;  %v4193_v23 = vrot.slane %v7665_v0, 4  ;;  %v7686_v19 = vld [vmem:[#allocation2 + $0x90] sm:$0xf0] }
 0x114   : > { %v1730_v21 = vrot.slane %v1728_v62, 5  ;;  %v1735_v28 = vrot.slane %v1733_v32, 4  ;;  %v4194_v56 = vrot.slane %v7500_v45, 4  ;;  %6346 = vmatprep.subr.bf16.mxu0 %v6737_v52  ;;  %v1738_v41 = vrot.slane %v1736_v4, 5  ;;  %v2048_v11 = vld [vmem:[#allocation2 + $0x10] sm:$0xf8] }
 0x115   : > { %v1722_v15 = vor.u32 %v1721_v61, %v1718_v58  ;;  %v4196_v3 = vrot.slane %v7668_v54, 4  ;;  %v4197_v7 = vrot.slane %v7507_v43, 4  ;;  %v1742_v16 = vshrl.u32 %v6762_v25, 16  ;;  %v6740_v43 = vld [vmem:[%s7936_s4 + $0x220] sm:$0xff]  }
 0x116   : > { %6315 = vmatmul.mubr.bf16.gmra.mrb[4].mxu0 %v4192_v31  ;;  %v1731_v8 = vor.u32 %v1730_v21, %v1727_v40  ;;  %v4195_v63 = vsel %vm987_vm0, %v4193_v23, %v4194_v56  ;;  %v1745_v50 = vshll.u32 %v6762_v25, 16  ;;  %v1739_v55 = vor.u32 %v1738_v41, %v1735_v28  ;;  %v2050_v4 = vld [vmem:[#allocation2 + $0x20] sm:$0xf8]  ;;  %v6764_v41 = vld [vmem:[#allocation2 + $0x18] sm:$0xf] }
 0x117   : > { %v1723_v51 = vsel %vm1502_vm2, %v1714_v13, %v1722_v15  ;;  %6318 = vmatprep.mubr.bf16.mxu0 %v4195_v63  ;;  %v4198_v45 = vsel %vm987_vm0, %v4196_v3, %v4197_v7  ;;  %6347 = vmatpush3.bf16.msra.mxu0 %v6737_v52  ;;  %v1750_v12 = vshrl.u32 %v1500_v37, 16  ;;  %v1744_v35 = vrot.slane %v1742_v16, 4  ;;  %v7700_v16 = vld [vmem:[#allocation2 + $0xb0] sm:$0xf0] }
 0x118   : > { %6094 = vmatprep.mubr.bf16.mxu1 %v1723_v51  ;;  %v1747_v29 = vrot.slane %v1745_v50, 5  ;;  %v1753_v36 = vshll.u32 %v1500_v37, 16  ;;  %v1759_v47 = vshrl.u32 %v6763_v10, 16  ;;  %6348 = vmatprep.subr.bf16.mxu0 %v6739_v5  ;;  %v1740_v53 = vsel %vm1502_vm2, %v1731_v8, %v1739_v55  ;;  %v6741_v37 = vld [vmem:[%s7936_s4 + $0x228] sm:$0xff]   ;;  %v7942_v55 = vld [vmem:[#allocation3_spill] sm:$0xff] }
 0x119   : > { %v1752_v26 = vrot.slane %v1750_v12, 4  ;;  %v1762_v24 = vshll.u32 %v6763_v10, 16  ;;  %v1767_v31 = vshrl.u32 %v1501_v59, 16  ;;  %v1770_v17 = vshll.u32 %v1501_v59, 16  ;;  %v2052_v12 = vld [vmem:[#allocation2 + $0x30] sm:$0xf8] }
 0x11a   : > { %v1748_v52 = vor.u32 %v1747_v29, %v1744_v35  ;;  %v1755_v6 = vrot.slane %v1753_v36, 5  ;;  %v1761_v49 = vrot.slane %v1759_v47, 4  ;;  %v4199_v58 = vrot.slane %v7683_v18, 4  ;;  %v6742_v47 = vld [vmem:[%s7936_s4 + $0x230] sm:$0xff]  }
 0x11b   : > { %v1764_v22 = vrot.slane %v1762_v24, 5  ;;  %v1769_v9 = vrot.slane %v1767_v31, 4  ;;  %v4200_v62 = vrot.slane %v7527_v46, 4  ;;  %6349 = vmatpush3.bf16.msra.mxu0 %v6739_v5  ;;  %6095 = vmatmul.mubr.bf16.gmra.mrb[24].mxu1 %v1740_v53  ;;  %v1772_v13 = vrot.slane %v1770_v17, 5  ;;  %v2054_v17 = vld [vmem:[#allocation2 + $0x40] sm:$0xf8] }
 0x11c   : > { %v1756_v32 = vor.u32 %v1755_v6, %v1752_v26  ;;  %v4202_v61 = vrot.slane %v7686_v19, 4  ;;  %v4203_v40 = vrot.slane %v7536_v39, 4  ;;  %6350 = vmatprep.subr.bf16.mxu0 %v6740_v43  ;;  %v2081_v23 = vshrl.u32 %v2048_v11, 16  ;;  %v7698_v39 = vld [vmem:[#allocation2 + $0xa0] sm:$0xf0] }
 0x11d   : > { %v1765_v21 = vor.u32 %v1764_v22, %v1761_v49  ;;  %v4201_v28 = vsel %vm987_vm0, %v4199_v58, %v4200_v62  ;;  %v2084_v56 = vshll.u32 %v2048_v11, 16  ;;  %v1773_v5 = vor.u32 %v1772_v13, %v1769_v9  ;;  %v6765_v6 = vld [vmem:[#allocation2 + $0x38] sm:$0xf]  ;;  %v7714_v62 = vld [vmem:[#allocation2 + $0xc0] sm:$0xf0] }
 0x11e   : > { %6319 = vmatmul.mubr.bf16.gmra.mrb[8].mxu0 %v4198_v45  ;;  %v1757_v46 = vsel %vm1502_vm2, %v1748_v52, %v1756_v32  ;;  %v4204_v15 = vsel %vm987_vm0, %v4202_v61, %v4203_v40  ;;  %v2089_v3 = vshrl.u32 %v6764_v41, 16  ;;  %v2083_v7 = vrot.slane %v2081_v23, 3  ;;  %v6743_v61 = vld [vmem:[%s7936_s4 + $0x238] sm:$0xff]   ;;  %v7721_v23 = vld [vmem:[#allocation2 + $0xd0] sm:$0xf0] }
 0x11f   : > { %6098 = vmatprep.mubr.bf16.mxu1 %v1757_v46  ;;  %6322 = vmatprep.mubr.bf16.mxu0 %v4201_v28  ;;  %v2086_v8 = vrot.slane %v2084_v56, 4  ;;  %v2092_v63 = vshll.u32 %v6764_v41, 16  ;;  %v2098_v25 = vshrl.u32 %v2050_v4, 16  ;;  %v1774_v50 = vsel %vm1502_vm2, %v1765_v21, %v1773_v5 }
 0x120   : > { %v2091_v59 = vrot.slane %v2089_v3, 3  ;;  %v2101_v51 = vshll.u32 %v2050_v4, 16  ;;  %v2112_v45 = vor.u32 %v7942_v55, %v7117_v2  ;;  %6351 = vmatpush3.bf16.msra.mxu0 %v6740_v43  ;;  %v4205_v10 = vrot.slane %v7698_v39, 4  ;;  %v2056_v3 = vld [vmem:[#allocation2 + $0x50] sm:$0xf8] }
 0x121   : > { %v2087_v35 = vor.u32 %v2086_v8, %v2083_v7  ;;  %v2094_v29 = vrot.slane %v2092_v63, 4  ;;  %v2100_v36 = vrot.slane %v2098_v25, 3  ;;  %6352 = vmatprep.subr.bf16.mxu0 %v6741_v37  ;;  %v4206_v26 = vrot.slane %v7548_v34, 4  ;;  %v2058_v55 = vld [vmem:[#allocation2 + $0x60] sm:$0xf8] }
 0x122   : > { %v2103_v53 = vrot.slane %v2101_v51, 4  ;;  %v4208_v24 = vrot.slane %v7700_v16, 4  ;;  %v4209_v31 = vrot.slane %v7555_v42, 4  ;;  %v2115_v43 = vshrl.u32 %v2052_v12, 16 }
 0x123   : > { %v2095_v2 = vor.u32 %v2094_v29, %v2091_v59  ;;  %v2118_v52 = vshll.u32 %v2052_v12, 16  ;;  %v2123_v49 = vshrl.u32 %v6765_v6, 16  ;;  %6099 = vmatmul.mubr.bf16.gmra.mrb[28].mxu1 %v1774_v50  ;;  %v4207_v22 = vsel %vm987_vm0, %v4205_v10, %v4206_v26 }
 0x124   : > { %v2104_v11 = vor.u32 %v2103_v53, %v2100_v36  ;;  %v4210_v9 = vsel %vm987_vm0, %v4208_v24, %v4209_v31  ;;  %v2126_v58 = vshll.u32 %v6765_v6, 16  ;;  %6353 = vmatpush3.bf16.msra.mxu0 %v6741_v37  ;;  %v2117_v32 = vrot.slane %v2115_v43, 3  ;;  %v6766_v37 = vld [vmem:[#allocation2 + $0x48] sm:$0xf] }
 0x125   : > { %v2096_v34 = vsel %vm634_vm1, %v2087_v35, %v2095_v2  ;;  %v2120_v42 = vrot.slane %v2118_v52, 4  ;;  %v2125_v13 = vrot.slane %v2123_v49, 3  ;;  %6354 = vmatprep.subr.bf16.mxu0 %v6742_v47  ;;  %v2132_v21 = vshrl.u32 %v2054_v17, 16  ;;  %v7732_v2 = vld [vmem:[#allocation2 + $0xe0] sm:$0xf0] }
 0x126   : > { %6323 = vmatmul.mubr.bf16.gmra.mrb[12].mxu0 %v4204_v15  ;;  %6118 = vmatprep.mubr.bf16.mxu1 %v2096_v34  ;;  %v2113_v40 = vsel %vm634_vm1, %v2104_v11, %v2112_v45  ;;  %v2128_v4 = vrot.slane %v2126_v58, 4  ;;  %v2135_v28 = vshll.u32 %v2054_v17, 16  ;;  %v2140_v46 = vshrl.u32 %v6766_v37, 16  ;;  %v6768_v49 = vld [vmem:[#allocation2 + $0x68] sm:$0xf] }
 0x127   : > { %6326 = vmatprep.mubr.bf16.mxu0 %v4207_v22  ;;  %v2121_v56 = vor.u32 %v2120_v42, %v2117_v32  ;;  %v2143_v5 = vshll.u32 %v6766_v37, 16  ;;  %v4211_v41 = vrot.slane %v7714_v62, 4  ;;  %v2134_v8 = vrot.slane %v2132_v21, 3  ;;  %v7736_v11 = vld [vmem:[#allocation2 + $0xf0] sm:$0xf0]  ;;  %v6769_v22 = vld [vmem:[%s7936_s4 + $0x108] sm:$0xff]  }
 0x128   : > { %v2129_v7 = vor.u32 %v2128_v4, %v2125_v13  ;;  %v2137_v63 = vrot.slane %v2135_v28, 4  ;;  %v4212_v15 = vrot.slane %v7578_v57, 4  ;;  %6355 = vmatpush3.bf16.msra.mxu0 %v6742_v47  ;;  %v2142_v25 = vrot.slane %v2140_v46, 3  ;;  %v6767_v47 = vld [vmem:[#allocation2 + $0x58] sm:$0xf] }
 0x129   : > { %v2145_v50 = vrot.slane %v2143_v5, 4  ;;  %v4214_v59 = vrot.slane %v7721_v23, 4  ;;  %v4215_v51 = vrot.slane %v7586_v60, 4  ;;  %6356 = vmatprep.subr.bf16.mxu0 %v6743_v61  ;;  %v2149_v29 = vshrl.u32 %v2056_v3, 16  ;;  %v2062_v37 = vld [vmem:[#allocation2 + $0x80] sm:$0xf8] }
 0x12a   : > { %v2130_v45 = vsel %vm634_vm1, %v2121_v56, %v2129_v7  ;;  %v2138_v12 = vor.u32 %v2137_v63, %v2134_v8  ;;  %v4213_v35 = vsel %vm987_vm0, %v4211_v41, %v4212_v15  ;;  %v2152_v57 = vshll.u32 %v2056_v3, 16  ;;  %v6771_v63 = vld [vmem:[#allocation2 + $0x78] sm:$0xf] }
 0x12b   : > { %v2146_v36 = vor.u32 %v2145_v50, %v2142_v25  ;;  %v7730_v10 = vsel %vm987_vm0, %v4214_v59, %v4215_v51  ;;  %v2157_v53 = vshrl.u32 %v6767_v47, 16  ;;  %6119 = vmatmul.mubr.bf16.vlgmr.msra.gmra.mrb[0].mxu1 %v2113_v40  ;;  %v2151_v26 = vrot.slane %v2149_v29, 3 }
 0x12c   : > { %v2160_v24 = vshll.u32 %v6767_v47, 16  ;;  %v2166_v31 = vshrl.u32 %v2058_v55, 16  ;;  %v2169_v60 = vshll.u32 %v2058_v55, 16  ;;  %6357 = vmatpush3.bf16.msra.mxu0 %v6743_v61  ;;  %6398 = vmatpush3.bf16.msra.mxu1 %v7629_v38  ;;  %v2154_v52 = vrot.slane %v2152_v57, 4  ;;  %v2060_v38 = vld [vmem:[#allocation2 + $0x70] sm:$0xf8] }
 0x12d   : > { %6122 = vmatprep.mubr.bf16.mxu1 %v2130_v45  ;;  %v2147_v43 = vsel %vm634_vm1, %v2138_v12, %v2146_v36  ;;  %v2159_v6 = vrot.slane %v2157_v53, 3  ;;  %v2174_v17 = vshrl.u32 %v6768_v49, 16  ;;  %6391 = vmatprep.subr.bf16.mxu1 %v6769_v22  ;;  %v2177_v42 = vshll.u32 %v6768_v49, 16  ;;  %v7756_v36 = vld [vmem:[#allocation2 + $0x110] sm:$0xf0] }
 0x12e   : > { %6327 = vmatmul.mubr.bf16.gmra.mrb[16].mxu0 %v4210_v9  ;;  %v2162_v58 = vrot.slane %v2160_v24, 4  ;;  %v2168_v34 = vrot.slane %v2166_v31, 3  ;;  %v2171_v32 = vrot.slane %v2169_v60, 4  ;;  %v2155_v13 = vor.u32 %v2154_v52, %v2151_v26  ;;  %v6772_v53 = vld [vmem:[#allocation2 + $0x88] sm:$0xf] }
 0x12f   : > { %6330 = vmatprep.mubr.bf16.mxu0 %v4213_v35  ;;  %v2176_v61 = vrot.slane %v2174_v17, 3  ;;  %v4217_v40 = vrot.slane %v7732_v2, 4  ;;  %v4218_v4 = vrot.slane %v7600_v27, 4  ;;  %v2179_v9 = vrot.slane %v2177_v42, 4  ;;  %v6770_v27 = vld [vmem:[%s7936_s4 + $0x110] sm:$0xff]  }
 0x130   : > { %v2163_v21 = vor.u32 %v2162_v58, %v2159_v6  ;;  %v2172_v28 = vor.u32 %v2171_v32, %v2168_v34  ;;  %v4220_v56 = vrot.slane %v7736_v11, 4  ;;  %6399 = vmatpush3.bf16.msra.mxu1 %v6769_v22  ;;  %v4221_v5 = vrot.slane %v7605_v33, 4  ;;  %v7753_v33 = vld [vmem:[#allocation2 + $0x100] sm:$0xf0]  ;;  %v2064_v31 = vld [vmem:[#allocation2 + $0x90] sm:$0xf8] }
 0x131   : > { %v4219_v46 = vsel %vm987_vm0, %v4217_v40, %v4218_v4  ;;  %v2183_v41 = vshrl.u32 %v2060_v38, 16  ;;  %v2186_v3 = vshll.u32 %v2060_v38, 16  ;;  %v2180_v8 = vor.u32 %v2179_v9, %v2176_v61  ;;  %6392 = vmatprep.subr.bf16.mxu1 %v6770_v27  ;;  %v7764_v17 = vld [vmem:[#allocation2 + $0x98] sm:$0xf]  ;;  %v2066_v32 = vld [vmem:[#allocation2 + $0xa0] sm:$0xf8] }
 0x132   : > { %v2164_v7 = vsel %vm634_vm1, %v2155_v13, %v2163_v21  ;;  %v2191_v15 = vshrl.u32 %v6771_v63, 16  ;;  %v2194_v25 = vshll.u32 %v6771_v63, 16  ;;  %v7751_v50 = vsel %vm987_vm0, %v4220_v56, %v4221_v5  ;;  %v7770_v40 = vld [vmem:[#allocation2 + $0xa8] sm:$0xf] }
 0x133   : > { %v2185_v59 = vrot.slane %v2183_v41, 3  ;;  %v2188_v51 = vrot.slane %v2186_v3, 4  ;;  %v2200_v55 = vshrl.u32 %v2062_v37, 16  ;;  %6123 = vmatmul.mubr.bf16.gmra.mrb[4].mxu1 %v2147_v43  ;;  %v2181_v45 = vsel %vm634_vm1, %v2172_v28, %v2180_v8  ;;  %v6773_v43 = vld [vmem:[%s7936_s4 + $0x118] sm:$0xff]   ;;  %v4502_v8 = vld [vmem:[#allocation2 + $0x28] sm:$0x1f] }
 0x134   : > { %v2193_v12 = vrot.slane %v2191_v15, 3  ;;  %v2196_v35 = vrot.slane %v2194_v25, 4  ;;  %v2203_v29 = vshll.u32 %v2062_v37, 16  ;;  %6126 = vmatprep.mubr.bf16.mxu1 %v2164_v7  ;;  %6400 = vmatpush3.bf16.msra.mxu1 %v6770_v27  ;;  %v2208_v26 = vshrl.u32 %v6772_v53, 16 }
 0x135   : > { %v2189_v57 = vor.u32 %v2188_v51, %v2185_v59  ;;  %v2202_v47 = vrot.slane %v2200_v55, 3  ;;  %v2211_v24 = vshll.u32 %v6772_v53, 16  ;;  %6393 = vmatprep.subr.bf16.mxu1 %v6773_v43  ;;  %v4223_v6 = vrot.slane %v7753_v33, 4  ;;  %v6775_v53 = vld [vmem:[%s7936_s4 + $0x128] sm:$0xff]  }
 0x136   : > { %6331 = vmatmul.mubr.bf16.gmra.mrb[20].mxu0 %v7730_v10  ;;  %v2197_v60 = vor.u32 %v2196_v35, %v2193_v12  ;;  %v2205_v52 = vrot.slane %v2203_v29, 4  ;;  %v4224_v49 = vrot.slane %v7618_v14, 4  ;;  %v2210_v22 = vrot.slane %v2208_v26, 3 }
 0x137   : > { %6334 = vmatprep.mubr.bf16.mxu0 %v4219_v46  ;;  %v2213_v58 = vrot.slane %v2211_v24, 4  ;;  %v4226_v34 = vrot.slane %v7756_v36, 4  ;;  %v4227_v10 = vrot.slane %v7623_v20, 4  ;;  %v2217_v61 = vshrl.u32 %v2064_v31, 16  ;;  %v6774_v46 = vld [vmem:[%s7936_s4 + $0x120] sm:$0xff]  }
 0x138   : > { %v2198_v42 = vsel %vm634_vm1, %v2189_v57, %v2197_v60  ;;  %v2206_v38 = vor.u32 %v2205_v52, %v2202_v47  ;;  %v4225_v13 = vsel %vm987_vm0, %v4223_v6, %v4224_v49  ;;  %6401 = vmatpush3.bf16.msra.mxu1 %v6773_v43  ;;  %v2220_v21 = vshll.u32 %v2064_v31, 16  ;;  %v7792_v49 = vld [vmem:[#allocation2 + $0xb8] sm:$0xf] }
 0x139   : > { %v2214_v4 = vor.u32 %v2213_v58, %v2210_v22  ;;  %v7773_v14 = vsel %vm987_vm0, %v4226_v34, %v4227_v10  ;;  %v2225_v28 = vshrl.u32 %v7764_v17, 16  ;;  %v2219_v9 = vrot.slane %v2217_v61, 3  ;;  %6394 = vmatprep.subr.bf16.mxu1 %v6774_v46  ;;  %v2070_v61 = vld [vmem:[#allocation2 + $0xc0] sm:$0xf8] }
 0x13a   : > { %v2228_v20 = vshll.u32 %v7764_v17, 16  ;;  %v2234_v56 = vshrl.u32 %v2066_v32, 16  ;;  %v2237_v37 = vshll.u32 %v2066_v32, 16  ;;  %v2222_v41 = vrot.slane %v2220_v21, 4 }
 0x13b   : > { %v2215_v5 = vsel %vm634_vm1, %v2206_v38, %v2214_v4  ;;  %v2227_v3 = vrot.slane %v2225_v28, 3  ;;  %v2242_v7 = vshrl.u32 %v7770_v40, 16  ;;  %6127 = vmatmul.mubr.bf16.gmra.mrb[8].mxu1 %v2181_v45  ;;  %v2245_v25 = vshll.u32 %v7770_v40, 16  ;;  %v4503_v45 = vld [vmem:[#allocation2 + $0x38] sm:$0x1f]  ;;  %v6776_v4 = vld [vmem:[%s7936_s4 + $0x130] sm:$0xff]  }
 0x13c   : > { %v2230_v27 = vrot.slane %v2228_v20, 4  ;;  %v2236_v63 = vrot.slane %v2234_v56, 3  ;;  %v2239_v15 = vrot.slane %v2237_v37, 4  ;;  %6130 = vmatprep.mubr.bf16.mxu1 %v2198_v42  ;;  %v2223_v59 = vor.u32 %v2222_v41, %v2219_v9  ;;  %6402 = vmatpush3.bf16.msra.mxu1 %v6774_v46  ;;  %v7799_v20 = vld [vmem:[#allocation2 + $0xc8] sm:$0xf] }
 0x13d   : > { %v2244_v51 = vrot.slane %v2242_v7, 3  ;;  %v4519_v55 = vshrl.u32 %v7636_v30, 16  ;;  %v4522_v12 = vshll.u32 %v7636_v30, 16  ;;  %v2247_v57 = vrot.slane %v2245_v25, 4  ;;  %6395 = vmatprep.subr.bf16.mxu1 %v6775_v53  ;;  %v2068_v30 = vld [vmem:[#allocation2 + $0xb0] sm:$0xf8] }
 0x13e   : > { %6335 = vmatmul.mubr.bf16.gmra.mrb[24].mxu0 %v7751_v50  ;;  %v2231_v35 = vor.u32 %v2230_v27, %v2227_v3  ;;  %v2240_v29 = vor.u32 %v2239_v15, %v2236_v63  ;;  %v4527_v47 = vshrl.u32 %v4502_v8, 16  ;;  %v4530_v31 = vshll.u32 %v4502_v8, 16 }
 0x13f   : > { %6338 = vmatprep.mubr.bf16.mxu0 %v4225_v13  ;;  %v4521_v26 = vrot.slane %v4519_v55, 4  ;;  %v4524_v24 = vrot.slane %v4522_v12, 5  ;;  %v4536_v60 = vshrl.u32 %v7638_v48, 16  ;;  %v2248_v50 = vor.u32 %v2247_v57, %v2244_v51  ;;  %v6777_v51 = vld [vmem:[%s7936_s4 + $0x138] sm:$0xff]  }
 0x140   : > { %v2232_v52 = vsel %vm634_vm1, %v2223_v59, %v2231_v35  ;;  %v4529_v43 = vrot.slane %v4527_v47, 4  ;;  %v4539_v6 = vshll.u32 %v7638_v48, 16  ;;  %v4532_v58 = vrot.slane %v4530_v31, 5  ;;  %6403 = vmatpush3.bf16.msra.mxu1 %v6775_v53 }
 0x141   : > { %v4525_v22 = vor.u32 %v4524_v24, %v4521_v26  ;;  %v4538_v34 = vrot.slane %v4536_v60, 4  ;;  %v4544_v10 = vshrl.u32 %v4503_v45, 16  ;;  %v2249_v32 = vsel %vm634_vm1, %v2240_v29, %v2248_v50  ;;  %6396 = vmatprep.subr.bf16.mxu1 %v6776_v4  ;;  %v4505_v60 = vld [vmem:[#allocation2 + $0x58] sm:$0x1f] }
 0x142   : > { %v4541_v42 = vrot.slane %v4539_v6, 5  ;;  %v4547_v38 = vshll.u32 %v4503_v45, 16  ;;  %v2251_v13 = vshrl.u32 %v2068_v30, 16  ;;  %v4533_v21 = vor.u32 %v4532_v58, %v4529_v43  ;;  %v2072_v6 = vld [vmem:[#allocation2 + $0xd0] sm:$0xf8] }
 0x143   : > { %v4546_v48 = vrot.slane %v4544_v10, 4  ;;  %v2254_v28 = vshll.u32 %v2068_v30, 16  ;;  %v2259_v9 = vshrl.u32 %v7792_v49, 16  ;;  %6131 = vmatmul.mubr.bf16.gmra.mrb[12].mxu1 %v2215_v5  ;;  %v2262_v41 = vshll.u32 %v7792_v49, 16  ;;  %v4504_v5 = vld [vmem:[#allocation2 + $0x48] sm:$0x1f] }
 0x144   : > { %v4542_v56 = vor.u32 %v4541_v42, %v4538_v34  ;;  %v4549_v37 = vrot.slane %v4547_v38, 5  ;;  %v2253_v46 = vrot.slane %v2251_v13, 3  ;;  %6134 = vmatprep.mubr.bf16.mxu1 %v2232_v52  ;;  %v4534_v3 = vsel %vm1502_vm2, %v4525_v22, %v4533_v21  ;;  %6404 = vmatpush3.bf16.msra.mxu1 %v6776_v4 }
 0x145   : > { %v2256_v7 = vrot.slane %v2254_v28, 4  ;;  %v2261_v8 = vrot.slane %v2259_v9, 3  ;;  %v2268_v27 = vshrl.u32 %v2070_v61, 16  ;;  %v2264_v15 = vrot.slane %v2262_v41, 4  ;;  %6397 = vmatprep.subr.bf16.mxu1 %v6777_v51  ;;  %v2074_v9 = vld [vmem:[#allocation2 + $0xe0] sm:$0xf8] }
 0x146   : > { %6339 = vmatmul.mubr.bf16.gmra.mrb[28].mxu0 %v7773_v14  ;;  %v4550_v63 = vor.u32 %v4549_v37, %v4546_v48  ;;  %v2271_v25 = vshll.u32 %v2070_v61, 16  ;;  %v2276_v59 = vshrl.u32 %v7799_v20, 16  ;;  %v2279_v35 = vshll.u32 %v7799_v20, 16  ;;  %v7815_v61 = vld [vmem:[#allocation2 + $0xd8] sm:$0xf] }
 0x147   : > { %6358 = vmatprep.mubr.bf16.mxu0 %v4534_v3  ;;  %v2257_v55 = vor.u32 %v2256_v7, %v2253_v46  ;;  %v2270_v12 = vrot.slane %v2268_v27, 3  ;;  %v4553_v29 = vshrl.u32 %v7646_v44, 16  ;;  %v2265_v57 = vor.u32 %v2264_v15, %v2261_v8 }
 0x148   : > { %v4551_v14 = vsel %vm1502_vm2, %v4542_v56, %v4550_v63  ;;  %v2273_v47 = vrot.slane %v2271_v25, 4  ;;  %v2278_v45 = vrot.slane %v2276_v59, 3  ;;  %v2281_v53 = vrot.slane %v2279_v35, 4  ;;  %6405 = vmatpush3.bf16.msra.mxu1 %v6777_v51 }
 0x149   : > { %v4555_v26 = vrot.slane %v4553_v29, 4  ;;  %v4556_v24 = vshll.u32 %v7646_v44, 16  ;;  %v4561_v31 = vshrl.u32 %v4504_v5, 16  ;;  %v2266_v30 = vsel %vm634_vm1, %v2257_v55, %v2265_v57 }
 0x14a   : > { %v2274_v52 = vor.u32 %v2273_v47, %v2270_v12  ;;  %v4564_v50 = vshll.u32 %v4504_v5, 16  ;;  %v4570_v43 = vshrl.u32 %v7649_v1, 16  ;;  %v2282_v22 = vor.u32 %v2281_v53, %v2278_v45  ;;  %v4506_v12 = vld [vmem:[#allocation2 + $0x68] sm:$0x1f] }
 0x14b   : > { %v4558_v58 = vrot.slane %v4556_v24, 5  ;;  %v4563_v34 = vrot.slane %v4561_v31, 4  ;;  %v4573_v10 = vshll.u32 %v7649_v1, 16  ;;  %6135 = vmatmul.mubr.bf16.gmra.mrb[16].mxu1 %v2249_v32  ;;  %v4578_v13 = vshrl.u32 %v4505_v60, 16  ;;  %v7818_v1 = vld [vmem:[#allocation2 + $0xe8] sm:$0xf] }
 0x14c   : > { %v4566_v42 = vrot.slane %v4564_v50, 5  ;;  %v4572_v38 = vrot.slane %v4570_v43, 4  ;;  %v4581_v44 = vshll.u32 %v4505_v60, 16  ;;  %6138 = vmatprep.mubr.bf16.mxu1 %v2266_v30  ;;  %v2283_v4 = vsel %vm634_vm1, %v2274_v52, %v2282_v22  ;;  %v4507_v52 = vld [vmem:[#allocation2 + $0x78] sm:$0x1f] }
 0x14d   : > { %v4559_v21 = vor.u32 %v4558_v58, %v4555_v26  ;;  %v4575_v48 = vrot.slane %v4573_v10, 5  ;;  %v2285_v28 = vshrl.u32 %v2072_v6, 16  ;;  %v4580_v37 = vrot.slane %v4578_v13, 4  ;;  %v2076_v58 = vld [vmem:[#allocation2 + $0xf0] sm:$0xf8] }
 0x14e   : > { %6359 = vmatmul.mubr.bf16.vlgmr.msra.gmra.mrb[0].mxu0 %v4551_v14  ;;  %v4567_v56 = vor.u32 %v4566_v42, %v4563_v34  ;;  %v4583_v46 = vrot.slane %v4581_v44, 5  ;;  %v2288_v41 = vshll.u32 %v2072_v6, 16  ;;  %v2293_v7 = vshrl.u32 %v7815_v61, 16 }
 0x14f   : > { %v4576_v32 = vor.u32 %v4575_v48, %v4572_v38  ;;  %v2287_v3 = vrot.slane %v2285_v28, 3  ;;  %v2296_v8 = vshll.u32 %v7815_v61, 16  ;;  %v2302_v25 = vshrl.u32 %v2074_v9, 16 }
 0x150   : > { %v4568_v27 = vsel %vm1502_vm2, %v4559_v21, %v4567_v56  ;;  %v4584_v63 = vor.u32 %v4583_v46, %v4580_v37  ;;  %v2290_v15 = vrot.slane %v2288_v41, 4  ;;  %v2295_v59 = vrot.slane %v2293_v7, 3  ;;  %v7831_v21 = vld [vmem:[#allocation2 + $0xf8] sm:$0xf]  ;;  %v2078_v37 = vld [vmem:[#allocation2 + $0x100] sm:$0xf8] }
 0x151   : > { %6362 = vmatprep.mubr.bf16.mxu0 %v4568_v27  ;;  %v2298_v5 = vrot.slane %v2296_v8, 4  ;;  %v2305_v51 = vshll.u32 %v2074_v9, 16  ;;  %v2310_v55 = vshrl.u32 %v7818_v1, 16  ;;  %v2304_v14 = vrot.slane %v2302_v25, 3  ;;  %v7834_v7 = vld [vmem:[#allocation2 + $0x108] sm:$0xf] }
 0x152   : > { %v4585_v35 = vsel %vm1502_vm2, %v4576_v32, %v4584_v63  ;;  %v2291_v29 = vor.u32 %v2290_v15, %v2287_v3  ;;  %v2313_v57 = vshll.u32 %v7818_v1, 16  ;;  %v4587_v26 = vshrl.u32 %v7665_v0, 16 }
 0x153   : > { %v2299_v47 = vor.u32 %v2298_v5, %v2295_v59  ;;  %v2307_v45 = vrot.slane %v2305_v51, 4  ;;  %v2312_v53 = vrot.slane %v2310_v55, 3  ;;  %6139 = vmatmul.mubr.bf16.gmra.mrb[20].mxu1 %v2283_v4  ;;  %v4590_v31 = vshll.u32 %v7665_v0, 16 }
 0x154   : > { %v2315_v24 = vrot.slane %v2313_v57, 4  ;;  %v4595_v60 = vshrl.u32 %v4506_v12, 16  ;;  %v4598_v30 = vshll.u32 %v4506_v12, 16  ;;  %v4589_v6 = vrot.slane %v4587_v26, 4 }
 0x155   : > { %v2300_v50 = vsel %vm634_vm1, %v2291_v29, %v2299_v47  ;;  %v2308_v43 = vor.u32 %v2307_v45, %v2304_v14  ;;  %v4604_v22 = vshrl.u32 %v7668_v54, 16  ;;  %v4592_v10 = vrot.slane %v4590_v31, 5  ;;  %v4508_v29 = vld [vmem:[#allocation2 + $0x88] sm:$0x1f] }
 0x156   : > { %6363 = vmatmul.mubr.bf16.gmra.mrb[4].mxu0 %v4585_v35  ;;  %6142 = vmatprep.mubr.bf16.mxu1 %v2300_v50  ;;  %v2316_v34 = vor.u32 %v2315_v24, %v2312_v53  ;;  %v4597_v42 = vrot.slane %v4595_v60, 4  ;;  %v4600_v38 = vrot.slane %v4598_v30, 5  ;;  %v4607_v44 = vshll.u32 %v7668_v54, 16 }
 0x157   : > { %v4606_v13 = vrot.slane %v4604_v22, 4  ;;  %v4612_v0 = vshrl.u32 %v4507_v52, 16  ;;  %v4615_v4 = vshll.u32 %v4507_v52, 16  ;;  %v4593_v28 = vor.u32 %v4592_v10, %v4589_v6 }
 0x158   : > { %v2317_v48 = vsel %vm634_vm1, %v2308_v43, %v2316_v34  ;;  %v4601_v9 = vor.u32 %v4600_v38, %v4597_v42  ;;  %v2319_v56 = vshrl.u32 %v2076_v58, 16  ;;  %v4609_v46 = vrot.slane %v4607_v44, 5  ;;  %v4509_v43 = vld [vmem:[#allocation2 + $0x98] sm:$0x1f] }
 0x159   : > { %v4614_v41 = vrot.slane %v4612_v0, 4  ;;  %v4617_v32 = vrot.slane %v4615_v4, 5  ;;  %v2322_v3 = vshll.u32 %v2076_v58, 16  ;;  %v2327_v54 = vshrl.u32 %v7831_v21, 16 }
 0x15a   : > { %v4602_v8 = vsel %vm1502_vm2, %v4593_v28, %v4601_v9  ;;  %v2321_v27 = vrot.slane %v2319_v56, 3  ;;  %v2330_v63 = vshll.u32 %v7831_v21, 16  ;;  %v4610_v15 = vor.u32 %v4609_v46, %v4606_v13  ;;  %v6778_v56 = vld [vmem:[#allocation2 + $0x90] sm:$0xf0] }
 0x15b   : > { %6366 = vmatprep.mubr.bf16.mxu0 %v4602_v8  ;;  %v4618_v25 = vor.u32 %v4617_v32, %v4614_v41  ;;  %v2324_v59 = vrot.slane %v2322_v3, 4  ;;  %v2336_v5 = vshrl.u32 %v2078_v37, 16  ;;  %6143 = vmatmul.mubr.bf16.gmra.mrb[24].mxu1 %v2317_v48  ;;  %v2329_v51 = vrot.slane %v2327_v54, 3  ;;  %v4510_v8 = vld [vmem:[#allocation2 + $0xa8] sm:$0x1f] }
 0x15c   : > { %v2332_v55 = vrot.slane %v2330_v63, 4  ;;  %v2339_v12 = vshll.u32 %v2078_v37, 16  ;;  %v2344_v35 = vshrl.u32 %v7834_v7, 16  ;;  %v2347_v45 = vshll.u32 %v7834_v7, 16  ;;  %v6779_v54 = vld [vmem:[#allocation2 + $0xa0] sm:$0xf0] }
 0x15d   : > { %v4619_v14 = vsel %vm1502_vm2, %v4610_v15, %v4618_v25  ;;  %v2325_v57 = vor.u32 %v2324_v59, %v2321_v27  ;;  %v2338_v47 = vrot.slane %v2336_v5, 3  ;;  %v4621_v31 = vshrl.u32 %v7683_v18, 16 }
 0x15e   : > { %6367 = vmatmul.mubr.bf16.gmra.mrb[8].mxu0 %v4619_v14  ;;  %v2333_v53 = vor.u32 %v2332_v55, %v2329_v51  ;;  %v2341_v26 = vrot.slane %v2339_v12, 4  ;;  %v2346_v24 = vrot.slane %v2344_v35, 3  ;;  %v2349_v60 = vrot.slane %v2347_v45, 4  ;;  %v4511_v55 = vld [vmem:[#allocation2 + $0xb8] sm:$0x1f] }
 0x15f   : > { %v4624_v30 = vshll.u32 %v7683_v18, 16  ;;  %v4629_v52 = vshrl.u32 %v4508_v29, 16  ;;  %v4632_v50 = vshll.u32 %v4508_v29, 16  ;;  %v4623_v58 = vrot.slane %v4621_v31, 4 }
 0x160   : > { %v2334_v6 = vsel %vm634_vm1, %v2325_v57, %v2333_v53  ;;  %v2342_v22 = vor.u32 %v2341_v26, %v2338_v47  ;;  %v4638_v34 = vshrl.u32 %v7686_v19, 16  ;;  %v2350_v10 = vor.u32 %v2349_v60, %v2346_v24 }
 0x161   : > { %6146 = vmatprep.mubr.bf16.mxu1 %v2334_v6  ;;  %v4626_v42 = vrot.slane %v4624_v30, 5  ;;  %v4631_v38 = vrot.slane %v4629_v52, 4  ;;  %v4634_v13 = vrot.slane %v4632_v50, 5  ;;  %v4641_v0 = vshll.u32 %v7686_v19, 16  ;;  %v6780_v30 = vld [vmem:[#allocation2 + $0xb0] sm:$0xf0] }
 0x162   : > { %v4640_v44 = vrot.slane %v4638_v34, 4  ;;  %v4646_v4 = vshrl.u32 %v4509_v43, 16  ;;  %v4649_v48 = vshll.u32 %v4509_v43, 16  ;;  %v2351_v18 = vsel %vm634_vm1, %v2342_v22, %v2350_v10  ;;  %v6781_v10 = vld [vmem:[#allocation2 + $0xc0] sm:$0xf0] }
 0x163   : > { %v4627_v28 = vor.u32 %v4626_v42, %v4623_v58  ;;  %v4635_v9 = vor.u32 %v4634_v13, %v4631_v38  ;;  %v2697_v37 = vrot.slane %v6778_v56, 4  ;;  %6147 = vmatmul.mubr.bf16.gmra.mrb[28].mxu1 %v2351_v18  ;;  %v4643_v46 = vrot.slane %v4641_v0, 5  ;;  %v4512_v58 = vld [vmem:[#allocation2 + $0xc8] sm:$0x1f] }
 0x164   : > { %v4648_v41 = vrot.slane %v4646_v4, 4  ;;  %v4651_v32 = vrot.slane %v4649_v48, 5  ;;  %v2698_v3 = vrot.slane %v7764_v17, 4  ;;  %v2700_v63 = vrot.slane %v6779_v54, 4  ;;  %v4513_v48 = vld [vmem:[#allocation2 + $0xd8] sm:$0x1f] }
 0x165   : > { %v4636_v27 = vsel %vm1502_vm2, %v4627_v28, %v4635_v9  ;;  %v2701_v19 = vrot.slane %v7770_v40, 4  ;;  %v4655_v15 = vshrl.u32 %v7698_v39, 16  ;;  %v4644_v25 = vor.u32 %v4643_v46, %v4640_v44 }
 0x166   : > { %6370 = vmatprep.mubr.bf16.mxu0 %v4636_v27  ;;  %v4652_v59 = vor.u32 %v4651_v32, %v4648_v41  ;;  %v2699_v5 = vsel %vm987_vm0, %v2697_v37, %v2698_v3  ;;  %v4658_v51 = vshll.u32 %v7698_v39, 16  ;;  %v4663_v35 = vshrl.u32 %v4510_v8, 16 }
 0x167   : > { %6182 = vmatprep.mubr.bf16.mxu1 %v2699_v5  ;;  %v2702_v17 = vsel %vm987_vm0, %v2700_v63, %v2701_v19  ;;  %v4657_v12 = vrot.slane %v4655_v15, 4  ;;  %v4666_v29 = vshll.u32 %v4510_v8, 16  ;;  %v4672_v40 = vshrl.u32 %v7700_v16, 16  ;;  %v6782_v63 = vld [vmem:[#allocation2 + $0xd0] sm:$0xf0] }
 0x168   : > { %v4653_v14 = vsel %vm1502_vm2, %v4644_v25, %v4652_v59  ;;  %v4660_v57 = vrot.slane %v4658_v51, 5  ;;  %v4675_v47 = vshll.u32 %v7700_v16, 16  ;;  %v4665_v45 = vrot.slane %v4663_v35, 4  ;;  %v4514_v51 = vld [vmem:[#allocation2 + $0xe8] sm:$0x1f] }
 0x169   : > { %6371 = vmatmul.mubr.bf16.gmra.mrb[12].mxu0 %v4653_v14  ;;  %v4668_v53 = vrot.slane %v4666_v29, 5  ;;  %v4680_v26 = vshrl.u32 %v4511_v55, 16  ;;  %v4683_v24 = vshll.u32 %v4511_v55, 16  ;;  %v4674_v31 = vrot.slane %v4672_v40, 4 }
 0x16a   : > { %v4661_v39 = vor.u32 %v4660_v57, %v4657_v12  ;;  %v4677_v60 = vrot.slane %v4675_v47, 5  ;;  %v2703_v52 = vrot.slane %v6780_v30, 4  ;;  %v2704_v22 = vrot.slane %v7792_v49, 4  ;;  %v4515_v47 = vld [vmem:[#allocation2 + $0xf8] sm:$0x1f] }
 0x16b   : > { %v4669_v50 = vor.u32 %v4668_v53, %v4665_v45  ;;  %v4682_v43 = vrot.slane %v4680_v26, 4  ;;  %v4685_v6 = vrot.slane %v4683_v24, 5  ;;  %6183 = vmatmul.mubr.bf16.vlgmr.msra.gmra.mrb[16].mxu1 %v2702_v17  ;;  %v2706_v16 = vrot.slane %v6781_v10, 4  ;;  %v6783_v17 = vld [vmem:[#allocation2 + $0xe0] sm:$0xf0] }
 0x16c   : > { %v4678_v34 = vor.u32 %v4677_v60, %v4674_v31  ;;  %v2707_v42 = vrot.slane %v7799_v20, 4  ;;  %v4689_v38 = vshrl.u32 %v7714_v62, 16  ;;  %v2705_v0 = vsel %vm987_vm0, %v2703_v52, %v2704_v22  ;;  %v6784_v22 = vld [vmem:[#allocation2 + $0xf0] sm:$0xf0] }
 0x16d   : > { %v4670_v13 = vsel %vm1502_vm2, %v4661_v39, %v4669_v50  ;;  %v4686_v44 = vor.u32 %v4685_v6, %v4682_v43  ;;  %v4692_v4 = vshll.u32 %v7714_v62, 16  ;;  %6186 = vmatprep.mubr.bf16.mxu1 %v2705_v0  ;;  %v4697_v28 = vshrl.u32 %v4512_v58, 16 }
 0x16e   : > { %6374 = vmatprep.mubr.bf16.mxu0 %v4670_v13  ;;  %v2708_v49 = vsel %vm987_vm0, %v2706_v16, %v2707_v42  ;;  %v4691_v18 = vrot.slane %v4689_v38, 4  ;;  %v4700_v9 = vshll.u32 %v4512_v58, 16  ;;  %v4706_v37 = vshrl.u32 %v7721_v23, 16  ;;  %v4516_v38 = vld [vmem:[#allocation2 + $0x108] sm:$0x1f] }
 0x16f   : > { %v4687_v56 = vsel %vm1502_vm2, %v4678_v34, %v4686_v44  ;;  %v4694_v20 = vrot.slane %v4692_v4, 5  ;;  %v4709_v46 = vshll.u32 %v7721_v23, 16  ;;  %v4699_v41 = vrot.slane %v4697_v28, 4  ;;  %v6785_v44 = vld [vmem:[#allocation2 + $0x100] sm:$0xf0] }
 0x170   : > { %v4702_v32 = vrot.slane %v4700_v9, 5  ;;  %v4714_v3 = vshrl.u32 %v4513_v48, 16  ;;  %v4717_v8 = vshll.u32 %v4513_v48, 16  ;;  %v4708_v27 = vrot.slane %v4706_v37, 4  ;;  %v4517_v28 = vld [vmem:[#allocation2 + $0x118] sm:$0x1f] }
 0x171   : > { %6375 = vmatmul.mubr.bf16.gmra.mrb[16].mxu0 %v4687_v56  ;;  %v4695_v62 = vor.u32 %v4694_v20, %v4691_v18  ;;  %v4711_v54 = vrot.slane %v4709_v46, 5  ;;  %v2709_v19 = vrot.slane %v6782_v63, 4  ;;  %v2710_v5 = vrot.slane %v7815_v61, 4 }
 0x172   : > { %v4703_v15 = vor.u32 %v4702_v32, %v4699_v41  ;;  %v4716_v25 = vrot.slane %v4714_v3, 4  ;;  %v4719_v59 = vrot.slane %v4717_v8, 5  ;;  %v2712_v12 = vrot.slane %v6783_v17, 4 }
 0x173   : > { %v4712_v55 = vor.u32 %v4711_v54, %v4708_v27  ;;  %v2713_v23 = vrot.slane %v7818_v1, 4  ;;  %v4723_v35 = vshrl.u32 %v7732_v2, 16  ;;  %6187 = vmatmul.mubr.bf16.gmra.mrb[20].mxu1 %v2708_v49  ;;  %v2711_v57 = vsel %vm987_vm0, %v2709_v19, %v2710_v5 }
 0x174   : > { %v4704_v29 = vsel %vm1502_vm2, %v4695_v62, %v4703_v15  ;;  %v4720_v14 = vor.u32 %v4719_v59, %v4716_v25  ;;  %v4726_v40 = vshll.u32 %v7732_v2, 16  ;;  %6190 = vmatprep.mubr.bf16.mxu1 %v2711_v57  ;;  %v4731_v53 = vshrl.u32 %v4514_v51, 16 }
 0x175   : > { %6378 = vmatprep.mubr.bf16.mxu0 %v4704_v29  ;;  %v2714_v61 = vsel %vm987_vm0, %v2712_v12, %v2713_v23  ;;  %v4725_v45 = vrot.slane %v4723_v35, 4  ;;  %v4734_v26 = vshll.u32 %v4514_v51, 16  ;;  %v4740_v39 = vshrl.u32 %v7736_v11, 16 }
 0x176   : > { %v4721_v1 = vsel %vm1502_vm2, %v4712_v55, %v4720_v14  ;;  %v4728_v24 = vrot.slane %v4726_v40, 5  ;;  %v4743_v31 = vshll.u32 %v7736_v11, 16  ;;  %v4733_v60 = vrot.slane %v4731_v53, 4 }
 0x177   : > { %v4736_v30 = vrot.slane %v4734_v26, 5  ;;  %v4748_v52 = vshrl.u32 %v4515_v47, 16  ;;  %v4751_v50 = vshll.u32 %v4515_v47, 16  ;;  %v4742_v43 = vrot.slane %v4740_v39, 4 }
 0x178   : > { %v4729_v2 = vor.u32 %v4728_v24, %v4725_v45  ;;  %v4745_v6 = vrot.slane %v4743_v31, 5  ;;  %v2715_v58 = vrot.slane %v6784_v22, 4  ;;  %v2716_v42 = vrot.slane %v7831_v21, 4 }
 0x179   : > { %6379 = vmatmul.mubr.bf16.gmra.mrb[20].mxu0 %v4721_v1  ;;  %v4737_v34 = vor.u32 %v4736_v30, %v4733_v60  ;;  %v4750_v10 = vrot.slane %v4748_v52, 4  ;;  %v4753_v16 = vrot.slane %v4751_v50, 5  ;;  %v2718_v0 = vrot.slane %v6785_v44, 4 }
 0x17a   : > { %v4746_v13 = vor.u32 %v4745_v6, %v4742_v43  ;;  %v4757_v11 = vshrl.u32 %v7753_v33, 16  ;;  %v2717_v49 = vsel %vm987_vm0, %v2715_v58, %v2716_v42  ;;  %v4760_v18 = vshll.u32 %v7753_v33, 16 }
 0x17b   : > { %v4738_v4 = vsel %vm1502_vm2, %v4729_v2, %v4737_v34  ;;  %v4754_v48 = vor.u32 %v4753_v16, %v4750_v10  ;;  %6191 = vmatmul.mubr.bf16.gmra.mrb[24].mxu1 %v2714_v61  ;;  %v2719_v9 = vrot.slane %v7834_v7, 4  ;;  %v4765_v21 = vshrl.u32 %v4516_v38, 16 }
 0x17c   : > { %6382 = vmatprep.mubr.bf16.mxu0 %v4738_v4  ;;  %v4759_v56 = vrot.slane %v4757_v11, 4  ;;  %v4768_v20 = vshll.u32 %v4516_v38, 16  ;;  %6194 = vmatprep.mubr.bf16.mxu1 %v2717_v49  ;;  %v4762_v46 = vrot.slane %v4760_v18, 5  ;;  %v4774_v41 = vshrl.u32 %v7756_v36, 16 }
 0x17d   : > { %v4755_v37 = vsel %vm1502_vm2, %v4746_v13, %v4754_v48  ;;  %v4777_v32 = vshll.u32 %v7756_v36, 16  ;;  %v4767_v3 = vrot.slane %v4765_v21, 4  ;;  %v4782_v62 = vshrl.u32 %v4517_v28, 16 }
 0x17e   : > { %v4770_v8 = vrot.slane %v4768_v20, 5  ;;  %v4785_v33 = vshll.u32 %v4517_v28, 16  ;;  %v4763_v27 = vor.u32 %v4762_v46, %v4759_v56  ;;  %v4776_v54 = vrot.slane %v4774_v41, 4 }
 0x17f   : > { %v4779_v63 = vrot.slane %v4777_v32, 5  ;;  %v4784_v7 = vrot.slane %v4782_v62, 4  ;;  %v2720_v25 = vsel %vm987_vm0, %v2718_v0, %v2719_v9 }
 0x180   : > { %v4771_v19 = vor.u32 %v4770_v8, %v4767_v3  ;;  %v4787_v15 = vrot.slane %v4785_v33, 5 }
 0x181   : > { %6383 = vmatmul.mubr.bf16.gmra.mrb[24].mxu0 %v4755_v37  ;;  %v4780_v5 = vor.u32 %v4779_v63, %v4776_v54 }
 0x182   : > { %v4772_v59 = vsel %vm1502_vm2, %v4763_v27, %v4771_v19  ;;  %v4788_v51 = vor.u32 %v4787_v15, %v4784_v7 }
 0x183   : > { %6386 = vmatprep.mubr.bf16.mxu0 %v4772_v59  ;;  %6195 = vmatmul.mubr.bf16.gmra.mrb[28].mxu1 %v2720_v25 }
 0x184   : > { %v4789_v36 = vsel %vm1502_vm2, %v4780_v5, %v4788_v51 }
 0x189   : > { %6387 = vmatmul.mubr.bf16.gmra.mrb[28].mxu0 %v4789_v36 }
 0x1fe   : > { %v6120_v55 = vpop.f32.mrb[0].mxu1 }
 0x1ff   : > { %v2466_v17 = vpop.f32.mrb[1].mxu1 }
 0x200   : > { %v6121_v12 = vpop.f32.mrb[2].mxu1 }
 0x201   : > { %v2469_v23 = vpop.f32.mrb[3].mxu1 }
 0x206   : > { %v6124_v35 = vpop.f32.mrb[4].mxu1 }
 0x207   : > { %v2482_v29 = vpop.f32.mrb[5].mxu1 }
 0x208   : > { %v6125_v14 = vpop.f32.mrb[6].mxu1 }
 0x209   : > { %v2485_v57 = vpop.f32.mrb[7].mxu1 }
 0x20e   : > { %v6128_v40 = vpop.f32.mrb[8].mxu1 }
 0x20f   : > { %v2498_v47 = vpop.f32.mrb[9].mxu1 }
 0x210   : > { %v6129_v61 = vpop.f32.mrb[10].mxu1 }
 0x211   : > { %v2501_v45 = vpop.f32.mrb[11].mxu1 }
 0x216   : > { %v7890_v53 = vpop.f32.mrb[12].mxu1 }
 0x217   : > { %v7892_v26 = vpop.f32.mrb[13].mxu1 }
 0x218   : > { %v7894_v1 = vpop.f32.mrb[14].mxu1 }
 0x219   : > { %v7896_v24 = vpop.f32.mrb[15].mxu1 }
 0x221   : > { %v6360_v39 = vpop.f32.mrb[0].mxu0 }
 0x222   : > { %v6406_v31 = vadd.f32 %v6360_v39, %v6120_v55  ;;  %v4904_v60 = vpop.f32.mrb[1].mxu0 }
 0x223   : > { %v6407_v30 = vadd.f32 %v4904_v60, %v2466_v17  ;;  %v6361_v52 = vpop.f32.mrb[2].mxu0 }
 0x224   : > { %v6408_v50 = vadd.f32 %v6361_v52, %v6121_v12  ;;  %v4907_v2 = vpop.f32.mrb[3].mxu0  ;;  %v5262_v16 = vmul.f32 %v6406_v31, %v6406_v31 }
 0x225   : > { %v6409_v43 = vadd.f32 %v4907_v2, %v2469_v23  ;;  %v5260_v22 = vmul.f32 %v6407_v30, %v6407_v30 }
 0x226   : > { %v5640_v6 = vpack.c.bf16 %v6408_v50, %v6406_v31  ;;  %v5263_v11 = vmul.f32 %v6408_v50, %v6408_v50 }
 0x227   : > { %v5635_v58 = vpack.c.bf16 %v6409_v43, %v6407_v30  ;;  %v5223_v34 = vadd.f32 %v6409_v43, %v6407_v30  ;;  %v5261_v10 = vmul.f32 %v6409_v43, %v6409_v43 }
 0x228   : > { %5727 = vst [vmem:[%s7903_s26 + $0x8] sm:$0xff] %v5640_v6  }
 0x229   : > { %5636 = vst [vmem:[%s7903_s26] sm:$0xff] %v5635_v58   ;;  %v5224_v42 = vadd.f32 %v6406_v31, %v5223_v34  ;;  %v5292_v38 = vadd.f32 %v5261_v10, %v5260_v22  ;;  %v6364_v13 = vpop.f32.mrb[4].mxu0 }
 0x22a   : > { %v6410_v44 = vadd.f32 %v6364_v13, %v6124_v35  ;;  %v4920_v0 = vpop.f32.mrb[5].mxu0 }
 0x22b   : > { %v5293_v4 = vadd.f32 %v5292_v38, %v5262_v16  ;;  %v6411_v48 = vadd.f32 %v4920_v0, %v2482_v29  ;;  %v5225_v49 = vadd.f32 %v6408_v50, %v5224_v42  ;;  %v6365_v18 = vpop.f32.mrb[6].mxu0 }
 0x22c   : > { %v6412_v28 = vadd.f32 %v6365_v18, %v6125_v14  ;;  %v4923_v9 = vpop.f32.mrb[7].mxu0  ;;  %v5266_v62 = vmul.f32 %v6410_v44, %v6410_v44 }
 0x22d   : > { %v5226_v56 = vadd.f32 %v6411_v48, %v5225_v49  ;;  %v5264_v21 = vmul.f32 %v6411_v48, %v6411_v48  ;;  %v5294_v20 = vadd.f32 %v5293_v4, %v5263_v11  ;;  %v6413_v37 = vadd.f32 %v4923_v9, %v2485_v57 }
 0x22e   : > { %v5650_v46 = vpack.c.bf16 %v6412_v28, %v6410_v44  ;;  %v5267_v7 = vmul.f32 %v6412_v28, %v6412_v28 }
 0x22f   : > { %v5295_v41 = vadd.f32 %v5294_v20, %v5264_v21  ;;  %v5645_v32 = vpack.c.bf16 %v6413_v37, %v6411_v48  ;;  %v5227_v3 = vadd.f32 %v6413_v37, %v5226_v56  ;;  %v5265_v8 = vmul.f32 %v6413_v37, %v6413_v37 }
 0x230   : > { %5729 = vst [vmem:[%s7903_s26 + $0x18] sm:$0xff] %v5650_v46  }
 0x231   : > { %5728 = vst [vmem:[%s7903_s26 + $0x10] sm:$0xff] %v5645_v32   ;;  %v5228_v33 = vadd.f32 %v6410_v44, %v5227_v3  ;;  %v5296_v27 = vadd.f32 %v5295_v41, %v5265_v8  ;;  %v6368_v54 = vpop.f32.mrb[8].mxu0 }
 0x232   : > { %v6414_v63 = vadd.f32 %v6368_v54, %v6128_v40  ;;  %v4936_v19 = vpop.f32.mrb[9].mxu0 }
 0x233   : > { %v5297_v15 = vadd.f32 %v5296_v27, %v5266_v62  ;;  %v6415_v25 = vadd.f32 %v4936_v19, %v2498_v47  ;;  %v5229_v59 = vadd.f32 %v6412_v28, %v5228_v33  ;;  %v6369_v5 = vpop.f32.mrb[10].mxu0 }
 0x234   : > { %v6416_v51 = vadd.f32 %v6369_v5, %v6129_v61  ;;  %v4939_v36 = vpop.f32.mrb[11].mxu0  ;;  %v5270_v40 = vmul.f32 %v6414_v63, %v6414_v63 }
 0x235   : > { %v5230_v55 = vadd.f32 %v6415_v25, %v5229_v59  ;;  %v5268_v17 = vmul.f32 %v6415_v25, %v6415_v25  ;;  %v5298_v12 = vadd.f32 %v5297_v15, %v5267_v7  ;;  %v6417_v23 = vadd.f32 %v4939_v36, %v2501_v45 }
 0x236   : > { %v5660_v35 = vpack.c.bf16 %v6416_v51, %v6414_v63  ;;  %v5271_v47 = vmul.f32 %v6416_v51, %v6416_v51 }
 0x237   : > { %v5299_v29 = vadd.f32 %v5298_v12, %v5268_v17  ;;  %v5655_v14 = vpack.c.bf16 %v6417_v23, %v6415_v25  ;;  %v5231_v57 = vadd.f32 %v6417_v23, %v5230_v55  ;;  %v5269_v39 = vmul.f32 %v6417_v23, %v6417_v23 }
 0x238   : > { %5731 = vst [vmem:[%s7903_s26 + $0x28] sm:$0xff] %v5660_v35  }
 0x239   : > { %5730 = vst [vmem:[%s7903_s26 + $0x20] sm:$0xff] %v5655_v14   ;;  %v5232_v31 = vadd.f32 %v6414_v63, %v5231_v57  ;;  %v5300_v60 = vadd.f32 %v5299_v29, %v5269_v39 }
 0x23b   : > { %v5301_v30 = vadd.f32 %v5300_v60, %v5270_v40  ;;  %v5233_v52 = vadd.f32 %v6416_v51, %v5232_v31 }
 0x23c   : > { %v6372_v50 = vpop.f32.mrb[12].mxu0 }
 0x23d   : > { %v6418_v61 = vadd.f32 %v6372_v50, %v7890_v53  ;;  %v4952_v2 = vpop.f32.mrb[13].mxu0  ;;  %v5302_v43 = vadd.f32 %v5301_v30, %v5271_v47 }
 0x23e   : > { %v6419_v45 = vadd.f32 %v4952_v2, %v7892_v26  ;;  %v6373_v6 = vpop.f32.mrb[14].mxu0  ;;  %v6184_v34 = vpop.f32.mrb[16].mxu1 }
 0x23f   : > { %v6420_v22 = vadd.f32 %v6373_v6, %v7894_v1  ;;  %v4955_v58 = vpop.f32.mrb[15].mxu0  ;;  %v2899_v38 = vpop.f32.mrb[17].mxu1  ;;  %v5274_v26 = vmul.f32 %v6418_v61, %v6418_v61 }
 0x240   : > { %v5234_v10 = vadd.f32 %v6419_v45, %v5233_v52  ;;  %v5272_v16 = vmul.f32 %v6419_v45, %v6419_v45  ;;  %v6421_v42 = vadd.f32 %v4955_v58, %v7896_v24  ;;  %v6185_v44 = vpop.f32.mrb[18].mxu1 }
 0x241   : > { %v5670_v13 = vpack.c.bf16 %v6420_v22, %v6418_v61  ;;  %v2902_v48 = vpop.f32.mrb[19].mxu1  ;;  %v5275_v56 = vmul.f32 %v6420_v22, %v6420_v22 }
 0x242   : > { %v5303_v0 = vadd.f32 %v5302_v43, %v5272_v16  ;;  %v5665_v53 = vpack.c.bf16 %v6421_v42, %v6419_v45  ;;  %v5235_v11 = vadd.f32 %v6421_v42, %v5234_v10  ;;  %v5273_v4 = vmul.f32 %v6421_v42, %v6421_v42 }
 0x243   : > { %5733 = vst [vmem:[%s7903_s26 + $0x38] sm:$0xff] %v5670_v13  }
 0x244   : > { %5732 = vst [vmem:[%s7903_s26 + $0x30] sm:$0xff] %v5665_v53   ;;  %v5236_v49 = vadd.f32 %v6418_v61, %v5235_v11  ;;  %v5304_v1 = vadd.f32 %v5303_v0, %v5273_v4  ;;  %v6376_v18 = vpop.f32.mrb[16].mxu0 }
 0x245   : > { %v6422_v28 = vadd.f32 %v6376_v18, %v6184_v34  ;;  %v4968_v9 = vpop.f32.mrb[17].mxu0 }
 0x246   : > { %v5305_v21 = vadd.f32 %v5304_v1, %v5274_v26  ;;  %v6423_v20 = vadd.f32 %v4968_v9, %v2899_v38  ;;  %v5237_v24 = vadd.f32 %v6420_v22, %v5236_v49  ;;  %v6377_v37 = vpop.f32.mrb[18].mxu0  ;;  %v6188_v32 = vpop.f32.mrb[20].mxu1 }
 0x247   : > { %v6424_v46 = vadd.f32 %v6377_v37, %v6185_v44  ;;  %v4971_v41 = vpop.f32.mrb[19].mxu0  ;;  %v2915_v27 = vpop.f32.mrb[21].mxu1  ;;  %v5278_v5 = vmul.f32 %v6422_v28, %v6422_v28 }
 0x248   : > { %v5238_v3 = vadd.f32 %v6423_v20, %v5237_v24  ;;  %v5276_v8 = vmul.f32 %v6423_v20, %v6423_v20  ;;  %v5306_v62 = vadd.f32 %v5305_v21, %v5275_v56  ;;  %v6425_v33 = vadd.f32 %v4971_v41, %v2902_v48  ;;  %v6189_v63 = vpop.f32.mrb[22].mxu1 }
 0x249   : > { %v5680_v54 = vpack.c.bf16 %v6424_v46, %v6422_v28  ;;  %v2918_v59 = vpop.f32.mrb[23].mxu1  ;;  %v5279_v23 = vmul.f32 %v6424_v46, %v6424_v46 }
 0x24a   : > { %v5307_v19 = vadd.f32 %v5306_v62, %v5276_v8  ;;  %v5675_v7 = vpack.c.bf16 %v6425_v33, %v6423_v20  ;;  %v5239_v15 = vadd.f32 %v6425_v33, %v5238_v3  ;;  %v5277_v25 = vmul.f32 %v6425_v33, %v6425_v33 }
 0x24b   : > { %5735 = vst [vmem:[%s7903_s26 + $0x48] sm:$0xff] %v5680_v54  }
 0x24c   : > { %5734 = vst [vmem:[%s7903_s26 + $0x40] sm:$0xff] %v5675_v7   ;;  %v5240_v51 = vadd.f32 %v6422_v28, %v5239_v15  ;;  %v5308_v36 = vadd.f32 %v5307_v19, %v5277_v25  ;;  %v6380_v55 = vpop.f32.mrb[20].mxu0 }
 0x24d   : > { %v6426_v17 = vadd.f32 %v6380_v55, %v6188_v32  ;;  %v4984_v12 = vpop.f32.mrb[21].mxu0 }
 0x24e   : > { %v5309_v35 = vadd.f32 %v5308_v36, %v5278_v5  ;;  %v6427_v29 = vadd.f32 %v4984_v12, %v2915_v27  ;;  %v5241_v14 = vadd.f32 %v6424_v46, %v5240_v51  ;;  %v6381_v57 = vpop.f32.mrb[22].mxu0  ;;  %v6192_v31 = vpop.f32.mrb[24].mxu1 }
 0x24f   : > { %v6428_v39 = vadd.f32 %v6381_v57, %v6189_v63  ;;  %v4987_v40 = vpop.f32.mrb[23].mxu0  ;;  %v2931_v50 = vpop.f32.mrb[25].mxu1  ;;  %v5282_v34 = vmul.f32 %v6426_v17, %v6426_v17 }
 0x250   : > { %v5242_v60 = vadd.f32 %v6427_v29, %v5241_v14  ;;  %v5280_v47 = vmul.f32 %v6427_v29, %v6427_v29  ;;  %v5310_v30 = vadd.f32 %v5309_v35, %v5279_v23  ;;  %v6429_v52 = vadd.f32 %v4987_v40, %v2918_v59  ;;  %v6193_v2 = vpop.f32.mrb[26].mxu1 }
 0x251   : > { %v5690_v61 = vpack.c.bf16 %v6428_v39, %v6426_v17  ;;  %v2934_v58 = vpop.f32.mrb[27].mxu1  ;;  %v5283_v44 = vmul.f32 %v6428_v39, %v6428_v39 }
 0x252   : > { %v5311_v43 = vadd.f32 %v5310_v30, %v5280_v47  ;;  %v5685_v45 = vpack.c.bf16 %v6429_v52, %v6427_v29  ;;  %v5243_v6 = vadd.f32 %v6429_v52, %v5242_v60  ;;  %v5281_v22 = vmul.f32 %v6429_v52, %v6429_v52 }
 0x253   : > { %5737 = vst [vmem:[%s7903_s26 + $0x58] sm:$0xff] %v5690_v61  }
 0x254   : > { %5736 = vst [vmem:[%s7903_s26 + $0x50] sm:$0xff] %v5685_v45   ;;  %v5244_v10 = vadd.f32 %v6426_v17, %v5243_v6  ;;  %v5312_v16 = vadd.f32 %v5311_v43, %v5281_v22  ;;  %v6384_v42 = vpop.f32.mrb[24].mxu0 }
 0x255   : > { %v6430_v38 = vadd.f32 %v6384_v42, %v6192_v31  ;;  %v5000_v13 = vpop.f32.mrb[25].mxu0 }
 0x256   : > { %v5313_v0 = vadd.f32 %v5312_v16, %v5282_v34  ;;  %v6431_v53 = vadd.f32 %v5000_v13, %v2931_v50  ;;  %v5245_v11 = vadd.f32 %v6428_v39, %v5244_v10  ;;  %v6385_v4 = vpop.f32.mrb[26].mxu0  ;;  %v6196_v49 = vpop.f32.mrb[28].mxu1 }
 0x257   : > { %v6432_v48 = vadd.f32 %v6385_v4, %v6193_v2  ;;  %v5003_v26 = vpop.f32.mrb[27].mxu0  ;;  %v2947_v56 = vpop.f32.mrb[29].mxu1  ;;  %v5286_v3 = vmul.f32 %v6430_v38, %v6430_v38 }
 0x258   : > { %v5246_v1 = vadd.f32 %v6431_v53, %v5245_v11  ;;  %v5284_v18 = vmul.f32 %v6431_v53, %v6431_v53  ;;  %v5314_v28 = vadd.f32 %v5313_v0, %v5283_v44  ;;  %v6433_v9 = vadd.f32 %v5003_v26, %v2934_v58  ;;  %v6197_v20 = vpop.f32.mrb[30].mxu1 }
 0x259   : > { %v5700_v21 = vpack.c.bf16 %v6432_v48, %v6430_v38  ;;  %v2950_v32 = vpop.f32.mrb[31].mxu1  ;;  %v5287_v63 = vmul.f32 %v6432_v48, %v6432_v48 }
 0x25a   : > { %v5315_v24 = vadd.f32 %v5314_v28, %v5284_v18  ;;  %v5695_v37 = vpack.c.bf16 %v6433_v9, %v6431_v53  ;;  %v5247_v46 = vadd.f32 %v6433_v9, %v5246_v1  ;;  %v5285_v41 = vmul.f32 %v6433_v9, %v6433_v9 }
 0x25b   : > { %5739 = vst [vmem:[%s7903_s26 + $0x68] sm:$0xff] %v5700_v21  }
 0x25c   : > { %5738 = vst [vmem:[%s7903_s26 + $0x60] sm:$0xff] %v5695_v37   ;;  %v5248_v8 = vadd.f32 %v6430_v38, %v5247_v46  ;;  %v5316_v62 = vadd.f32 %v5315_v24, %v5285_v41  ;;  %v6388_v33 = vpop.f32.mrb[28].mxu0 }
 0x25d   : > { %v6434_v27 = vadd.f32 %v6388_v33, %v6196_v49  ;;  %v5016_v54 = vpop.f32.mrb[29].mxu0 }
 0x25e   : > { %v5317_v19 = vadd.f32 %v5316_v62, %v5286_v3  ;;  %v6435_v7 = vadd.f32 %v5016_v54, %v2947_v56  ;;  %v5249_v15 = vadd.f32 %v6432_v48, %v5248_v8  ;;  %v6389_v25 = vpop.f32.mrb[30].mxu0 }
 0x25f   : > { %v6436_v59 = vadd.f32 %v6389_v25, %v6197_v20  ;;  %v5019_v5 = vpop.f32.mrb[31].mxu0  ;;  %v5290_v57 = vmul.f32 %v6434_v27, %v6434_v27 }
 0x260   : > { %v5250_v51 = vadd.f32 %v6435_v7, %v5249_v15  ;;  %v5288_v36 = vmul.f32 %v6435_v7, %v6435_v7  ;;  %v5318_v55 = vadd.f32 %v5317_v19, %v5287_v63  ;;  %v6437_v17 = vadd.f32 %v5019_v5, %v2950_v32 }
 0x261   : > { %v5710_v12 = vpack.c.bf16 %v6436_v59, %v6434_v27  ;;  %v5291_v31 = vmul.f32 %v6436_v59, %v6436_v59 }
 0x262   : > { %v5319_v23 = vadd.f32 %v5318_v55, %v5288_v36  ;;  %v5705_v35 = vpack.c.bf16 %v6437_v17, %v6435_v7  ;;  %v5251_v29 = vadd.f32 %v6437_v17, %v5250_v51  ;;  %v5289_v14 = vmul.f32 %v6437_v17, %v6437_v17 }
 0x263   : > { %5741 = vst [vmem:[%s7903_s26 + $0x78] sm:$0xff] %v5710_v12  }
 0x264   : > { %5740 = vst [vmem:[%s7903_s26 + $0x70] sm:$0xff] %v5705_v35   ;;  %v5252_v39 = vadd.f32 %v6434_v27, %v5251_v29  ;;  %v5320_v40 = vadd.f32 %v5319_v23, %v5289_v14 }
 0x266   : > { %v5253_v60 = vadd.f32 %v6436_v59, %v5252_v39  ;;  %v5321_v47 = vadd.f32 %v5320_v40, %v5290_v57 }
 0x268   : > { %v5254_v30 = vrot.slane %v5253_v60, 4  ;;  %v5322_v52 = vadd.f32 %v5321_v47, %v5291_v31 }
 0x26a   : > { %v5255_v50 = vadd.f32 %v5254_v30, %v5253_v60  ;;  %v5323_v61 = vrot.slane %v5322_v52, 4 }
 0x26c   : > { %v5256_v2 = vrot.slane %v5255_v50, 2  ;;  %v5324_v43 = vadd.f32 %v5323_v61, %v5322_v52 }
 0x26e   : > { %v5257_v45 = vadd.f32 %v5256_v2, %v5255_v50  ;;  %v5325_v6 = vrot.slane %v5324_v43, 2 }
 0x270   : > { %v5258_v22 = vrot.slane %v5257_v45, 1  ;;  %v5326_v58 = vadd.f32 %v5325_v6, %v5324_v43 }
 0x272   : > { %v5327_v34 = vrot.slane %v5326_v58, 1  ;;  %v5259_v10 = vadd.f32 %v5258_v22, %v5257_v45 }
 0x274   : > { %v5328_v16 = vadd.f32 %v5327_v34, %v5326_v58 }
 0x276   : > { %v5330_v42 = vsel %vm5329_vm3, %v5259_v10, %v5328_v16 }
 0x277   : > { %5331 = vst [vmem:[%s262_s29] sm:$0x3] %v5330_v42 }
 0x278 PF: > { %s17_s21 = sadd.s32 1, %s6792_s21  }
 0x279   : > { %p14_p4 = scmp.ge.s32.totalorder %s17_s21, 4  }
 0x27b   :  { %16 = sbr.rel (!%p14_p4) target bundleno = 1 (0x1), region = 84 }

</bundles_post_ra>
